<compile_context>
chip_gen: v7x
topology: tpu7x:2x2x1
jax: 0.10.0
libtpu: 0.0.40
codegen_flags: <defaults>
</compile_context>

<pallas_src>
import math

import jax
import jax.numpy as jnp
import numpy as np
from jax.experimental import pallas as pl
from jax.experimental.pallas import tpu as pltpu


def _round_up(n, m):
    return -(-n // m) * m


# ---------------------------------------------------------------------------
# Architecture bookkeeping (mirrors NeILFMLP.__init__ with multires_view == 0)
# ---------------------------------------------------------------------------
def build_layer_specs(out_dims, dims, skip_connection, position_insertion):
    d_pos = 3
    d_dir = 3
    full = [d_dir] + list(dims) + [out_dims]
    n_layers = len(full)
    specs = []
    d_prev = full[0]                      # width of x entering layer l (pre-concat)
    for l in range(n_layers - 1):
        out_dim = full[l + 1]
        if (l + 1) in skip_connection:
            out_dim -= full[0]
        if (l + 1) in position_insertion:
            out_dim -= d_pos
        has_skip = l in skip_connection   # cat([x, view]) before this layer
        has_pos = l in position_insertion # cat([x, pose]) before this layer
        in_dim = d_prev + (3 if has_skip else 0) + (d_pos if has_pos else 0)
        specs.append(dict(d_prev=d_prev, in_dim=in_dim, out_dim=out_dim,
                          skip=has_skip, pos=has_pos,
                          first=(l == 0), last=(l == n_layers - 2)))
        d_prev = out_dim
    return specs


def init_params(key, specs):
    """Weights stored (out_dim, in_dim), matching nn.Linear.

    Sine layers follow the module's init (first: U(+-omega0/in), hidden:
    U(+-sqrt(3/in)), zero bias).  The reference's last layer is zero weight +
    bias=log(1.5); zero weights under weight_norm are degenerate (0/0), so we
    use a small uniform weight (bias kept at log(1.5)) for a non-trivial test.
    """
    params = []
    omega0 = 30.0
    for spec in specs:
        key, wk = jax.random.split(key)
        d_in, d_out = spec["in_dim"], spec["out_dim"]
        if spec["last"]:
            w = jax.random.uniform(wk, (d_out, d_in), jnp.float32, -0.1, 0.1)
            b = jnp.full((d_out,), np.log(1.5), jnp.float32)
        else:
            bound = (omega0 / d_in) if spec["first"] else math.sqrt(3.0 / d_in)
            w = jax.random.uniform(wk, (d_out, d_in), jnp.float32, -bound, bound)
            b = jnp.zeros((d_out,), jnp.float32)
        params.append((w, b))
    return params


def split_params(params, specs):
    """Split each weight along its input columns: [x | view? | pose?]."""
    split = []
    for (w, b), spec in zip(params, specs):
        pieces = [w[:, : spec["d_prev"]]]
        off = spec["d_prev"]
        if spec["skip"]:
            pieces.append(w[:, off:off + 3]); off += 3
        if spec["pos"]:
            pieces.append(w[:, off:off + 3]); off += 3
        split.append((pieces, b.reshape(-1, 1)))
    return split


# ---------------------------------------------------------------------------
# Pallas kernel
# ---------------------------------------------------------------------------
def _small_contract(w, x):
    """(out, k) @ (k, T) with tiny k via VPU broadcast FMAs (keeps MXU free;
    a contraction dim of 3 would pad to 128/256 on the MXU)."""
    out = None
    for i in range(w.shape[1]):
        term = w[:, i:i + 1] * x[i:i + 1, :]       # (out,1)*(1,T) -> (out,T)
        out = term if out is None else out + term
    return out


def make_kernel(specs, n_param_refs):
    def kernel(pts_ref, *refs):
        out_ref = refs[n_param_refs]
        pts = pts_ref[...]                         # (6, T), batch on lanes
        pose = pts[0:3, :]                         # points[:, 0:3]
        view = pts[3:6, :]                         # embedview_fn == identity
        x = view
        idx = 0
        for spec in specs:
            w_main = refs[idx][...]; idx += 1
            if spec["d_prev"] <= 4:                # first layer: in_dim == 3
                y = _small_contract(w_main, x)
            else:
                y = jnp.dot(w_main, x, preferred_element_type=jnp.float32)
            if spec["skip"]:
                w_view = refs[idx][...]; idx += 1
                y = y + _small_contract(w_view, view)
            if spec["pos"]:
                w_pose = refs[idx][...]; idx += 1
                y = y + _small_contract(w_pose, pose)
            b = refs[idx][...]; idx += 1           # (out,1) broadcasts over lanes
            y = y + b
            x = y if spec["last"] else jnp.sin(y)  # SineLayer
        out_ref[...] = jnp.exp(x).astype(out_ref.dtype)   # last_active_fun = exp
    return kernel


def neilf_forward(points, split, specs, tile_n=512):
    N, D = points.shape
    out_dims = specs[-1]["out_dim"]

    # Tile sizing: multiples of 256; keep >= 2 grid steps when possible (v7x 2 TCs).
    n256 = _round_up(N, 256)
    if n256 >= 2 * 256:
        tile_n = min(tile_n, max(256, ((n256 // 2) // 256) * 256))
    else:
        tile_n = 256
    tile_n = max(256, (tile_n // 256) * 256)
    n_pad = _round_up(N, tile_n)

    # Feature-major, lane-dense layout: (6, N_pad); tail rows padded with zeros.
    pts_t = jnp.pad(points, ((0, n_pad - N), (0, 0))).T

    flat = []
    in_specs = [pl.BlockSpec((D, tile_n), lambda i: (0, i))]
    for pieces, b in split:
        for p in pieces:
            flat.append(p)
            in_specs.append(pl.BlockSpec(p.shape, lambda i: (0, 0)))  # resident
        flat.append(b)
        in_specs.append(pl.BlockSpec(b.shape, lambda i: (0, 0)))

    n_param_refs = len(flat)
    kernel = make_kernel(specs, n_param_refs)

    # Advisory cost hint for XLA's scheduler (memory-streaming kernel).
    flops = 2 * n_pad * sum(int(p.shape[0]) * int(p.shape[1])
                            for pieces, _ in split for p in pieces)
    transcend = n_pad * (sum(s["out_dim"] for s in specs if not s["last"]) + out_dims)
    bytes_acc = 4 * (D * n_pad + out_dims * n_pad
                     + sum(int(np.prod(a.shape)) for a in flat))

    out_t = pl.pallas_call(
        kernel,
        out_shape=jax.ShapeDtypeStruct((out_dims, n_pad), points.dtype),
        grid_spec=pltpu.PrefetchScalarGridSpec(
            num_scalar_prefetch=0,
            grid=(n_pad // tile_n,),
            in_specs=in_specs,
            out_specs=pl.BlockSpec((out_dims, tile_n), lambda i: (0, i)),
        ),
        compiler_params=pltpu.CompilerParams(dimension_semantics=("parallel",)),
        cost_estimate=pl.CostEstimate(flops=flops, transcendentals=transcend,
                                      bytes_accessed=bytes_acc),
    )(pts_t, *flat)

    return out_t[:, :N].T      # layout plumbing back to (N, out_dims)


# ---------------------------------------------------------------------------
# Pure-JAX reference (mirrors NeILFMLP.forward) for correctness checking
# ---------------------------------------------------------------------------
def neilf_ref(points, params, specs):
    pose_embed = points[:, 0:3]
    view_embed = points[:, 3:6]
    x = view_embed
    for (w, b), spec in zip(params, specs):
        if spec["skip"]:
            x = jnp.concatenate([x, view_embed], axis=1)
        if spec["pos"]:
            x = jnp.concatenate([x, pose_embed], axis=1)
        x = x @ w.T + b[None, :]
        if not spec["last"]:
            x = jnp.sin(x)
    return jnp.exp(x)


if __name__ == "__main__":
    # NeILFMLP(in_dims=6, out_dims=3, dims=[32, 32, 32],
    #          skip_connection=(1,), position_insertion=(2,),
    #          weight_norm=True, multires_view=0)
    out_dims = 3
    dims = [32, 32, 32]
    skip_connection = (1,)
    position_insertion = (2,)

    specs = build_layer_specs(out_dims, dims, skip_connection, position_insertion)
    params = init_params(jax.random.PRNGKey(0), specs)
    split = split_params(params, specs)

    N = 1000   # not a multiple of the tile -> exercises padding / tail handling
    key = jax.random.PRNGKey(0)
    points = jax.random.normal(key, (N, 6), jnp.float32)   # [pos(3) | view dir(3)]

    out = neilf_forward(points, split, specs, tile_n=512)
    out = jax.block_until_ready(out)

    ref = jax.block_until_ready(neilf_ref(points, params, specs))
    np.testing.assert_allclose(np.asarray(out), np.asarray(ref), rtol=2e-2, atol=2e-2)
    assert out.shape == (N, out_dims)
    assert np.all(np.isfinite(np.asarray(out)))

    print("KERNEL_OK")
</pallas_src>

<mosaic_0001>
module attributes {stable_mosaic.version = 11 : i64} {
  func.func @kernel(%arg0: i32, %arg1: memref<6x512xf32, #tpu.memory_space<vmem>>, %arg2: memref<29x3xf32, #tpu.memory_space<vmem>>, %arg3: memref<29x1xf32, #tpu.memory_space<vmem>>, %arg4: memref<29x29xf32, #tpu.memory_space<vmem>>, %arg5: memref<29x3xf32, #tpu.memory_space<vmem>>, %arg6: memref<29x1xf32, #tpu.memory_space<vmem>>, %arg7: memref<32x29xf32, #tpu.memory_space<vmem>>, %arg8: memref<32x3xf32, #tpu.memory_space<vmem>>, %arg9: memref<32x1xf32, #tpu.memory_space<vmem>>, %arg10: memref<3x32xf32, #tpu.memory_space<vmem>>, %arg11: memref<3x1xf32, #tpu.memory_space<vmem>>, %arg12: memref<3x512xf32, #tpu.memory_space<vmem>>) attributes {dimension_semantics = [#tpu.dimension_semantics<parallel>], iteration_bounds = array<i64: 2>, scalar_prefetch = 0 : i64, scratch_operands = 0 : i64, tpu.core_type = #tpu.core_type<tc>, window_params = [{transform_indices = @transform_0, window_bounds = array<i64: 6, 512>}, {pipeline_mode = #tpu.pipeline_mode<synchronous>, transform_indices = @transform_1, window_bounds = array<i64: 29, 3>}, {pipeline_mode = #tpu.pipeline_mode<synchronous>, transform_indices = @transform_2, window_bounds = array<i64: 29, 1>}, {pipeline_mode = #tpu.pipeline_mode<synchronous>, transform_indices = @transform_3, window_bounds = array<i64: 29, 29>}, {pipeline_mode = #tpu.pipeline_mode<synchronous>, transform_indices = @transform_4, window_bounds = array<i64: 29, 3>}, {pipeline_mode = #tpu.pipeline_mode<synchronous>, transform_indices = @transform_5, window_bounds = array<i64: 29, 1>}, {pipeline_mode = #tpu.pipeline_mode<synchronous>, transform_indices = @transform_6, window_bounds = array<i64: 32, 29>}, {pipeline_mode = #tpu.pipeline_mode<synchronous>, transform_indices = @transform_7, window_bounds = array<i64: 32, 3>}, {pipeline_mode = #tpu.pipeline_mode<synchronous>, transform_indices = @transform_8, window_bounds = array<i64: 32, 1>}, {pipeline_mode = #tpu.pipeline_mode<synchronous>, transform_indices = @transform_9, window_bounds = array<i64: 3, 32>}, {pipeline_mode = #tpu.pipeline_mode<synchronous>, transform_indices = @transform_10, window_bounds = array<i64: 3, 1>}, {transform_indices = @transform_11, window_bounds = array<i64: 3, 512>}]} {
    %c0 = arith.constant 0 : index
    %c0_0 = arith.constant 0 : index
    %0 = vector.load %arg1[%c0, %c0_0] : memref<6x512xf32, #tpu.memory_space<vmem>>, vector<6x512xf32>
    %1 = vector.extract_strided_slice %0 {offsets = [0, 0], sizes = [3, 512], strides = [1, 1]} : vector<6x512xf32> to vector<3x512xf32>
    %2 = vector.extract_strided_slice %0 {offsets = [3, 0], sizes = [3, 512], strides = [1, 1]} : vector<6x512xf32> to vector<3x512xf32>
    %c0_1 = arith.constant 0 : index
    %c0_2 = arith.constant 0 : index
    %3 = vector.load %arg2[%c0_1, %c0_2] : memref<29x3xf32, #tpu.memory_space<vmem>>, vector<29x3xf32>
    %4 = vector.extract_strided_slice %3 {offsets = [0, 0], sizes = [29, 1], strides = [1, 1]} : vector<29x3xf32> to vector<29x1xf32>
    %5 = vector.extract_strided_slice %2 {offsets = [0, 0], sizes = [1, 512], strides = [1, 1]} : vector<3x512xf32> to vector<1x512xf32>
    %6 = vector.broadcast %4 : vector<29x1xf32> to vector<29x512xf32>
    %7 = vector.broadcast %5 : vector<1x512xf32> to vector<29x512xf32>
    %8 = arith.mulf %6, %7 : vector<29x512xf32>
    %9 = vector.extract_strided_slice %3 {offsets = [0, 1], sizes = [29, 1], strides = [1, 1]} : vector<29x3xf32> to vector<29x1xf32>
    %10 = vector.extract_strided_slice %2 {offsets = [1, 0], sizes = [1, 512], strides = [1, 1]} : vector<3x512xf32> to vector<1x512xf32>
    %11 = vector.broadcast %9 : vector<29x1xf32> to vector<29x512xf32>
    %12 = vector.broadcast %10 : vector<1x512xf32> to vector<29x512xf32>
    %13 = arith.mulf %11, %12 : vector<29x512xf32>
    %14 = arith.addf %8, %13 : vector<29x512xf32>
    %15 = vector.extract_strided_slice %3 {offsets = [0, 2], sizes = [29, 1], strides = [1, 1]} : vector<29x3xf32> to vector<29x1xf32>
    %16 = vector.extract_strided_slice %2 {offsets = [2, 0], sizes = [1, 512], strides = [1, 1]} : vector<3x512xf32> to vector<1x512xf32>
    %17 = vector.broadcast %15 : vector<29x1xf32> to vector<29x512xf32>
    %18 = vector.broadcast %16 : vector<1x512xf32> to vector<29x512xf32>
    %19 = arith.mulf %17, %18 : vector<29x512xf32>
    %20 = arith.addf %14, %19 : vector<29x512xf32>
    %c0_3 = arith.constant 0 : index
    %c0_4 = arith.constant 0 : index
    %21 = vector.load %arg3[%c0_3, %c0_4] : memref<29x1xf32, #tpu.memory_space<vmem>>, vector<29x1xf32>
    %22 = vector.broadcast %21 : vector<29x1xf32> to vector<29x512xf32>
    %23 = arith.addf %20, %22 : vector<29x512xf32>
    %24 = math.sin %23 : vector<29x512xf32>
    %c0_5 = arith.constant 0 : index
    %c0_6 = arith.constant 0 : index
    %25 = vector.load %arg4[%c0_5, %c0_6] : memref<29x29xf32, #tpu.memory_space<vmem>>, vector<29x29xf32>
    %cst = arith.constant dense<0.000000e+00> : vector<29x512xf32>
    %26 = tpu.matmul %25, %24, %cst {dimension_numbers = #tpu.dot_dimension_numbers<[1], [0], [0], [1], [0, 0, 1, 1], [], []>} : vector<29x29xf32>, vector<29x512xf32>, vector<29x512xf32> -> vector<29x512xf32>
    %c0_7 = arith.constant 0 : index
    %c0_8 = arith.constant 0 : index
    %27 = vector.load %arg5[%c0_7, %c0_8] : memref<29x3xf32, #tpu.memory_space<vmem>>, vector<29x3xf32>
    %28 = vector.extract_strided_slice %27 {offsets = [0, 0], sizes = [29, 1], strides = [1, 1]} : vector<29x3xf32> to vector<29x1xf32>
    %29 = vector.extract_strided_slice %2 {offsets = [0, 0], sizes = [1, 512], strides = [1, 1]} : vector<3x512xf32> to vector<1x512xf32>
    %30 = vector.broadcast %28 : vector<29x1xf32> to vector<29x512xf32>
    %31 = vector.broadcast %29 : vector<1x512xf32> to vector<29x512xf32>
    %32 = arith.mulf %30, %31 : vector<29x512xf32>
    %33 = vector.extract_strided_slice %27 {offsets = [0, 1], sizes = [29, 1], strides = [1, 1]} : vector<29x3xf32> to vector<29x1xf32>
    %34 = vector.extract_strided_slice %2 {offsets = [1, 0], sizes = [1, 512], strides = [1, 1]} : vector<3x512xf32> to vector<1x512xf32>
    %35 = vector.broadcast %33 : vector<29x1xf32> to vector<29x512xf32>
    %36 = vector.broadcast %34 : vector<1x512xf32> to vector<29x512xf32>
    %37 = arith.mulf %35, %36 : vector<29x512xf32>
    %38 = arith.addf %32, %37 : vector<29x512xf32>
    %39 = vector.extract_strided_slice %27 {offsets = [0, 2], sizes = [29, 1], strides = [1, 1]} : vector<29x3xf32> to vector<29x1xf32>
    %40 = vector.extract_strided_slice %2 {offsets = [2, 0], sizes = [1, 512], strides = [1, 1]} : vector<3x512xf32> to vector<1x512xf32>
    %41 = vector.broadcast %39 : vector<29x1xf32> to vector<29x512xf32>
    %42 = vector.broadcast %40 : vector<1x512xf32> to vector<29x512xf32>
    %43 = arith.mulf %41, %42 : vector<29x512xf32>
    %44 = arith.addf %38, %43 : vector<29x512xf32>
    %45 = arith.addf %26, %44 : vector<29x512xf32>
    %c0_9 = arith.constant 0 : index
    %c0_10 = arith.constant 0 : index
    %46 = vector.load %arg6[%c0_9, %c0_10] : memref<29x1xf32, #tpu.memory_space<vmem>>, vector<29x1xf32>
    %47 = vector.broadcast %46 : vector<29x1xf32> to vector<29x512xf32>
    %48 = arith.addf %45, %47 : vector<29x512xf32>
    %49 = math.sin %48 : vector<29x512xf32>
    %c0_11 = arith.constant 0 : index
    %c0_12 = arith.constant 0 : index
    %50 = vector.load %arg7[%c0_11, %c0_12] : memref<32x29xf32, #tpu.memory_space<vmem>>, vector<32x29xf32>
    %cst_13 = arith.constant dense<0.000000e+00> : vector<32x512xf32>
    %51 = tpu.matmul %50, %49, %cst_13 {dimension_numbers = #tpu.dot_dimension_numbers<[1], [0], [0], [1], [0, 0, 1, 1], [], []>} : vector<32x29xf32>, vector<29x512xf32>, vector<32x512xf32> -> vector<32x512xf32>
    %c0_14 = arith.constant 0 : index
    %c0_15 = arith.constant 0 : index
    %52 = vector.load %arg8[%c0_14, %c0_15] : memref<32x3xf32, #tpu.memory_space<vmem>>, vector<32x3xf32>
    %53 = vector.extract_strided_slice %52 {offsets = [0, 0], sizes = [32, 1], strides = [1, 1]} : vector<32x3xf32> to vector<32x1xf32>
    %54 = vector.extract_strided_slice %1 {offsets = [0, 0], sizes = [1, 512], strides = [1, 1]} : vector<3x512xf32> to vector<1x512xf32>
    %55 = vector.broadcast %53 : vector<32x1xf32> to vector<32x512xf32>
    %56 = vector.broadcast %54 : vector<1x512xf32> to vector<32x512xf32>
    %57 = arith.mulf %55, %56 : vector<32x512xf32>
    %58 = vector.extract_strided_slice %52 {offsets = [0, 1], sizes = [32, 1], strides = [1, 1]} : vector<32x3xf32> to vector<32x1xf32>
    %59 = vector.extract_strided_slice %1 {offsets = [1, 0], sizes = [1, 512], strides = [1, 1]} : vector<3x512xf32> to vector<1x512xf32>
    %60 = vector.broadcast %58 : vector<32x1xf32> to vector<32x512xf32>
    %61 = vector.broadcast %59 : vector<1x512xf32> to vector<32x512xf32>
    %62 = arith.mulf %60, %61 : vector<32x512xf32>
    %63 = arith.addf %57, %62 : vector<32x512xf32>
    %64 = vector.extract_strided_slice %52 {offsets = [0, 2], sizes = [32, 1], strides = [1, 1]} : vector<32x3xf32> to vector<32x1xf32>
    %65 = vector.extract_strided_slice %1 {offsets = [2, 0], sizes = [1, 512], strides = [1, 1]} : vector<3x512xf32> to vector<1x512xf32>
    %66 = vector.broadcast %64 : vector<32x1xf32> to vector<32x512xf32>
    %67 = vector.broadcast %65 : vector<1x512xf32> to vector<32x512xf32>
    %68 = arith.mulf %66, %67 : vector<32x512xf32>
    %69 = arith.addf %63, %68 : vector<32x512xf32>
    %70 = arith.addf %51, %69 : vector<32x512xf32>
    %c0_16 = arith.constant 0 : index
    %c0_17 = arith.constant 0 : index
    %71 = vector.load %arg9[%c0_16, %c0_17] : memref<32x1xf32, #tpu.memory_space<vmem>>, vector<32x1xf32>
    %72 = vector.broadcast %71 : vector<32x1xf32> to vector<32x512xf32>
    %73 = arith.addf %70, %72 : vector<32x512xf32>
    %74 = math.sin %73 : vector<32x512xf32>
    %c0_18 = arith.constant 0 : index
    %c0_19 = arith.constant 0 : index
    %75 = vector.load %arg10[%c0_18, %c0_19] : memref<3x32xf32, #tpu.memory_space<vmem>>, vector<3x32xf32>
    %cst_20 = arith.constant dense<0.000000e+00> : vector<3x512xf32>
    %76 = tpu.matmul %75, %74, %cst_20 {dimension_numbers = #tpu.dot_dimension_numbers<[1], [0], [0], [1], [0, 0, 1, 1], [], []>} : vector<3x32xf32>, vector<32x512xf32>, vector<3x512xf32> -> vector<3x512xf32>
    %c0_21 = arith.constant 0 : index
    %c0_22 = arith.constant 0 : index
    %77 = vector.load %arg11[%c0_21, %c0_22] : memref<3x1xf32, #tpu.memory_space<vmem>>, vector<3x1xf32>
    %78 = vector.broadcast %77 : vector<3x1xf32> to vector<3x512xf32>
    %79 = arith.addf %76, %78 : vector<3x512xf32>
    %80 = math.exp %79 : vector<3x512xf32>
    %c0_23 = arith.constant 0 : index
    %c0_24 = arith.constant 0 : index
    %81 = vector.load %arg12[%c0_23, %c0_24] : memref<3x512xf32, #tpu.memory_space<vmem>>, vector<3x512xf32>
    tpu.vector_store %arg12[%c0_23, %c0_24], %80 {strides = array<i32>} : memref<3x512xf32, #tpu.memory_space<vmem>>, vector<3x512xf32>,
    return
  }
  func.func @transform_0(%arg0: i32) -> (i32, i32) {
    %c0_i32 = arith.constant 0 : i32
    %c0_i32_0 = arith.constant 0 : i32
    return %c0_i32, %arg0 : i32, i32
  }
  func.func @transform_1(%arg0: i32) -> (i32, i32) {
    %c0_i32 = arith.constant 0 : i32
    %c0_i32_0 = arith.constant 0 : i32
    %c0_i32_1 = arith.constant 0 : i32
    return %c0_i32, %c0_i32_0 : i32, i32
  }
  func.func @transform_2(%arg0: i32) -> (i32, i32) {
    %c0_i32 = arith.constant 0 : i32
    %c0_i32_0 = arith.constant 0 : i32
    %c0_i32_1 = arith.constant 0 : i32
    return %c0_i32, %c0_i32_0 : i32, i32
  }
  func.func @transform_3(%arg0: i32) -> (i32, i32) {
    %c0_i32 = arith.constant 0 : i32
    %c0_i32_0 = arith.constant 0 : i32
    %c0_i32_1 = arith.constant 0 : i32
    return %c0_i32, %c0_i32_0 : i32, i32
  }
  func.func @transform_4(%arg0: i32) -> (i32, i32) {
    %c0_i32 = arith.constant 0 : i32
    %c0_i32_0 = arith.constant 0 : i32
    %c0_i32_1 = arith.constant 0 : i32
    return %c0_i32, %c0_i32_0 : i32, i32
  }
  func.func @transform_5(%arg0: i32) -> (i32, i32) {
    %c0_i32 = arith.constant 0 : i32
    %c0_i32_0 = arith.constant 0 : i32
    %c0_i32_1 = arith.constant 0 : i32
    return %c0_i32, %c0_i32_0 : i32, i32
  }
  func.func @transform_6(%arg0: i32) -> (i32, i32) {
    %c0_i32 = arith.constant 0 : i32
    %c0_i32_0 = arith.constant 0 : i32
    %c0_i32_1 = arith.constant 0 : i32
    return %c0_i32, %c0_i32_0 : i32, i32
  }
  func.func @transform_7(%arg0: i32) -> (i32, i32) {
    %c0_i32 = arith.constant 0 : i32
    %c0_i32_0 = arith.constant 0 : i32
    %c0_i32_1 = arith.constant 0 : i32
    return %c0_i32, %c0_i32_0 : i32, i32
  }
  func.func @transform_8(%arg0: i32) -> (i32, i32) {
    %c0_i32 = arith.constant 0 : i32
    %c0_i32_0 = arith.constant 0 : i32
    %c0_i32_1 = arith.constant 0 : i32
    return %c0_i32, %c0_i32_0 : i32, i32
  }
  func.func @transform_9(%arg0: i32) -> (i32, i32) {
    %c0_i32 = arith.constant 0 : i32
    %c0_i32_0 = arith.constant 0 : i32
    %c0_i32_1 = arith.constant 0 : i32
    return %c0_i32, %c0_i32_0 : i32, i32
  }
  func.func @transform_10(%arg0: i32) -> (i32, i32) {
    %c0_i32 = arith.constant 0 : i32
    %c0_i32_0 = arith.constant 0 : i32
    %c0_i32_1 = arith.constant 0 : i32
    return %c0_i32, %c0_i32_0 : i32, i32
  }
  func.func @transform_11(%arg0: i32) -> (i32, i32) {
    %c0_i32 = arith.constant 0 : i32
    %c0_i32_0 = arith.constant 0 : i32
    return %c0_i32, %arg0 : i32, i32
  }
}

</mosaic_0001>

<bundles_post_ra>
// kernel: tpu_custom_call.1
= control target key start
LH: loop header
LB: loop body
LE: loop exit
PB: predicated region body
PF: predicated region fallthrough
CT: control target
= control target key end

     0   :  { %s13156_s0 = inlined_call_operand.vmem [shape: f32[6,1024], index: 0, kind: input, shape index: {}]   ;;  %s13157_s1 = inlined_call_operand.vmem [shape: f32[29,3], index: 1, kind: input, shape index: {}]   ;;  %s13158_s2 = inlined_call_operand.vmem [shape: f32[29,1], index: 2, kind: input, shape index: {}]   ;;  %s13159_s3 = inlined_call_operand.vmem [shape: f32[29,29], index: 3, kind: input, shape index: {}]   ;;  %s13160_s4 = inlined_call_operand.vmem [shape: f32[29,3], index: 4, kind: input, shape index: {}]   ;;  %s13161_s5 = inlined_call_operand.vmem [shape: f32[29,1], index: 5, kind: input, shape index: {}]   ;;  %s13162_s6 = inlined_call_operand.vmem [shape: f32[32,29], index: 6, kind: input, shape index: {}]   ;;  %s13163_s7 = inlined_call_operand.vmem [shape: f32[32,3], index: 7, kind: input, shape index: {}]   ;;  %s13164_s8 = inlined_call_operand.vmem [shape: f32[32,1], index: 8, kind: input, shape index: {}]   ;;  %s13165_s9 = inlined_call_operand.vmem [shape: f32[3,32], index: 9, kind: input, shape index: {}]   ;;  %s13166_s10 = inlined_call_operand.vmem [shape: f32[3,1], index: 10, kind: input, shape index: {}]   ;;  %s13167_s11 = inlined_call_operand.hbm [shape: f32[3,1024], index: 11, kind: output, shape index: {}]  }
   0x1   :  { %13400 = sst [smem:[#allocation51_spill]] %s13156_s0 }
   0x2   :  { %16 = vsyncpa [#allocation3], 0 }
   0x3   :  { %18 = vsyncpa [#allocation3 + $0x1], 0  ;;  %s7562_s17 = smov 0   ;;  %s7564_s18 = smov 0  }
   0x4   :  { %s7566_s19 = smov 0   ;;  %s7568_s20 = smov 0  }
   0x5 LB: > { %s7583_s21 = sadd.s32 4294967295, %s7488_s20   ;;  %s6667_s22 = sadd.s32 4294967294, %s7488_s20   ;;  %s7488_s20 = sphi %s7568_s20, %s13905_s20   ;;  %s7484_s19 = sphi %s7566_s19, %s13904_s19   ;;  %s7480_s18 = sphi %s7564_s18, %s13903_s18   ;;  %s7476_s17 = sphi %s7562_s17, %s13902_s17  }
   0x6   : > { %s7587_s23 = sadd.s32 1, %s7488_s20   ;;  %s267_s24 = sadd.s32 1, %s7484_s19 }
   0x7   : > { %s264_s25 = ssub.s32 %s7488_s20, %s7587_s23  ;;  %p277_p0 = scmp.ne.s32.totalorder %s7484_s19, %s7480_s18 }
   0x8   : > { %p265_p1 = scmp.eq.s32.totalorder %s264_s25, 0  ;;  %p278_p2 = scmp.eq.s32.totalorder %s7583_s21, 1 }
   0x9   : > { %p283_p3 = scmp.ne.s32.totalorder %s7480_s18, %s7476_s17  ;;  %p284_p4 = scmp.eq.s32.totalorder %s6667_s22, 1 }
   0xa   : > { %s7598_s26 = scalar_select %p265_p1, %s7484_s19, %s267_s24  }
   0xb   : > { %p7600_p5 = por %p278_p2, %p277_p0  ;;  %p7604_p6 = por %p284_p4, %p283_p3 }
   0xc   : > { %p6670_p7 = scmp.ge.s32.totalorder %s7488_s20, 1  ;;  %p341_p8 = scmp.lt.s32.totalorder %s7488_s20, 3 }
   0xe   : > { %p342_p9 = pnand %p6670_p7, %p341_p8 }
  0x10   : > { %345 = sbr.rel (%p342_p9) target bundleno = 2121 (0x849), region = 64 }
  0x17   : > { %v392_v0 = vld [vmem:[%s13157_s1] sm:$0xff]  ;;  %v13170_v1 = vmov 2   ;;  %v13174_v2 = vmov 1   ;;  %v394_v3 = vld [vmem:[%s13157_s1 + $0x10] sm:$0xff]  ;;  %v393_v4 = vld [vmem:[%s13157_s1 + $0x8] sm:$0xff]  ;;  %v13172_v5 = vmov 0   ;;  %v416_v14 = vlaneseq }
  0x18   : > { %7197 = vset.pattern.permute.xlu0 %v13170_v1  ;;  %7196 = vset.pattern.permute.xlu1 %v13174_v2  ;;  %v395_v6 = vld [vmem:[%s13157_s1 + $0x18] sm:$0x1f]  ;;  %v577_v7 = vld [vmem:[%s13158_s2 + $0x8] sm:$0xff]  ;;  %v2284_v8 = vld [vmem:[%s13160_s4] sm:$0xff]  ;;  %s6672_s12 = sshll.u32 %s7583_s21, 2  ;;  %s13404_s0 = sld [smem:[#allocation51_spill]] }
  0x19   : > { %513 = vperm.xlu0 %7197, %v392_v0   ;;  %449 = vperm.xlu1 %7196, %v392_v0   ;;  %v576_v9 = vld [vmem:[%s13158_s2] sm:$0xff]  ;;  %v2286_v10 = vld [vmem:[%s13160_s4 + $0x10] sm:$0xff]  ;;  %v579_v12 = vld [vmem:[%s13158_s2 + $0x18] sm:$0x1f]  ;;  %p382_p10 = scmp.lt.s32.totalorder %s6672_s12, 7  ;;  %v7657_v15 = vshrl.u32 %v416_v14, 7 }
  0x1a   : > { %v578_v11 = vld [vmem:[%s13158_s2 + $0x10] sm:$0xff]  ;;  %v2285_v13 = vld [vmem:[%s13160_s4 + $0x8] sm:$0xff]  ;;  %s378_s25 = sand.u32 1, %s7480_s18  }
  0x1b   : > { %s13907_s12 = smov (!%p382_p10, %s6672_s12), 7  ;;  %13403 = vst [vmem:[#allocation5_spill] sm:$0xff] %v7657_v15  ;;  %v466_v18 = vsub.s32 4, %v7657_v15  ;;  %v418_v19 = vsub.s32 3, %v7657_v15  ;;  %v7685_v28 = vsub.s32 5, %v7657_v15  ;;  %s6671_s29 = sshll.u32 %s378_s25, 4 }
  0x1c   : > { %s6673_s13 = sshll.u32 %s13907_s12, 3  ;;  %s380_s30 = scalar_lea.vmem [#allocation2], %s6671_s29 }
  0x1d   : > { %521 = vperm.xlu0 %7197, %v394_v3   ;;  %453 = vperm.xlu1 %7196, %v393_v4   ;;  %s6897_s12 = sshll.u32 %s7583_s21, 8  ;;  %s7501_s21 = smov [#allocation2]  }
  0x1e   : > { %s7664_s16 = scalar_lea.vmem %s13404_s0, %s6673_s13  ;;  %s6608_s13 = sshll.u32 %s380_s30, 4  ;;  %s13116_s13 = int_to_ptr.vmem [resolvable:$true] %s6608_s13 }
  0x1f   : > { %v388_v20 = vld [vmem:[%s7664_s16] sm:$0x3f]  ;;  %v390_v21 = vld [vmem:[%s7664_s16 + $0x10] sm:$0x3f]  ;;  %v389_v47 = vld [vmem:[%s7664_s16 + $0x8] sm:$0x3f]  ;;  %s13114_s22 = scalar_lea.hbm %s13167_s11, %s6897_s12 }
  0x20   : > { %v7676_v24 = vrot.slane %v388_v20, %v466_v18  ;;  %v7678_v25 = vrot.slane %v390_v21, %v466_v18  ;;  %v7680_v26 = vrot.slane %v388_v20, %v418_v19  ;;  %v7682_v27 = vrot.slane %v390_v21, %v418_v19  ;;  %v391_v48 = vld [vmem:[%s7664_s16 + $0x18] sm:$0x3f]  ;;  %s7426_s24 = scalar_lea.vmem %s13116_s13, 256  ;;  %s7430_s29 = sshll.u32 %s7501_s21, 4  ;;  %s7431_s29 = int_to_ptr.vmem [resolvable:$false] %s7430_s29 }
  0x21   : > { %7201 = vset.pattern.permute.xlu0 %v13172_v5  ;;  %7198 = vset.pattern.permute.xlu1 %v13170_v1  ;;  %v7700_v35 = vrot.slane %v388_v20, %v7685_v28  ;;  %v7703_v36 = vrot.slane %v390_v21, %v7685_v28  ;;  %v7717_v49 = vrot.slane %v389_v47, %v418_v19  ;;  %p7427_p11 = scmp.ne.s32.totalorder %s13116_s13, %s7426_s24  ;;  %s7432_s0 = scalar_lea.vmem %s7431_s29, 512 }
  0x22   : > { %398 = vperm.xlu0 %7201, %v392_v0   ;;  %517 = vperm.xlu1 %7198, %v393_v4   ;;  %13405 = vst [vmem:[#allocation6_spill] sm:$0xff] %v7676_v24  ;;  %13406 = vst [vmem:[#allocation7_spill] sm:$0xff] %v7678_v25  ;;  %v7719_v50 = vrot.slane %v391_v48, %v418_v19  ;;  %v7725_v58 = vrot.slane %v389_v47, %v466_v18  ;;  %p7433_p0 = scmp.lt.s32.totalorder %s13116_s13, %s7431_s29  ;;  %p7434_p1 = scmp.lt.s32.totalorder %s7432_s0, %s7426_s24 }
  0x23   : > { %13407 = vst [vmem:[#allocation8_spill] sm:$0xff] %v7680_v26  ;;  %13408 = vst [vmem:[#allocation9_spill] sm:$0xff] %v7682_v27  ;;  %v7727_v59 = vrot.slane %v391_v48, %v466_v18  ;;  %p7428_p12 = pnand %p7427_p11, %p7600_p5 }
  0x24   : > { %13409 = vst [vmem:[#allocation10_spill] sm:$0xff] %v7700_v35  ;;  %13410 = vst [vmem:[#allocation11_spill] sm:$0xff] %v7703_v36  ;;  %p7435_p2 = por %p7434_p1, %p7433_p0 }
  0x25   : > { %13411 = vst [vmem:[#allocation12_spill] sm:$0xff] %v7717_v49  ;;  %13412 = vst [vmem:[#allocation13_spill] sm:$0xff] %v7719_v50  ;;  %p7429_p13 = pneg %p7428_p12 }
  0x26   : > { %403 = vperm.xlu0 %7201, %v393_v4   ;;  %7199 = vset.pattern.permute.xlu1 %v13172_v5  ;;  %13413 = vst [vmem:[#allocation14_spill] sm:$0xff] %v7725_v58  ;;  %13414 = vst [vmem:[#allocation15_spill] sm:$0xff] %v7727_v59 }
  0x27   : > { %408 = vperm.xlu1 %7199, %v394_v3   ;;  %p7436_p3 = pnand %p7435_p2, %p7429_p13 }
  0x2a   : > { %413 = vperm.xlu0 %7201, %v395_v6  }
  0x2b   : > { %7200 = vset.pattern.permute.xlu1 %v13174_v2 }
  0x2c   : > { %457 = vperm.xlu1 %7200, %v394_v3  }
  0x2e   : > { %587 = vperm.xlu0 %7201, %v577_v7  }
  0x30   : > { %461 = vperm.xlu1 %7200, %v395_v6  }
  0x32   : > { %2290 = vperm.xlu0 %7201, %v2284_v8  }
  0x34   : > { %7202 = vset.pattern.permute.xlu1 %v13170_v1 }
  0x35   : > { %525 = vperm.xlu1 %7202, %v395_v6  }
  0x36   : > { %7204 = vset.pattern.permute.xlu0 %v13174_v2 }
  0x37   : > { %2325 = vperm.xlu0 %7204, %v2284_v8  }
  0x39   : > { %7203 = vset.pattern.permute.xlu1 %v13172_v5 }
  0x3a   : > { %582 = vperm.xlu1 %7203, %v576_v9  }
  0x3b   : > { %2333 = vperm.xlu0 %7204, %v2286_v10  }
  0x3e   : > { %592 = vperm.xlu1 %7203, %v578_v11  }
  0x3f   : > { %7208 = vset.pattern.permute.xlu0 %v13170_v1 }
  0x40   : > { %2377 = vperm.xlu0 %7208, %v2285_v13  }
  0x42   : > { %597 = vperm.xlu1 %7203, %v579_v12  }
  0x46   : > { %2295 = vperm.xlu1 %7203, %v2285_v13  }
  0x4a   : > { %7205 = vset.pattern.permute.xlu1 %v13174_v2 }
  0x4b   : > { %2329 = vperm.xlu1 %7205, %v2285_v13  }
  0x4f   : > { %7206 = vset.pattern.permute.xlu1 %v13170_v1  ;;  %v13196_v1 = vmov 1326507024  }
  0x50   : > { %2373 = vperm.xlu1 %7206, %v2284_v8  }
  0x54   : > { %7207 = vset.pattern.permute.xlu1 %v13172_v5 }
  0x55   : > { %2300 = vperm.xlu1 %7207, %v2286_v10  }
  0x98   : > { %v7659_v16 = vpop.permute.xlu1 %449  ;;  %v7666_v17 = vpop.permute.xlu0 %513 }
  0x99   : > { %v480_v31 = vmul.f32 %v7676_v24, %v7659_v16  ;;  %v482_v32 = vmul.f32 %v7678_v25, %v7659_v16  ;;  %v544_v39 = vmul.f32 %v7700_v35, %v7666_v17  ;;  %v546_v40 = vmul.f32 %v7703_v36, %v7666_v17 }
  0x9c   : > { %v7672_v22 = vpop.permute.xlu1 %453  ;;  %v7674_v23 = vpop.permute.xlu0 %521 }
  0x9d   : > { %v484_v42 = vmul.f32 %v7676_v24, %v7672_v22  ;;  %v486_v43 = vmul.f32 %v7678_v25, %v7672_v22 }
  0xa1   : > { %v7687_v29 = vpop.permute.xlu0 %398  ;;  %v7689_v30 = vpop.permute.xlu1 %517 }
  0xa2   : > { %v432_v33 = vmul.f32 %v7680_v26, %v7687_v29  ;;  %v434_v34 = vmul.f32 %v7682_v27, %v7687_v29  ;;  %v548_v53 = vmul.f32 %v7700_v35, %v7689_v30  ;;  %v550_v54 = vmul.f32 %v7703_v36, %v7689_v30 }
  0xa4   : > { %v496_v37 = vadd.f32 %v480_v31, %v432_v33  ;;  %v498_v38 = vadd.f32 %v482_v32, %v434_v34 }
  0xa5   : > { %v404_v41 = vpop.permute.xlu0 %403 }
  0xa6   : > { %v436_v44 = vmul.f32 %v7680_v26, %v404_v41  ;;  %v438_v45 = vmul.f32 %v7682_v27, %v404_v41  ;;  %v409_v46 = vpop.permute.xlu1 %408  ;;  %v560_v56 = vadd.f32 %v544_v39, %v496_v37  ;;  %v562_v57 = vadd.f32 %v546_v40, %v498_v38 }
  0xa7   : > { %v440_v60 = vmul.f32 %v7680_v26, %v409_v46  ;;  %v441_v61 = vmul.f32 %v7717_v49, %v409_v46  ;;  %v442_v62 = vmul.f32 %v7682_v27, %v409_v46  ;;  %v443_v63 = vmul.f32 %v7719_v50, %v409_v46 }
  0xa8   : > { %v500_v51 = vadd.f32 %v484_v42, %v436_v44  ;;  %v502_v52 = vadd.f32 %v486_v43, %v438_v45  ;;  %v437_v46 = vmul.f32 %v7717_v49, %v404_v41 }
  0xa9   : > { %v414_v55 = vpop.permute.xlu0 %413 }
  0xaa   : > { %v564_v3 = vadd.f32 %v548_v53, %v500_v51  ;;  %v566_v4 = vadd.f32 %v550_v54, %v502_v52  ;;  %v444_v10 = vmul.f32 %v7680_v26, %v414_v55  ;;  %v445_v11 = vmul.f32 %v7717_v49, %v414_v55 }
  0xab   : > { %v458_v0 = vpop.permute.xlu1 %457  ;;  %v446_v12 = vmul.f32 %v7682_v27, %v414_v55  ;;  %v447_v13 = vmul.f32 %v7719_v50, %v414_v55  ;;  %v439_v51 = vmul.f32 %v7719_v50, %v404_v41  ;;  %v7762_v52 = vrot.slane %v389_v47, %v7685_v28 }
  0xac   : > { %v488_v6 = vmul.f32 %v7676_v24, %v458_v0  ;;  %v489_v7 = vmul.f32 %v7725_v58, %v458_v0  ;;  %v490_v8 = vmul.f32 %v7678_v25, %v458_v0  ;;  %v491_v9 = vmul.f32 %v7727_v59, %v458_v0 }
  0xad   : > { %v588_v14 = vpop.permute.xlu0 %587  ;;  %13417 = vst [vmem:[#allocation18_spill] sm:$0xff] %v7762_v52  ;;  %v485_v53 = vmul.f32 %v7725_v58, %v7672_v22  ;;  %v7767_v54 = vrot.slane %v391_v48, %v7685_v28  ;;  %v487_v55 = vmul.f32 %v7727_v59, %v7672_v22  ;;  %v552_v41 = vmul.f32 %v7700_v35, %v7674_v23 }
  0xae   : > { %v504_v18 = vadd.f32 %v488_v6, %v440_v60  ;;  %v505_v19 = vadd.f32 %v489_v7, %v441_v61  ;;  %v506_v20 = vadd.f32 %v490_v8, %v442_v62  ;;  %v507_v21 = vadd.f32 %v491_v9, %v443_v63 }
  0xaf   : > { %v7741_v31 = vadd.f32 %v588_v14, %v564_v3  ;;  %v7743_v32 = vadd.f32 %v588_v14, %v566_v4  ;;  %v462_v33 = vpop.permute.xlu1 %461  ;;  %13418 = vst [vmem:[#allocation19_spill] sm:$0xff] %v7767_v54  ;;  %v501_v61 = vadd.f32 %v485_v53, %v437_v46  ;;  %v503_v62 = vadd.f32 %v487_v55, %v439_v51 }
  0xb0   : > { %v492_v34 = vmul.f32 %v7676_v24, %v462_v33  ;;  %v493_v37 = vmul.f32 %v7725_v58, %v462_v33  ;;  %v494_v38 = vmul.f32 %v7678_v25, %v462_v33  ;;  %v495_v39 = vmul.f32 %v7727_v59, %v462_v33 }
  0xb1   : > { %13415 = vst [vmem:[#allocation16_spill] sm:$0xff] %v7741_v31  ;;  %13416 = vst [vmem:[#allocation17_spill] sm:$0xff] %v7743_v32  ;;  %v549_v63 = vmul.f32 %v7762_v52, %v7689_v30  ;;  %v553_v47 = vmul.f32 %v7762_v52, %v7674_v23  ;;  %v551_v28 = vmul.f32 %v7767_v54, %v7689_v30  ;;  %v1243_v33 = vand.u32 2139095040, %v7743_v32 }
  0xb2   : > { %v7749_v40 = vadd.f32 %v492_v34, %v444_v10  ;;  %v7751_v42 = vadd.f32 %v493_v37, %v445_v11  ;;  %v7753_v43 = vadd.f32 %v494_v38, %v446_v12  ;;  %v7755_v44 = vadd.f32 %v495_v39, %v447_v13 }
  0xb3   : > { %v554_v22 = vmul.f32 %v7703_v36, %v7674_v23  ;;  %v555_v0 = vmul.f32 %v7767_v54, %v7674_v23  ;;  %v565_v3 = vadd.f32 %v549_v63, %v501_v61  ;;  %v567_v7 = vadd.f32 %v551_v28, %v503_v62 }
  0xb4   : > { %v7757_v45 = vpop.permute.xlu1 %525  ;;  %v568_v8 = vadd.f32 %v552_v41, %v504_v18  ;;  %v569_v9 = vadd.f32 %v553_v47, %v505_v19  ;;  %v481_v23 = vmul.f32 %v7725_v58, %v7659_v16  ;;  %v435_v13 = vmul.f32 %v7719_v50, %v7687_v29 }
  0xb5   : > { %v7793_v10 = vadd.f32 %v588_v14, %v565_v3  ;;  %v570_v30 = vadd.f32 %v554_v22, %v506_v20  ;;  %v7797_v11 = vadd.f32 %v588_v14, %v567_v7  ;;  %v1035_v18 = vand.u32 2139095040, %v7741_v31 }
  0xb6   : > { %v547_v39 = vmul.f32 %v7767_v54, %v7666_v17 }
  0xb7   : > { %13421 = vst [vmem:[#allocation22_spill] sm:$0xff] %v7797_v11  ;;  %v1139_v19 = vand.u32 2139095040, %v7793_v10  ;;  %v1347_v34 = vand.u32 2139095040, %v7797_v11  ;;  %v1036_v53 = vshrl.u32 %v1035_v18, 23 }
  0xb9   : > { %v7771_v60 = vpop.permute.xlu1 %582  ;;  %v1140_v55 = vshrl.u32 %v1139_v19, 23  ;;  %v1348_v62 = vshrl.u32 %v1347_v34, 23 }
  0xba   : > { %v7782_v48 = vadd.f32 %v7771_v60, %v560_v56  ;;  %v7789_v4 = vadd.f32 %v7771_v60, %v562_v57  ;;  %v7795_v56 = vadd.f32 %v555_v0, %v507_v21  ;;  %v433_v57 = vmul.f32 %v7717_v49, %v7687_v29 }
  0xbb   : > { %v483_v21 = vmul.f32 %v7727_v59, %v7659_v16  ;;  %v545_v29 = vmul.f32 %v7762_v52, %v7666_v17  ;;  %v1244_v16 = vshrl.u32 %v1243_v33, 23  ;;  %v6690_v0 = vadd.s32 4294967169, %v1036_v53 }
  0xbc   : > { %13419 = vst [vmem:[#allocation20_spill] sm:$0xff] %v7782_v48  ;;  %13420 = vst [vmem:[#allocation21_spill] sm:$0xff] %v7789_v4  ;;  %v497_v46 = vadd.f32 %v481_v23, %v433_v57  ;;  %v6694_v3 = vadd.s32 4294967169, %v1140_v55  ;;  %v6702_v23 = vadd.s32 4294967169, %v1348_v62  ;;  %v7853_v33 = vmul.f32 %v7767_v54, %v7757_v45 }
  0xbd   : > { %v7791_v6 = vpop.permute.xlu1 %592  ;;  %v499_v51 = vadd.f32 %v483_v21, %v435_v13  ;;  %v7849_v21 = vmul.f32 %v7703_v36, %v7757_v45  ;;  %v13190_v62 = vmov 683565275  }
  0xbe   : > { %v7800_v12 = vadd.f32 %v7791_v6, %v568_v8  ;;  %v7811_v20 = vadd.f32 %v7791_v6, %v569_v9  ;;  %v7828_v47 = vadd.f32 %v7791_v6, %v570_v30  ;;  %v7830_v22 = vadd.f32 %v545_v29, %v497_v46 }
  0xbf   : > { %v7832_v17 = vadd.f32 %v547_v39, %v499_v51  ;;  %v6698_v9 = vadd.s32 4294967169, %v1244_v16  ;;  %v7840_v30 = vmul.f32 %v7700_v35, %v7757_v45  ;;  %v7857_v29 = vadd.s32 1, %v6694_v3 }
  0xc0   : > { %v1451_v14 = vand.u32 2139095040, %v7800_v12  ;;  %v13168_v37 = vand.u32 2147483647, %v7800_v12  ;;  %v1555_v61 = vand.u32 2139095040, %v7811_v20  ;;  %v13169_v41 = vand.u32 2147483647, %v7811_v20 }
  0xc1   : > { %13422 = vst [vmem:[#allocation23_spill] sm:$0xff] %v7828_v47  ;;  %v1659_v19 = vand.u32 2139095040, %v7828_v47  ;;  %v7859_v51 = vadd.s32 1, %v6698_v9  ;;  %vm1147_vm8 = vcmp.gt.s32.totalorder %v7857_v29, 0 }
  0xc2   : > { %v1452_v38 = vshrl.u32 %v1451_v14, 23  ;;  %v1455_v63 = vand.u32 8388607, %v13168_v37  ;;  %v1556_v8 = vshrl.u32 %v1555_v61, 23  ;;  %v7836_v13 = vand.u32 8388607, %v13169_v41 }
  0xc3   : > { %v7845_v14 = vmul.f32 %v7762_v52, %v7757_v45  ;;  %v13182_v45 = vmov 2475754826   ;;  %vm1251_vm9 = vcmp.gt.s32.totalorder %v7859_v51, 0 }
  0xc4   : > { %v6706_v28 = vadd.s32 4294967169, %v1452_v38  ;;  %v1456_v57 = vor.u32 8388608, %v1455_v63  ;;  %v6710_v18 = vadd.s32 4294967169, %v1556_v8  ;;  %v7855_v38 = vadd.s32 1, %v6690_v0 }
  0xc5   : > { %v1560_v55 = vor.u32 8388608, %v7836_v13  ;;  %v1660_v0 = vshrl.u32 %v1659_v19, 23  ;;  %v13186_v8 = vmov 2102212464  }
  0xc6   : > { %v1458_v7 = vadd.s32 1, %v6706_v28  ;;  %v7861_v53 = vshll.u32 %v1456_v57, 8  ;;  %v1562_v61 = vadd.s32 1, %v6710_v18  ;;  %vm1043_vm7 = vcmp.gt.s32.totalorder %v7855_v38, 0 }
  0xc8   : > { %vm1459_vm0 = vcmp.gt.s32.totalorder %v1458_v7, 0  ;;  %vm1563_vm4 = vcmp.gt.s32.totalorder %v1562_v61, 0 }
  0xc9   : > { %v1460_v34 = vsel %vm1459_vm0, %v1458_v7, 0  ;;  %v13184_v7 = vmov 2131351028  }
  0xca   : > { %v1461_v39 = vshrl.u32 %v1460_v34, 5  ;;  %v1462_v46 = vand.u32 31, %v1460_v34  ;;  %v13192_v34 = vmov 920167782  }
  0xcc   : > { %v1463_v16 = vsub.s32 32, %v1462_v46  ;;  %v1465_v63 = vshll.u32 %v13190_v62, %v1462_v46  ;;  %v1468_v28 = vshll.u32 %v13182_v45, %v1462_v46  ;;  %v1471_v3 = vshll.u32 %v13184_v7, %v1462_v46 }
  0xcd   : > { %v1474_v9 = vshll.u32 %v13186_v8, %v1462_v46  ;;  %v1477_v57 = vshll.u32 %v13192_v34, %v1462_v46  ;;  %vm1480_vm1 = vcmp.lt.s32.totalorder %v1461_v39, 1  ;;  %vm1481_vm2 = vcmp.lt.s32.totalorder %v1461_v39, 2 }
  0xce   : > { %v1466_v13 = vshrl.u32 %v13182_v45, %v1463_v16  ;;  %v1469_v18 = vshrl.u32 %v13184_v7, %v1463_v16  ;;  %v1472_v37 = vshrl.u32 %v13186_v8, %v1463_v16  ;;  %v1464_v41 = vshrl.u32 %v13190_v62, %v1463_v16 }
  0xcf   : > { %v1475_v19 = vshrl.u32 %v13192_v34, %v1463_v16  ;;  %v1478_v5 = vshrl.u32 %v13196_v1, %v1463_v16  ;;  %vm1482_vm3 = vcmp.lt.s32.totalorder %v1461_v39, 3  ;;  %vm1483_vm5 = vcmp.lt.s32.totalorder %v1461_v39, 4 }
  0xd0   : > { %v1467_v2 = vor.u32 %v1466_v13, %v1465_v63  ;;  %v1470_v15 = vor.u32 %v1469_v18, %v1468_v28  ;;  %v1473_v54 = vor.u32 %v1472_v37, %v1471_v3  ;;  %v1564_v45 = vsel %vm1563_vm4, %v1562_v61, 0 }
  0xd1   : > { %v1476_v46 = vor.u32 %v1475_v19, %v1474_v9  ;;  %v1479_v36 = vor.u32 %v1478_v5, %v1477_v57  ;;  %v7879_v1 = vshrl.u32 %v1564_v45, 5  ;;  %v1566_v61 = vand.u32 31, %v1564_v45 }
  0xd2   : > { %v1484_v7 = vsel %vm1480_vm1, %v1464_v41, %v1467_v2  ;;  %v1485_v8 = vsel %vm1483_vm5, %v1473_v54, 2102212464  ;;  %v1488_v59 = vsel %vm1480_vm1, %v1467_v2, %v1470_v15  ;;  %v1492_v62 = vsel %vm1480_vm1, %v1470_v15, %v1473_v54 }
  0xd3   : > { %v1486_v34 = vsel %vm1482_vm3, %v1470_v15, %v1485_v8  ;;  %v1489_v25 = vsel %vm1483_vm5, %v1476_v46, 920167782  ;;  %v1493_v16 = vsel %vm1483_vm5, %v1479_v36, 1326507024  ;;  %v7884_v28 = vadd.s32 1, %v6702_v23 }
  0xd4   : > { %v1487_v37 = vsel %vm1481_vm2, %v1484_v7, %v1486_v34  ;;  %v1490_v63 = vsel %vm1482_vm3, %v1473_v54, %v1489_v25  ;;  %v1494_v5 = vsel %vm1482_vm3, %v1476_v46, %v1493_v16  ;;  %v7888_v3 = vshll.u32 %v1560_v55, 8 }
  0xd5   : > { %v1491_v41 = vsel %vm1481_vm2, %v1488_v59, %v1490_v63  ;;  %v1495_v2 = vsel %vm1481_vm2, %v1492_v62, %v1494_v5  ;;  %v1503_v25 = vmul.u32 %v7861_v53, %v1487_v37  ;;  %v1567_v54 = vsub.s32 32, %v1566_v61 }
  0xd6   : > { %v7891_v15 = vmul.u32.u64.low %v7861_v53, %v1495_v2  ;;  %v7892_v36 = vmul.u32.u64.high %v7861_v53, %v1495_v2, %v7891_v15  ;;  %v7895_v8 = vmul.u32.u64.low %v7861_v53, %v1491_v41  ;;  %v7896_v7 = vmul.u32.u64.high %v7861_v53, %v1491_v41, %v7895_v8 }
  0xd7   : > { %vm1584_vm6 = vcmp.lt.s32.totalorder %v7879_v1, 1  ;;  %v6714_v23 = vadd.s32 4294967169, %v1660_v0  ;;  %v13423_v59 = vmov 683565275   ;;  %v13424_v55 = vmov 2475754826  }
  0xd8   : > { %v1569_v39 = vshll.u32 %v13423_v59, %v1566_v61  ;;  %v1572_v62 = vshll.u32 %v13424_v55, %v1566_v61  ;;  %v13425_v45 = vmov 2131351028   ;;  %v13426_v34 = vmov 2102212464  }
  0xd9   : > { %v1575_v9 = vshll.u32 %v13425_v45, %v1566_v61  ;;  %v1578_v57 = vshll.u32 %v13426_v34, %v1566_v61  ;;  %v1570_v13 = vshrl.u32 %v13424_v55, %v1567_v54  ;;  %v1573_v53 = vshrl.u32 %v13425_v45, %v1567_v54 }
  0xda   : > { %v1576_v18 = vshrl.u32 %v13426_v34, %v1567_v54  ;;  %v13427_v19 = vmov 920167782   ;;  %vm1355_vm10 = vcmp.gt.s32.totalorder %v7884_v28, 0  ;;  %vm1505_vm11 = vc.u32 %v7892_v36, %v7895_v8 }
  0xdb   : > { %v1581_v0 = vshll.u32 %v13427_v19, %v1566_v61  ;;  %v1506_v46 = vadd.s32 1, %v7896_v7  ;;  %v1579_v16 = vshrl.u32 %v13427_v19, %v1567_v54  ;;  %vm1585_vm12 = vcmp.lt.s32.totalorder %v7879_v1, 2 }
  0xdc   : > { %v1571_v37 = vor.u32 %v1570_v13, %v1569_v39  ;;  %v1574_v63 = vor.u32 %v1573_v53, %v1572_v62  ;;  %v1577_v5 = vor.u32 %v1576_v18, %v1575_v9  ;;  %v13428_v41 = vmov 1326507024  }
  0xdd   : > { %v1582_v2 = vshrl.u32 %v13428_v41, %v1567_v54  ;;  %v1507_v61 = vsel %vm1505_vm11, %v1506_v46, %v7896_v7  ;;  %v1580_v15 = vor.u32 %v1579_v16, %v1578_v57  ;;  %vm1587_vm13 = vcmp.lt.s32.totalorder %v7879_v1, 4 }
  0xde   : > { %v1666_v50 = vadd.s32 1, %v6714_v23  ;;  %v1508_v27 = vadd.s32 %v1507_v61, %v1503_v25  ;;  %v1568_v52 = vshrl.u32 %v13423_v59, %v1567_v54  ;;  %v1589_v35 = vsel %vm1587_vm13, %v1577_v5, 2102212464 }
  0xdf   : > { %v1583_v49 = vor.u32 %v1582_v2, %v1581_v0  ;;  %vm1586_vm14 = vcmp.lt.s32.totalorder %v7879_v1, 3  ;;  %v1592_v39 = vsel %vm1584_vm6, %v1571_v37, %v1574_v63  ;;  %v1593_v62 = vsel %vm1587_vm13, %v1580_v15, 920167782 }
  0xe0   : > { %v1596_v9 = vsel %vm1584_vm6, %v1574_v63, %v1577_v5  ;;  %v1509_v13 = vadd.s32 536870912, %v1508_v27  ;;  %v1588_v7 = vsel %vm1584_vm6, %v1568_v52, %v1571_v37  ;;  %v1594_v57 = vsel %vm1586_vm14, %v1577_v5, %v1593_v62 }
  0xe1   : > { %v1597_v23 = vsel %vm1587_vm13, %v1583_v49, 1326507024  ;;  %v1590_v25 = vsel %vm1586_vm14, %v1574_v63, %v1589_v35  ;;  %v1595_v54 = vsel %vm1585_vm12, %v1592_v39, %v1594_v57  ;;  %vm1667_vm15 = vcmp.gt.s32.totalorder %v1666_v50, 0 }
  0xe2   : > { %v1598_v53 = vsel %vm1586_vm14, %v1580_v15, %v1597_v23  ;;  %v7931_v18 = vshrl.u32 %v1509_v13, 30  ;;  %v7936_v46 = vmul.u32.u64.low %v7888_v3, %v1595_v54  ;;  %v7937_v16 = vmul.u32.u64.high %v7888_v3, %v1595_v54, %v7936_v46 }
  0xe3   : > { %v1599_v0 = vsel %vm1585_vm12, %v1596_v9, %v1598_v53  ;;  %v13208_v35 = vand.u32 2147483647, %v7828_v47  ;;  %v1668_v49 = vsel %vm1667_vm15, %v1666_v50, 0  ;;  %v1044_v63 = vsel %vm1043_vm7, %v7855_v38, 0 }
  0xe4   : > { %13429 = vst [vmem:[#allocation24_spill] sm:$0xff] %v7931_v18  ;;  %v7941_v52 = vmul.u32.u64.low %v7888_v3, %v1599_v0  ;;  %v7942_v37 = vmul.u32.u64.high %v7888_v3, %v1599_v0, %v7941_v52  ;;  %v1511_v5 = vshll.u32 %v7931_v18, 30  ;;  %v1591_v2 = vsel %vm1585_vm12, %v1588_v7, %v1590_v25 }
  0xe5   : > { %v1670_v61 = vand.u32 31, %v1668_v49  ;;  %v1148_v15 = vsel %vm1147_vm8, %v7857_v29, 0  ;;  %v7956_v39 = vadd.f32 %v7840_v30, %v7749_v40  ;;  %v7960_v50 = vadd.f32 %v7845_v14, %v7751_v42 }
  0xe6   : > { %v7964_v38 = vadd.f32 %v7849_v21, %v7753_v43  ;;  %v7969_v1 = vsel %vm1251_vm9, %v7859_v51, 0  ;;  %v7974_v29 = vsel %vm1355_vm10, %v7884_v28, 0  ;;  %v1610_v40 = vadd.s32 1, %v7937_v16 }
  0xe7   : > { %v7977_v30 = vsub.s32 32, %v1670_v61  ;;  %v7981_v42 = vadd.f32 %v7791_v6, %v7795_v56  ;;  %v1607_v43 = vmul.u32 %v7888_v3, %v1591_v2  ;;  %vm1609_vm0 = vc.u32 %v7942_v37, %v7936_v46 }
  0xe8   : > { %v1663_v14 = vand.u32 8388607, %v13208_v35  ;;  %v7988_v21 = vsub.s32 %v1508_v27, %v1511_v5  ;;  %v1611_v51 = vsel %vm1609_vm0, %v1610_v40, %v7937_v16  ;;  %v7991_v28 = vshrl.u32 %v1668_v49, 5 }
  0xe9   : > { %v1674_v62 = vshrl.u32 %v13424_v55, %v7977_v30  ;;  %v1673_v6 = vshll.u32 %v13423_v59, %v1670_v61  ;;  %v1676_v56 = vshll.u32 %v13424_v55, %v1670_v61  ;;  %v1677_v3 = vshrl.u32 %v13425_v45, %v7977_v30 }
  0xea   : > { %v1680_v9 = vshrl.u32 %v13426_v34, %v7977_v30  ;;  %v8001_v13 = vadd.s32 %v1611_v51, %v1607_v43  ;;  %v1679_v27 = vshll.u32 %v13425_v45, %v1670_v61  ;;  %v1682_v7 = vshll.u32 %v13426_v34, %v1670_v61 }
  0xeb   : > { %v1683_v57 = vshrl.u32 %v13427_v19, %v7977_v30  ;;  %v8007_v23 = vor.u32 %v1674_v62, %v1673_v6  ;;  %v8009_v25 = vor.u32 %v1677_v3, %v1676_v56  ;;  %v1685_v54 = vshll.u32 %v13427_v19, %v1670_v61 }
  0xec   : > { %v1686_v53 = vshrl.u32 %v13428_v41, %v7977_v30  ;;  %v8014_v0 = vshrl.u32 %v1044_v63, 5  ;;  %v8018_v16 = vadd.f32 %v7771_v60, %v7830_v22  ;;  %v1681_v52 = vor.u32 %v1680_v9, %v1679_v27 }
  0xed   : > { %v1684_v49 = vor.u32 %v1683_v57, %v1682_v7  ;;  %v8022_v5 = vadd.f32 %v7771_v60, %v7832_v17  ;;  %v619_v2 = vand.u32 2139095040, %v7782_v48  ;;  %v1763_v61 = vand.u32 2139095040, %v7981_v42 }
  0xee   : > { %13430 = vst [vmem:[#allocation25_spill] sm:$0xff] %v8014_v0  ;;  %v1687_v40 = vor.u32 %v1686_v53, %v1685_v54  ;;  %v1514_v43 = vsub.s32 0, %v7988_v21  ;;  %v1664_v51 = vor.u32 8388608, %v1663_v14  ;;  %vm1688_vm1 = vcmp.lt.s32.totalorder %v7991_v28, 1 }
  0xef   : > { %13431 = vst [vmem:[#allocation26_spill] sm:$0xff] %v8022_v5  ;;  %vm1691_vm2 = vcmp.lt.s32.totalorder %v7991_v28, 4  ;;  %v1613_v22 = vadd.s32 536870912, %v8001_v13  ;;  %vm1690_vm3 = vcmp.lt.s32.totalorder %v7991_v28, 3  ;;  %v1696_v60 = vsel %vm1688_vm1, %v8007_v23, %v8009_v25 }
  0xf0   : > { %v1697_v17 = vsel %vm1691_vm2, %v1684_v49, 920167782  ;;  %v723_v62 = vand.u32 2139095040, %v8018_v16  ;;  %v1700_v6 = vsel %vm1688_vm1, %v8009_v25, %v1681_v52  ;;  %v1701_v56 = vsel %vm1691_vm2, %v1687_v40, 1326507024 }
  0xf1   : > { %v1698_v14 = vsel %vm1690_vm3, %v1681_v52, %v1697_v17  ;;  %v8045_v3 = vand.u32 31, %v1044_v63  ;;  %vm1689_vm4 = vcmp.lt.s32.totalorder %v7991_v28, 2  ;;  %v1702_v9 = vsel %vm1690_vm3, %v1684_v49, %v1701_v56 }
  0xf2   : > { %v1764_v27 = vshrl.u32 %v1763_v61, 23  ;;  %v8050_v7 = vshrl.u32 %v1148_v15, 5  ;;  %v8052_v57 = vand.u32 31, %v1148_v15  ;;  %v827_v54 = vand.u32 2139095040, %v7789_v4 }
  0xf3   : > { %13432 = vst [vmem:[#allocation27_spill] sm:$0xff] %v8045_v3  ;;  %v1699_v53 = vsel %vm1689_vm4, %v1696_v60, %v1698_v14  ;;  %v6707_v17 = vmin.u32 %v1514_v43, %v7988_v21  ;;  %v8058_v40 = vshrl.u32 %v1613_v22, 30  ;;  %v1703_v63 = vsel %vm1689_vm4, %v1700_v6, %v1702_v9 }
  0xf4   : > { %13433 = vst [vmem:[#allocation28_spill] sm:$0xff] %v8050_v7  ;;  %v8062_v35 = vshll.u32 %v1664_v51, 8  ;;  %v8065_v49 = vshrl.u32 %v7969_v1, 5  ;;  %v620_v61 = vshrl.u32 %v619_v2, 23  ;;  %v724_v15 = vshrl.u32 %v723_v62, 23 }
  0xf5   : > { %13434 = vst [vmem:[#allocation29_spill] sm:$0xff] %v8058_v40  ;;  %v931_v56 = vand.u32 2139095040, %v8022_v5  ;;  %v6718_v43 = vadd.s32 4294967169, %v1764_v27  ;;  %v8075_v22 = vadd.f32 %v7853_v33, %v7755_v44  ;;  %v828_v60 = vshrl.u32 %v827_v54, 23 }
  0xf6   : > { %13435 = vst [vmem:[#allocation30_spill] sm:$0xff] %v8065_v49  ;;  %v8069_v26 = vmul.u32.u64.low %v8062_v35, %v1699_v53  ;;  %v8070_v58 = vmul.u32.u64.high %v8062_v35, %v1699_v53, %v8069_v26  ;;  %v8078_v51 = vmul.u32.u64.low %v8062_v35, %v1703_v63  ;;  %v8079_v14 = vmul.u32.u64.high %v8062_v35, %v1703_v63, %v8078_v51 }
  0xf7   : > { %v13219_v2 = vand.u32 2147483647, %v7981_v42  ;;  %v8083_v62 = vand.u32 31, %v7969_v1  ;;  %v1516_v6 = vclz %v6707_v17  ;;  %v1615_v9 = vshll.u32 %v8058_v40, 30 }
  0xf8   : > { %v1770_v53 = vadd.s32 1, %v6718_v43  ;;  %v8087_v27 = vsub.s32 32, %v8045_v3  ;;  %v8090_v44 = vshrl.u32 %v7974_v29, 5  ;;  %v8093_v33 = vand.u32 31, %v7974_v29 }
  0xf9   : > { %13436 = vst [vmem:[#allocation31_spill] sm:$0xff] %v8083_v62  ;;  %v932_v54 = vshrl.u32 %v931_v56, 23  ;;  %v6674_v63 = vadd.s32 4294967169, %v620_v61  ;;  %v6678_v51 = vadd.s32 4294967169, %v724_v15  ;;  %v1693_v1 = vsel %vm1691_vm2, %v1681_v52, 2102212464 }
  0xfa   : > { %13437 = vst [vmem:[#allocation32_spill] sm:$0xff] %v8087_v27  ;;  %13438 = vst [vmem:[#allocation33_spill] sm:$0xff] %v8090_v44  ;;  %vm1771_vm5 = vcmp.gt.s32.totalorder %v1770_v53, 0  ;;  %v6682_v17 = vadd.s32 4294967169, %v828_v60  ;;  %v1672_v43 = vshrl.u32 %v13423_v59, %v7977_v30  ;;  %v1767_v24 = vand.u32 8388607, %v13219_v2 }
  0xfb   : > { %13439 = vst [vmem:[#allocation34_spill] sm:$0xff] %v8093_v33  ;;  %v1772_v18 = vsel %vm1771_vm5, %v1770_v53, 0  ;;  %v8102_v47 = vsub.s32 32, %v8052_v57  ;;  %v6708_v29 = vadd.s32 4294967294, %v1516_v6  ;;  %v8105_v56 = vsub.s32 %v8001_v13, %v1615_v9  ;;  %v8119_v53 = vpop.permute.xlu1 %597 }
  0xfc   : > { %v1774_v61 = vand.u32 31, %v1772_v18  ;;  %v8108_v15 = vsub.s32 32, %v8083_v62  ;;  %v8111_v52 = vsub.s32 32, %v8093_v33  ;;  %v1692_v30 = vsel %vm1688_vm1, %v1672_v43, %v8007_v23 }
  0xfd   : > { %v1694_v60 = vsel %vm1690_vm3, %v8009_v25, %v1693_v1  ;;  %v626_v6 = vadd.s32 1, %v6674_v63  ;;  %v730_v13 = vadd.s32 1, %v6678_v51  ;;  %v6686_v9 = vadd.s32 4294967169, %v932_v54 }
  0xfe   : > { %13440 = vst [vmem:[#allocation35_spill] sm:$0xff] %v8108_v15  ;;  %13441 = vst [vmem:[#allocation36_spill] sm:$0xff] %v8111_v52  ;;  %v1714_v2 = vadd.s32 1, %v8070_v58  ;;  %v8122_v40 = vadd.s32 1, %v6682_v17  ;;  %vm1713_vm6 = vc.u32 %v8079_v14, %v8069_v26  ;;  %v1768_v49 = vor.u32 8388608, %v1767_v24 }
  0xff   : > { %v1775_v62 = vsub.s32 32, %v1774_v61  ;;  %vm6709_vm7 = vcmp.lt.s32.totalorder %v6708_v29, 0  ;;  %v1618_v23 = vsub.s32 0, %v8105_v56  ;;  %v1695_v25 = vsel %vm1689_vm4, %v1692_v30, %v1694_v60 }
 0x100   : > { %v8131_v63 = vadd.f32 %v8119_v53, %v7956_v39  ;;  %v1777_v54 = vshll.u32 %v13423_v59, %v1774_v61  ;;  %v1780_v1 = vshll.u32 %v13424_v55, %v1774_v61  ;;  %v1715_v24 = vsel %vm1713_vm6, %v1714_v2, %v8070_v58 }
 0x101   : > { %v1778_v51 = vshrl.u32 %v13424_v55, %v1775_v62  ;;  %v1781_v17 = vshrl.u32 %v13425_v45, %v1775_v62  ;;  %v1773_v43 = vshrl.u32 %v1772_v18, 5  ;;  %v1783_v15 = vshll.u32 %v13425_v45, %v1774_v61 }
 0x102   : > { %13442 = vst [vmem:[#allocation37_spill] sm:$0xff] %v8131_v63  ;;  %v1784_v28 = vshrl.u32 %v13426_v34, %v1775_v62  ;;  %v1786_v39 = vshll.u32 %v13426_v34, %v1774_v61  ;;  %v1787_v32 = vshrl.u32 %v13427_v19, %v1775_v62  ;;  %vm627_vm8 = vcmp.gt.s32.totalorder %v626_v6, 0 }
 0x103   : > { %v1779_v30 = vor.u32 %v1778_v51, %v1777_v54  ;;  %v1782_v60 = vor.u32 %v1781_v17, %v1780_v1  ;;  %vm731_vm9 = vcmp.gt.s32.totalorder %v730_v13, 0  ;;  %v1711_v4 = vmul.u32 %v8062_v35, %v1695_v25 }
 0x104   : > { %v1785_v0 = vor.u32 %v1784_v28, %v1783_v15  ;;  %v8144_v3 = vsel %vm6709_vm7, 0, %v6708_v29  ;;  %v1788_v58 = vor.u32 %v1787_v32, %v1786_v39  ;;  %v1789_v18 = vshll.u32 %v13427_v19, %v1774_v61 }
 0x105   : > { %v1790_v2 = vshrl.u32 %v13428_v41, %v1775_v62  ;;  %v6711_v54 = vmin.u32 %v1618_v23, %v8105_v56  ;;  %v8149_v51 = vadd.s32 %v1715_v24, %v1711_v4  ;;  %vm1792_vm10 = vcmp.lt.s32.totalorder %v1773_v43, 1 }
 0x106   : > { %v1808_v1 = vshll.u32 %v1768_v49, 8  ;;  %vm1795_vm11 = vcmp.lt.s32.totalorder %v1773_v43, 4  ;;  %v1800_v27 = vsel %vm1792_vm10, %v1779_v30, %v1782_v60  ;;  %v1867_v35 = vand.u32 2139095040, %v8131_v63 }
 0x107   : > { %v1791_v17 = vor.u32 %v1790_v2, %v1789_v18  ;;  %v1776_v15 = vshrl.u32 %v13423_v59, %v1775_v62  ;;  %vm1794_vm12 = vcmp.lt.s32.totalorder %v1773_v43, 3  ;;  %v1797_v29 = vsel %vm1795_vm11, %v1785_v0, 2102212464 }
 0x108   : > { %v1801_v32 = vsel %vm1795_vm11, %v1788_v58, 920167782  ;;  %vm1793_vm13 = vcmp.lt.s32.totalorder %v1773_v43, 2  ;;  %v1804_v25 = vsel %vm1792_vm10, %v1782_v60, %v1785_v0  ;;  %v1717_v23 = vadd.s32 536870912, %v8149_v51 }
 0x109   : > { %v1802_v61 = vsel %vm1794_vm12, %v1785_v0, %v1801_v32  ;;  %v1805_v28 = vsel %vm1795_vm11, %v1791_v17, 1326507024  ;;  %v1796_v4 = vsel %vm1792_vm10, %v1776_v15, %v1779_v30  ;;  %v8157_v49 = vadd.f32 %v8119_v53, %v7960_v50 }
 0x10a   : > { %v1803_v24 = vsel %vm1793_vm13, %v1800_v27, %v1802_v61  ;;  %v1798_v39 = vsel %vm1794_vm12, %v1782_v60, %v1797_v29  ;;  %v1806_v18 = vsel %vm1794_vm12, %v1788_v58, %v1805_v28  ;;  %v628_v31 = vsel %vm627_vm8, %v626_v6, 0 }
 0x10b   : > { %13443 = vst [vmem:[#allocation38_spill] sm:$0xff] %v8157_v49  ;;  %v8159_v2 = vmul.u32.u64.low %v1808_v1, %v1803_v24  ;;  %v8160_v62 = vmul.u32.u64.high %v1808_v1, %v1803_v24, %v8159_v2  ;;  %v938_v32 = vadd.s32 1, %v6686_v9  ;;  %v1807_v0 = vsel %vm1793_vm13, %v1804_v25, %v1806_v18 }
 0x10c   : > { %v1868_v17 = vshrl.u32 %v1867_v35, 23  ;;  %v732_v30 = vsel %vm731_vm9, %v730_v13, 0  ;;  %v1524_v27 = vsub.s32 4294967266, %v8144_v3  ;;  %v1620_v50 = vclz %v6711_v54 }
 0x10d   : > { %v8167_v15 = vmul.u32.u64.low %v1808_v1, %v1807_v0  ;;  %v8168_v61 = vmul.u32.u64.high %v1808_v1, %v1807_v0, %v8167_v15  ;;  %v8170_v60 = vshrl.u32 %v1717_v23, 30  ;;  %v1799_v58 = vsel %vm1793_vm13, %v1796_v4, %v1798_v39 }
 0x10e   : > { %v6722_v29 = vadd.s32 4294967169, %v1868_v17  ;;  %vm835_vm14 = vcmp.gt.s32.totalorder %v8122_v40, 0  ;;  %v1818_v6 = vadd.s32 1, %v8160_v62  ;;  %v13236_v9 = vand.u32 2147483647, %v8131_v63 }
 0x10f   : > { %13444 = vst [vmem:[#allocation39_spill] sm:$0xff] %v8170_v60  ;;  %v1971_v35 = vand.u32 2139095040, %v8157_v49  ;;  %v8177_v13 = vand.u32 31, %v628_v31  ;;  %vm939_vm15 = vcmp.gt.s32.totalorder %v938_v32, 0  ;;  %v1504_v25 = vadd.s32 %v7895_v8, %v7892_v36 }
 0x110   : > { %v1874_v54 = vadd.s32 1, %v6722_v29  ;;  %v1520_v28 = vsub.s32 32, %v8144_v3  ;;  %v8182_v43 = vadd.s32 127, %v1524_v27  ;;  %v1815_v23 = vmul.u32 %v1808_v1, %v1799_v58 }
 0x111   : > { %13445 = vst [vmem:[#allocation40_spill] sm:$0xff] %v8177_v13  ;;  %vm1817_vm0 = vc.u32 %v8168_v61, %v8159_v2  ;;  %v6712_v4 = vadd.s32 4294967294, %v1620_v50  ;;  %v1719_v24 = vshll.u32 %v8170_v60, 30  ;;  %v1871_v36 = vand.u32 8388607, %v13236_v9 }
 0x112   : > { %v1819_v39 = vsel %vm1817_vm0, %v1818_v6, %v8160_v62  ;;  %vm1875_vm1 = vcmp.gt.s32.totalorder %v1874_v54, 0  ;;  %v1972_v0 = vshrl.u32 %v1971_v35, 23  ;;  %v8192_v17 = vshrl.u32 %v628_v31, 5 }
 0x113   : > { %v8188_v18 = vadd.s32 %v1819_v39, %v1815_v23  ;;  %v1876_v8 = vsel %vm1875_vm1, %v1874_v54, 0  ;;  %v8194_v27 = vshrl.u32 %v732_v30, 5  ;;  %v8196_v1 = vand.u32 31, %v732_v30 }
 0x114   : > { %13446 = vst [vmem:[#allocation41_spill] sm:$0xff] %v8192_v17  ;;  %v1878_v15 = vand.u32 31, %v1876_v8  ;;  %v8199_v50 = vsub.s32 32, %v8177_v13  ;;  %v836_v62 = vsel %vm835_vm14, %v8122_v40, 0  ;;  %v8205_v58 = vsel %vm939_vm15, %v938_v32, 0 }
 0x115   : > { %v8207_v29 = vshrl.u32 %v1504_v25, %v1520_v28  ;;  %vm6713_vm2 = vcmp.lt.s32.totalorder %v6712_v4, 0  ;;  %v8211_v6 = vsub.s32 %v8149_v51, %v1719_v24  ;;  %v1821_v35 = vadd.s32 536870912, %v8188_v18 }
 0x116   : > { %13447 = vst [vmem:[#allocation42_spill] sm:$0xff] %v8199_v50  ;;  %v1879_v30 = vsub.s32 32, %v1878_v15  ;;  %v1872_v54 = vor.u32 8388608, %v1871_v36  ;;  %v1877_v23 = vshrl.u32 %v1876_v8, 5  ;;  %v6726_v39 = vadd.s32 4294967169, %v1972_v0 }
 0x117   : > { %v1881_v9 = vshll.u32 %v13423_v59, %v1878_v15  ;;  %v1884_v32 = vshll.u32 %v13424_v55, %v1878_v15  ;;  %v1887_v28 = vshll.u32 %v13425_v45, %v1878_v15  ;;  %v1890_v51 = vshll.u32 %v13426_v34, %v1878_v15 }
 0x118   : > { %v1882_v40 = vshrl.u32 %v13424_v55, %v1879_v30  ;;  %v1885_v25 = vshrl.u32 %v13425_v45, %v1879_v30  ;;  %v1888_v31 = vshrl.u32 %v13426_v34, %v1879_v30  ;;  %v1891_v24 = vshrl.u32 %v13427_v19, %v1879_v30 }
 0x119   : > { %v1893_v8 = vshll.u32 %v13427_v19, %v1878_v15  ;;  %v1894_v0 = vshrl.u32 %v13428_v41, %v1879_v30  ;;  %v8225_v63 = vsel %vm6713_vm2, 0, %v6712_v4  ;;  %v1722_v17 = vsub.s32 0, %v8211_v6 }
 0x11a   : > { %v1883_v60 = vor.u32 %v1882_v40, %v1881_v9  ;;  %v1886_v36 = vor.u32 %v1885_v25, %v1884_v32  ;;  %v1889_v13 = vor.u32 %v1888_v31, %v1887_v28  ;;  %v1892_v50 = vor.u32 %v1891_v24, %v1890_v51 }
 0x11b   : > { %v8228_v48 = vshrl.u32 %v1821_v35, 30  ;;  %v1895_v44 = vor.u32 %v1894_v0, %v1893_v8  ;;  %vm1896_vm3 = vcmp.lt.s32.totalorder %v1877_v23, 1  ;;  %v1978_v33 = vadd.s32 1, %v6726_v39 }
 0x11c   : > { %vm1899_vm4 = vcmp.lt.s32.totalorder %v1877_v23, 4  ;;  %v1904_v9 = vsel %vm1896_vm3, %v1883_v60, %v1886_v36  ;;  %v1912_v40 = vshll.u32 %v1872_v54, 8  ;;  %v1880_v32 = vshrl.u32 %v13423_v59, %v1879_v30 }
 0x11d   : > { %13448 = vst [vmem:[#allocation43_spill] sm:$0xff] %v8228_v48  ;;  %vm1898_vm5 = vcmp.lt.s32.totalorder %v1877_v23, 3  ;;  %v1905_v4 = vsel %vm1899_vm4, %v1892_v50, 920167782  ;;  %v1908_v25 = vsel %vm1896_vm3, %v1886_v36, %v1889_v13  ;;  %vm1897_vm6 = vcmp.lt.s32.totalorder %v1877_v23, 2 }
 0x11e   : > { %v1901_v31 = vsel %vm1899_vm4, %v1889_v13, 2102212464  ;;  %v1906_v28 = vsel %vm1898_vm5, %v1889_v13, %v1905_v4  ;;  %v1909_v35 = vsel %vm1899_vm4, %v1895_v44, 1326507024  ;;  %v1823_v51 = vshll.u32 %v8228_v48, 30 }
 0x11f   : > { %v1907_v39 = vsel %vm1897_vm6, %v1904_v9, %v1906_v28  ;;  %v1910_v24 = vsel %vm1898_vm5, %v1892_v50, %v1909_v35  ;;  %vm1979_vm7 = vcmp.gt.s32.totalorder %v1978_v33, 0  ;;  %v1900_v54 = vsel %vm1896_vm3, %v1880_v32, %v1883_v60 }
 0x120   : > { %v1911_v8 = vsel %vm1897_vm6, %v1908_v25, %v1910_v24  ;;  %v8238_v0 = vmul.u32.u64.low %v1912_v40, %v1907_v39  ;;  %v8239_v30 = vmul.u32.u64.high %v1912_v40, %v1907_v39, %v8238_v0  ;;  %v1902_v15 = vsel %vm1898_vm5, %v1886_v36, %v1901_v31 }
 0x121   : > { %v8242_v52 = vmul.u32.u64.low %v1912_v40, %v1911_v8  ;;  %v8243_v11 = vmul.u32.u64.high %v1912_v40, %v1911_v8, %v8242_v52  ;;  %v1980_v13 = vsel %vm1979_vm7, %v1978_v33, 0  ;;  %v8246_v44 = vsub.s32 32, %v8196_v1 }
 0x122   : > { %v8248_v4 = vshrl.u32 %v836_v62, 5  ;;  %v1628_v50 = vsub.s32 4294967266, %v8225_v63  ;;  %v1982_v9 = vand.u32 31, %v1980_v13  ;;  %v8251_v60 = vand.u32 31, %v836_v62 }
 0x123   : > { %v1521_v32 = vshll.u32 %v7988_v21, %v8144_v3  ;;  %v1608_v36 = vadd.s32 %v7936_v46, %v7942_v37  ;;  %v6715_v25 = vmin.u32 %v1722_v17, %v8211_v6  ;;  %v1903_v33 = vsel %vm1897_vm6, %v1900_v54, %v1902_v15 }
 0x124   : > { %13449 = vst [vmem:[#allocation44_spill] sm:$0xff] %v8248_v4  ;;  %v1922_v52 = vadd.s32 1, %v8239_v30  ;;  %v13450_v31 = vand.u32 2147483647, %v8157_v49  ;;  %v1983_v35 = vsub.s32 32, %v1982_v9  ;;  %v13451_v62 = vshll.u32 %v8182_v43, 23 }
 0x125   : > { %v8263_v39 = vor.u32 %v8207_v29, %v1521_v32  ;;  %v8270_v21 = vsub.s32 %v8188_v18, %v1823_v51  ;;  %vm1921_vm8 = vc.u32 %v8243_v11, %v8238_v0  ;;  %v1624_v46 = vsub.s32 32, %v8225_v63 }
 0x126   : > { %v1975_v28 = vand.u32 8388607, %v13450_v31  ;;  %v8267_v24 = vor.u32 4788187, %v13451_v62  ;;  %v1629_v37 = vadd.s32 127, %v1628_v50  ;;  %v8277_v3 = vadd.f32 %v8119_v53, %v7964_v38 }
 0x127   : > { %v1923_v17 = vsel %vm1921_vm8, %v1922_v52, %v8239_v30  ;;  %v1724_v29 = vclz %v6715_v25  ;;  %v1919_v23 = vmul.u32 %v1912_v40, %v1903_v33  ;;  %v1986_v43 = vshrl.u32 %v13424_v55, %v1983_v35 }
 0x128   : > { %13452 = vst [vmem:[#allocation45_spill] sm:$0xff] %v8277_v3  ;;  %v1989_v15 = vshrl.u32 %v13425_v45, %v1983_v35  ;;  %v1976_v18 = vor.u32 8388608, %v1975_v28  ;;  %v1985_v51 = vshll.u32 %v13423_v59, %v1982_v9  ;;  %v1988_v54 = vshll.u32 %v13424_v55, %v1982_v9 }
 0x129   : > { %v1992_v8 = vshrl.u32 %v13426_v34, %v1983_v35  ;;  %v1826_v50 = vsub.s32 0, %v8270_v21  ;;  %v8286_v32 = vadd.s32 %v1923_v17, %v1919_v23  ;;  %v1981_v38 = vshrl.u32 %v1980_v13, 5 }
 0x12a   : > { %v1991_v30 = vshll.u32 %v13425_v45, %v1982_v9  ;;  %v1987_v25 = vor.u32 %v1986_v43, %v1985_v51  ;;  %v1990_v40 = vor.u32 %v1989_v15, %v1988_v54  ;;  %v1994_v33 = vshll.u32 %v13426_v34, %v1982_v9 }
 0x12b   : > { %v1995_v52 = vshrl.u32 %v13427_v19, %v1983_v35  ;;  %v8293_v31 = vadd.f32 %v8119_v53, %v8075_v22  ;;  %v1997_v62 = vshll.u32 %v13427_v19, %v1982_v9  ;;  %v1998_v48 = vshrl.u32 %v13428_v41, %v1983_v35 }
 0x12c   : > { %v1993_v28 = vor.u32 %v1992_v8, %v1991_v30  ;;  %v1626_v17 = vshrl.u32 %v1608_v36, %v1624_v46  ;;  %v1630_v23 = vshll.u32 %v1629_v37, 23  ;;  %v6716_v13 = vadd.s32 4294967294, %v1724_v29 }
 0x12d   : > { %13453 = vst [vmem:[#allocation46_spill] sm:$0xff] %v8293_v31  ;;  %v1996_v4 = vor.u32 %v1995_v52, %v1994_v33  ;;  %v1925_v43 = vadd.s32 536870912, %v8286_v32  ;;  %v1999_v15 = vor.u32 %v1998_v48, %v1997_v62  ;;  %vm2000_vm9 = vcmp.lt.s32.totalorder %v1981_v38, 1 }
 0x12e   : > { %v2016_v51 = vshll.u32 %v1976_v18, 8  ;;  %v6719_v54 = vmin.u32 %v1826_v50, %v8270_v21  ;;  %vm2003_vm10 = vcmp.lt.s32.totalorder %v1981_v38, 4  ;;  %v2008_v22 = vsel %vm2000_vm9, %v1987_v25, %v1990_v40 }
 0x12f   : > { %v2075_v53 = vand.u32 2139095040, %v8277_v3  ;;  %v1984_v9 = vshrl.u32 %v13423_v59, %v1983_v35  ;;  %vm2002_vm11 = vcmp.lt.s32.totalorder %v1981_v38, 3  ;;  %v2009_v8 = vsel %vm2003_vm10, %v1996_v4, 920167782 }
 0x130   : > { %v2012_v36 = vsel %vm2000_vm9, %v1990_v40, %v1993_v28  ;;  %vm2001_vm12 = vcmp.lt.s32.totalorder %v1981_v38, 2  ;;  %v2005_v46 = vsel %vm2003_vm10, %v1993_v28, 2102212464  ;;  %v2010_v37 = vsel %vm2002_vm11, %v1993_v28, %v2009_v8 }
 0x131   : > { %v2013_v29 = vsel %vm2003_vm10, %v1999_v15, 1326507024  ;;  %v8303_v48 = vshrl.u32 %v1925_v43, 30  ;;  %v2011_v18 = vsel %vm2001_vm12, %v2008_v22, %v2010_v37  ;;  %v2179_v30 = vand.u32 2139095040, %v8293_v31 }
 0x132   : > { %v2014_v50 = vsel %vm2002_vm11, %v1996_v4, %v2013_v29  ;;  %v2004_v33 = vsel %vm2000_vm9, %v1984_v9, %v1987_v25  ;;  %v8309_v35 = vmul.u32.u64.low %v2016_v51, %v2011_v18  ;;  %v8310_v62 = vmul.u32.u64.high %v2016_v51, %v2011_v18, %v8309_v35 }
 0x133   : > { %13454 = vst [vmem:[#allocation47_spill] sm:$0xff] %v8303_v48  ;;  %v2015_v52 = vsel %vm2001_vm12, %v2012_v36, %v2014_v50  ;;  %v2006_v49 = vsel %vm2002_vm11, %v1990_v40, %v2005_v46  ;;  %v2076_v28 = vshrl.u32 %v2075_v53, 23  ;;  %v1528_v43 = vand.u32 2147483647, %v8267_v24 }
 0x134   : > { %v8313_v5 = vmul.u32.u64.low %v2016_v51, %v2015_v52  ;;  %v8314_v7 = vmul.u32.u64.high %v2016_v51, %v2015_v52, %v8313_v5  ;;  %v1625_v4 = vshll.u32 %v8105_v56, %v8225_v63  ;;  %vm6717_vm13 = vcmp.lt.s32.totalorder %v6716_v13, 0 }
 0x135   : > { %v1828_v15 = vclz %v6719_v54  ;;  %v8320_v25 = vand.u32 31, %v8205_v58  ;;  %v1530_v22 = vcvt.s32.f32 %v8263_v39  ;;  %v1631_v9 = vor.u32 4788187, %v1630_v23 }
 0x136   : > { %v6730_v8 = vadd.s32 4294967169, %v2076_v28  ;;  %v1627_v36 = vor.u32 %v1626_v17, %v1625_v4  ;;  %v2007_v40 = vsel %vm2001_vm12, %v2004_v33, %v2006_v49  ;;  %v2026_v5 = vadd.s32 1, %v8310_v62 }
 0x137   : > { %v2180_v53 = vshrl.u32 %v2179_v30, 23  ;;  %v1727_v46 = vsel %vm6717_vm13, 0, %v6716_v13  ;;  %v1927_v24 = vshll.u32 %v8303_v48, 30  ;;  %vm2025_vm14 = vc.u32 %v8314_v7, %v8309_v35 }
 0x138   : > { %v2082_v56 = vadd.s32 1, %v6730_v8  ;;  %v8329_v63 = vshrl.u32 %v8205_v58, 5  ;;  %v8331_v54 = vmul.f32 %v1530_v22, %v1528_v43  ;;  %v6720_v39 = vadd.s32 4294967294, %v1828_v15 }
 0x139   : > { %v2027_v17 = vsel %vm2025_vm14, %v2026_v5, %v8310_v62  ;;  %v8335_v49 = vsub.s32 32, %v8251_v60  ;;  %v1632_v38 = vand.u32 2147483647, %v1631_v9  ;;  %v2023_v23 = vmul.u32 %v2016_v51, %v2007_v40 }
 0x13a   : > { %vm2083_vm15 = vcmp.gt.s32.totalorder %v2082_v56, 0  ;;  %v1728_v13 = vsub.s32 32, %v1727_v46  ;;  %v13261_v37 = vand.u32 2147483647, %v8277_v3  ;;  %v6734_v18 = vadd.s32 4294967169, %v2180_v53 }
 0x13b   : > { %13455 = vst [vmem:[#allocation48_spill] sm:$0xff] %v8335_v49  ;;  %v2084_v29 = vsel %vm2083_vm15, %v2082_v56, 0  ;;  %v8339_v50 = vsub.s32 32, %v8320_v25  ;;  %v1634_v58 = vcvt.s32.f32 %v1627_v36  ;;  %v8342_v30 = vsub.s32 %v8286_v32, %v1927_v24 }
 0x13c   : > { %v8344_v33 = vadd.s32 %v2027_v17, %v2023_v23  ;;  %v1712_v51 = vadd.s32 %v8069_v26, %v8079_v14  ;;  %vm6721_vm0 = vcmp.lt.s32.totalorder %v6720_v39, 0  ;;  %v2086_v62 = vand.u32 31, %v2084_v29 }
 0x13d   : > { %v8349_v28 = vmul.f32 %v1634_v58, %v1632_v38  ;;  %v1729_v43 = vshll.u32 %v8211_v6, %v1727_v46  ;;  %v1732_v4 = vsub.s32 4294967266, %v1727_v46  ;;  %v8354_v15 = vadd.s32 %v8159_v2, %v8168_v61 }
 0x13e   : > { %v1730_v32 = vshrl.u32 %v1712_v51, %v1728_v13  ;;  %v2079_v22 = vand.u32 8388607, %v13261_v37  ;;  %v2087_v9 = vsub.s32 32, %v2086_v62  ;;  %v2186_v8 = vadd.s32 1, %v6734_v18 }
 0x13f   : > { %v8358_v36 = vsel %vm6721_vm0, 0, %v6720_v39  ;;  %v1930_v26 = vsub.s32 0, %v8342_v30  ;;  %v2029_v14 = vadd.s32 536870912, %v8344_v33  ;;  %v2089_v40 = vshll.u32 %v13423_v59, %v2086_v62 }
 0x140   : > { %v2090_v6 = vshrl.u32 %v13424_v55, %v2087_v9  ;;  %v2092_v5 = vshll.u32 %v13424_v55, %v2086_v62  ;;  %v2093_v2 = vshrl.u32 %v13425_v45, %v2087_v9  ;;  %v2096_v61 = vshrl.u32 %v13426_v34, %v2087_v9 }
 0x141   : > { %v8367_v53 = vshrl.u32 %v2084_v29, 5  ;;  %v2095_v46 = vshll.u32 %v13425_v45, %v2086_v62  ;;  %v2098_v24 = vshll.u32 %v13426_v34, %v2086_v62  ;;  %v2099_v56 = vshrl.u32 %v13427_v19, %v2087_v9 }
 0x142   : > { %v2080_v39 = vor.u32 8388608, %v2079_v22  ;;  %v2091_v17 = vor.u32 %v2090_v6, %v2089_v40  ;;  %v2094_v38 = vor.u32 %v2093_v2, %v2092_v5  ;;  %vm2187_vm1 = vcmp.gt.s32.totalorder %v2186_v8, 0 }
 0x143   : > { %v2097_v23 = vor.u32 %v2096_v61, %v2095_v46  ;;  %v2100_v13 = vor.u32 %v2099_v56, %v2098_v24  ;;  %v2101_v18 = vshll.u32 %v13427_v19, %v2086_v62  ;;  %v2102_v58 = vshrl.u32 %v13428_v41, %v2087_v9 }
 0x144   : > { %v8374_v51 = vor.u32 %v1730_v32, %v1729_v43  ;;  %v8376_v29 = vadd.s32 127, %v1732_v4  ;;  %v1836_v37 = vsub.s32 4294967266, %v8358_v36  ;;  %v8379_v52 = vshrl.u32 %v2029_v14, 30 }
 0x145   : > { %v2103_v3 = vor.u32 %v2102_v58, %v2101_v18  ;;  %vm2104_vm2 = vcmp.lt.s32.totalorder %v8367_v53, 1  ;;  %vm2107_vm3 = vcmp.lt.s32.totalorder %v8367_v53, 4  ;;  %v2188_v22 = vsel %vm2187_vm1, %v2186_v8, 0 }
 0x146   : > { %13456 = vst [vmem:[#allocation49_spill] sm:$0xff] %v8379_v52  ;;  %v6723_v40 = vmin.u32 %v1930_v26, %v8342_v30  ;;  %vm2106_vm4 = vcmp.lt.s32.totalorder %v8367_v53, 3  ;;  %v2112_v62 = vsel %vm2104_vm2, %v2091_v17, %v2094_v38  ;;  %v2113_v43 = vsel %vm2107_vm3, %v2100_v13, 920167782 }
 0x147   : > { %vm2105_vm5 = vcmp.lt.s32.totalorder %v8367_v53, 2  ;;  %v2114_v4 = vsel %vm2106_vm4, %v2097_v23, %v2113_v43  ;;  %v2116_v32 = vsel %vm2104_vm2, %v2094_v38, %v2097_v23  ;;  %v2120_v14 = vshll.u32 %v2080_v39, 8 }
 0x148   : > { %v2031_v6 = vshll.u32 %v8379_v52, 30  ;;  %v2115_v8 = vsel %vm2105_vm5, %v2112_v62, %v2114_v4  ;;  %v2117_v26 = vsel %vm2107_vm3, %v2103_v3, 1326507024  ;;  %v2190_v5 = vand.u32 31, %v2188_v22 }
 0x149   : > { %v1837_v2 = vadd.s32 127, %v1836_v37  ;;  %v2109_v61 = vsel %vm2107_vm3, %v2097_v23, 2102212464  ;;  %v2118_v46 = vsel %vm2106_vm4, %v2100_v13, %v2117_v26  ;;  %v13264_v24 = vand.u32 2147483647, %v8293_v31 }
 0x14a   : > { %v2119_v56 = vsel %vm2105_vm5, %v2116_v32, %v2118_v46  ;;  %v8400_v18 = vmul.u32.u64.low %v2120_v14, %v2115_v8  ;;  %v8401_v58 = vmul.u32.u64.high %v2120_v14, %v2115_v8, %v8400_v18  ;;  %v8404_v39 = vsub.s32 32, %v2190_v5 }
 0x14b   : > { %v1932_v43 = vclz %v6723_v40  ;;  %v2088_v3 = vshrl.u32 %v13423_v59, %v2087_v9  ;;  %v8407_v62 = vmul.u32.u64.low %v2120_v14, %v2119_v56  ;;  %v8408_v37 = vmul.u32.u64.high %v2120_v14, %v2119_v56, %v8407_v62 }
 0x14c   : > { %v1734_v23 = vshll.u32 %v8376_v29, 23  ;;  %v1832_v13 = vsub.s32 32, %v8358_v36  ;;  %v1833_v4 = vshll.u32 %v8270_v21, %v8358_v36  ;;  %v8415_v32 = vsub.s32 %v8344_v33, %v2031_v6 }
 0x14d   : > { %v2108_v8 = vsel %vm2104_vm2, %v2088_v3, %v2091_v17  ;;  %v2110_v40 = vsel %vm2106_vm4, %v2094_v38, %v2109_v61  ;;  %v2194_v9 = vshrl.u32 %v13424_v55, %v8404_v39  ;;  %v2197_v29 = vshrl.u32 %v13425_v45, %v8404_v39 }
 0x14e   : > { %v1838_v26 = vshll.u32 %v1837_v2, 23  ;;  %v2130_v46 = vadd.s32 1, %v8401_v58  ;;  %v2183_v21 = vand.u32 8388607, %v13264_v24  ;;  %v2200_v33 = vshrl.u32 %v13426_v34, %v8404_v39 }
 0x14f   : > { %v6724_v36 = vadd.s32 4294967294, %v1932_v43  ;;  %vm2129_vm6 = vc.u32 %v8408_v37, %v8400_v18  ;;  %v2193_v17 = vshll.u32 %v13423_v59, %v2190_v5  ;;  %v2196_v38 = vshll.u32 %v13424_v55, %v2190_v5 }
 0x150   : > { %v2034_v6 = vsub.s32 0, %v8415_v32  ;;  %v2111_v2 = vsel %vm2105_vm5, %v2108_v8, %v2110_v40  ;;  %v8437_v61 = vshrl.u32 %v2188_v22, 5  ;;  %v2199_v56 = vshll.u32 %v13425_v45, %v2190_v5 }
 0x151   : > { %v2195_v3 = vor.u32 %v2194_v9, %v2193_v17  ;;  %v2198_v62 = vor.u32 %v2197_v29, %v2196_v38  ;;  %v2202_v43 = vshll.u32 %v13426_v34, %v2190_v5  ;;  %v2203_v24 = vshrl.u32 %v13427_v19, %v8404_v39 }
 0x152   : > { %v2131_v48 = vsel %vm2129_vm6, %v2130_v46, %v8401_v58  ;;  %v2201_v31 = vor.u32 %v2200_v33, %v2199_v56  ;;  %v2205_v52 = vshll.u32 %v13427_v19, %v2190_v5  ;;  %v2206_v53 = vshrl.u32 %v13428_v41, %v8404_v39 }
 0x153   : > { %v1834_v22 = vshrl.u32 %v8354_v15, %v1832_v13  ;;  %v2127_v8 = vmul.u32 %v2120_v14, %v2111_v2  ;;  %v2184_v40 = vor.u32 8388608, %v2183_v21  ;;  %v2204_v49 = vor.u32 %v2203_v24, %v2202_v43 }
 0x154   : > { %v1839_v9 = vor.u32 4788187, %v1838_v26  ;;  %v6727_v29 = vmin.u32 %v2034_v6, %v8415_v32  ;;  %v2207_v17 = vor.u32 %v2206_v53, %v2205_v52  ;;  %vm2208_vm7 = vcmp.lt.s32.totalorder %v8437_v61, 1 }
 0x155   : > { %vm6725_vm8 = vcmp.lt.s32.totalorder %v6724_v36, 0  ;;  %v8450_v38 = vadd.s32 %v2131_v48, %v2127_v8  ;;  %vm2211_vm9 = vcmp.lt.s32.totalorder %v8437_v61, 4  ;;  %v2216_v5 = vsel %vm2208_vm7, %v2195_v3, %v2198_v62 }
 0x156   : > { %vm2210_vm10 = vcmp.lt.s32.totalorder %v8437_v61, 3  ;;  %v2217_v15 = vsel %vm2211_vm9, %v2204_v49, 920167782  ;;  %v2220_v14 = vsel %vm2208_vm7, %v2198_v62, %v2201_v31  ;;  %v2221_v52 = vsel %vm2211_vm9, %v2207_v17, 1326507024 }
 0x157   : > { %v1835_v24 = vor.u32 %v1834_v22, %v1833_v4  ;;  %vm2209_vm11 = vcmp.lt.s32.totalorder %v8437_v61, 2  ;;  %v2218_v48 = vsel %vm2210_vm10, %v2201_v31, %v2217_v15  ;;  %v8465_v58 = vshll.u32 %v2184_v40, 8 }
 0x158   : > { %v1935_v13 = vsel %vm6725_vm8, 0, %v6724_v36  ;;  %v2036_v26 = vclz %v6727_v29  ;;  %v2219_v46 = vsel %vm2209_vm11, %v2216_v5, %v2218_v48  ;;  %v2222_v21 = vsel %vm2210_vm10, %v2204_v49, %v2221_v52 }
 0x159   : > { %v1735_v33 = vor.u32 4788187, %v1734_v23  ;;  %v1840_v6 = vand.u32 2147483647, %v1839_v9  ;;  %v2133_v2 = vadd.s32 536870912, %v8450_v38  ;;  %v2223_v4 = vsel %vm2209_vm11, %v2220_v14, %v2222_v21 }
 0x15a   : > { %v8475_v56 = vmul.u32.u64.low %v8465_v58, %v2223_v4  ;;  %v8476_v43 = vmul.u32.u64.high %v8465_v58, %v2223_v4, %v8475_v56  ;;  %v8479_v36 = vmul.u32.u64.low %v8465_v58, %v2219_v46  ;;  %v8480_v53 = vmul.u32.u64.high %v8465_v58, %v2219_v46, %v8479_v36 }
 0x15b   : > { %v1636_v22 = vxor.u32 2147483648, %v8349_v28  ;;  %v1936_v8 = vsub.s32 32, %v1935_v13  ;;  %v1940_v49 = vsub.s32 4294967266, %v1935_v13  ;;  %v2213_v23 = vsel %vm2211_vm9, %v2201_v31, 2102212464 }
 0x15c   : > { %v1738_v40 = vcvt.s32.f32 %v8374_v51  ;;  %v1842_v9 = vcvt.s32.f32 %v1835_v24  ;;  %v6728_v29 = vadd.s32 4294967294, %v2036_v26  ;;  %v2192_v17 = vshrl.u32 %v13423_v59, %v8404_v39 }
 0x15d   : > { %v1736_v5 = vand.u32 2147483647, %v1735_v33  ;;  %v1920_v15 = vadd.s32 %v8238_v0, %v8243_v11  ;;  %v8491_v14 = vshrl.u32 %v2133_v2, 30  ;;  %v720_v52 = vand.u32 2147483647, %v8018_v16 }
 0x15e   : > { %v8494_v48 = vmul.f32 %v1842_v9, %v1840_v6  ;;  %v1937_v46 = vshll.u32 %v8342_v30, %v1935_v13  ;;  %v2212_v31 = vsel %vm2208_vm7, %v2192_v17, %v2195_v3  ;;  %v2214_v51 = vsel %vm2210_vm10, %v2198_v62, %v2213_v23 }
 0x15f   : > { %13457 = vst [vmem:[#allocation50_spill] sm:$0xff] %v8491_v14  ;;  %v1938_v24 = vshrl.u32 %v1920_v15, %v1936_v8  ;;  %v1941_v39 = vadd.s32 127, %v1940_v49  ;;  %v2234_v26 = vadd.s32 1, %v8480_v53  ;;  %v738_v11 = vshrl.u32 %v13424_v55, %v8246_v44 }
 0x160   : > { %vm6729_vm12 = vcmp.lt.s32.totalorder %v6728_v29, 0  ;;  %vm2233_vm13 = vc.u32 %v8476_v43, %v8479_v36  ;;  %v741_v0 = vshrl.u32 %v13425_v45, %v8246_v44  ;;  %v744_v30 = vshrl.u32 %v13426_v34, %v8246_v44 }
 0x161   : > { %v2135_v3 = vshll.u32 %v8491_v14, 30  ;;  %v2215_v62 = vsel %vm2209_vm11, %v2212_v31, %v2214_v51  ;;  %v727_v13 = vand.u32 8388607, %v720_v52  ;;  %v737_v21 = vshll.u32 %v13423_v59, %v8196_v1  ;;  %v13477_v14 = vld [vmem:[#allocation41_spill] sm:$0xff] }
 0x162   : > { %v740_v33 = vshll.u32 %v13424_v55, %v8196_v1  ;;  %v743_v6 = vshll.u32 %v13425_v45, %v8196_v1  ;;  %v746_v2 = vshll.u32 %v13426_v34, %v8196_v1  ;;  %v747_v4 = vshrl.u32 %v13427_v19, %v8246_v44 }
 0x163   : > { %v8525_v61 = vsel %vm6729_vm12, 0, %v6728_v29  ;;  %v2235_v56 = vsel %vm2233_vm13, %v2234_v26, %v8480_v53  ;;  %v739_v8 = vor.u32 %v738_v11, %v737_v21  ;;  %v750_v49 = vshrl.u32 %v13428_v41, %v8246_v44 }
 0x164   : > { %v742_v23 = vor.u32 %v741_v0, %v740_v33  ;;  %v745_v9 = vor.u32 %v744_v30, %v743_v6  ;;  %v748_v17 = vor.u32 %v747_v4, %v746_v2  ;;  %v749_v15 = vshll.u32 %v13427_v19, %v8196_v1 }
 0x165   : > { %vm1450_vm14 = vcmp.lt.s32.totalorder %v7800_v12, 0  ;;  %v8533_v31 = vmul.f32 %v1738_v40, %v1736_v5  ;;  %v1844_v51 = vxor.u32 2147483648, %v8494_v48  ;;  %v8537_v29 = vsub.s32 %v8450_v38, %v2135_v3 }
 0x166   : > { %v2231_v53 = vmul.u32 %v8465_v58, %v2215_v62  ;;  %vm1554_vm15 = vcmp.lt.s32.totalorder %v7811_v20, 0  ;;  %v8541_v26 = vor.u32 %v1938_v24, %v1937_v46  ;;  %v1942_v11 = vshll.u32 %v1941_v39, 23 }
 0x167   : > { %v728_v0 = vor.u32 8388608, %v727_v13  ;;  %v751_v30 = vor.u32 %v750_v49, %v749_v15  ;;  %v2044_v1 = vsub.s32 4294967266, %v8525_v61  ;;  %vm752_vm0 = vcmp.lt.s32.totalorder %v8194_v27, 1 }
 0x168   : > { %v8544_v21 = vadd.s32 %v2235_v56, %v2231_v53  ;;  %vm755_vm1 = vcmp.lt.s32.totalorder %v8194_v27, 4  ;;  %v760_v38 = vsel %vm752_vm0, %v739_v8, %v742_v23  ;;  %v2138_v58 = vsub.s32 0, %v8537_v29 }
 0x169   : > { %v757_v40 = vsel %vm755_vm1, %v745_v9, 2102212464  ;;  %v761_v5 = vsel %vm755_vm1, %v748_v17, 920167782  ;;  %v765_v3 = vsel %vm755_vm1, %v751_v30, 1326507024  ;;  %v736_v46 = vshrl.u32 %v13423_v59, %v8246_v44 }
 0x16a   : > { %vm754_vm2 = vcmp.lt.s32.totalorder %v8194_v27, 3  ;;  %v764_v24 = vsel %vm752_vm0, %v742_v23, %v745_v9  ;;  %vm753_vm3 = vcmp.lt.s32.totalorder %v8194_v27, 2  ;;  %v768_v13 = vshll.u32 %v728_v0, 8 }
 0x16b   : > { %v762_v39 = vsel %vm754_vm2, %v745_v9, %v761_v5  ;;  %v766_v62 = vsel %vm754_vm2, %v748_v17, %v765_v3  ;;  %v2045_v33 = vadd.s32 127, %v2044_v1  ;;  %v756_v6 = vsel %vm752_vm0, %v736_v46, %v739_v8 }
 0x16c   : > { %v758_v2 = vsel %vm754_vm2, %v742_v23, %v757_v40  ;;  %v763_v4 = vsel %vm753_vm3, %v760_v38, %v762_v39  ;;  %v2237_v56 = vadd.s32 536870912, %v8544_v21  ;;  %v767_v49 = vsel %vm753_vm3, %v764_v24, %v766_v62 }
 0x16d   : > { %v8558_v44 = vmul.u32.u64.low %v768_v13, %v763_v4  ;;  %v8559_v15 = vmul.u32.u64.high %v768_v13, %v763_v4, %v8558_v44  ;;  %v1943_v53 = vor.u32 4788187, %v1942_v11  ;;  %v6731_v9 = vmin.u32 %v2138_v58, %v8537_v29 }
 0x16e   : > { %v8563_v17 = vmul.u32.u64.low %v768_v13, %v767_v49  ;;  %v8564_v0 = vmul.u32.u64.high %v768_v13, %v767_v49, %v8563_v17  ;;  %v13458_v8 = vxor.u32 2147483648, %v8331_v54  ;;  %vm1762_vm4 = vcmp.lt.s32.totalorder %v7981_v42, 0 }
 0x16f   : > { %v2040_v30 = vsub.s32 32, %v8525_v61  ;;  %v759_v1 = vsel %vm753_vm3, %v756_v6, %v758_v2  ;;  %v8582_v11 = vsel %vm1554_vm15, %v1636_v22, %v8349_v28  ;;  %v2046_v38 = vshll.u32 %v2045_v33, 23 }
 0x170   : > { %v8571_v23 = vsel %vm1450_vm14, %v13458_v8, %v8331_v54  ;;  %v8588_v54 = vsel %vm1762_vm4, %v1844_v51, %v8494_v48  ;;  %v1946_v5 = vcvt.s32.f32 %v8541_v26  ;;  %v2024_v27 = vadd.s32 %v8309_v35, %v8314_v7 }
 0x171   : > { %v8593_v3 = vshrl.u32 %v2237_v56, 30  ;;  %v778_v58 = vadd.s32 1, %v8559_v15  ;;  %v1944_v46 = vand.u32 2147483647, %v1943_v53  ;;  %v2140_v28 = vclz %v6731_v9 }
 0x172   : > { %v775_v22 = vmul.u32 %v768_v13, %v759_v1  ;;  %vm777_vm5 = vc.u32 %v8564_v0, %v8558_v44  ;;  %v2041_v48 = vshll.u32 %v8415_v32, %v8525_v61  ;;  %v2042_v51 = vshrl.u32 %v2024_v27, %v2040_v30 }
 0x173   : > { %v779_v24 = vsel %vm777_vm5, %v778_v58, %v8559_v15  ;;  %v1136_v26 = vand.u32 2147483647, %v7793_v10  ;;  %v2047_v39 = vor.u32 4788187, %v2046_v38  ;;  %v1154_v35 = vshrl.u32 %v13424_v55, %v8102_v47 }
 0x174   : > { %v780_v7 = vadd.s32 %v779_v24, %v775_v22  ;;  %v1157_v62 = vshrl.u32 %v13425_v45, %v8102_v47  ;;  %v2239_v13 = vshll.u32 %v8593_v3, 30  ;;  %v1160_v33 = vshrl.u32 %v13426_v34, %v8102_v47 }
 0x175   : > { %v1162_v32 = vshll.u32 %v13426_v34, %v8052_v57  ;;  %v1163_v61 = vshrl.u32 %v13427_v19, %v8102_v47  ;;  %v6732_v6 = vadd.s32 4294967294, %v2140_v28  ;;  %v1153_v4 = vshll.u32 %v13423_v59, %v8052_v57 }
 0x176   : > { %v781_v2 = vadd.s32 536870912, %v780_v7  ;;  %v1156_v56 = vshll.u32 %v13424_v55, %v8052_v57  ;;  %v1143_v49 = vand.u32 8388607, %v1136_v26  ;;  %v1159_v15 = vshll.u32 %v13425_v45, %v8052_v57 }
 0x177   : > { %v1164_v53 = vor.u32 %v1163_v61, %v1162_v32  ;;  %v1166_v9 = vshrl.u32 %v13428_v41, %v8102_v47  ;;  %v2043_v17 = vor.u32 %v2042_v51, %v2041_v48  ;;  %v1155_v30 = vor.u32 %v1154_v35, %v1153_v4  ;;  %v13459_v32 = vld [vmem:[#allocation28_spill] sm:$0xff] }
 0x178   : > { %v782_v8 = vshrl.u32 %v781_v2, 30  ;;  %v1158_v1 = vor.u32 %v1157_v62, %v1156_v56  ;;  %v8623_v38 = vmul.f32 %v1946_v5, %v1944_v46  ;;  %v8626_v27 = vsub.s32 %v8544_v21, %v2239_v13 }
 0x179   : > { %v1161_v58 = vor.u32 %v1160_v33, %v1159_v15  ;;  %v1165_v28 = vshll.u32 %v13427_v19, %v8052_v57  ;;  %v2048_v22 = vand.u32 2147483647, %v2047_v39  ;;  %vm6733_vm6 = vcmp.lt.s32.totalorder %v6732_v6, 0 }
 0x17a   : > { %v783_v24 = vshll.u32 %v782_v8, 30  ;;  %vm1171_vm7 = vcmp.lt.s32.totalorder %v13459_v32, 4  ;;  %v1144_v61 = vor.u32 8388608, %v1143_v49  ;;  %vm1168_vm8 = vcmp.lt.s32.totalorder %v13459_v32, 1 }
 0x17b   : > { %v1167_v40 = vor.u32 %v1166_v9, %v1165_v28  ;;  %v1177_v5 = vsel %vm1171_vm7, %v1164_v53, 920167782  ;;  %v2050_v46 = vcvt.s32.f32 %v2043_v17  ;;  %vm1170_vm9 = vcmp.lt.s32.totalorder %v13459_v32, 3 }
 0x17c   : > { %v8634_v48 = vsub.s32 %v780_v7, %v783_v24  ;;  %v1176_v57 = vsel %vm1168_vm8, %v1155_v30, %v1158_v1  ;;  %v8639_v21 = vsel %vm6733_vm6, 0, %v6732_v6  ;;  %v2242_v51 = vsub.s32 0, %v8626_v27 }
 0x17d   : > { %v1152_v39 = vshrl.u32 %v13423_v59, %v8102_v47  ;;  %v1178_v35 = vsel %vm1170_vm9, %v1161_v58, %v1177_v5  ;;  %vm1169_vm10 = vcmp.lt.s32.totalorder %v13459_v32, 2  ;;  %v1173_v7 = vsel %vm1171_vm7, %v1161_v58, 2102212464 }
 0x17e   : > { %v786_v62 = vsub.s32 0, %v8634_v48  ;;  %v1180_v13 = vsel %vm1168_vm8, %v1158_v1, %v1161_v58  ;;  %v8652_v33 = vmul.f32 %v2050_v46, %v2048_v22  ;;  %v1179_v6 = vsel %vm1169_vm10, %v1176_v57, %v1178_v35  ;;  %v13460_v35 = vld [vmem:[#allocation26_spill] sm:$0xff] }
 0x17f   : > { %v1181_v47 = vsel %vm1171_vm7, %v1167_v40, 1326507024  ;;  %v1184_v2 = vshll.u32 %v1144_v61, 8  ;;  %v2144_v4 = vsub.s32 32, %v8639_v21  ;;  %v1172_v49 = vsel %vm1168_vm8, %v1152_v39, %v1155_v30 }
 0x180   : > { %v6679_v56 = vmin.u32 %v786_v62, %v8634_v48  ;;  %v1182_v15 = vsel %vm1170_vm9, %v1164_v53, %v1181_v47  ;;  %v1174_v9 = vsel %vm1170_vm9, %v1158_v1, %v1173_v7  ;;  %v2148_v22 = vsub.s32 4294967266, %v8639_v21 }
 0x181   : > { %v1183_v17 = vsel %vm1169_vm10, %v1180_v13, %v1182_v15  ;;  %v8668_v58 = vmul.u32.u64.low %v1184_v2, %v1179_v6  ;;  %v8669_v28 = vmul.u32.u64.high %v1184_v2, %v1179_v6, %v8668_v58  ;;  %v6735_v24 = vmin.u32 %v2242_v51, %v8626_v27  ;;  %v13465_v6 = vld [vmem:[#allocation22_spill] sm:$0xff] }
 0x182   : > { %v788_v30 = vclz %v6679_v56  ;;  %v2128_v53 = vadd.s32 %v8400_v18, %v8408_v37  ;;  %v806_v61 = vsub.s32 4, %v782_v8  ;;  %v1175_v39 = vsel %vm1169_vm10, %v1172_v49, %v1174_v9 }
 0x183   : > { %v8677_v5 = vmul.u32.u64.low %v1184_v2, %v1183_v17  ;;  %v8678_v1 = vmul.u32.u64.high %v1184_v2, %v1183_v17, %v8677_v5  ;;  %v13272_v62 = vand.u32 2147483647, %v13460_v35  ;;  %v2145_v7 = vshll.u32 %v8537_v29, %v8639_v21 }
 0x184   : > { %v6680_v57 = vadd.s32 4294967294, %v788_v30  ;;  %v8686_v51 = vshrl.u32 %v2128_v53, %v2144_v4  ;;  %vm722_vm11 = vcmp.lt.s32.totalorder %v8018_v16, 0  ;;  %v1194_v18 = vadd.s32 1, %v8669_v28 }
 0x185   : > { %v8690_v37 = vadd.s32 127, %v2148_v22  ;;  %v2244_v13 = vclz %v6735_v24  ;;  %vm8694_vm12 = vcmp.le.f32.partialorder %v720_v52, 0.7853982  ;;  %v776_v32 = vadd.s32 %v8558_v44, %v8564_v0 }
 0x186   : > { %vm6681_vm13 = vcmp.lt.s32.totalorder %v6680_v57, 0  ;;  %v807_v4 = vsel %vm722_vm11, %v806_v61, %v782_v8  ;;  %v1191_v56 = vmul.u32 %v1184_v2, %v1175_v39  ;;  %vm1193_vm0 = vc.u32 %v8678_v1, %v8668_v58 }
 0x187   : > { %v791_v47 = vsel %vm6681_vm13, 0, %v6680_v57  ;;  %v1195_v9 = vsel %vm1193_vm0, %v1194_v18, %v8669_v28  ;;  %v935_v52 = vand.u32 8388607, %v13272_v62  ;;  %v945_v44 = vshll.u32 %v13423_v59, %v8320_v25 }
 0x188   : > { %v792_v49 = vsub.s32 32, %v791_v47  ;;  %v796_v15 = vsub.s32 4294967266, %v791_v47  ;;  %v1196_v17 = vadd.s32 %v1195_v9, %v1191_v56  ;;  %v946_v0 = vshrl.u32 %v13424_v55, %v8339_v50 }
 0x189   : > { %v949_v8 = vshrl.u32 %v13425_v45, %v8339_v50  ;;  %v793_v2 = vshll.u32 %v8634_v48, %v791_v47  ;;  %v952_v28 = vshrl.u32 %v13426_v34, %v8339_v50  ;;  %v954_v53 = vshll.u32 %v13426_v34, %v8320_v25 }
 0x18a   : > { %v794_v22 = vshrl.u32 %v776_v32, %v792_v49  ;;  %v797_v24 = vadd.s32 127, %v796_v15  ;;  %v1197_v30 = vadd.s32 536870912, %v1196_v17  ;;  %v955_v61 = vshrl.u32 %v13427_v19, %v8339_v50 }
 0x18b   : > { %v958_v5 = vshrl.u32 %v13428_v41, %v8339_v50  ;;  %v948_v48 = vshll.u32 %v13424_v55, %v8320_v25  ;;  %v951_v18 = vshll.u32 %v13425_v45, %v8320_v25  ;;  %v6736_v32 = vadd.s32 4294967294, %v2244_v13 }
 0x18c   : > { %v795_v57 = vor.u32 %v794_v22, %v793_v2  ;;  %v798_v39 = vshll.u32 %v797_v24, 23  ;;  %vm1138_vm1 = vcmp.lt.s32.totalorder %v7793_v10, 0  ;;  %v1198_v47 = vshrl.u32 %v1197_v30, 30 }
 0x18d   : > { %v956_v56 = vor.u32 %v955_v61, %v954_v53  ;;  %v957_v49 = vshll.u32 %v13427_v19, %v8320_v25  ;;  %v947_v9 = vor.u32 %v946_v0, %v945_v44  ;;  %v950_v40 = vor.u32 %v949_v8, %v948_v48 }
 0x18e   : > { %v799_v15 = vor.u32 4788187, %v798_v39  ;;  %v953_v46 = vor.u32 %v952_v28, %v951_v18  ;;  %v809_v2 = vsel %vm8694_vm12, 0, %v807_v4  ;;  %v1199_v22 = vshll.u32 %v1198_v47, 30 }
 0x18f   : > { %v959_v24 = vor.u32 %v958_v5, %v957_v49  ;;  %vm963_vm2 = vcmp.lt.s32.totalorder %v8329_v63, 4  ;;  %v802_v13 = vcvt.s32.f32 %v795_v57  ;;  %vm8734_vm3 = vcmp.le.f32.partialorder %v1136_v26, 0.7853982 }
 0x190   : > { %v800_v62 = vand.u32 2147483647, %v799_v15  ;;  %v936_v25 = vor.u32 8388608, %v935_v52  ;;  %v969_v44 = vsel %vm963_vm2, %v956_v56, 920167782  ;;  %v8740_v0 = vsub.s32 %v1196_v17, %v1199_v22 }
 0x191   : > { %v1222_v8 = vsub.s32 4, %v1198_v47  ;;  %vm960_vm5 = vcmp.lt.s32.totalorder %v8329_v63, 1  ;;  %vm962_vm6 = vcmp.lt.s32.totalorder %v8329_v63, 3  ;;  %v813_v53 = vadd.s32 3, %v809_v2 }
 0x192   : > { %v803_v4 = vmul.f32 %v802_v13, %v800_v62  ;;  %v968_v28 = vsel %vm960_vm5, %v947_v9, %v950_v40  ;;  %v970_v26 = vsel %vm962_vm6, %v953_v46, %v969_v44  ;;  %v972_v52 = vsel %vm960_vm5, %v950_v40, %v953_v46 }
 0x193   : > { %v1202_v61 = vsub.s32 0, %v8740_v0  ;;  %vm961_vm7 = vcmp.lt.s32.totalorder %v8329_v63, 2  ;;  %v973_v17 = vsel %vm963_vm2, %v959_v24, 1326507024  ;;  %v965_v62 = vsel %vm963_vm2, %v953_v46, 2102212464 }
 0x194   : > { %v804_v5 = vxor.u32 2147483648, %v803_v4  ;;  %v974_v57 = vsel %vm962_vm6, %v956_v56, %v973_v17  ;;  %v976_v39 = vshll.u32 %v936_v25, 8  ;;  %v944_v18 = vshrl.u32 %v13423_v59, %v8339_v50 }
 0x195   : > { %v6695_v48 = vmin.u32 %v1202_v61, %v8740_v0  ;;  %v971_v49 = vsel %vm961_vm7, %v968_v28, %v970_v26  ;;  %v975_v15 = vsel %vm961_vm7, %v972_v52, %v974_v57  ;;  %v1223_v46 = vsel %vm1138_vm1, %v1222_v8, %v1198_v47 }
 0x196   : > { %v805_v2 = vsel %vm722_vm11, %v804_v5, %v803_v4  ;;  %v8769_v22 = vmul.u32.u64.low %v976_v39, %v975_v15  ;;  %v8770_v56 = vmul.u32.u64.high %v976_v39, %v975_v15, %v8769_v22  ;;  %v964_v13 = vsel %vm960_vm5, %v944_v18, %v947_v9 }
 0x197   : > { %v808_v24 = vsel %vm8694_vm12, %v8018_v16, %v805_v2  ;;  %v1204_v50 = vclz %v6695_v48  ;;  %v966_v25 = vsel %vm962_vm6, %v950_v40, %v965_v62  ;;  %vm6737_vm8 = vcmp.lt.s32.totalorder %v6736_v32, 0  ;;  %v13466_v62 = vld [vmem:[#allocation36_spill] sm:$0xff] }
 0x198   : > { %7221 = vcosq.f32 %v808_v24  ;;  %v8779_v44 = vmul.u32.u64.low %v976_v39, %v971_v49  ;;  %v8780_v4 = vmul.u32.u64.high %v976_v39, %v971_v49, %v8779_v44  ;;  %v1225_v8 = vsel %vm8734_vm3, 0, %v1223_v46  ;;  %v13467_v49 = vld [vmem:[#allocation34_spill] sm:$0xff] }
 0x199   : > { %7223 = vsinq.f32 %v808_v24  ;;  %v6696_v47 = vadd.s32 4294967294, %v1204_v50  ;;  %v1344_v28 = vand.u32 2147483647, %v13465_v6  ;;  %v8790_v9 = vor.u32 %v8686_v51, %v2145_v7 }
 0x19a   : > { %v2150_v40 = vshll.u32 %v8690_v37, 23  ;;  %v8795_v26 = vadd.s32 %v8479_v36, %v8476_v43  ;;  %v967_v52 = vsel %vm961_vm7, %v964_v13, %v966_v25  ;;  %v8799_v61 = vsel %vm6737_vm8, 0, %v6736_v32 }
 0x19b   : > { %v8801_v17 = vand.u32 3, %v813_v53  ;;  %vm6697_vm9 = vcmp.lt.s32.totalorder %v6696_v47, 0  ;;  %vm985_vm10 = vc.u32 %v8770_v56, %v8779_v44  ;;  %v1192_v29 = vadd.s32 %v8668_v58, %v8678_v1 }
 0x19c   : > { %v1207_v21 = vsel %vm6697_vm9, 0, %v6696_v47  ;;  %v8807_v7 = vadd.s32 3, %v1225_v8  ;;  %v986_v43 = vadd.s32 1, %v8780_v4  ;;  %v983_v63 = vmul.u32 %v976_v39, %v967_v52 }
 0x19d   : > { %v1208_v36 = vsub.s32 32, %v1207_v21  ;;  %v1212_v51 = vsub.s32 4294967266, %v1207_v21  ;;  %v1351_v32 = vand.u32 8388607, %v1344_v28  ;;  %v1209_v53 = vshll.u32 %v8740_v0, %v1207_v21 }
 0x19e   : > { %v987_v5 = vsel %vm985_vm10, %v986_v43, %v8780_v4  ;;  %v1362_v57 = vshrl.u32 %v13424_v55, %v13466_v62  ;;  %v1365_v58 = vshrl.u32 %v13425_v45, %v13466_v62  ;;  %vm819_vm11 = vcmp.eq.s32.totalorder %v8801_v17, 2 }
 0x19f   : > { %v1210_v1 = vshrl.u32 %v1192_v29, %v1208_v36  ;;  %v1213_v48 = vadd.s32 127, %v1212_v51  ;;  %v988_v18 = vadd.s32 %v987_v5, %v983_v63  ;;  %v1371_v39 = vshrl.u32 %v13427_v19, %v13466_v62 }
 0x1a0   : > { %v1361_v15 = vshll.u32 %v13423_v59, %v13467_v49  ;;  %v1364_v0 = vshll.u32 %v13424_v55, %v13467_v49  ;;  %v1368_v2 = vshrl.u32 %v13426_v34, %v13466_v62  ;;  %v1370_v46 = vshll.u32 %v13426_v34, %v13467_v49 }
 0x1a1   : > { %vm816_vm12 = vcmp.eq.s32.totalorder %v8801_v17, 0  ;;  %v1211_v22 = vor.u32 %v1210_v1, %v1209_v53  ;;  %v1214_v24 = vshll.u32 %v1213_v48, 23  ;;  %v989_v50 = vadd.s32 536870912, %v988_v18 }
 0x1a2   : > { %v1367_v13 = vshll.u32 %v13425_v45, %v13467_v49  ;;  %v7222_v25 = vpop.eup %7221  ;;  %v1363_v4 = vor.u32 %v1362_v57, %v1361_v15  ;;  %v1366_v47 = vor.u32 %v1365_v58, %v1364_v0  ;;  %v1372_v8 = vor.u32 %v1371_v39, %v1370_v46  ;;  %v13468_v57 = vld [vmem:[#allocation33_spill] sm:$0xff] }
 0x1a3   : > { %v1374_v52 = vshrl.u32 %v13428_v41, %v13466_v62  ;;  %v7224_v29 = vpop.eup %7223  ;;  %v1215_v21 = vor.u32 4788187, %v1214_v24  ;;  %v990_v43 = vshrl.u32 %v989_v50, 30  ;;  %v1352_v36 = vor.u32 8388608, %v1351_v32 }
 0x1a4   : > { %v1360_v51 = vshrl.u32 %v13423_v59, %v13466_v62  ;;  %vm815_vm13 = vcmp.lt.s32.totalorder %v8801_v17, 2  ;;  %v820_v63 = vxor.u32 2147483648, %v7222_v25  ;;  %v1369_v53 = vor.u32 %v1368_v2, %v1367_v13 }
 0x1a5   : > { %v1373_v5 = vshll.u32 %v13427_v19, %v13467_v49  ;;  %vm1376_vm0 = vcmp.lt.s32.totalorder %v13468_v57, 1  ;;  %v1216_v58 = vand.u32 2147483647, %v1215_v21  ;;  %v1218_v1 = vcvt.s32.f32 %v1211_v22 }
 0x1a6   : > { %vm930_vm2 = vcmp.lt.s32.totalorder %v13460_v35, 0  ;;  %v991_v48 = vshll.u32 %v990_v43, 30  ;;  %vm1379_vm5 = vcmp.lt.s32.totalorder %v13468_v57, 4  ;;  %v817_v32 = vxor.u32 2147483648, %v7224_v29 }
 0x1a7   : > { %v1375_v39 = vor.u32 %v1374_v52, %v1373_v5  ;;  %v1384_v62 = vsel %vm1376_vm0, %v1363_v4, %v1366_v47  ;;  %v1385_v15 = vsel %vm1379_vm5, %v1372_v8, 920167782  ;;  %v1219_v0 = vmul.f32 %v1218_v1, %v1216_v58 }
 0x1a8   : > { %v8846_v2 = vsub.s32 %v988_v18, %v991_v48  ;;  %vm1377_vm6 = vcmp.lt.s32.totalorder %v13468_v57, 2  ;;  %vm1378_vm7 = vcmp.lt.s32.totalorder %v13468_v57, 3  ;;  %vm812_vm8 = vweird.f32 %v8018_v16 }
 0x1a9   : > { %v821_v49 = vsel %vm819_vm11, %v820_v63, %v7224_v29  ;;  %v1380_v46 = vsel %vm1376_vm0, %v1360_v51, %v1363_v4  ;;  %v1381_v22 = vsel %vm1379_vm5, %v1369_v53, 2102212464  ;;  %v1386_v24 = vsel %vm1378_vm7, %v1369_v53, %v1385_v15 }
 0x1aa   : > { %v1220_v18 = vxor.u32 2147483648, %v1219_v0  ;;  %v994_v50 = vsub.s32 0, %v8846_v2  ;;  %v1387_v13 = vsel %vm1377_vm6, %v1384_v62, %v1386_v24  ;;  %v1388_v52 = vsel %vm1376_vm0, %v1366_v47, %v1369_v53 }
 0x1ab   : > { %v818_v29 = vsel %vm816_vm12, %v7222_v25, %v817_v32  ;;  %v1014_v21 = vsub.s32 4, %v990_v43  ;;  %v1389_v4 = vsel %vm1379_vm5, %v1375_v39, 1326507024  ;;  %v1392_v51 = vshll.u32 %v1352_v36, 8 }
 0x1ac   : > { %v1221_v63 = vsel %vm1138_vm1, %v1220_v18, %v1219_v0  ;;  %v6687_v5 = vmin.u32 %v994_v50, %v8846_v2  ;;  %v1382_v58 = vsel %vm1378_vm7, %v1366_v47, %v1381_v22  ;;  %v1390_v1 = vsel %vm1378_vm7, %v1372_v8, %v1389_v4  ;;  %v13472_v18 = vld [vmem:[#allocation20_spill] sm:$0xff] }
 0x1ad   : > { %v1224_v25 = vsel %vm8734_vm3, %v7793_v10, %v1221_v63  ;;  %v1391_v53 = vsel %vm1377_vm6, %v1388_v52, %v1390_v1  ;;  %v8880_v48 = vmul.u32.u64.low %v1392_v51, %v1387_v13  ;;  %v8881_v36 = vmul.u32.u64.high %v1392_v51, %v1387_v13, %v8880_v48  ;;  %v13473_v52 = vld [vmem:[#allocation42_spill] sm:$0xff] }
 0x1ae   : > { %v822_v32 = vsel %vm815_vm13, %v818_v29, %v821_v49  ;;  %7225 = vcosq.f32 %v1224_v25  ;;  %v8887_v47 = vand.u32 3, %v8807_v7  ;;  %v996_v39 = vclz %v6687_v5  ;;  %v13474_v5 = vld [vmem:[#allocation40_spill] sm:$0xff] }
 0x1af   : > { %7227 = vsinq.f32 %v1224_v25  ;;  %v1015_v30 = vsel %vm930_vm2, %v1014_v21, %v990_v43  ;;  %v8891_v8 = vmul.u32.u64.low %v1392_v51, %v1391_v53  ;;  %v8892_v62 = vmul.u32.u64.high %v1392_v51, %v1391_v53, %v8891_v8 }
 0x1b0   : > { %v8896_v15 = vor.u32 4788187, %v2150_v40  ;;  %v6688_v17 = vadd.s32 4294967294, %v996_v39  ;;  %v1383_v49 = vsel %vm1377_vm6, %v1380_v46, %v1382_v58  ;;  %v13469_v22 = vand.u32 2147483647, %v13460_v35 }
 0x1b1   : > { %v1402_v43 = vadd.s32 1, %v8881_v36  ;;  %v13273_v37 = vand.u32 2147483647, %v13472_v18  ;;  %v8912_v40 = vsel %vm812_vm8, nan, %v822_v32  ;;  %vm1235_vm3 = vcmp.eq.s32.totalorder %v8887_v47, 2 }
 0x1b2   : > { %vm8904_vm1 = vcmp.le.f32.partialorder %v13469_v22, 0.7853982  ;;  %v984_v57 = vadd.s32 %v8779_v44, %v8770_v56  ;;  %vm6689_vm9 = vcmp.lt.s32.totalorder %v6688_v17, 0  ;;  %vm1232_vm10 = vcmp.eq.s32.totalorder %v8887_v47, 0 }
 0x1b3   : > { %v1017_v46 = vsel %vm8904_vm1, 0, %v1015_v30  ;;  %v999_v50 = vsel %vm6689_vm9, 0, %v6688_v17  ;;  %v1399_v13 = vmul.u32 %v1392_v51, %v1383_v49  ;;  %vm1401_vm11 = vc.u32 %v8892_v62, %v8880_v48 }
 0x1b4   : > { %v634_v16 = vshrl.u32 %v13424_v55, %v13473_v52  ;;  %vm1231_vm12 = vcmp.lt.s32.totalorder %v8887_v47, 2  ;;  %v1000_v29 = vsub.s32 32, %v999_v50  ;;  %v1004_v21 = vsub.s32 4294967266, %v999_v50 }
 0x1b5   : > { %v1403_v56 = vsel %vm1401_vm11, %v1402_v43, %v8881_v36  ;;  %v637_v44 = vshrl.u32 %v13425_v45, %v13473_v52  ;;  %vm1228_vm13 = vweird.f32 %v7793_v10  ;;  %v8929_v4 = vadd.s32 3, %v1017_v46 }
 0x1b6   : > { %v1404_v51 = vadd.s32 %v1403_v56, %v1399_v13  ;;  %v8933_v63 = vand.u32 8388607, %v13273_v37  ;;  %v633_v58 = vshll.u32 %v13423_v59, %v13474_v5  ;;  %v1001_v1 = vshll.u32 %v8846_v2, %v999_v50 }
 0x1b7   : > { %v1002_v25 = vshrl.u32 %v984_v57, %v1000_v29  ;;  %v1005_v53 = vadd.s32 127, %v1004_v21  ;;  %vm1346_vm0 = vcmp.lt.s32.totalorder %v13465_v6, 0  ;;  %v636_v36 = vshll.u32 %v13424_v55, %v13474_v5 }
 0x1b8   : > { %v1405_v32 = vadd.s32 536870912, %v1404_v51  ;;  %v632_v39 = vshrl.u32 %v13423_v59, %v13473_v52  ;;  %v635_v30 = vor.u32 %v634_v16, %v633_v58  ;;  %v640_v8 = vshrl.u32 %v13426_v34, %v13473_v52  ;;  %v7226_v17 = vpop.eup %7225 }
 0x1b9   : > { %v1003_v49 = vor.u32 %v1002_v25, %v1001_v1  ;;  %v1006_v22 = vshll.u32 %v1005_v53, 23  ;;  %v638_v43 = vor.u32 %v637_v44, %v636_v36  ;;  %v643_v2 = vshrl.u32 %v13427_v19, %v13473_v52  ;;  %v7228_v57 = vpop.eup %7227 }
 0x1ba   : > { %v1236_v46 = vxor.u32 2147483648, %v7226_v17  ;;  %v1406_v50 = vshrl.u32 %v1405_v32, 30  ;;  %v639_v13 = vshll.u32 %v13425_v45, %v13474_v5  ;;  %v646_v29 = vshrl.u32 %v13428_v41, %v13473_v52 }
 0x1bb   : > { %v1233_v16 = vxor.u32 2147483648, %v7228_v57  ;;  %v1007_v21 = vor.u32 4788187, %v1006_v22  ;;  %v642_v56 = vshll.u32 %v13426_v34, %v13474_v5  ;;  %v645_v44 = vshll.u32 %v13427_v19, %v13474_v5 }
 0x1bc   : > { %v1237_v58 = vsel %vm1235_vm3, %v1236_v46, %v7228_v57  ;;  %vm8959_vm5 = vcmp.le.f32.partialorder %v1344_v28, 0.7853982  ;;  %v1407_v25 = vshll.u32 %v1406_v50, 30  ;;  %v1430_v53 = vsub.s32 4, %v1406_v50 }
 0x1bd   : > { %v641_v52 = vor.u32 %v640_v8, %v639_v13  ;;  %v1234_v36 = vsel %vm1232_vm10, %v7226_v17, %v1233_v16  ;;  %v1008_v32 = vand.u32 2147483647, %v1007_v21  ;;  %v1010_v22 = vcvt.s32.f32 %v1003_v49 }
 0x1be   : > { %v644_v37 = vor.u32 %v643_v2, %v642_v56  ;;  %v1238_v5 = vsel %vm1231_vm12, %v1234_v36, %v1237_v58  ;;  %v8967_v0 = vsub.s32 %v1404_v51, %v1407_v25  ;;  %v624_v57 = vor.u32 8388608, %v8933_v63 }
 0x1bf   : > { %v647_v28 = vor.u32 %v646_v29, %v645_v44  ;;  %v1239_v46 = vsel %vm1228_vm13, nan, %v1238_v5  ;;  %v1011_v7 = vmul.f32 %v1010_v22, %v1008_v32  ;;  %vm648_vm6 = vcmp.lt.s32.totalorder %v13477_v14, 1 }
 0x1c0   : > { %vm650_vm7 = vcmp.lt.s32.totalorder %v13477_v14, 3  ;;  %v6898_v8 = vpack.c.bf16 %v1239_v46, %v8912_v40  ;;  %v1410_v17 = vsub.s32 0, %v8967_v0  ;;  %v1431_v47 = vsel %vm1346_vm0, %v1430_v53, %v1406_v50 }
 0x1c1   : > { %vm651_vm8 = vcmp.lt.s32.totalorder %v13477_v14, 4  ;;  %v1012_v51 = vxor.u32 2147483648, %v1011_v7  ;;  %v656_v10 = vsel %vm648_vm6, %v635_v30, %v638_v43  ;;  %v660_v40 = vsel %vm648_vm6, %v638_v43, %v641_v52 }
 0x1c2   : > { %v653_v63 = vsel %vm651_vm8, %v641_v52, 2102212464  ;;  %v657_v49 = vsel %vm651_vm8, %v644_v37, 920167782  ;;  %6899 = vmatprep.subr.bf16.mxu0 %v6898_v8  ;;  %v6703_v2 = vmin.u32 %v1410_v17, %v8967_v0  ;;  %v661_v29 = vsel %vm651_vm8, %v647_v28, 1326507024 }
 0x1c3   : > { %v658_v13 = vsel %vm650_vm7, %v641_v52, %v657_v49  ;;  %v1013_v50 = vsel %vm930_vm2, %v1012_v51, %v1011_v7  ;;  %vm649_vm3 = vcmp.lt.s32.totalorder %v13477_v14, 2  ;;  %v652_v16 = vsel %vm648_vm6, %v632_v39, %v635_v30  ;;  %v13480_v49 = vld [vmem:[#allocation16_spill] sm:$0xff]  ;;  %v13483_v14 = vld [vmem:[#allocation25_spill] sm:$0xff] }
 0x1c4   : > { %v662_v21 = vsel %vm650_vm7, %v644_v37, %v661_v29  ;;  %v1016_v56 = vsel %vm8904_vm1, %v13460_v35, %v1013_v50  ;;  %v1412_v44 = vclz %v6703_v2  ;;  %v659_v58 = vsel %vm649_vm3, %v656_v10, %v658_v13 }
 0x1c5   : > { %v664_v25 = vshll.u32 %v624_v57, 8  ;;  %7229 = vcosq.f32 %v1016_v56  ;;  %v1433_v7 = vsel %vm8959_vm5, 0, %v1431_v47  ;;  %v654_v53 = vsel %vm650_vm7, %v638_v43, %v653_v63 }
 0x1c6   : > { %v663_v39 = vsel %vm649_vm3, %v660_v40, %v662_v21  ;;  %7231 = vsinq.f32 %v1016_v56  ;;  %v6704_v37 = vadd.s32 4294967294, %v1412_v44  ;;  %v13478_v36 = vsub.s32 4294967266, %v8799_v61  ;;  %v13482_v56 = vld [vmem:[#allocation27_spill] sm:$0xff] }
 0x1c7   : > { %v9004_v30 = vmul.u32.u64.low %v664_v25, %v663_v39  ;;  %v9005_v24 = vmul.u32.u64.high %v664_v25, %v663_v39, %v9004_v30  ;;  %v9012_v22 = vmul.u32.u64.low %v664_v25, %v659_v58  ;;  %v9013_v5 = vmul.u32.u64.high %v664_v25, %v659_v58, %v9012_v22 }
 0x1c8   : > { %v9010_v32 = vadd.s32 127, %v13478_v36  ;;  %v9018_v57 = vand.u32 3, %v8929_v4  ;;  %vm6705_vm2 = vcmp.lt.s32.totalorder %v6704_v37, 0  ;;  %v655_v28 = vsel %vm649_vm3, %v652_v16, %v654_v53  ;;  %v13481_v16 = vld [vmem:[#allocation32_spill] sm:$0xff] }
 0x1c9   : > { %v2249_v46 = vshll.u32 %v8626_v27, %v8799_v61  ;;  %v13479_v8 = vsub.s32 32, %v8799_v61  ;;  %v1415_v47 = vsel %vm6705_vm2, 0, %v6704_v37  ;;  %v1437_v51 = vadd.s32 3, %v1433_v7 }
 0x1ca   : > { %v1400_v63 = vadd.s32 %v8880_v48, %v8892_v62  ;;  %v1416_v10 = vsub.s32 32, %v1415_v47  ;;  %v1420_v4 = vsub.s32 4294967266, %v1415_v47  ;;  %v13276_v2 = vand.u32 2147483647, %v13480_v49 }
 0x1cb   : > { %v9027_v17 = vshrl.u32 %v8795_v26, %v13479_v8  ;;  %v671_v13 = vmul.u32 %v664_v25, %v655_v28  ;;  %vm673_vm1 = vc.u32 %v9005_v24, %v9012_v22  ;;  %v674_v40 = vadd.s32 1, %v9013_v5 }
 0x1cc   : > { %vm1027_vm9 = vcmp.eq.s32.totalorder %v9018_v57, 2  ;;  %v1417_v26 = vshll.u32 %v8967_v0, %v1415_v47  ;;  %v1418_v29 = vshrl.u32 %v1400_v63, %v1416_v10  ;;  %v1421_v50 = vadd.s32 127, %v1420_v4 }
 0x1cd   : > { %v1050_v48 = vshrl.u32 %v13424_v55, %v13481_v16  ;;  %v9040_v62 = vand.u32 3, %v1437_v51  ;;  %v675_v21 = vsel %vm673_vm1, %v674_v40, %v9013_v5  ;;  %v1049_v44 = vshll.u32 %v13423_v59, %v13482_v56 }
 0x1ce   : > { %v1053_v58 = vshrl.u32 %v13425_v45, %v13481_v16  ;;  %vm1024_vm10 = vcmp.eq.s32.totalorder %v9018_v57, 0  ;;  %v1419_v25 = vor.u32 %v1418_v29, %v1417_v26  ;;  %v1422_v7 = vshll.u32 %v1421_v50, 23 }
 0x1cf   : > { %v676_v0 = vadd.s32 %v675_v21, %v671_v13  ;;  %v1039_v53 = vand.u32 8388607, %v13276_v2  ;;  %v7230_v39 = vpop.eup %7229  ;;  %v1052_v37 = vshll.u32 %v13424_v55, %v13482_v56  ;;  %v1056_v30 = vshrl.u32 %v13426_v34, %v13481_v16 }
 0x1d0   : > { %v1058_v36 = vshll.u32 %v13426_v34, %v13482_v56  ;;  %v1059_v5 = vshrl.u32 %v13427_v19, %v13481_v16  ;;  %v7232_v28 = vpop.eup %7231  ;;  %v1423_v8 = vor.u32 4788187, %v1422_v7  ;;  %v1051_v51 = vor.u32 %v1050_v48, %v1049_v44 }
 0x1d1   : > { %v677_v47 = vadd.s32 536870912, %v676_v0  ;;  %v1055_v63 = vshll.u32 %v13425_v45, %v13482_v56  ;;  %v1028_v10 = vxor.u32 2147483648, %v7230_v39  ;;  %v1054_v4 = vor.u32 %v1053_v58, %v1052_v37 }
 0x1d2   : > { %v1060_v13 = vor.u32 %v1059_v5, %v1058_v36  ;;  %v1062_v40 = vshrl.u32 %v13428_v41, %v13481_v16  ;;  %v1424_v26 = vand.u32 2147483647, %v1423_v8  ;;  %v1426_v29 = vcvt.s32.f32 %v1419_v25 }
 0x1d3   : > { %v678_v50 = vshrl.u32 %v677_v47, 30  ;;  %v1048_v21 = vshrl.u32 %v13423_v59, %v13481_v16  ;;  %v1025_v2 = vxor.u32 2147483648, %v7232_v28  ;;  %v1040_v52 = vor.u32 8388608, %v1039_v53 }
 0x1d4   : > { %v1057_v7 = vor.u32 %v1056_v30, %v1055_v63  ;;  %v1061_v48 = vshll.u32 %v13427_v19, %v13482_v56  ;;  %v1427_v44 = vmul.f32 %v1426_v29, %v1424_v26  ;;  %vm1064_vm11 = vcmp.lt.s32.totalorder %v13483_v14, 1 }
 0x1d5   : > { %v679_v43 = vshll.u32 %v678_v50, 30  ;;  %vm1067_vm12 = vcmp.lt.s32.totalorder %v13483_v14, 4  ;;  %v1029_v58 = vsel %vm1027_vm9, %v1028_v10, %v7232_v28  ;;  %v1072_v37 = vsel %vm1064_vm11, %v1051_v51, %v1054_v4 }
 0x1d6   : > { %v1063_v25 = vor.u32 %v1062_v40, %v1061_v48  ;;  %v1073_v16 = vsel %vm1067_vm12, %v1060_v13, 920167782  ;;  %v1428_v53 = vxor.u32 2147483648, %v1427_v44  ;;  %vm1065_vm13 = vcmp.lt.s32.totalorder %v13483_v14, 2 }
 0x1d7   : > { %v9074_v30 = vsub.s32 %v676_v0, %v679_v43  ;;  %vm1066_vm6 = vcmp.lt.s32.totalorder %v13483_v14, 3  ;;  %v1026_v56 = vsel %vm1024_vm10, %v7230_v39, %v1025_v2  ;;  %v1068_v36 = vsel %vm1064_vm11, %v1048_v21, %v1051_v51 }
 0x1d8   : > { %v1069_v5 = vsel %vm1067_vm12, %v1057_v7, 2102212464  ;;  %v1074_v28 = vsel %vm1066_vm6, %v1057_v7, %v1073_v16  ;;  %v1429_v43 = vsel %vm1346_vm0, %v1428_v53, %v1427_v44  ;;  %v1076_v2 = vsel %vm1064_vm11, %v1054_v4, %v1057_v7 }
 0x1d9   : > { %v682_v0 = vsub.s32 0, %v9074_v30  ;;  %v1075_v8 = vsel %vm1065_vm13, %v1072_v37, %v1074_v28  ;;  %v1432_v39 = vsel %vm8959_vm5, %v13465_v6, %v1429_v43  ;;  %v702_v47 = vsub.s32 4, %v678_v50 }
 0x1da   : > { %v1077_v51 = vsel %vm1067_vm12, %v1063_v25, 1326507024  ;;  %v1080_v63 = vshll.u32 %v1040_v52, 8  ;;  %7233 = vcosq.f32 %v1432_v39  ;;  %v1070_v40 = vsel %vm1066_vm6, %v1054_v4, %v1069_v5 }
 0x1db   : > { %v6675_v10 = vmin.u32 %v682_v0, %v9074_v30  ;;  %v1078_v26 = vsel %vm1066_vm6, %v1060_v13, %v1077_v51  ;;  %7235 = vsinq.f32 %v1432_v39  ;;  %v9113_v52 = vor.u32 %v9027_v17, %v2249_v46  ;;  %v13488_v17 = vld [vmem:[#allocation21_spill] sm:$0xff] }
 0x1dc   : > { %v1079_v29 = vsel %vm1065_vm13, %v1076_v2, %v1078_v26  ;;  %v9105_v1 = vmul.u32.u64.low %v1080_v63, %v1075_v8  ;;  %v9106_v21 = vmul.u32.u64.high %v1080_v63, %v1075_v8, %v9105_v1  ;;  %v13484_v7 = vshll.u32 %v9010_v32, 23  ;;  %v2287_v32 = vld [vmem:[%s13160_s4 + $0x18] sm:$0x1f] }
 0x1dd   : > { %vm1023_vm0 = vcmp.lt.s32.totalorder %v9018_v57, 2  ;;  %v684_v13 = vclz %v6675_v10  ;;  %vm618_vm5 = vcmp.lt.s32.totalorder %v13472_v18, 0  ;;  %vm1020_vm7 = vweird.f32 %v13460_v35  ;;  %2305 = vperm.xlu1 %7207, %v2287_v32   ;;  %2385 = vperm.xlu0 %7208, %v2287_v32   ;;  %v13489_v8 = vld [vmem:[#allocation48_spill] sm:$0xff] }
 0x1de   : > { %v9117_v4 = vor.u32 4788187, %v13484_v7  ;;  %v1030_v48 = vsel %vm1023_vm0, %v1026_v56, %v1029_v58  ;;  %v9121_v44 = vmul.u32.u64.low %v1080_v63, %v1079_v29  ;;  %v9122_v25 = vmul.u32.u64.high %v1080_v63, %v1079_v29, %v9121_v44 }
 0x1df   : > { %v6676_v37 = vadd.s32 4294967294, %v684_v13  ;;  %v9127_v27 = vsel %vm618_vm5, %v702_v47, %v678_v50  ;;  %v1071_v61 = vsel %vm1065_vm13, %v1068_v36, %v1070_v40  ;;  %vm1440_vm8 = vcmp.eq.s32.totalorder %v9040_v62, 0 }
 0x1e0   : > { %v13485_v57 = vand.u32 2147483647, %v13472_v18  ;;  %v1090_v35 = vadd.s32 1, %v9106_v21  ;;  %v824_v50 = vand.u32 2147483647, %v13488_v17  ;;  %v9143_v14 = vsel %vm1020_vm7, nan, %v1030_v48 }
 0x1e1   : > { %vm1439_vm2 = vcmp.lt.s32.totalorder %v9040_v62, 2  ;;  %vm1443_vm1 = vcmp.eq.s32.totalorder %v9040_v62, 2  ;;  %v672_v58 = vadd.s32 %v9012_v22, %v9005_v24  ;;  %vm6677_vm9 = vcmp.lt.s32.totalorder %v6676_v37, 0  ;;  %v2626_v24 = vld [vmem:[%s13161_s5 + $0x10] sm:$0xff] }
 0x1e2   : > { %vm9137_vm3 = vcmp.le.f32.partialorder %v13485_v57, 0.7853982  ;;  %vm1436_vm10 = vweird.f32 %v13465_v6  ;;  %v687_v16 = vsel %vm6677_vm9, 0, %v6676_v37  ;;  %v1087_v56 = vmul.u32 %v1080_v63, %v1071_v61 }
 0x1e3   : > { %v705_v53 = vsel %vm9137_vm3, 0, %v9127_v27  ;;  %vm1089_vm11 = vc.u32 %v9122_v25, %v9105_v1  ;;  %v688_v36 = vsub.s32 32, %v687_v16  ;;  %v692_v5 = vsub.s32 4294967266, %v687_v16 }
 0x1e4   : > { %v1091_v28 = vsel %vm1089_vm11, %v1090_v35, %v9106_v21  ;;  %v841_v43 = vshll.u32 %v13423_v59, %v8251_v60  ;;  %v9163_v0 = vand.u32 8388607, %v824_v50  ;;  %v842_v2 = vshrl.u32 %v13424_v55, %v13489_v8  ;;  %v7234_v51 = vpop.eup %7233 }
 0x1e5   : > { %v1092_v22 = vadd.s32 %v1091_v28, %v1087_v56  ;;  %v844_v39 = vshll.u32 %v13424_v55, %v8251_v60  ;;  %v13490_v47 = vmov 1   ;;  %v689_v63 = vshll.u32 %v9074_v30, %v687_v16  ;;  %v7236_v21 = vpop.eup %7235 }
 0x1e6   : > { %7209 = vset.pattern.permute.xlu1 %v13490_v47  ;;  %v690_v10 = vshrl.u32 %v672_v58, %v688_v36  ;;  %v693_v40 = vadd.s32 127, %v692_v5  ;;  %v845_v26 = vshrl.u32 %v13425_v45, %v13489_v8  ;;  %v13491_v29 = vmov 0  }
 0x1e7   : > { %2337 = vperm.xlu1 %7209, %v2287_v32   ;;  %7212 = vset.pattern.permute.xlu0 %v13491_v29  ;;  %v1444_v7 = vxor.u32 2147483648, %v7234_v51  ;;  %v1093_v13 = vadd.s32 536870912, %v1092_v22  ;;  %v847_v48 = vshll.u32 %v13425_v45, %v8251_v60  ;;  %v851_v44 = vshrl.u32 %v13427_v19, %v13489_v8 }
 0x1e8   : > { %2640 = vperm.xlu0 %7212, %v2626_v24   ;;  %v1441_v37 = vxor.u32 2147483648, %v7236_v21  ;;  %v691_v30 = vor.u32 %v690_v10, %v689_v63  ;;  %v694_v27 = vshll.u32 %v693_v40, 23  ;;  %v848_v61 = vshrl.u32 %v13426_v34, %v13489_v8 }
 0x1e9   : > { %v1445_v32 = vsel %vm1443_vm1, %v1444_v7, %v7236_v21  ;;  %v9182_v57 = vshrl.u32 %v1093_v13, 30  ;;  %v850_v35 = vshll.u32 %v13426_v34, %v8251_v60  ;;  %v854_v58 = vshrl.u32 %v13428_v41, %v13489_v8  ;;  %v7421_v21 = vld [vmem:[%s13160_s4 + $0x10] sm:$0xff]  ;;  %v2624_v13 = vld [vmem:[%s13161_s5] sm:$0xff] }
 0x1ea   : > { %v1442_v16 = vsel %vm1440_vm8, %v7234_v51, %v1441_v37  ;;  %v695_v56 = vor.u32 4788187, %v694_v27  ;;  %v843_v36 = vor.u32 %v842_v2, %v841_v43  ;;  %v846_v5 = vor.u32 %v845_v26, %v844_v39 }
 0x1eb   : > { %v13492_v28 = vmov 2   ;;  %v1446_v24 = vsel %vm1439_vm2, %v1442_v16, %v1445_v32  ;;  %v1095_v63 = vshll.u32 %v9182_v57, 30  ;;  %v852_v10 = vor.u32 %v851_v44, %v850_v35  ;;  %v13493_v44 = vld [vmem:[#allocation38_spill] sm:$0xff]  ;;  %v13494_v32 = vld [vmem:[#allocation44_spill] sm:$0xff] }
 0x1ec   : > { %7210 = vset.pattern.permute.xlu1 %v13492_v28  ;;  %v853_v40 = vshll.u32 %v13427_v19, %v8251_v60  ;;  %7214 = vset.pattern.permute.xlu0 %v13490_v47  ;;  %v1447_v43 = vsel %vm1436_vm10, nan, %v1446_v24  ;;  %v696_v2 = vand.u32 2147483647, %v695_v56  ;;  %v698_v39 = vcvt.s32.f32 %v691_v30  ;;  %v2625_v16 = vld [vmem:[%s13161_s5 + $0x8] sm:$0xff] }
 0x1ed   : > { %2381 = vperm.xlu1 %7210, %v7421_v21   ;;  %v849_v62 = vor.u32 %v848_v61, %v847_v48  ;;  %v2256_v51 = vand.u32 2147483647, %v9117_v4  ;;  %v6908_v26 = vpack.c.bf16 %v1447_v43, %v9143_v14  ;;  %v9204_v7 = vsub.s32 %v1092_v22, %v1095_v63 }
 0x1ee   : > { %v855_v60 = vor.u32 %v854_v58, %v853_v40  ;;  %vm1970_vm12 = vcmp.lt.s32.totalorder %v13493_v44, 0  ;;  %v699_v37 = vmul.f32 %v698_v39, %v696_v2  ;;  %v709_v27 = vadd.s32 3, %v705_v53 }
 0x1ef   : > { %v832_v6 = vor.u32 8388608, %v9163_v0  ;;  %vm859_vm13 = vcmp.lt.s32.totalorder %v13494_v32, 4  ;;  %6909 = vmatprep.subr.bf16.mxu1 %v6908_v26  ;;  %v1098_v4 = vsub.s32 0, %v9204_v7  ;;  %vm856_vm6 = vcmp.lt.s32.totalorder %v13494_v32, 1 }
 0x1f0   : > { %vm858_vm0 = vcmp.lt.s32.totalorder %v13494_v32, 3  ;;  %v865_v14 = vsel %vm859_vm13, %v852_v10, 920167782  ;;  %v700_v22 = vxor.u32 2147483648, %v699_v37  ;;  %v840_v48 = vshrl.u32 %v13423_v59, %v13489_v8 }
 0x1f1   : > { %7211 = vset.pattern.permute.xlu1 %v13491_v29  ;;  %v864_v53 = vsel %vm856_vm6, %v843_v36, %v846_v5  ;;  %v866_v0 = vsel %vm858_vm0, %v849_v62, %v865_v14  ;;  %v6691_v30 = vmin.u32 %v1098_v4, %v9204_v7  ;;  %v861_v61 = vsel %vm859_vm13, %v849_v62, 2102212464 }
 0x1f2   : > { %2630 = vperm.xlu1 %7211, %v2624_v13   ;;  %v868_v35 = vsel %vm856_vm6, %v846_v5, %v849_v62  ;;  %v869_v58 = vsel %vm859_vm13, %v855_v60, 1326507024  ;;  %v701_v8 = vsel %vm618_vm5, %v700_v22, %v699_v37  ;;  %v1118_v56 = vsub.s32 4, %v9182_v57  ;;  %v2627_v60 = vld [vmem:[%s13161_s5 + $0x18] sm:$0x1f] }
 0x1f3   : > { %vm857_vm7 = vcmp.lt.s32.totalorder %v13494_v32, 2  ;;  %v870_v24 = vsel %vm858_vm0, %v852_v10, %v869_v58  ;;  %v704_v63 = vsel %vm9137_vm3, %v13472_v18, %v701_v8  ;;  %v1100_v40 = vclz %v6691_v30  ;;  %v13501_v8 = vld [vmem:[#allocation17_spill] sm:$0xff] }
 0x1f4   : > { %v867_v21 = vsel %vm857_vm7, %v864_v53, %v866_v0  ;;  %v872_v43 = vshll.u32 %v832_v6, 8  ;;  %7237 = vcosq.f32 %v704_v63  ;;  %v860_v2 = vsel %vm856_vm6, %v840_v48, %v843_v36 }
 0x1f5   : > { %v862_v39 = vsel %vm858_vm0, %v846_v5, %v861_v61  ;;  %v871_v62 = vsel %vm857_vm7, %v868_v35, %v870_v24  ;;  %vm1034_vm5 = vcmp.lt.s32.totalorder %v13480_v49, 0  ;;  %v6692_v46 = vadd.s32 4294967294, %v1100_v40 }
 0x1f6   : > { %2635 = vperm.xlu1 %7211, %v2625_v16   ;;  %v9246_v10 = vmul.u32.u64.low %v872_v43, %v871_v62  ;;  %v9247_v26 = vmul.u32.u64.high %v872_v43, %v871_v62, %v9246_v10  ;;  %7239 = vsinq.f32 %v704_v63  ;;  %v1119_v36 = vsel %vm1034_vm5, %v1118_v56, %v9182_v57 }
 0x1f7   : > { %v9255_v5 = vmul.u32.u64.low %v872_v43, %v867_v21  ;;  %v9256_v13 = vmul.u32.u64.high %v872_v43, %v867_v21, %v9255_v5  ;;  %v13495_v37 = vxor.u32 2147483648, %v8652_v33  ;;  %v13496_v4 = vand.u32 2147483647, %v8896_v15 }
 0x1f8   : > { %v13497_v14 = vcvt.s32.f32 %v8790_v9  ;;  %vm6693_vm8 = vcmp.lt.s32.totalorder %v6692_v46, 0  ;;  %v863_v57 = vsel %vm857_vm7, %v860_v2, %v862_v39  ;;  %v2258_v48 = vcvt.s32.f32 %v9113_v52  ;;  %v4332_v52 = vld [vmem:[%s13163_s7] sm:$0xff] }
 0x1f9   : > { %v9264_v6 = vsel %vm1970_vm12, %v13495_v37, %v8652_v33  ;;  %v9275_v53 = vand.u32 3, %v709_v27  ;;  %v13498_v0 = vand.u32 2147483647, %v13480_v49  ;;  %v1103_v33 = vsel %vm6693_vm8, 0, %v6692_v46 }
 0x1fa   : > { %v9270_v22 = vmul.f32 %v13497_v14, %v13496_v4  ;;  %2645 = vperm.xlu1 %7211, %v2627_v60   ;;  %v1088_v9 = vadd.s32 %v9105_v1, %v9122_v25  ;;  %v1104_v15 = vsub.s32 32, %v1103_v33  ;;  %v1108_v61 = vsub.s32 4294967266, %v1103_v33  ;;  %v13503_v60 = vld [vmem:[#allocation31_spill] sm:$0xff] }
 0x1fb   : > { %vm9279_vm3 = vcmp.le.f32.partialorder %v13498_v0, 0.7853982  ;;  %v9290_v27 = vmul.f32 %v2258_v48, %v2256_v51  ;;  %v879_v35 = vmul.u32 %v872_v43, %v863_v57  ;;  %vm881_vm2 = vc.u32 %v9247_v26, %v9255_v5  ;;  %v13502_v51 = vld [vmem:[#allocation35_spill] sm:$0xff] }
 0x1fc   : > { %v1121_v32 = vsel %vm9279_vm3, 0, %v1119_v36  ;;  %v882_v58 = vadd.s32 1, %v9256_v13  ;;  %v1105_v16 = vshll.u32 %v9204_v7, %v1103_v33  ;;  %v1106_v1 = vshrl.u32 %v1088_v9, %v1104_v15 }
 0x1fd   : > { %v1109_v25 = vadd.s32 127, %v1108_v61  ;;  %v13277_v56 = vand.u32 2147483647, %v13501_v8  ;;  %vm715_vm1 = vcmp.eq.s32.totalorder %v9275_v53, 2  ;;  %v9298_v24 = vadd.s32 3, %v1121_v32 }
 0x1fe   : > { %v883_v63 = vsel %vm881_vm2, %v882_v58, %v9256_v13  ;;  %v1256_v40 = vshrl.u32 %v13423_v59, %v13502_v51  ;;  %v1267_v21 = vshrl.u32 %v13427_v19, %v13502_v51  ;;  %4338 = vperm.xlu1 %7211, %v4332_v52   ;;  %v1107_v43 = vor.u32 %v1106_v1, %v1105_v16  ;;  %v7238_v62 = vpop.eup %7237 }
 0x1ff   : > { %v1110_v2 = vshll.u32 %v1109_v25, 23  ;;  %v884_v7 = vadd.s32 %v883_v63, %v879_v35  ;;  %v1258_v39 = vshrl.u32 %v13424_v55, %v13502_v51  ;;  %vm712_vm9 = vcmp.eq.s32.totalorder %v9275_v53, 0 }
 0x200   : > { %v1261_v46 = vshrl.u32 %v13425_v45, %v13502_v51  ;;  %v1264_v10 = vshrl.u32 %v13426_v34, %v13502_v51  ;;  %v1266_v36 = vshll.u32 %v13426_v34, %v13503_v60  ;;  %v1270_v13 = vshrl.u32 %v13428_v41, %v13502_v51  ;;  %v7240_v48 = vpop.eup %7239 }
 0x201   : > { %v1111_v37 = vor.u32 4788187, %v1110_v2  ;;  %v885_v4 = vadd.s32 536870912, %v884_v7  ;;  %v1247_v14 = vand.u32 8388607, %v13277_v56  ;;  %v1257_v57 = vshll.u32 %v13423_v59, %v13503_v60 }
 0x202   : > { %v1260_v0 = vshll.u32 %v13424_v55, %v13503_v60  ;;  %v1263_v33 = vshll.u32 %v13425_v45, %v13503_v60  ;;  %v1268_v9 = vor.u32 %v1267_v21, %v1266_v36  ;;  %v1269_v15 = vshll.u32 %v13427_v19, %v13503_v60  ;;  %7213 = vset.pattern.permute.xlu1 %v13490_v47  ;;  %v13504_v21 = vld [vmem:[#allocation30_spill] sm:$0xff] }
 0x203   : > { %v716_v61 = vxor.u32 2147483648, %v7238_v62  ;;  %v1112_v32 = vand.u32 2147483647, %v1111_v37  ;;  %v1114_v35 = vcvt.s32.f32 %v1107_v43  ;;  %v9327_v58 = vshrl.u32 %v885_v4, 30  ;;  %4389 = vperm.xlu1 %7213, %v4332_v52  }
 0x204   : > { %v1259_v16 = vor.u32 %v1258_v39, %v1257_v57  ;;  %v1262_v1 = vor.u32 %v1261_v46, %v1260_v0  ;;  %v1265_v25 = vor.u32 %v1264_v10, %v1263_v33  ;;  %v1271_v63 = vor.u32 %v1270_v13, %v1269_v15 }
 0x205   : > { %v713_v51 = vxor.u32 2147483648, %v7240_v48  ;;  %v1115_v2 = vmul.f32 %v1114_v35, %v1112_v32  ;;  %v887_v56 = vshll.u32 %v9327_v58, 30  ;;  %vm1275_vm10 = vcmp.lt.s32.totalorder %v13504_v21, 4 }
 0x206   : > { %v1248_v36 = vor.u32 8388608, %v1247_v14  ;;  %vm1272_vm11 = vcmp.lt.s32.totalorder %v13504_v21, 1  ;;  %vm1273_vm13 = vcmp.lt.s32.totalorder %v13504_v21, 2  ;;  %v1281_v43 = vsel %vm1275_vm10, %v1268_v9, 920167782 }
 0x207   : > { %v717_v39 = vsel %vm715_vm1, %v716_v61, %v7240_v48  ;;  %v1116_v46 = vxor.u32 2147483648, %v1115_v2  ;;  %v9337_v10 = vsub.s32 %v884_v7, %v887_v56  ;;  %vm1274_vm6 = vcmp.lt.s32.totalorder %v13504_v21, 3  ;;  %7215 = vset.pattern.permute.xlu1 %v13492_v28  ;;  %v13512_v21 = vld [vmem:[#allocation49_spill] sm:$0xff] }
 0x208   : > { %v1280_v60 = vsel %vm1272_vm11, %v1259_v16, %v1262_v1  ;;  %v1282_v13 = vsel %vm1274_vm6, %v1265_v25, %v1281_v43  ;;  %v1284_v37 = vsel %vm1272_vm11, %v1262_v1, %v1265_v25  ;;  %v1285_v4 = vsel %vm1275_vm10, %v1271_v63, 1326507024  ;;  %4453 = vperm.xlu1 %7215, %v4332_v52  }
 0x209   : > { %v714_v56 = vsel %vm712_vm9, %v7238_v62, %v713_v51  ;;  %v1117_v7 = vsel %vm1034_vm5, %v1116_v46, %v1115_v2  ;;  %v890_v14 = vsub.s32 0, %v9337_v10  ;;  %v1277_v57 = vsel %vm1275_vm10, %v1265_v25, 2102212464 }
 0x20a   : > { %v1120_v48 = vsel %vm9279_vm3, %v13480_v49, %v1117_v7  ;;  %v1276_v0 = vsel %vm1272_vm11, %v1256_v40, %v1259_v16  ;;  %v1286_v52 = vsel %vm1274_vm6, %v1268_v9, %v1285_v4  ;;  %v1288_v33 = vshll.u32 %v1248_v36, 8 }
 0x20b   : > { %7241 = vcosq.f32 %v1120_v48  ;;  %v6683_v62 = vmin.u32 %v890_v14, %v9337_v10  ;;  %v1283_v15 = vsel %vm1273_vm13, %v1280_v60, %v1282_v13  ;;  %v1287_v61 = vsel %vm1273_vm13, %v1284_v37, %v1286_v52 }
 0x20c   : > { %7243 = vsinq.f32 %v1120_v48  ;;  %v1278_v30 = vsel %vm1274_vm6, %v1262_v1, %v1277_v57  ;;  %v9370_v32 = vmul.u32.u64.low %v1288_v33, %v1287_v61  ;;  %v9371_v35 = vmul.u32.u64.high %v1288_v33, %v1287_v61, %v9370_v32  ;;  %v13508_v1 = vld [vmem:[#allocation29_spill] sm:$0xff] }
 0x20d   : > { %vm711_vm0 = vcmp.lt.s32.totalorder %v9275_v53, 2  ;;  %v1126_v40 = vand.u32 3, %v9298_v24  ;;  %v880_v9 = vadd.s32 %v9255_v5, %v9247_v26  ;;  %v892_v16 = vclz %v6683_v62 }
 0x20e   : > { %v9377_v25 = vmul.u32.u64.low %v1288_v33, %v1283_v15  ;;  %v9378_v63 = vmul.u32.u64.high %v1288_v33, %v1283_v15, %v9377_v25  ;;  %v13505_v51 = vand.u32 2147483647, %v7811_v20  ;;  %v1638_v36 = vsub.s32 4, %v13508_v1 }
 0x20f   : > { %vm708_vm5 = vweird.f32 %v13472_v18  ;;  %v718_v53 = vsel %vm711_vm0, %v714_v56, %v717_v39  ;;  %v6684_v24 = vadd.s32 4294967294, %v892_v16  ;;  %v1279_v26 = vsel %vm1273_vm13, %v1276_v0, %v1278_v30 }
 0x210   : > { %vm9383_vm7 = vcmp.le.f32.partialorder %v13505_v51, 0.7853982  ;;  %vm1297_vm8 = vc.u32 %v9371_v35, %v9377_v25  ;;  %v1639_v43 = vsel %vm1554_vm15, %v1638_v36, %v13508_v1  ;;  %v13509_v46 = vand.u32 2147483647, %v13493_v44 }
 0x211   : > { %v1640_v5 = vsel %vm9383_vm7, %v7811_v20, %v8582_v11  ;;  %vm826_vm2 = vcmp.lt.s32.totalorder %v13488_v17, 0  ;;  %vm6685_vm1 = vcmp.lt.s32.totalorder %v6684_v24, 0  ;;  %v1641_v11 = vsel %vm9383_vm7, 0, %v1639_v43 }
 0x212   : > { %7245 = vcosq.f32 %v1640_v5  ;;  %vm9402_vm3 = vcmp.le.f32.partialorder %v13509_v46, 0.7853982  ;;  %v2054_v60 = vsub.s32 4, %v13512_v21  ;;  %v895_v13 = vsel %vm6685_vm1, 0, %v6684_v24 }
 0x213   : > { %7247 = vsinq.f32 %v1640_v5  ;;  %v1295_v37 = vmul.u32 %v1288_v33, %v1279_v26  ;;  %v1298_v4 = vadd.s32 1, %v9378_v63  ;;  %v2056_v56 = vsel %vm9402_vm3, %v13493_v44, %v9264_v6  ;;  %v13513_v6 = vld [vmem:[#allocation46_spill] sm:$0xff] }
 0x214   : > { %v896_v7 = vsub.s32 32, %v895_v13  ;;  %v900_v14 = vsub.s32 4294967266, %v895_v13  ;;  %v1645_v57 = vadd.s32 3, %v1641_v11  ;;  %v2055_v48 = vsel %vm1970_vm12, %v2054_v60, %v13512_v21 }
 0x215   : > { %v897_v0 = vshll.u32 %v9337_v10, %v895_v13  ;;  %v1299_v52 = vsel %vm1297_vm8, %v1298_v4, %v9378_v63  ;;  %v2057_v33 = vsel %vm9402_vm3, 0, %v2055_v48  ;;  %7249 = vcosq.f32 %v2056_v56  ;;  %v7242_v62 = vpop.eup %7241 }
 0x216   : > { %vm2178_vm15 = vcmp.lt.s32.totalorder %v13513_v6, 0  ;;  %v898_v15 = vshrl.u32 %v880_v9, %v896_v7  ;;  %v901_v61 = vadd.s32 127, %v900_v14  ;;  %v1300_v30 = vadd.s32 %v1299_v52, %v1295_v37  ;;  %v7244_v32 = vpop.eup %7243 }
 0x217   : > { %7251 = vsinq.f32 %v2056_v56  ;;  %vm1127_vm12 = vcmp.lt.s32.totalorder %v1126_v40, 2  ;;  %vm1131_vm9 = vcmp.eq.s32.totalorder %v1126_v40, 2  ;;  %v1132_v10 = vxor.u32 2147483648, %v7242_v62 }
 0x218   : > { %v910_v16 = vsub.s32 4, %v9327_v58  ;;  %v1129_v51 = vxor.u32 2147483648, %v7244_v32  ;;  %v899_v2 = vor.u32 %v898_v15, %v897_v0  ;;  %v902_v63 = vshll.u32 %v901_v61, 23 }
 0x219   : > { %v1301_v1 = vadd.s32 536870912, %v1300_v30  ;;  %v719_v36 = vsel %vm708_vm5, nan, %v718_v53  ;;  %vm1128_vm10 = vcmp.eq.s32.totalorder %v1126_v40, 0  ;;  %v1133_v24 = vsel %vm1131_vm9, %v1132_v10, %v7244_v32 }
 0x21a   : > { %v2061_v26 = vadd.s32 3, %v2057_v33  ;;  %v1130_v9 = vsel %vm1128_vm10, %v7242_v62, %v1129_v51  ;;  %v903_v5 = vor.u32 4788187, %v902_v63  ;;  %v1646_v46 = vand.u32 3, %v1645_v57 }
 0x21b   : > { %v9429_v43 = vshrl.u32 %v1301_v1, 30  ;;  %v2260_v11 = vxor.u32 2147483648, %v9290_v27  ;;  %vm1124_vm11 = vweird.f32 %v13480_v49  ;;  %v1134_v21 = vsel %vm1127_vm12, %v1130_v9, %v1133_v24 }
 0x21c   : > { %v7246_v39 = vpop.eup %7245  ;;  %v911_v18 = vsel %vm826_vm2, %v910_v16, %v9327_v58  ;;  %v1135_v60 = vsel %vm1124_vm11, nan, %v1134_v21  ;;  %v904_v13 = vand.u32 2147483647, %v903_v5  ;;  %v906_v37 = vcvt.s32.f32 %v899_v2 }
 0x21d   : > { %v7248_v53 = vpop.eup %7247  ;;  %v1303_v4 = vshll.u32 %v9429_v43, 30  ;;  %v6900_v56 = vpack.c.bf16 %v1135_v60, %v719_v36  ;;  %v1652_v14 = vxor.u32 2147483648, %v7246_v39  ;;  %v2062_v57 = vand.u32 3, %v2061_v26  ;;  %v13516_v36 = vld [vmem:[#allocation43_spill] sm:$0xff] }
 0x21e   : > { %v1649_v7 = vxor.u32 2147483648, %v7248_v53  ;;  %v907_v48 = vmul.f32 %v906_v37, %v904_v13  ;;  %vm1648_vm13 = vcmp.eq.s32.totalorder %v1646_v46, 0  ;;  %vm1651_vm6 = vcmp.eq.s32.totalorder %v1646_v46, 2  ;;  %v13526_v13 = vld [vmem:[#allocation23_spill] sm:$0xff]  ;;  %v13527_v37 = vld [vmem:[#allocation37_spill] sm:$0xff] }
 0x21f   : > { %v9438_v0 = vsub.s32 %v1300_v30, %v1303_v4  ;;  %v7250_v49 = vpop.eup %7249  ;;  %v2261_v58 = vsel %vm2178_vm15, %v2260_v11, %v9290_v27  ;;  %6901 = vmatpush1.bf16.msra.mxu0 %v6900_v56  ;;  %vm9445_vm0 = vcmp.le.f32.partialorder %v824_v50, 0.7853982  ;;  %v1653_v33 = vsel %vm1651_vm6, %v1652_v14, %v7248_v53 }
 0x220   : > { %v1650_v52 = vsel %vm1648_vm13, %v7246_v39, %v1649_v7  ;;  %v908_v15 = vxor.u32 2147483648, %v907_v48  ;;  %v913_v61 = vsel %vm9445_vm0, 0, %v911_v18  ;;  %vm1647_vm7 = vcmp.lt.s32.totalorder %v1646_v46, 2 }
 0x221   : > { %v7252_v62 = vpop.eup %7251  ;;  %v1306_v30 = vsub.s32 0, %v9438_v0  ;;  %vm2064_vm5 = vcmp.eq.s32.totalorder %v2062_v57, 0  ;;  %v2068_v27 = vxor.u32 2147483648, %v7250_v49  ;;  %vm2433_vm8 = vcmask 1044480  }
 0x222   : > { %v2065_v32 = vxor.u32 2147483648, %v7252_v62  ;;  %v909_v50 = vsel %vm826_vm2, %v908_v15, %v907_v48  ;;  %v1654_v16 = vsel %vm1647_vm7, %v1650_v52, %v1653_v33  ;;  %vm2067_vm3 = vcmp.eq.s32.totalorder %v2062_v57, 2 }
 0x223   : > { %v6699_v10 = vmin.u32 %v1306_v30, %v9438_v0  ;;  %v912_v51 = vsel %vm9445_vm0, %v13488_v17, %v909_v50  ;;  %v2069_v63 = vsel %vm2067_vm3, %v2068_v27, %v7252_v62  ;;  %vm1644_vm1 = vweird.f32 %v7811_v20 }
 0x224   : > { %v2066_v2 = vsel %vm2064_vm5, %v7250_v49, %v2065_v32  ;;  %vm2063_vm12 = vcmp.lt.s32.totalorder %v2062_v57, 2  ;;  %v1846_v24 = vsub.s32 4, %v13516_v36  ;;  %v1655_v26 = vsel %vm1644_vm1, nan, %v1654_v16 }
 0x225   : > { %v1308_v1 = vclz %v6699_v10  ;;  %vm2060_vm9 = vweird.f32 %v13493_v44  ;;  %v2070_v9 = vsel %vm2063_vm12, %v2066_v2, %v2069_v63  ;;  %v13517_v5 = vand.u32 2147483647, %v7981_v42 }
 0x226   : > { %7253 = vcosq.f32 %v912_v51  ;;  %v2071_v11 = vsel %vm2060_vm9, nan, %v2070_v9  ;;  %vm7499_vm10 = vmmov 1   ;;  %v13520_v20 = vmov 0 }
 0x227   : > { %vm9463_vm2 = vcmp.le.f32.partialorder %v13517_v5, 0.7853982  ;;  %v6700_v39 = vadd.s32 4294967294, %v1308_v1  ;;  %vm9468_vm11 = vmpackc.low %vm2433_vm8, %vm7499_vm10  ;;  %7255 = vsinq.f32 %v912_v51  ;;  %v1326_v21 = vsub.s32 4, %v9429_v43 }
 0x228   : > { %v13521_v20 = vsel %vm9468_vm11, 4294967295, %v13520_v20  ;;  %v1848_v44 = vsel %vm9463_vm2, %v7981_v42, %v8588_v54  ;;  %v6902_v18 = vpack.c.bf16 %v2071_v11, %v1655_v26  ;;  %v13523_v53 = vand.u32 2147483647, %v13513_v6  ;;  %v13538_v11 = vld [vmem:[#allocation45_spill] sm:$0xff] }
 0x229   : > { %13522 = vst [vmem:[#allocation28_spill] sm:$0xff] %v13521_v20  ;;  %vm1658_vm6 = vcmp.lt.s32.totalorder %v13526_v13, 0  ;;  %vm1866_vm0 = vcmp.lt.s32.totalorder %v13527_v37, 0  ;;  %vm6701_vm7 = vcmp.lt.s32.totalorder %v6700_v39, 0  ;;  %v1847_v4 = vsel %vm1762_vm4, %v1846_v24, %v13516_v36 }
 0x22a   : > { %vm9479_vm13 = vcmp.le.f32.partialorder %v13523_v53, 0.7853982  ;;  %v2262_v54 = vsub.s32 4, %v8593_v3  ;;  %v917_v7 = vadd.s32 3, %v913_v61  ;;  %vm1242_vm5 = vcmp.lt.s32.totalorder %v13501_v8, 0  ;;  %6904 = vmatprep.subr.msk.bf16.mxu0 %vm9468_vm11, %v6902_v18 }
 0x22b   : > { %v2264_v56 = vsel %vm9479_vm13, %v13513_v6, %v2261_v58  ;;  %v1311_v14 = vsel %vm6701_vm7, 0, %v6700_v39  ;;  %7257 = vcosq.f32 %v1848_v44  ;;  %v1296_v57 = vadd.s32 %v9377_v25, %v9371_v35 }
 0x22c   : > { %v1312_v48 = vsub.s32 32, %v1311_v14  ;;  %v1316_v49 = vsub.s32 4294967266, %v1311_v14  ;;  %7259 = vsinq.f32 %v1848_v44  ;;  %v1327_v40 = vsel %vm1242_vm5, %v1326_v21, %v9429_v43 }
 0x22d   : > { %v1849_v58 = vsel %vm9463_vm2, 0, %v1847_v4  ;;  %v2263_v52 = vsel %vm2178_vm15, %v2262_v54, %v8593_v3  ;;  %7261 = vcosq.f32 %v2264_v56  ;;  %v1313_v33 = vshll.u32 %v9438_v0, %v1311_v14  ;;  %v13534_v3 = vld [vmem:[#allocation24_spill] sm:$0xff] }
 0x22e   : > { %v1314_v62 = vshrl.u32 %v1296_v57, %v1312_v48  ;;  %v1317_v15 = vadd.s32 127, %v1316_v49  ;;  %v13528_v35 = vand.u32 2147483647, %v7800_v12  ;;  %v2156_v43 = vxor.u32 2147483648, %v9270_v22 }
 0x22f   : > { %v13531_v61 = vand.u32 2147483647, %v13501_v8  ;;  %v1534_v32 = vsub.s32 4, %v13534_v3  ;;  %v2265_v10 = vsel %vm9479_vm13, 0, %v2263_v52  ;;  %7263 = vsinq.f32 %v2264_v56 }
 0x230   : > { %vm9508_vm4 = vcmp.le.f32.partialorder %v13528_v35, 0.7853982  ;;  %v1315_v27 = vor.u32 %v1314_v62, %v1313_v33  ;;  %v1318_v50 = vshll.u32 %v1317_v15, 23  ;;  %v918_v16 = vand.u32 3, %v917_v7  ;;  %v7254_v63 = vpop.eup %7253 }
 0x231   : > { %vm9515_vm8 = vcmp.le.f32.partialorder %v13531_v61, 0.7853982  ;;  %v1536_v0 = vsel %vm9508_vm4, %v7800_v12, %v8571_v23  ;;  %v1853_v2 = vadd.s32 3, %v1849_v58  ;;  %v1535_v36 = vsel %vm1450_vm14, %v1534_v32, %v13534_v3  ;;  %v13535_v23 = vld [vmem:[#allocation47_spill] sm:$0xff]  ;;  %v7256_v26 = vpop.eup %7255 }
 0x232   : > { %v1329_v51 = vsel %vm9515_vm8, 0, %v1327_v40  ;;  %7265 = vcosq.f32 %v1536_v0  ;;  %v1319_v1 = vor.u32 4788187, %v1318_v50  ;;  %v1950_v24 = vsub.s32 4, %v13535_v23 }
 0x233   : > { %7267 = vsinq.f32 %v1536_v0  ;;  %v13536_v9 = vxor.u32 2147483648, %v8533_v31  ;;  %v13537_v46 = vxor.u32 2147483648, %v8623_v38  ;;  %vm2074_vm15 = vcmp.lt.s32.totalorder %v13538_v11, 0 }
 0x234   : > { %v2269_v44 = vadd.s32 3, %v2265_v10  ;;  %v9546_v21 = vsel %vm2074_vm15, %v2156_v43, %v9270_v22  ;;  %v1320_v18 = vand.u32 2147483647, %v1319_v1  ;;  %v1322_v53 = vcvt.s32.f32 %v1315_v27  ;;  %v13542_v1 = vld [vmem:[#allocation39_spill] sm:$0xff] }
 0x235   : > { %v1741_v5 = vsel %vm1658_vm6, %v13536_v9, %v8533_v31  ;;  %v1949_v39 = vsel %vm1866_vm0, %v13537_v46, %v8623_v38  ;;  %v1333_v60 = vadd.s32 3, %v1329_v51  ;;  %v7258_v4 = vpop.eup %7257  ;;  %vm919_vm14 = vcmp.lt.s32.totalorder %v918_v16, 2 }
 0x236   : > { %v924_v31 = vxor.u32 2147483648, %v7254_v63  ;;  %v9548_v54 = vand.u32 3, %v1853_v2  ;;  %v1537_v56 = vsel %vm9508_vm4, 0, %v1535_v36  ;;  %v7260_v38 = vpop.eup %7259  ;;  %v921_v7 = vxor.u32 2147483648, %v7256_v26 }
 0x237   : > { %v1323_v14 = vmul.f32 %v1322_v53, %v1320_v18  ;;  %v13539_v57 = vand.u32 2147483647, %v13527_v37  ;;  %v1951_v22 = vsel %vm1866_vm0, %v1950_v24, %v13535_v23  ;;  %v7262_v49 = vpop.eup %7261  ;;  %vm920_vm1 = vcmp.eq.s32.totalorder %v918_v16, 0 }
 0x238   : > { %vm923_vm12 = vcmp.eq.s32.totalorder %v918_v16, 2  ;;  %v9561_v40 = vand.u32 3, %v2269_v44  ;;  %v9566_v33 = vand.u32 3, %v1333_v60  ;;  %v1541_v62 = vadd.s32 3, %v1537_v56 }
 0x239   : > { %vm9554_vm3 = vcmp.le.f32.partialorder %v13539_v57, 0.7853982  ;;  %v1324_v52 = vxor.u32 2147483648, %v1323_v14  ;;  %v925_v15 = vsel %vm923_vm12, %v924_v31, %v7256_v26  ;;  %vm1856_vm9 = vcmp.eq.s32.totalorder %v9548_v54, 0  ;;  %v7264_v43 = vpop.eup %7263  ;;  %v13549_v31 = vld [vmem:[#allocation50_spill] sm:$0xff] }
 0x23a   : > { %v1952_v58 = vsel %vm9554_vm3, %v13527_v37, %v1949_v39  ;;  %v1860_v35 = vxor.u32 2147483648, %v7258_v4  ;;  %v1953_v25 = vsel %vm9554_vm3, 0, %v1951_v22  ;;  %v922_v61 = vsel %vm920_vm1, %v7254_v63, %v921_v7 }
 0x23b   : > { %7269 = vcosq.f32 %v1952_v58  ;;  %v1325_v3 = vsel %vm1242_vm5, %v1324_v52, %v1323_v14  ;;  %v1857_v32 = vxor.u32 2147483648, %v7260_v38  ;;  %vm1859_vm2 = vcmp.eq.s32.totalorder %v9548_v54, 2 }
 0x23c   : > { %7271 = vsinq.f32 %v1952_v58  ;;  %v7266_v0 = vpop.eup %7265  ;;  %v1328_v27 = vsel %vm9515_vm8, %v13501_v8, %v1325_v3  ;;  %vm2272_vm10 = vcmp.eq.s32.totalorder %v9561_v40, 0  ;;  %v2276_v50 = vxor.u32 2147483648, %v7262_v49 }
 0x23d   : > { %v7268_v10 = vpop.eup %7267  ;;  %7273 = vcosq.f32 %v1328_v27  ;;  %vm2271_vm13 = vcmp.lt.s32.totalorder %v9561_v40, 2  ;;  %vm2275_vm0 = vcmp.eq.s32.totalorder %v9561_v40, 2  ;;  %v1542_v51 = vand.u32 3, %v1541_v62 }
 0x23e   : > { %v1957_v2 = vadd.s32 3, %v1953_v25  ;;  %v9581_v63 = vsel %vm919_vm14, %v922_v61, %v925_v15  ;;  %7275 = vsinq.f32 %v1328_v27  ;;  %vm1855_vm7 = vcmp.lt.s32.totalorder %v9548_v54, 2 }
 0x23f   : > { %v1861_v30 = vsel %vm1859_vm2, %v1860_v35, %v7260_v38  ;;  %v1742_v36 = vsub.s32 4, %v13542_v1  ;;  %v1858_v23 = vsel %vm1856_vm9, %v7258_v4, %v1857_v32  ;;  %v2273_v24 = vxor.u32 2147483648, %v7264_v43 }
 0x240   : > { %v1548_v26 = vxor.u32 2147483648, %v7266_v0  ;;  %v13543_v9 = vand.u32 2147483647, %v13526_v13  ;;  %vm2268_vm4 = vweird.f32 %v13513_v6  ;;  %v2277_v16 = vsel %vm2275_vm0, %v2276_v50, %v7264_v43 }
 0x241   : > { %v1545_v39 = vxor.u32 2147483648, %v7268_v10  ;;  %v1743_v44 = vsel %vm1658_vm6, %v1742_v36, %v13542_v1  ;;  %vm1339_vm8 = vcmp.eq.s32.totalorder %v9566_v33, 2  ;;  %vm1540_vm14 = vweird.f32 %v7800_v12 }
 0x242   : > { %vm9589_vm5 = vcmp.le.f32.partialorder %v13543_v9, 0.7853982  ;;  %vm1544_vm3 = vcmp.eq.s32.totalorder %v1542_v51, 0  ;;  %vm1547_vm1 = vcmp.eq.s32.totalorder %v1542_v51, 2  ;;  %v1958_v53 = vand.u32 3, %v1957_v2 }
 0x243   : > { %v1744_v18 = vsel %vm9589_vm5, %v13526_v13, %v1741_v5  ;;  %vm916_vm12 = vweird.f32 %v13488_v17  ;;  %vm1336_vm9 = vcmp.eq.s32.totalorder %v9566_v33, 0  ;;  %v1745_v60 = vsel %vm9589_vm5, 0, %v1743_v44 }
 0x244   : > { %7277 = vcosq.f32 %v1744_v18  ;;  %v13546_v4 = vand.u32 2147483647, %v13538_v11  ;;  %v2158_v56 = vsub.s32 4, %v13549_v31  ;;  %vm1335_vm2 = vcmp.lt.s32.totalorder %v9566_v33, 2 }
 0x245   : > { %7279 = vsinq.f32 %v1744_v18  ;;  %v7270_v38 = vpop.eup %7269  ;;  %v2274_v7 = vsel %vm2272_vm10, %v7262_v49, %v2273_v24  ;;  %v1549_v14 = vsel %vm1547_vm1, %v1548_v26, %v7268_v10  ;;  %vm1332_vm0 = vweird.f32 %v13501_v8 }
 0x246   : > { %vm9608_vm6 = vcmp.le.f32.partialorder %v13546_v4, 0.7853982  ;;  %v1546_v48 = vsel %vm1544_vm3, %v7266_v0, %v1545_v39  ;;  %v1964_v22 = vxor.u32 2147483648, %v7270_v38  ;;  %v2159_v58 = vsel %vm2074_vm15, %v2158_v56, %v13549_v31  ;;  %v7272_v49 = vpop.eup %7271  ;;  %v2281_v31 = vld [vmem:[%s13159_s3 + $0x8] sm:$0xff] }
 0x247   : > { %v2160_v57 = vsel %vm9608_vm6, %v13538_v11, %v9546_v21  ;;  %v13278_v52 = vmov 0.0   ;;  %vm1963_vm10 = vcmp.eq.s32.totalorder %v1958_v53, 2  ;;  %v1749_v62 = vadd.s32 3, %v1745_v60  ;;  %v7274_v43 = vpop.eup %7273 }
 0x248   : > { %7281 = vcosq.f32 %v2160_v57  ;;  %2510 = vmatprep.mubr.f32.mxu0 %v13278_v52  ;;  %2599 = vmatprep.mubr.f32.mxu1 %v13278_v52  ;;  %v2161_v21 = vsel %vm9608_vm6, 0, %v2159_v58  ;;  %v2278_v15 = vsel %vm2271_vm13, %v2274_v7, %v2277_v16  ;;  %vm1543_vm5 = vcmp.lt.s32.totalorder %v1542_v51, 2  ;;  %v7276_v32 = vpop.eup %7275 }
 0x249   : > { %7283 = vsinq.f32 %v2160_v57  ;;  %v1961_v35 = vxor.u32 2147483648, %v7272_v49  ;;  %v1965_v25 = vsel %vm1963_vm10, %v1964_v22, %v7272_v49  ;;  %v1862_v61 = vsel %vm1855_vm7, %v1858_v23, %v1861_v30 }
 0x24a   : > { %v1550_v3 = vsel %vm1543_vm5, %v1546_v48, %v1549_v14  ;;  %vm1956_vm15 = vweird.f32 %v13527_v37  ;;  %vm1960_vm3 = vcmp.eq.s32.totalorder %v1958_v53, 0  ;;  %v1340_v0 = vxor.u32 2147483648, %v7274_v43  ;;  %v2282_v48 = vld [vmem:[%s13159_s3 + $0x10] sm:$0xff] }
 0x24b   : > { %vm1959_vm1 = vcmp.lt.s32.totalorder %v1958_v53, 2  ;;  %v1962_v27 = vsel %vm1960_vm3, %v7270_v38, %v1961_v35  ;;  %v2165_v50 = vadd.s32 3, %v2161_v21  ;;  %v1337_v10 = vxor.u32 2147483648, %v7276_v32 }
 0x24c   : > { %v2279_v40 = vsel %vm2268_vm4, nan, %v2278_v15  ;;  %v1966_v51 = vsel %vm1959_vm1, %v1962_v27, %v1965_v25  ;;  %v1750_v2 = vand.u32 3, %v1749_v62  ;;  %v1341_v1 = vsel %vm1339_vm8, %v1340_v0, %v7276_v32  ;;  %v2291_v62 = vpop.permute.xlu0 %2290  ;;  %v13550_v25 = vld [vmem:[#allocation6_spill] sm:$0xff]  ;;  %v13552_v32 = vld [vmem:[#allocation8_spill] sm:$0xff] }
 0x24d   : > { %vm1852_vm13 = vweird.f32 %v7981_v42  ;;  %v1551_v37 = vsel %vm1540_vm14, nan, %v1550_v3  ;;  %v1967_v54 = vsel %vm1956_vm15, nan, %v1966_v51  ;;  %v927_v36 = vsel %vm916_vm12, nan, %v9581_v63  ;;  %v2280_v63 = vld [vmem:[%s13159_s3] sm:$0xff]  ;;  %v13553_v27 = vld [vmem:[#allocation10_spill] sm:$0xff] }
 0x24e   : > { %v7278_v30 = vpop.eup %7277  ;;  %v1338_v6 = vsel %vm1336_vm9, %v7274_v43, %v1337_v10  ;;  %v1863_v23 = vsel %vm1852_vm13, nan, %v1862_v61  ;;  %v6905_v24 = vpack.c.bf16 %v1967_v54, %v1551_v37  ;;  %v2166_v16 = vand.u32 3, %v2165_v50  ;;  %v13551_v61 = vld [vmem:[#allocation14_spill] sm:$0xff]  ;;  %v13554_v10 = vld [vmem:[#allocation12_spill] sm:$0xff] }
 0x24f   : > { %v7280_v26 = vpop.eup %7279  ;;  %v1342_v9 = vsel %vm1335_vm2, %v1338_v6, %v1341_v1  ;;  %v6912_v46 = vpack.c.bf16 %v2279_v40, %v1863_v23  ;;  %v1756_v42 = vxor.u32 2147483648, %v7278_v30  ;;  %vm1755_vm7 = vcmp.eq.s32.totalorder %v1750_v2, 2  ;;  %v13555_v1 = vld [vmem:[#allocation18_spill] sm:$0xff]  ;;  %v13557_v6 = vld [vmem:[#allocation13_spill] sm:$0xff] }
 0x250   : > { %v1343_v12 = vsel %vm1332_vm0, nan, %v1342_v9  ;;  %6907 = vmatpush1.bf16.msk.msra.mxu0 %vm9468_vm11, %v6905_v24  ;;  %v1753_v17 = vxor.u32 2147483648, %v7280_v26  ;;  %vm13337_vm4 = vcmask 236544   ;;  %vm1752_vm8 = vcmp.eq.s32.totalorder %v1750_v2, 0  ;;  %v2326_v15 = vpop.permute.xlu0 %2325  ;;  %v13558_v24 = vld [vmem:[#allocation7_spill] sm:$0xff] }
 0x251   : > { %v6910_v44 = vpack.c.bf16 %v1343_v12, %v927_v36  ;;  %v1757_v33 = vsel %vm1755_vm7, %v1756_v42, %v7280_v26  ;;  %vm1751_vm14 = vcmp.lt.s32.totalorder %v1750_v2, 2  ;;  %vm2171_vm12 = vcmp.eq.s32.totalorder %v2166_v16, 2 }
 0x252   : > { %v7282_v39 = vpop.eup %7281  ;;  %v1754_v53 = vsel %vm1752_vm8, %v7278_v30, %v1753_v17  ;;  %vm2168_vm9 = vcmp.eq.s32.totalorder %v2166_v16, 0  ;;  %vm2167_vm6 = vcmp.lt.s32.totalorder %v2166_v16, 2  ;;  %vm1748_vm2 = vweird.f32 %v13526_v13  ;;  %v2283_v13 = vld [vmem:[%s13159_s3 + $0x18] sm:$0x1f]  ;;  %v13556_v30 = vld [vmem:[#allocation9_spill] sm:$0xff] }
 0x253   : > { %v7284_v18 = vpop.eup %7283  ;;  %v2172_v60 = vxor.u32 2147483648, %v7282_v39  ;;  %6911 = vmatpush1.bf16.msra.mxu1 %v6910_v44  ;;  %6740 = vmatmul.mubr.msk.f32.vlgmr.msra.gmra.mrb[0].mxu0 %vm13337_vm4, %v2280_v63  ;;  %v1758_v4 = vsel %vm1751_vm14, %v1754_v53, %v1757_v33  ;;  %vm2164_vm0 = vweird.f32 %v13538_v11  ;;  %v2296_v11 = vpop.permute.xlu1 %2295  ;;  %v2340_v43 = vmul.f32 %v2326_v15, %v13550_v25 }
 0x254   : > { %v2169_v8 = vxor.u32 2147483648, %v7284_v18  ;;  %6914 = vmatprep.subr.msk.bf16.mxu1 %vm9468_vm11, %v6912_v46  ;;  %2516 = vmatprep.mubr.f32.mxu0 %v13278_v52  ;;  %v1759_v7 = vsel %vm1748_vm2, nan, %v1758_v4  ;;  %v2341_v3 = vmul.f32 %v2326_v15, %v13551_v61  ;;  %v2308_v0 = vmul.f32 %v2291_v62, %v13552_v32  ;;  %v2334_v51 = vpop.permute.xlu0 %2333  ;;  %v13559_v46 = vld [vmem:[#allocation15_spill] sm:$0xff] }
 0x255   : > { %v2173_v5 = vsel %vm2171_vm12, %v2172_v60, %v7284_v18  ;;  %v2309_v40 = vmul.f32 %v2291_v62, %v13554_v10  ;;  %v2310_v36 = vmul.f32 %v2291_v62, %v13556_v30  ;;  %v2311_v23 = vmul.f32 %v2291_v62, %v13557_v6 }
 0x256   : > { %v2170_v56 = vsel %vm2168_vm9, %v7282_v39, %v2169_v8  ;;  %v2356_v54 = vadd.f32 %v2340_v43, %v2308_v0  ;;  %v2342_v26 = vmul.f32 %v2326_v15, %v13558_v24  ;;  %v2343_v42 = vmul.f32 %v2326_v15, %v13559_v46  ;;  %v13561_v15 = vld [vmem:[#allocation11_spill] sm:$0xff] }
 0x257   : > { %v2174_v38 = vsel %vm2167_vm6, %v2170_v56, %v2173_v5  ;;  %6741 = vmatmul.mubr.msk.f32.gmra.mrb[2].mxu0 %vm13337_vm4, %v2281_v31  ;;  %v2330_v22 = vpop.permute.xlu1 %2329  ;;  %v2357_v9 = vadd.f32 %v2341_v3, %v2309_v40  ;;  %v2312_v16 = vmul.f32 %v2296_v11, %v13552_v32  ;;  %v2313_v12 = vmul.f32 %v2296_v11, %v13554_v10  ;;  %v13563_v0 = vld [vmem:[#allocation19_spill] sm:$0xff] }
 0x258   : > { %v2175_v14 = vsel %vm2164_vm0, nan, %v2174_v38  ;;  %2522 = vmatprep.mubr.f32.mxu0 %v13278_v52  ;;  %v2315_v39 = vmul.f32 %v2296_v11, %v13557_v6  ;;  %v2344_v44 = vmul.f32 %v2330_v22, %v13550_v25  ;;  %v9710_v53 = vmul.f32 %v2334_v51, %v13550_v25 }
 0x259   : > { %v6915_v57 = vpack.c.bf16 %v2175_v14, %v1759_v7  ;;  %v9713_v60 = vmul.f32 %v2334_v51, %v13551_v61  ;;  %v2346_v8 = vmul.f32 %v2330_v22, %v13558_v24  ;;  %v9720_v56 = vmul.f32 %v2334_v51, %v13559_v46  ;;  %v2378_v7 = vpop.permute.xlu0 %2377 }
 0x25a   : > { %v2345_v38 = vmul.f32 %v2330_v22, %v13551_v61  ;;  %v2360_v40 = vadd.f32 %v2344_v44, %v2312_v16  ;;  %v2395_v44 = vmul.f32 %v2378_v7, %v13563_v0  ;;  %v2359_v20 = vadd.f32 %v2343_v42, %v2311_v23 }
 0x25b   : > { %6917 = vmatpush1.bf16.msk.msra.mxu1 %vm9468_vm11, %v6915_v57  ;;  %6742 = vmatmul.mubr.msk.f32.gmra.mrb[4].mxu0 %vm13337_vm4, %v2282_v48  ;;  %v2374_v58 = vpop.permute.xlu1 %2373 }
 0x25c   : > { %2528 = vmatprep.mubr.f32.mxu0 %v13278_v52  ;;  %v2388_v50 = vmul.f32 %v2374_v58, %v13553_v27  ;;  %v2389_v37 = vmul.f32 %v2374_v58, %v13555_v1  ;;  %v2390_v43 = vmul.f32 %v2374_v58, %v13561_v15 }
 0x25e   : > { %6746 = vmatmul.mubr.msk.f32.vlgmr.msra.gmra.mrb[0].mxu1 %vm13337_vm4, %v2280_v63  ;;  %v2404_v17 = vadd.f32 %v2388_v50, %v2356_v54  ;;  %v2314_v63 = vmul.f32 %v2296_v11, %v13556_v30  ;;  %v2405_v18 = vadd.f32 %v2389_v37, %v2357_v9  ;;  %v2391_v50 = vmul.f32 %v2374_v58, %v13563_v0 }
 0x25f   : > { %2605 = vmatprep.mubr.f32.mxu1 %v13278_v52  ;;  %6743 = vmatmul.mubr.msk.f32.gmra.mrb[6].mxu0 %vm13337_vm4, %v2283_v13  ;;  %v9686_v49 = vpop.permute.xlu1 %2300  ;;  %v2392_v54 = vmul.f32 %v2378_v7, %v13553_v27  ;;  %v2358_v58 = vadd.f32 %v2342_v26, %v2310_v36 }
 0x260   : > { %4604 = vmatprep.mubr.f32.mxu0 %v13278_v52  ;;  %v9732_v11 = vmul.f32 %v9686_v49, %v13554_v10  ;;  %v2362_v9 = vadd.f32 %v2346_v8, %v2314_v63  ;;  %v9759_v28 = vmul.f32 %v9686_v49, %v13557_v6 }
 0x262   : > { %6747 = vmatmul.mubr.msk.f32.gmra.mrb[2].mxu1 %vm13337_vm4, %v2281_v31  ;;  %v9717_v31 = vmul.f32 %v2334_v51, %v13558_v24 }
 0x263   : > { %2611 = vmatprep.mubr.f32.mxu1 %v13278_v52  ;;  %v9688_v21 = vpop.permute.xlu1 %2305 }
 0x266   : > { %6748 = vmatmul.mubr.msk.f32.gmra.mrb[4].mxu1 %vm13337_vm4, %v2282_v48  ;;  %v2347_v48 = vmul.f32 %v2330_v22, %v13559_v46 }
 0x267   : > { %2617 = vmatprep.mubr.f32.mxu1 %v13278_v52  ;;  %v9690_v35 = vpop.permute.xlu1 %2337 }
 0x268   : > { %v2363_v16 = vadd.f32 %v2347_v48, %v2315_v39  ;;  %v2407_v39 = vadd.f32 %v2391_v50, %v2359_v20  ;;  %v9774_v20 = vmul.f32 %v9688_v21, %v13554_v10  ;;  %v9778_v50 = vmul.f32 %v9688_v21, %v13556_v30 }
 0x269   : > { %v9793_v10 = vmul.f32 %v9690_v35, %v13550_v25 }
 0x26a   : > { %6749 = vmatmul.mubr.msk.f32.gmra.mrb[6].mxu1 %vm13337_vm4, %v2283_v13  ;;  %v9728_v13 = vmul.f32 %v9686_v49, %v13552_v32  ;;  %13565 = vst [vmem:[#allocation34_spill] sm:$0xff] %v9774_v20  ;;  %13566 = vst [vmem:[#allocation33_spill] sm:$0xff] %v9778_v50 }
 0x26b   : > { %4693 = vmatprep.mubr.f32.mxu1 %v13278_v52  ;;  %v9753_v52 = vmul.f32 %v9686_v49, %v13556_v30  ;;  %v9769_v49 = vmul.f32 %v9688_v21, %v13552_v32  ;;  %13569 = vst [vmem:[#allocation40_spill] sm:$0xff] %v9793_v10 }
 0x26c   : > { %v9697_v2 = vpop.permute.xlu1 %2381 }
 0x26d   : > { %13564 = vst [vmem:[#allocation36_spill] sm:$0xff] %v9769_v49 }
 0x271   : > { %v9723_v14 = vpop.permute.xlu1 %2630 }
 0x326   : > { %v2512_v33 = vpop.f32.mrb[0].mxu0 }
 0x327   : > { %v2513_v4 = vadd.f32 %v2512_v33, %v2404_v17  ;;  %v2514_v5 = vpop.f32.mrb[1].mxu0 }
 0x328   : > { %v2515_v57 = vadd.f32 %v2514_v5, %v2405_v18  ;;  %v2394_v18 = vmul.f32 %v2378_v7, %v13561_v15  ;;  %v2393_v5 = vmul.f32 %v2378_v7, %v13555_v1 }
 0x329   : > { %v9735_v62 = vadd.f32 %v9723_v14, %v2513_v4  ;;  %v2361_v4 = vadd.f32 %v2345_v38, %v2313_v12  ;;  %v2406_v38 = vadd.f32 %v2390_v43, %v2358_v58 }
 0x32a   : > { %v9739_v3 = vadd.f32 %v9723_v14, %v2515_v57  ;;  %v2518_v22 = vpop.f32.mrb[2].mxu0  ;;  %v9761_v7 = vadd.f32 %v2394_v18, %v2362_v9 }
 0x32b   : > { %13560 = vst [vmem:[#allocation26_spill] sm:$0xff] %v9735_v62  ;;  %v13287_v51 = vand.u32 2147483647, %v9735_v62  ;;  %v2667_v37 = vand.u32 2139095040, %v9735_v62  ;;  %v9745_v17 = vpop.f32.mrb[3].mxu0  ;;  %v9763_v48 = vadd.f32 %v2393_v5, %v2361_v4  ;;  %v9805_v4 = vmul.f32 %v9690_v35, %v13558_v24 }
 0x32c   : > { %13562 = vst [vmem:[#allocation22_spill] sm:$0xff] %v9739_v3  ;;  %v2771_v33 = vand.u32 2139095040, %v9739_v3  ;;  %v13288_v42 = vand.u32 2147483647, %v9739_v3 }
 0x32d   : > { %v2668_v57 = vshrl.u32 %v2667_v37, 23  ;;  %v2671_v63 = vand.u32 8388607, %v13287_v51  ;;  %v2408_v37 = vadd.f32 %v2392_v54, %v2360_v40  ;;  %v9780_v40 = vpop.permute.xlu1 %2635  ;;  %v9789_v54 = vmul.f32 %v9688_v21, %v13557_v6  ;;  %13572 = vst [vmem:[#allocation32_spill] sm:$0xff] %v9805_v4 }
 0x32e   : > { %v2772_v8 = vshrl.u32 %v2771_v33, 23  ;;  %v9765_v33 = vadd.f32 %v2395_v44, %v2363_v16  ;;  %v9785_v32 = vpop.f32.mrb[4].mxu0 }
 0x32f   : > { %v6750_v12 = vadd.s32 4294967169, %v2668_v57  ;;  %v2519_v51 = vadd.f32 %v2518_v22, %v2408_v37  ;;  %v2672_v23 = vor.u32 8388608, %v2671_v63  ;;  %13568 = vst [vmem:[#allocation42_spill] sm:$0xff] %v9789_v54  ;;  %v9797_v18 = vpop.f32.mrb[5].mxu0  ;;  %v9816_v57 = vand.u32 8388607, %v13288_v42 }
 0x330   : > { %v6754_v26 = vadd.s32 4294967169, %v2772_v8  ;;  %13570 = vst [vmem:[#allocation41_spill] sm:$0xff] %v9797_v18 }
 0x331   : > { %v2601_v36 = vpop.f32.mrb[0].mxu1  ;;  %v2674_v47 = vadd.s32 1, %v6750_v12  ;;  %v9808_v6 = vadd.f32 %v9780_v40, %v2519_v51  ;;  %v9812_v5 = vshll.u32 %v2672_v23, 8 }
 0x332   : > { %v2602_v29 = vadd.f32 %v2601_v36, %v2406_v38  ;;  %v2603_v62 = vpop.f32.mrb[1].mxu1  ;;  %v2778_v43 = vadd.s32 1, %v6754_v26 }
 0x333   : > { %vm2675_vm10 = vcmp.gt.s32.totalorder %v2674_v47, 0  ;;  %13573 = vst [vmem:[#allocation27_spill] sm:$0xff] %v9808_v6  ;;  %v2604_v58 = vadd.f32 %v2603_v62, %v2407_v39 }
 0x334   : > { %v9783_v22 = vadd.f32 %v9723_v14, %v2602_v29  ;;  %v2676_v9 = vsel %vm2675_vm10, %v2674_v47, 0  ;;  %vm2779_vm5 = vcmp.gt.s32.totalorder %v2778_v43, 0  ;;  %v9801_v29 = vmul.f32 %v9690_v35, %v13551_v61 }
 0x335   : > { %v9795_v30 = vpop.f32.mrb[2].mxu1  ;;  %v2678_v21 = vand.u32 31, %v2676_v9  ;;  %v2677_v47 = vshrl.u32 %v2676_v9, 5  ;;  %v2780_v44 = vsel %vm2779_vm5, %v2778_v43, 0 }
 0x336   : > { %13567 = vst [vmem:[#allocation20_spill] sm:$0xff] %v9783_v22  ;;  %13571 = vst [vmem:[#allocation16_spill] sm:$0xff] %v9801_v29  ;;  %v9810_v25 = vpop.f32.mrb[3].mxu1  ;;  %v2875_v24 = vand.u32 2139095040, %v9783_v22  ;;  %v13575_v4 = vand.u32 2147483647, %v9783_v22 }
 0x337   : > { %v2679_v61 = vsub.s32 32, %v2678_v21  ;;  %v2681_v63 = vshll.u32 %v13423_v59, %v2678_v21  ;;  %v2684_v51 = vshll.u32 %v13424_v55, %v2678_v21  ;;  %v2687_v8 = vshll.u32 %v13425_v45, %v2678_v21 }
 0x338   : > { %v2690_v12 = vshll.u32 %v13426_v34, %v2678_v21  ;;  %v2693_v26 = vshll.u32 %v13427_v19, %v2678_v21  ;;  %vm2696_vm15 = vcmp.lt.s32.totalorder %v2677_v47, 1  ;;  %vm2697_vm3 = vcmp.lt.s32.totalorder %v2677_v47, 2 }
 0x339   : > { %v9824_v38 = vpop.f32.mrb[4].mxu1  ;;  %v2682_v37 = vshrl.u32 %v13424_v55, %v2679_v61  ;;  %v2685_v62 = vshrl.u32 %v13425_v45, %v2679_v61  ;;  %v2688_v36 = vshrl.u32 %v13426_v34, %v2679_v61  ;;  %v2691_v23 = vshrl.u32 %v13427_v19, %v2679_v61 }
 0x33a   : > { %v9830_v39 = vpop.f32.mrb[5].mxu1  ;;  %v2694_v43 = vshrl.u32 %v13428_v41, %v2679_v61  ;;  %vm2699_vm1 = vcmp.lt.s32.totalorder %v2677_v47, 4  ;;  %v2876_v20 = vshrl.u32 %v2875_v24, 23  ;;  %v2879_v50 = vand.u32 8388607, %v13575_v4 }
 0x33b   : > { %13574 = vst [vmem:[#allocation25_spill] sm:$0xff] %v9830_v39  ;;  %v2683_v9 = vor.u32 %v2682_v37, %v2681_v63  ;;  %v2686_v42 = vor.u32 %v2685_v62, %v2684_v51  ;;  %v2689_v16 = vor.u32 %v2688_v36, %v2687_v8  ;;  %v2692_v54 = vor.u32 %v2691_v23, %v2690_v12 }
 0x33c   : > { %v2695_v29 = vor.u32 %v2694_v43, %v2693_v26  ;;  %v2680_v21 = vshrl.u32 %v13423_v59, %v2679_v61  ;;  %vm2698_vm13 = vcmp.lt.s32.totalorder %v2677_v47, 3  ;;  %v6758_v63 = vadd.s32 4294967169, %v2876_v20 }
 0x33d   : > { %v2701_v10 = vsel %vm2699_vm1, %v2689_v16, 2102212464  ;;  %v2704_v49 = vsel %vm2696_vm15, %v2683_v9, %v2686_v42  ;;  %v2708_v39 = vsel %vm2696_vm15, %v2686_v42, %v2689_v16  ;;  %v2705_v3 = vsel %vm2699_vm1, %v2692_v54, 920167782 }
 0x33e   : > { %v2709_v18 = vsel %vm2699_vm1, %v2695_v29, 1326507024  ;;  %v2700_v51 = vsel %vm2696_vm15, %v2680_v21, %v2683_v9  ;;  %v2702_v8 = vsel %vm2698_vm13, %v2686_v42, %v2701_v10  ;;  %v2706_v12 = vsel %vm2698_vm13, %v2689_v16, %v2705_v3 }
 0x33f   : > { %v2710_v37 = vsel %vm2698_vm13, %v2692_v54, %v2709_v18  ;;  %v2707_v24 = vsel %vm2697_vm3, %v2704_v49, %v2706_v12  ;;  %v2880_v62 = vor.u32 8388608, %v2879_v50  ;;  %v2882_v61 = vadd.s32 1, %v6758_v63 }
 0x340   : > { %v2711_v4 = vsel %vm2697_vm3, %v2708_v39, %v2710_v37  ;;  %v9847_v23 = vmul.u32.u64.low %v9812_v5, %v2707_v24  ;;  %v9848_v43 = vmul.u32.u64.high %v9812_v5, %v2707_v24, %v9847_v23  ;;  %v9853_v42 = vmul.f32 %v9690_v35, %v13559_v46 }
 0x341   : > { %v9843_v36 = vmul.u32.u64.low %v9812_v5, %v2711_v4  ;;  %v9844_v26 = vmul.u32.u64.high %v9812_v5, %v2711_v4, %v9843_v36  ;;  %v2703_v3 = vsel %vm2697_vm3, %v2700_v51, %v2702_v8  ;;  %vm2883_vm7 = vcmp.gt.s32.totalorder %v2882_v61, 0 }
 0x342   : > { %13576 = vst [vmem:[#allocation21_spill] sm:$0xff] %v9853_v42  ;;  %v9856_v49 = vand.u32 31, %v2780_v44  ;;  %v2884_v20 = vsel %vm2883_vm7, %v2882_v61, 0  ;;  %v9860_v50 = vadd.f32 %v9710_v53, %v9728_v13  ;;  %v9864_v54 = vmul.f32 %v9697_v2, %v13553_v27 }
 0x343   : > { %v9868_v10 = vadd.f32 %v9717_v31, %v9753_v52  ;;  %v2886_v35 = vand.u32 31, %v2884_v20  ;;  %v9872_v18 = vadd.f32 %v9723_v14, %v2604_v58  ;;  %v2719_v47 = vmul.u32 %v9812_v5, %v2703_v3 }
 0x344   : > { %vm2721_vm8 = vc.u32 %v9844_v26, %v9847_v23  ;;  %v2722_v53 = vadd.s32 1, %v9848_v43  ;;  %v9879_v13 = vshll.u32 %v2880_v62, 8  ;;  %v2885_v16 = vshrl.u32 %v2884_v20, 5 }
 0x345   : > { %13577 = vst [vmem:[#allocation48_spill] sm:$0xff] %v9872_v18  ;;  %v2887_v52 = vsub.s32 32, %v2886_v35  ;;  %v9881_v31 = vshrl.u32 %v2780_v44, 5  ;;  %v9884_v39 = vsub.s32 32, %v9856_v49  ;;  %v2889_v58 = vshll.u32 %v13423_v59, %v2886_v35 }
 0x346   : > { %v2723_v14 = vsel %vm2721_vm8, %v2722_v53, %v9848_v43  ;;  %v2892_v5 = vshll.u32 %v13424_v55, %v2886_v35  ;;  %v2895_v9 = vshll.u32 %v13425_v45, %v2886_v35  ;;  %v2898_v8 = vshll.u32 %v13426_v34, %v2886_v35 }
 0x347   : > { %v2724_v21 = vadd.s32 %v2723_v14, %v2719_v47  ;;  %v2890_v63 = vshrl.u32 %v13424_v55, %v2887_v52  ;;  %v2893_v51 = vshrl.u32 %v13425_v45, %v2887_v52  ;;  %v2896_v44 = vshrl.u32 %v13426_v34, %v2887_v52 }
 0x348   : > { %v2899_v12 = vshrl.u32 %v13427_v19, %v2887_v52  ;;  %v2901_v37 = vshll.u32 %v13427_v19, %v2886_v35  ;;  %v2902_v24 = vshrl.u32 %v13428_v41, %v2887_v52  ;;  %vm2904_vm14 = vcmp.lt.s32.totalorder %v2885_v16, 1 }
 0x349   : > { %v2725_v4 = vadd.s32 536870912, %v2724_v21  ;;  %v2891_v62 = vor.u32 %v2890_v63, %v2889_v58  ;;  %v2894_v61 = vor.u32 %v2893_v51, %v2892_v5  ;;  %v2888_v36 = vshrl.u32 %v13423_v59, %v2887_v52 }
 0x34a   : > { %v2897_v43 = vor.u32 %v2896_v44, %v2895_v9  ;;  %v2900_v3 = vor.u32 %v2899_v12, %v2898_v8  ;;  %v2903_v20 = vor.u32 %v2902_v24, %v2901_v37  ;;  %vm2906_vm12 = vcmp.lt.s32.totalorder %v2885_v16, 3 }
 0x34b   : > { %v9898_v47 = vshrl.u32 %v2725_v4, 30  ;;  %vm2907_vm9 = vcmp.lt.s32.totalorder %v2885_v16, 4  ;;  %v2912_v53 = vsel %vm2904_vm14, %v2891_v62, %v2894_v61  ;;  %vm2905_vm6 = vcmp.lt.s32.totalorder %v2885_v16, 2 }
 0x34c   : > { %v2909_v14 = vsel %vm2907_vm9, %v2897_v43, 2102212464  ;;  %v2913_v29 = vsel %vm2907_vm9, %v2900_v3, 920167782  ;;  %v2916_v46 = vsel %vm2904_vm14, %v2894_v61, %v2897_v43  ;;  %v2917_v35 = vsel %vm2907_vm9, %v2903_v20, 1326507024 }
 0x34d   : > { %v2727_v42 = vshll.u32 %v9898_v47, 30  ;;  %v2908_v58 = vsel %vm2904_vm14, %v2888_v36, %v2891_v62  ;;  %v2914_v5 = vsel %vm2906_vm12, %v2897_v43, %v2913_v29  ;;  %v2910_v63 = vsel %vm2906_vm12, %v2894_v61, %v2909_v14 }
 0x34e   : > { %v2915_v51 = vsel %vm2905_vm6, %v2912_v53, %v2914_v5  ;;  %v2918_v52 = vsel %vm2906_vm12, %v2900_v3, %v2917_v35  ;;  %v2786_v9 = vshrl.u32 %v13424_v55, %v9884_v39  ;;  %v2785_v12 = vshll.u32 %v13423_v59, %v9856_v49 }
 0x34f   : > { %v9903_v8 = vsub.s32 %v2724_v21, %v2727_v42  ;;  %v2919_v44 = vsel %vm2905_vm6, %v2916_v46, %v2918_v52  ;;  %v2788_v37 = vshll.u32 %v13424_v55, %v9856_v49  ;;  %v2911_v42 = vsel %vm2905_vm6, %v2908_v58, %v2910_v63 }
 0x350   : > { %v9910_v24 = vmul.u32.u64.low %v9879_v13, %v2919_v44  ;;  %v9911_v16 = vmul.u32.u64.high %v9879_v13, %v2919_v44, %v9910_v24  ;;  %v9914_v29 = vmul.u32.u64.low %v9879_v13, %v2915_v51  ;;  %v9915_v4 = vmul.u32.u64.high %v9879_v13, %v2915_v51, %v9914_v29 }
 0x351   : > { %v2730_v62 = vsub.s32 0, %v9903_v8  ;;  %v2787_v21 = vor.u32 %v2786_v9, %v2785_v12  ;;  %v2789_v46 = vshrl.u32 %v13425_v45, %v9884_v39  ;;  %v2791_v61 = vshll.u32 %v13425_v45, %v9856_v49 }
 0x352   : > { %v2792_v36 = vshrl.u32 %v13426_v34, %v9884_v39  ;;  %v2794_v43 = vshll.u32 %v13426_v34, %v9856_v49  ;;  %v2795_v3 = vshrl.u32 %v13427_v19, %v9884_v39  ;;  %v2797_v14 = vshll.u32 %v13427_v19, %v9856_v49 }
 0x353   : > { %v6751_v20 = vmin.u32 %v2730_v62, %v9903_v8  ;;  %v2790_v53 = vor.u32 %v2789_v46, %v2788_v37  ;;  %v2798_v35 = vshrl.u32 %v13428_v41, %v9884_v39  ;;  %vm2929_vm2 = vc.u32 %v9911_v16, %v9914_v29 }
 0x354   : > { %v2930_v58 = vadd.s32 1, %v9915_v4  ;;  %v2793_v5 = vor.u32 %v2792_v36, %v2791_v61  ;;  %v2979_v63 = vand.u32 2139095040, %v9872_v18  ;;  %v2927_v52 = vmul.u32 %v9879_v13, %v2911_v42 }
 0x355   : > { %v2732_v51 = vclz %v6751_v20  ;;  %v2796_v9 = vor.u32 %v2795_v3, %v2794_v43  ;;  %v2799_v44 = vor.u32 %v2798_v35, %v2797_v14  ;;  %vm2800_vm0 = vcmp.lt.s32.totalorder %v9881_v31, 1 }
 0x356   : > { %v2931_v12 = vsel %vm2929_vm2, %v2930_v58, %v9915_v4  ;;  %vm2801_vm10 = vcmp.lt.s32.totalorder %v9881_v31, 2  ;;  %vm2802_vm5 = vcmp.lt.s32.totalorder %v9881_v31, 3  ;;  %vm2803_vm15 = vcmp.lt.s32.totalorder %v9881_v31, 4 }
 0x357   : > { %v6752_v49 = vadd.s32 4294967294, %v2732_v51  ;;  %v2932_v37 = vadd.s32 %v2931_v12, %v2927_v52  ;;  %v2808_v24 = vsel %vm2800_vm0, %v2787_v21, %v2790_v53  ;;  %v2784_v13 = vshrl.u32 %v13423_v59, %v9884_v39 }
 0x358   : > { %v2805_v62 = vsel %vm2803_vm15, %v2793_v5, 2102212464  ;;  %v2809_v42 = vsel %vm2803_vm15, %v2796_v9, 920167782  ;;  %v2813_v46 = vsel %vm2803_vm15, %v2799_v44, 1326507024  ;;  %v2812_v36 = vsel %vm2800_vm0, %v2790_v53, %v2793_v5 }
 0x359   : > { %vm6753_vm3 = vcmp.lt.s32.totalorder %v6752_v49, 0  ;;  %v2933_v4 = vadd.s32 536870912, %v2932_v37  ;;  %v2810_v61 = vsel %vm2802_vm5, %v2793_v5, %v2809_v42  ;;  %v2814_v3 = vsel %vm2802_vm5, %v2796_v9, %v2813_v46 }
 0x35a   : > { %v2811_v43 = vsel %vm2801_vm10, %v2808_v24, %v2810_v61  ;;  %v13578_v20 = vor.u32 8388608, %v9816_v57  ;;  %v13579_v14 = vand.u32 2139095040, %v9808_v6  ;;  %v9960_v58 = vsel %vm6753_vm3, 0, %v6752_v49 }
 0x35b   : > { %v9962_v51 = vshrl.u32 %v2933_v4, 30  ;;  %v2804_v52 = vsel %vm2800_vm0, %v2784_v13, %v2787_v21  ;;  %v2806_v5 = vsel %vm2802_vm5, %v2790_v53, %v2805_v62  ;;  %v2815_v44 = vsel %vm2801_vm10, %v2812_v36, %v2814_v3 }
 0x35c   : > { %v2816_v39 = vshll.u32 %v13578_v20, 8  ;;  %v3084_v35 = vshrl.u32 %v13579_v14, 23  ;;  %v2980_v57 = vshrl.u32 %v2979_v63, 23  ;;  %v13292_v49 = vand.u32 2147483647, %v9808_v6 }
 0x35d   : > { %v2935_v24 = vshll.u32 %v9962_v51, 30  ;;  %v2398_v42 = vmul.f32 %v9697_v2, %v13561_v15  ;;  %v9980_v21 = vadd.f32 %v9713_v60, %v9732_v11  ;;  %v2740_v53 = vsub.s32 4294967266, %v9960_v58 }
 0x35e   : > { %v9970_v9 = vmul.u32.u64.low %v2816_v39, %v2811_v43  ;;  %v9971_v12 = vmul.u32.u64.high %v2816_v39, %v2811_v43, %v9970_v9  ;;  %v9983_v13 = vmul.u32.u64.low %v2816_v39, %v2815_v44  ;;  %v9984_v62 = vmul.u32.u64.high %v2816_v39, %v2815_v44, %v9983_v13 }
 0x35f   : > { %v6762_v46 = vadd.s32 4294967169, %v2980_v57  ;;  %v9986_v4 = vsub.s32 %v2932_v37, %v2935_v24  ;;  %v2807_v63 = vsel %vm2801_vm10, %v2804_v52, %v2806_v5  ;;  %v13291_v61 = vand.u32 2147483647, %v9872_v18 }
 0x360   : > { %v9993_v36 = vmul.f32 %v9697_v2, %v13555_v1  ;;  %v2826_v60 = vadd.s32 1, %v9971_v12  ;;  %v6766_v43 = vadd.s32 4294967169, %v3084_v35  ;;  %v9998_v3 = vadd.f32 %v9720_v56, %v9759_v28 }
 0x361   : > { %v2986_v11 = vadd.s32 1, %v6762_v46  ;;  %v2938_v37 = vsub.s32 0, %v9986_v4  ;;  %v10003_v31 = vand.u32 8388607, %v13292_v49  ;;  %v2521_v20 = vadd.f32 %v9745_v17, %v9763_v48 }
 0x362   : > { %v10009_v14 = vmul.f32 %v9697_v2, %v13563_v0  ;;  %v2741_v52 = vadd.s32 127, %v2740_v53  ;;  %v2823_v5 = vmul.u32 %v2816_v39, %v2807_v63  ;;  %vm2825_vm1 = vc.u32 %v9984_v62, %v9970_v9 }
 0x363   : > { %vm2987_vm13 = vcmp.gt.s32.totalorder %v2986_v11, 0  ;;  %v6759_v28 = vmin.u32 %v2938_v37, %v9986_v4  ;;  %v2827_v56 = vsel %vm2825_vm1, %v2826_v60, %v9971_v12  ;;  %v2983_v35 = vand.u32 8388607, %v13291_v61 }
 0x364   : > { %v2988_v44 = vsel %vm2987_vm13, %v2986_v11, 0  ;;  %v2736_v17 = vsub.s32 32, %v9960_v58  ;;  %v2828_v48 = vadd.s32 %v2827_v56, %v2823_v5  ;;  %v3090_v2 = vadd.s32 1, %v6766_v43 }
 0x365   : > { %v2990_v57 = vand.u32 31, %v2988_v44  ;;  %v2940_v24 = vclz %v6759_v28  ;;  %v10019_v39 = vadd.f32 %v9780_v40, %v2521_v20  ;;  %v10023_v53 = vadd.f32 %v9864_v54, %v9860_v50 }
 0x366   : > { %v10026_v13 = vadd.f32 %v2398_v42, %v9868_v10  ;;  %v2720_v12 = vadd.s32 %v9847_v23, %v9844_v26  ;;  %v2742_v46 = vshll.u32 %v2741_v52, 23  ;;  %v2829_v63 = vadd.s32 536870912, %v2828_v48 }
 0x367   : > { %v2991_v60 = vsub.s32 32, %v2990_v57  ;;  %v2737_v11 = vshll.u32 %v9903_v8, %v9960_v58  ;;  %v2928_v43 = vadd.s32 %v9914_v29, %v9911_v16  ;;  %v6760_v37 = vadd.s32 4294967294, %v2940_v24 }
 0x368   : > { %v2738_v50 = vshrl.u32 %v2720_v12, %v2736_v17  ;;  %v10035_v54 = vshrl.u32 %v2829_v63, 30  ;;  %v2984_v10 = vor.u32 8388608, %v2983_v35  ;;  %vm3091_vm7 = vcmp.gt.s32.totalorder %v3090_v2, 0 }
 0x369   : > { %vm6761_vm8 = vcmp.lt.s32.totalorder %v6760_v37, 0  ;;  %v2994_v26 = vshrl.u32 %v13424_v55, %v2991_v60  ;;  %v2997_v23 = vshrl.u32 %v13425_v45, %v2991_v60  ;;  %v3000_v42 = vshrl.u32 %v13426_v34, %v2991_v60 }
 0x36a   : > { %13580 = vst [vmem:[#allocation38_spill] sm:$0xff] %v10035_v54  ;;  %v2743_v52 = vor.u32 4788187, %v2742_v46  ;;  %v10040_v8 = vsel %vm6761_vm8, 0, %v6760_v37  ;;  %v2831_v16 = vshll.u32 %v10035_v54, 30  ;;  %v3003_v29 = vshrl.u32 %v13427_v19, %v2991_v60 }
 0x36b   : > { %v2948_v58 = vsub.s32 4294967266, %v10040_v8  ;;  %v2993_v5 = vshll.u32 %v13423_v59, %v2990_v57  ;;  %v2996_v28 = vshll.u32 %v13424_v55, %v2990_v57  ;;  %v2999_v56 = vshll.u32 %v13425_v45, %v2990_v57 }
 0x36c   : > { %v10048_v35 = vsub.s32 %v2828_v48, %v2831_v16  ;;  %v2989_v17 = vshrl.u32 %v2988_v44, 5  ;;  %v3002_v24 = vshll.u32 %v13426_v34, %v2990_v57  ;;  %v3092_v12 = vsel %vm3091_vm7, %v3090_v2, 0 }
 0x36d   : > { %v2739_v46 = vor.u32 %v2738_v50, %v2737_v11  ;;  %v2995_v63 = vor.u32 %v2994_v26, %v2993_v5  ;;  %v2998_v37 = vor.u32 %v2997_v23, %v2996_v28  ;;  %v3001_v61 = vor.u32 %v3000_v42, %v2999_v56 }
 0x36e   : > { %v2834_v49 = vsub.s32 0, %v10048_v35  ;;  %v3004_v20 = vor.u32 %v3003_v29, %v3002_v24  ;;  %v3005_v54 = vshll.u32 %v13427_v19, %v2990_v57  ;;  %v3006_v0 = vshrl.u32 %v13428_v41, %v2991_v60 }
 0x36f   : > { %v2744_v1 = vand.u32 2147483647, %v2743_v52  ;;  %v2949_v15 = vadd.s32 127, %v2948_v58  ;;  %v3024_v48 = vshll.u32 %v2984_v10, 8  ;;  %v3094_v16 = vand.u32 31, %v3092_v12 }
 0x370   : > { %v6755_v44 = vmin.u32 %v2834_v49, %v10048_v35  ;;  %v2992_v27 = vshrl.u32 %v13423_v59, %v2991_v60  ;;  %v3007_v2 = vor.u32 %v3006_v0, %v3005_v54  ;;  %vm3008_vm14 = vcmp.lt.s32.totalorder %v2989_v17, 1 }
 0x371   : > { %v2944_v11 = vsub.s32 32, %v10040_v8  ;;  %vm3009_vm12 = vcmp.lt.s32.totalorder %v2989_v17, 2  ;;  %vm3011_vm9 = vcmp.lt.s32.totalorder %v2989_v17, 4  ;;  %v3016_v50 = vsel %vm3008_vm14, %v2995_v63, %v2998_v37 }
 0x372   : > { %vm3010_vm6 = vcmp.lt.s32.totalorder %v2989_v17, 3  ;;  %v3013_v26 = vsel %vm3011_vm9, %v3001_v61, 2102212464  ;;  %v3017_v57 = vsel %vm3011_vm9, %v3004_v20, 920167782  ;;  %v3020_v23 = vsel %vm3008_vm14, %v2998_v37, %v3001_v61 }
 0x373   : > { %v2950_v42 = vshll.u32 %v2949_v15, 23  ;;  %v2836_v52 = vclz %v6755_v44  ;;  %v3018_v29 = vsel %vm3010_vm6, %v3001_v61, %v3017_v57  ;;  %v3021_v10 = vsel %vm3011_vm9, %v3007_v2, 1326507024 }
 0x374   : > { %v3012_v58 = vsel %vm3008_vm14, %v2992_v27, %v2995_v63  ;;  %v3019_v49 = vsel %vm3009_vm12, %v3016_v50, %v3018_v29  ;;  %v3022_v5 = vsel %vm3010_vm6, %v3004_v20, %v3021_v10  ;;  %v3095_v60 = vsub.s32 32, %v3094_v16 }
 0x375   : > { %v3014_v0 = vsel %vm3010_vm6, %v2998_v37, %v3013_v26  ;;  %v3023_v54 = vsel %vm3009_vm12, %v3020_v23, %v3022_v5  ;;  %v10060_v28 = vmul.u32.u64.low %v3024_v48, %v3019_v49  ;;  %v10061_v56 = vmul.u32.u64.high %v3024_v48, %v3019_v49, %v10060_v28  ;;  %v13582_v23 = vld [vmem:[#allocation26_spill] sm:$0xff] }
 0x376   : > { %v2946_v24 = vshrl.u32 %v2928_v43, %v2944_v11  ;;  %v10064_v18 = vmul.u32.u64.low %v3024_v48, %v3023_v54  ;;  %v10065_v6 = vmul.u32.u64.high %v3024_v48, %v3023_v54, %v10064_v18  ;;  %v10069_v15 = vadd.f32 %v9993_v36, %v9980_v21 }
 0x377   : > { %v2746_v27 = vcvt.s32.f32 %v2739_v46  ;;  %v2951_v61 = vor.u32 4788187, %v2950_v42  ;;  %v6756_v63 = vadd.s32 4294967294, %v2836_v52  ;;  %v10073_v20 = vadd.f32 %v10009_v14, %v9998_v3 }
 0x378   : > { %v2945_v37 = vshll.u32 %v9986_v4, %v10040_v8  ;;  %v3015_v44 = vsel %vm3009_vm12, %v3012_v58, %v3014_v0  ;;  %v3098_v43 = vshrl.u32 %v13424_v55, %v3095_v60  ;;  %v13303_v18 = vand.u32 2147483647, %v10019_v39 }
 0x379   : > { %v2747_v2 = vmul.f32 %v2746_v27, %v2744_v1  ;;  %v3034_v21 = vadd.s32 1, %v10061_v56  ;;  %v3101_v36 = vshrl.u32 %v13425_v45, %v3095_v60  ;;  %v13581_v46 = vor.u32 8388608, %v10003_v31 }
 0x37a   : > { %v2947_v3 = vor.u32 %v2946_v24, %v2945_v37  ;;  %v3093_v14 = vshrl.u32 %v3092_v12, 5  ;;  %v3097_v50 = vshll.u32 %v13423_v59, %v3094_v16  ;;  %v3100_v4 = vshll.u32 %v13424_v55, %v3094_v16 }
 0x37b   : > { %v10084_v11 = vshll.u32 %v13581_v46, 8  ;;  %v2952_v8 = vand.u32 2147483647, %v2951_v61  ;;  %vm6757_vm2 = vcmp.lt.s32.totalorder %v6756_v63, 0  ;;  %v3031_v17 = vmul.u32 %v3024_v48, %v3015_v44 }
 0x37c   : > { %vm3033_vm0 = vc.u32 %v10065_v6, %v10060_v28  ;;  %v3099_v26 = vor.u32 %v3098_v43, %v3097_v50  ;;  %v3102_v57 = vor.u32 %v3101_v36, %v3100_v4  ;;  %v3103_v31 = vshll.u32 %v13425_v45, %v3094_v16 }
 0x37d   : > { %v3035_v1 = vsel %vm3033_vm0, %v3034_v21, %v10061_v56  ;;  %vm2666_vm10 = vcmp.lt.s32.totalorder %v13582_v23, 0  ;;  %v3104_v12 = vshrl.u32 %v13426_v34, %v3095_v60  ;;  %v3106_v52 = vshll.u32 %v13426_v34, %v3094_v16 }
 0x37e   : > { %v3036_v42 = vadd.s32 %v3035_v1, %v3031_v17  ;;  %v3107_v29 = vshrl.u32 %v13427_v19, %v3095_v60  ;;  %v2954_v10 = vcvt.s32.f32 %v2947_v3  ;;  %v10096_v48 = vsel %vm6757_vm2, 0, %v6756_v63 }
 0x37f   : > { %v3109_v58 = vshll.u32 %v13427_v19, %v3094_v16  ;;  %v3110_v49 = vshrl.u32 %v13428_v41, %v3095_v60  ;;  %v2748_v5 = vxor.u32 2147483648, %v2747_v2  ;;  %v3105_v54 = vor.u32 %v3104_v12, %v3103_v31 }
 0x380   : > { %v3037_v0 = vadd.s32 536870912, %v3036_v42  ;;  %v3108_v56 = vor.u32 %v3107_v29, %v3106_v52  ;;  %v2955_v24 = vmul.f32 %v2954_v10, %v2952_v8  ;;  %v3096_v27 = vshrl.u32 %v13423_v59, %v3095_v60 }
 0x381   : > { %v3111_v61 = vor.u32 %v3110_v49, %v3109_v58  ;;  %vm3112_vm5 = vcmp.lt.s32.totalorder %v3093_v14, 1  ;;  %v2844_v37 = vsub.s32 4294967266, %v10096_v48  ;;  %vm3115_vm15 = vcmp.lt.s32.totalorder %v3093_v14, 4 }
 0x382   : > { %v10102_v44 = vshrl.u32 %v3037_v0, 30  ;;  %v3120_v63 = vsel %vm3112_vm5, %v3099_v26, %v3102_v57  ;;  %v13583_v43 = vand.u32 2147483647, %v13582_v23  ;;  %v13584_v16 = vmov 0 }
 0x383   : > { %vm3114_vm1 = vcmp.lt.s32.totalorder %v3093_v14, 3  ;;  %v3117_v21 = vsel %vm3115_vm15, %v3105_v54, 2102212464  ;;  %v3121_v36 = vsel %vm3115_vm15, %v3108_v56, 920167782  ;;  %v3124_v46 = vsel %vm3112_vm5, %v3102_v57, %v3105_v54 }
 0x384   : > { %vm10106_vm3 = vcmp.le.f32.partialorder %v13583_v43, 0.7853982  ;;  %v3039_v60 = vshll.u32 %v10102_v44, 30  ;;  %vm3113_vm13 = vcmp.lt.s32.totalorder %v3093_v14, 2  ;;  %v3122_v3 = vsel %vm3114_vm1, %v3105_v54, %v3121_v36  ;;  %v10145_v36 = vpop.f32.mrb[6].mxu0 }
 0x385   : > { %v13585_v16 = vsel %vm10106_vm3, 4294967295, %v13584_v16  ;;  %v3125_v50 = vsel %vm3115_vm15, %v3111_v61, 1326507024  ;;  %v3116_v4 = vsel %vm3112_vm5, %v3096_v27, %v3099_v26  ;;  %v3118_v8 = vsel %vm3114_vm1, %v3102_v57, %v3117_v21 }
 0x386   : > { %13586 = vst [vmem:[#allocation44_spill] sm:$0xff] %v13585_v16  ;;  %v3123_v17 = vsel %vm3113_vm13, %v3120_v63, %v3122_v3  ;;  %v3126_v1 = vsel %vm3114_vm1, %v3108_v56, %v3125_v50  ;;  %v10111_v31 = vsub.s32 %v3036_v42, %v3039_v60  ;;  %v2749_v10 = vsel %vm2666_vm10, %v2748_v5, %v2747_v2 }
 0x387   : > { %v3127_v12 = vsel %vm3113_vm13, %v3124_v46, %v3126_v1  ;;  %v10114_v52 = vmul.u32.u64.low %v10084_v11, %v3123_v17  ;;  %v10115_v29 = vmul.u32.u64.high %v10084_v11, %v3123_v17, %v10114_v52  ;;  %vm2874_vm7 = vcmp.lt.s32.totalorder %v9783_v22, 0 }
 0x388   : > { %v10122_v14 = vmul.u32.u64.low %v10084_v11, %v3127_v12  ;;  %v10123_v58 = vmul.u32.u64.high %v10084_v11, %v3127_v12, %v10122_v14  ;;  %v13587_v26 = vand.u32 2147483647, %v9783_v22  ;;  %v13588_v57 = vmov 0 }
 0x389   : > { %v3042_v42 = vsub.s32 0, %v10111_v31  ;;  %v3119_v49 = vsel %vm3113_vm13, %v3116_v4, %v3118_v8  ;;  %v2608_v0 = vadd.f32 %v9795_v30, %v9761_v7  ;;  %v3187_v2 = vand.u32 2139095040, %v10019_v39 }
 0x38a   : > { %vm10127_vm8 = vcmp.le.f32.partialorder %v13587_v26, 0.7853982  ;;  %v2956_v5 = vxor.u32 2147483648, %v2955_v24  ;;  %v2840_v54 = vsub.s32 32, %v10096_v48  ;;  %v2845_v56 = vadd.s32 127, %v2844_v37 }
 0x38b   : > { %v13589_v57 = vsel %vm10127_vm8, 4294967295, %v13588_v57  ;;  %v10138_v27 = vadd.f32 %v9824_v38, %v10026_v13  ;;  %v6763_v61 = vmin.u32 %v3042_v42, %v10111_v31  ;;  %v3138_v63 = vadd.s32 1, %v10115_v29 }
 0x38c   : > { %13590 = vst [vmem:[#allocation17_spill] sm:$0xff] %v13589_v57  ;;  %v10143_v43 = vadd.f32 %v9780_v40, %v2608_v0  ;;  %v3188_v21 = vshrl.u32 %v3187_v2, 23  ;;  %v2750_v7 = vsub.s32 4, %v9898_v47  ;;  %v2824_v30 = vadd.s32 %v9970_v9, %v9984_v62 }
 0x38d   : > { %v3135_v37 = vmul.u32 %v10084_v11, %v3119_v49  ;;  %vm3137_vm14 = vc.u32 %v10123_v58, %v10114_v52  ;;  %v2752_v38 = vsel %vm10106_vm3, %v13582_v23, %v2749_v10  ;;  %v2841_v13 = vshll.u32 %v10048_v35, %v10096_v48 }
 0x38e   : > { %13591 = vst [vmem:[#allocation35_spill] sm:$0xff] %v10143_v43  ;;  %v3044_v46 = vclz %v6763_v61  ;;  %v3139_v60 = vsel %vm3137_vm14, %v3138_v63, %v10115_v29  ;;  %v2842_v3 = vshrl.u32 %v2824_v30, %v2840_v54  ;;  %v3291_v4 = vand.u32 2139095040, %v10143_v43 }
 0x38f   : > { %v3140_v50 = vadd.s32 %v3139_v60, %v3135_v37  ;;  %v6770_v9 = vadd.s32 4294967169, %v3188_v21  ;;  %v2957_v62 = vsel %vm2874_vm7, %v2956_v5, %v2955_v24  ;;  %v2846_v11 = vshll.u32 %v2845_v56, 23 }
 0x390   : > { %v6764_v8 = vadd.s32 4294967294, %v3044_v46  ;;  %v13304_v17 = vand.u32 2147483647, %v10143_v43  ;;  %v3292_v12 = vshrl.u32 %v3291_v4, 23  ;;  %v3191_v35 = vand.u32 8388607, %v13303_v18 }
 0x391   : > { %v3141_v1 = vadd.s32 536870912, %v3140_v50  ;;  %v3194_v48 = vadd.s32 1, %v6770_v9  ;;  %v10168_v29 = vsel %vm2666_vm10, %v2750_v7, %v9898_v47  ;;  %7285 = vcosq.f32 %v2752_v38  ;;  %v10241_v7 = vpop.f32.mrb[6].mxu1 }
 0x392   : > { %13592 = vst [vmem:[#allocation31_spill] sm:$0xff] %v10168_v29  ;;  %v2958_v10 = vsub.s32 4, %v9962_v51  ;;  %v2610_v24 = vadd.f32 %v9810_v25, %v9765_v33  ;;  %v10176_v14 = vsel %vm10127_vm8, %v9783_v22, %v2957_v62  ;;  %v10178_v26 = vor.u32 %v2842_v3, %v2841_v13 }
 0x393   : > { %v10180_v42 = vshrl.u32 %v3141_v1, 30  ;;  %v6774_v49 = vadd.s32 4294967169, %v3292_v12  ;;  %7287 = vsinq.f32 %v2752_v38  ;;  %v10182_v0 = vor.u32 4788187, %v2846_v11 }
 0x394   : > { %vm6765_vm12 = vcmp.lt.s32.totalorder %v6764_v8, 0  ;;  %v3295_v47 = vand.u32 8388607, %v13304_v17  ;;  %v3192_v25 = vor.u32 8388608, %v3191_v35  ;;  %vm3195_vm9 = vcmp.gt.s32.totalorder %v3194_v48, 0 }
 0x395   : > { %v3143_v2 = vshll.u32 %v10180_v42, 30  ;;  %v3298_v33 = vadd.s32 1, %v6774_v49  ;;  %v10190_v5 = vsel %vm2874_vm7, %v2958_v10, %v9962_v51  ;;  %7289 = vcosq.f32 %v10176_v14 }
 0x396   : > { %13593 = vst [vmem:[#allocation30_spill] sm:$0xff] %v10190_v5  ;;  %v3032_v54 = vadd.s32 %v10060_v28, %v10065_v6  ;;  %v10196_v56 = vadd.f32 %v9780_v40, %v2610_v24  ;;  %v10199_v63 = vsel %vm6765_vm12, 0, %v6764_v8  ;;  %v3296_v30 = vor.u32 8388608, %v3295_v47 }
 0x397   : > { %v10201_v21 = vsub.s32 %v3140_v50, %v3143_v2  ;;  %vm3299_vm6 = vcmp.gt.s32.totalorder %v3298_v33, 0  ;;  %v3196_v37 = vsel %vm3195_vm9, %v3194_v48, 0  ;;  %v10206_v38 = vadd.s32 %v10114_v52, %v10123_v58 }
 0x398   : > { %v3300_v51 = vsel %vm3299_vm6, %v3298_v33, 0  ;;  %v10209_v28 = vshll.u32 %v3192_v25, 8  ;;  %v3048_v13 = vsub.s32 32, %v10199_v63  ;;  %v3395_v3 = vand.u32 2139095040, %v10196_v56 }
 0x399   : > { %v3146_v6 = vsub.s32 0, %v10201_v21  ;;  %v3302_v40 = vand.u32 31, %v3300_v51  ;;  %v3052_v50 = vsub.s32 4294967266, %v10199_v63  ;;  %v10218_v58 = vand.u32 31, %v3196_v37 }
 0x39a   : > { %v3301_v62 = vshrl.u32 %v3300_v51, 5  ;;  %v10224_v1 = vshll.u32 %v3296_v30, 8  ;;  %v3050_v18 = vshrl.u32 %v3032_v54, %v3048_v13  ;;  %7291 = vsinq.f32 %v10176_v14 }
 0x39b   : > { %v6767_v4 = vmin.u32 %v3146_v6, %v10201_v21  ;;  %v3303_v52 = vsub.s32 32, %v3302_v40  ;;  %v10220_v9 = vpop.eup %7285  ;;  %v3305_v11 = vshll.u32 %v13423_v59, %v3302_v40  ;;  %v3308_v8 = vshll.u32 %v13424_v55, %v3302_v40 }
 0x39c   : > { %13594 = vst [vmem:[#allocation29_spill] sm:$0xff] %v10220_v9  ;;  %v3311_v10 = vshll.u32 %v13425_v45, %v3302_v40  ;;  %v3314_v47 = vshll.u32 %v13426_v34, %v3302_v40  ;;  %v3317_v51 = vshll.u32 %v13427_v19, %v3302_v40  ;;  %v10237_v6 = vsub.s32 32, %v10218_v58 }
 0x39d   : > { %v3148_v12 = vclz %v6767_v4  ;;  %v3306_v35 = vshrl.u32 %v13424_v55, %v3303_v52  ;;  %v3309_v48 = vshrl.u32 %v13425_v45, %v3303_v52  ;;  %v10229_v24 = vpop.eup %7287  ;;  %v3312_v49 = vshrl.u32 %v13426_v34, %v3303_v52 }
 0x39e   : > { %13595 = vst [vmem:[#allocation49_spill] sm:$0xff] %v10229_v24  ;;  %v3315_v2 = vshrl.u32 %v13427_v19, %v3303_v52  ;;  %v3318_v33 = vshrl.u32 %v13428_v41, %v3303_v52  ;;  %v3304_v46 = vshrl.u32 %v13423_v59, %v3303_v52  ;;  %vm3323_vm0 = vcmp.lt.s32.totalorder %v3301_v62, 4 }
 0x39f   : > { %v6768_v25 = vadd.s32 4294967294, %v3148_v12  ;;  %v3307_v30 = vor.u32 %v3306_v35, %v3305_v11  ;;  %v10239_v4 = vpop.eup %7289  ;;  %v3310_v17 = vor.u32 %v3309_v48, %v3308_v8  ;;  %v3313_v60 = vor.u32 %v3312_v49, %v3311_v10 }
 0x3a0   : > { %13596 = vst [vmem:[#allocation46_spill] sm:$0xff] %v10239_v4  ;;  %v3316_v61 = vor.u32 %v3315_v2, %v3314_v47  ;;  %v3319_v22 = vor.u32 %v3318_v33, %v3317_v51  ;;  %v10244_v12 = vadd.s32 127, %v3052_v50  ;;  %vm3320_vm10 = vcmp.lt.s32.totalorder %v3301_v62, 1 }
 0x3a1   : > { %vm6769_vm2 = vcmp.lt.s32.totalorder %v6768_v25, 0  ;;  %v3325_v40 = vsel %vm3323_vm0, %v3313_v60, 2102212464  ;;  %vm3322_vm5 = vcmp.lt.s32.totalorder %v3301_v62, 3  ;;  %v3324_v4 = vsel %vm3320_vm10, %v3304_v46, %v3307_v30 }
 0x3a2   : > { %v3151_v11 = vsel %vm6769_vm2, 0, %v6768_v25  ;;  %v3202_v54 = vshrl.u32 %v13424_v55, %v10237_v6  ;;  %v3326_v13 = vsel %vm3322_vm5, %v3310_v17, %v3325_v40  ;;  %v3328_v8 = vsel %vm3320_vm10, %v3307_v30, %v3310_v17 }
 0x3a3   : > { %v3156_v35 = vsub.s32 4294967266, %v3151_v11  ;;  %v3329_v48 = vsel %vm3323_vm0, %v3316_v61, 920167782  ;;  %v3332_v10 = vsel %vm3320_vm10, %v3310_v17, %v3313_v60  ;;  %v3152_v52 = vsub.s32 32, %v3151_v11 }
 0x3a4   : > { %vm3321_vm15 = vcmp.lt.s32.totalorder %v3301_v62, 2  ;;  %v3330_v49 = vsel %vm3322_vm5, %v3313_v60, %v3329_v48  ;;  %v3333_v50 = vsel %vm3323_vm0, %v3319_v22, 1326507024  ;;  %v10251_v25 = vshrl.u32 %v3196_v37, 5 }
 0x3a5   : > { %v3157_v47 = vadd.s32 127, %v3156_v35  ;;  %v3331_v2 = vsel %vm3321_vm15, %v3328_v8, %v3330_v49  ;;  %v3334_v33 = vsel %vm3322_vm5, %v3316_v61, %v3333_v50  ;;  %v3327_v51 = vsel %vm3321_vm15, %v3324_v4, %v3326_v13 }
 0x3a6   : > { %v3335_v46 = vsel %vm3321_vm15, %v3332_v10, %v3334_v33  ;;  %v3201_v57 = vshll.u32 %v13423_v59, %v10218_v58  ;;  %v3396_v40 = vshrl.u32 %v3395_v3, 23  ;;  %v3154_v22 = vshrl.u32 %v10206_v38, %v3152_v52 }
 0x3a7   : > { %v10256_v30 = vmul.u32.u64.low %v10224_v1, %v3335_v46  ;;  %v10257_v5 = vmul.u32.u64.high %v10224_v1, %v3335_v46, %v10256_v30  ;;  %v10260_v17 = vmul.u32.u64.low %v10224_v1, %v3331_v2  ;;  %v10261_v60 = vmul.u32.u64.high %v10224_v1, %v3331_v2, %v10260_v17 }
 0x3a8   : > { %v3203_v61 = vor.u32 %v3202_v54, %v3201_v57  ;;  %v3204_v37 = vshll.u32 %v13424_v55, %v10218_v58  ;;  %v3205_v62 = vshrl.u32 %v13425_v45, %v10237_v6  ;;  %v3158_v4 = vshll.u32 %v3157_v47, 23 }
 0x3a9   : > { %v3207_v3 = vshll.u32 %v13425_v45, %v10218_v58  ;;  %v3208_v35 = vshrl.u32 %v13426_v34, %v10237_v6  ;;  %v3211_v13 = vshrl.u32 %v13427_v19, %v10237_v6  ;;  %v3210_v57 = vshll.u32 %v13426_v34, %v10218_v58 }
 0x3aa   : > { %v3206_v8 = vor.u32 %v3205_v62, %v3204_v37  ;;  %v3213_v38 = vshll.u32 %v13427_v19, %v10218_v58  ;;  %v3214_v54 = vshrl.u32 %v13428_v41, %v10237_v6  ;;  %v3153_v48 = vshll.u32 %v10201_v21, %v3151_v11 }
 0x3ab   : > { %vm3345_vm1 = vc.u32 %v10257_v5, %v10260_v17  ;;  %v3346_v10 = vadd.s32 1, %v10261_v60  ;;  %v3209_v52 = vor.u32 %v3208_v35, %v3207_v3  ;;  %v13597_v49 = vshll.u32 %v10111_v31, %v10199_v63 }
 0x3ac   : > { %v3343_v47 = vmul.u32 %v10224_v1, %v3327_v51  ;;  %v3212_v2 = vor.u32 %v3211_v13, %v3210_v57  ;;  %v3215_v33 = vor.u32 %v3214_v54, %v3213_v38  ;;  %v3054_v58 = vshll.u32 %v10244_v12, 23 }
 0x3ad   : > { %v3051_v50 = vor.u32 %v3050_v18, %v13597_v49  ;;  %v3155_v46 = vor.u32 %v3154_v22, %v3153_v48  ;;  %v3347_v30 = vsel %vm3345_vm1, %v3346_v10, %v10261_v60  ;;  %vm3216_vm13 = vcmp.lt.s32.totalorder %v10251_v25, 1  ;;  %v10319_v10 = vpop.permute.xlu0 %2385 }
 0x3ae   : > { %v3159_v21 = vor.u32 4788187, %v3158_v4  ;;  %v3348_v11 = vadd.s32 %v3347_v30, %v3343_v47  ;;  %vm3219_vm7 = vcmp.lt.s32.totalorder %v10251_v25, 4  ;;  %v3224_v37 = vsel %vm3216_vm13, %v3203_v61, %v3206_v8 }
 0x3af   : > { %vm3218_vm14 = vcmp.lt.s32.totalorder %v10251_v25, 3  ;;  %v3225_v18 = vsel %vm3219_vm7, %v3212_v2, 920167782  ;;  %v3228_v31 = vsel %vm3216_vm13, %v3206_v8, %v3209_v52  ;;  %v3229_v63 = vsel %vm3219_vm7, %v3215_v33, 1326507024 }
 0x3b0   : > { %v3349_v1 = vadd.s32 536870912, %v3348_v11  ;;  %vm3217_vm12 = vcmp.lt.s32.totalorder %v10251_v25, 2  ;;  %v3221_v12 = vsel %vm3219_vm7, %v3209_v52, 2102212464  ;;  %v3226_v51 = vsel %vm3218_vm14, %v3209_v52, %v3225_v18  ;;  %v13601_v25 = vld [vmem:[#allocation41_spill] sm:$0xff] }
 0x3b1   : > { %v3055_v60 = vor.u32 4788187, %v3054_v58  ;;  %v3200_v22 = vshrl.u32 %v13423_v59, %v10237_v6  ;;  %v3227_v62 = vsel %vm3217_vm12, %v3224_v37, %v3226_v51  ;;  %v3230_v4 = vsel %vm3218_vm14, %v3212_v2, %v3229_v63 }
 0x3b2   : > { %v3160_v3 = vand.u32 2147483647, %v3159_v21  ;;  %v10307_v35 = vshrl.u32 %v3349_v1, 30  ;;  %v3231_v13 = vsel %vm3217_vm12, %v3228_v31, %v3230_v4  ;;  %v6778_v57 = vadd.s32 4294967169, %v3396_v40  ;;  %v10342_v31 = vpop.f32.mrb[7].mxu0 }
 0x3b3   : > { %v3220_v38 = vsel %vm3216_vm13, %v3200_v22, %v3203_v61  ;;  %v3222_v54 = vsel %vm3218_vm14, %v3206_v8, %v3221_v12  ;;  %v10316_v6 = vmul.u32.u64.low %v10209_v28, %v3231_v13  ;;  %v10317_v48 = vmul.u32.u64.high %v10209_v28, %v3231_v13, %v10316_v6  ;;  %v10352_v12 = vpop.permute.xlu0 %2640 }
 0x3b4   : > { %v3162_v52 = vcvt.s32.f32 %v3155_v46  ;;  %v3351_v49 = vshll.u32 %v10307_v35, 30  ;;  %v10323_v47 = vmul.u32.u64.low %v10209_v28, %v3227_v62  ;;  %v10324_v2 = vmul.u32.u64.high %v10209_v28, %v3227_v62, %v10323_v47 }
 0x3b5   : > { %v13598_v40 = vand.u32 2147483647, %v10182_v0  ;;  %v13599_v61 = vcvt.s32.f32 %v10178_v26  ;;  %v3056_v33 = vand.u32 2147483647, %v3055_v60  ;;  %v3402_v58 = vadd.s32 1, %v6778_v57 }
 0x3b6   : > { %v10334_v30 = vmul.f32 %v3162_v52, %v3160_v3  ;;  %v10336_v46 = vsub.s32 %v3348_v11, %v3351_v49  ;;  %v3223_v21 = vsel %vm3217_vm12, %v3220_v38, %v3222_v54  ;;  %v13600_v37 = vand.u32 2147483647, %v10196_v56 }
 0x3b7   : > { %v10332_v8 = vmul.f32 %v13599_v61, %v13598_v40  ;;  %v3058_v14 = vcvt.s32.f32 %v3051_v50  ;;  %vm3241_vm9 = vc.u32 %v10317_v48, %v10323_v47  ;;  %vm3403_vm6 = vcmp.gt.s32.totalorder %v3402_v58, 0 }
 0x3b8   : > { %v3399_v18 = vand.u32 8388607, %v13600_v37  ;;  %v2525_v26 = vadd.f32 %v9785_v32, %v10023_v53  ;;  %v3354_v0 = vsub.s32 0, %v10336_v46  ;;  %v3242_v11 = vadd.s32 1, %v10324_v2 }
 0x3b9   : > { %v3404_v63 = vsel %vm3403_vm6, %v3402_v58, 0  ;;  %v2527_v1 = vadd.f32 %v13601_v25, %v10069_v15  ;;  %v10354_v51 = vmul.f32 %v3058_v14, %v3056_v33  ;;  %v10358_v50 = vadd.s32 %v10260_v17, %v10257_v5  ;;  %v10378_v58 = vpop.eup %7291 }
 0x3ba   : > { %v3239_v60 = vmul.u32 %v10209_v28, %v3223_v21  ;;  %v3406_v22 = vand.u32 31, %v3404_v63  ;;  %v6775_v53 = vmin.u32 %v3354_v0, %v10336_v46  ;;  %v3243_v62 = vsel %vm3241_vm9, %v3242_v11, %v10324_v2  ;;  %13603 = vst [vmem:[#allocation23_spill] sm:$0xff] %v10378_v58 }
 0x3bb   : > { %v3400_v4 = vor.u32 8388608, %v3399_v18  ;;  %v10364_v15 = vshrl.u32 %v3404_v63, 5  ;;  %v10367_v57 = vadd.f32 %v10352_v12, %v2525_v26  ;;  %v10383_v14 = vadd.f32 %v10352_v12, %v2527_v1 }
 0x3bc   : > { %v3244_v3 = vadd.s32 %v3243_v62, %v3239_v60  ;;  %v3407_v13 = vsub.s32 32, %v3406_v22  ;;  %v3356_v38 = vclz %v6775_v53  ;;  %v3409_v5 = vshll.u32 %v13423_v59, %v3406_v22 }
 0x3bd   : > { %13602 = vst [vmem:[#allocation43_spill] sm:$0xff] %v10367_v57  ;;  %v3412_v28 = vshll.u32 %v13424_v55, %v3406_v22  ;;  %v3415_v17 = vshll.u32 %v13425_v45, %v3406_v22  ;;  %v3418_v49 = vshll.u32 %v13426_v34, %v3406_v22  ;;  %v3421_v11 = vshll.u32 %v13427_v19, %v3406_v22 }
 0x3be   : > { %v3245_v54 = vadd.s32 536870912, %v3244_v3  ;;  %v3410_v6 = vshrl.u32 %v13424_v55, %v3407_v13  ;;  %v3413_v52 = vshrl.u32 %v13425_v45, %v3407_v13  ;;  %v6776_v2 = vadd.s32 4294967294, %v3356_v38 }
 0x3bf   : > { %v3416_v40 = vshrl.u32 %v13426_v34, %v3407_v13  ;;  %v3419_v61 = vshrl.u32 %v13427_v19, %v3407_v13  ;;  %v3422_v33 = vshrl.u32 %v13428_v41, %v3407_v13  ;;  %v3440_v60 = vshll.u32 %v3400_v4, 8 }
 0x3c0   : > { %v10380_v21 = vshrl.u32 %v3245_v54, 30  ;;  %v3411_v37 = vor.u32 %v3410_v6, %v3409_v5  ;;  %v3414_v18 = vor.u32 %v3413_v52, %v3412_v28  ;;  %vm6777_vm2 = vcmp.lt.s32.totalorder %v6776_v2, 0  ;;  %v13604_v5 = vld [vmem:[#allocation27_spill] sm:$0xff]  ;;  %v13605_v52 = vld [vmem:[#allocation22_spill] sm:$0xff] }
 0x3c1   : > { %v3417_v26 = vor.u32 %v3416_v40, %v3415_v17  ;;  %v3420_v0 = vor.u32 %v3419_v61, %v3418_v49  ;;  %v3359_v63 = vsel %vm6777_vm2, 0, %v6776_v2  ;;  %v3499_v53 = vand.u32 2139095040, %v10367_v57 }
 0x3c2   : > { %v3247_v25 = vshll.u32 %v10380_v21, 30  ;;  %v3364_v62 = vsub.s32 4294967266, %v3359_v63  ;;  %v3423_v38 = vor.u32 %v3422_v33, %v3421_v11  ;;  %vm3424_vm0 = vcmp.lt.s32.totalorder %v10364_v15, 1 }
 0x3c3   : > { %vm3427_vm10 = vcmp.lt.s32.totalorder %v10364_v15, 4  ;;  %vm3082_vm5 = vcmp.lt.s32.totalorder %v13604_v5, 0  ;;  %v3408_v28 = vshrl.u32 %v13423_v59, %v3407_v13  ;;  %v3432_v4 = vsel %vm3424_vm0, %v3411_v37, %v3414_v18 }
 0x3c4   : > { %v10391_v1 = vsub.s32 %v3244_v3, %v3247_v25  ;;  %v3429_v22 = vsel %vm3427_vm10, %v3417_v26, 2102212464  ;;  %v3360_v17 = vsub.s32 32, %v3359_v63  ;;  %v3365_v54 = vadd.s32 127, %v3364_v62 }
 0x3c5   : > { %vm3426_vm15 = vcmp.lt.s32.totalorder %v10364_v15, 3  ;;  %v3433_v6 = vsel %vm3427_vm10, %v3420_v0, 920167782  ;;  %vm2770_vm1 = vcmp.lt.s32.totalorder %v13605_v52, 0  ;;  %vm3425_vm13 = vcmp.lt.s32.totalorder %v10364_v15, 2 }
 0x3c6   : > { %v3250_v3 = vsub.s32 0, %v10391_v1  ;;  %v3434_v13 = vsel %vm3426_vm15, %v3417_v26, %v3433_v6  ;;  %v3436_v49 = vsel %vm3424_vm0, %v3414_v18, %v3417_v26  ;;  %v13606_v2 = vand.u32 2147483647, %v13604_v5 }
 0x3c7   : > { %v13607_v40 = vmov 0  ;;  %v3428_v61 = vsel %vm3424_vm0, %v3408_v28, %v3411_v37  ;;  %v3430_v33 = vsel %vm3426_vm15, %v3414_v18, %v3429_v22  ;;  %v3435_v11 = vsel %vm3425_vm13, %v3432_v4, %v3434_v13 }
 0x3c8   : > { %vm10408_vm7 = vcmp.le.f32.partialorder %v13606_v2, 0.7853982  ;;  %v3437_v25 = vsel %vm3427_vm10, %v3423_v38, 1326507024  ;;  %v6771_v62 = vmin.u32 %v3250_v3, %v10391_v1  ;;  %v13610_v2 = vld [vmem:[#allocation48_spill] sm:$0xff]  ;;  %v3362_v58 = vshrl.u32 %v10358_v50, %v3360_v17 }
 0x3c9   : > { %v13608_v40 = vsel %vm10408_vm7, 4294967295, %v13607_v40  ;;  %v3438_v6 = vsel %vm3426_vm15, %v3420_v0, %v3437_v25  ;;  %v10419_v26 = vmul.u32.u64.low %v3440_v60, %v3435_v11  ;;  %v10420_v32 = vmul.u32.u64.high %v3440_v60, %v3435_v11, %v10419_v26 }
 0x3ca   : > { %13609 = vst [vmem:[#allocation37_spill] sm:$0xff] %v13608_v40  ;;  %vm13343_vm14 = vcmp.lt.s32.totalorder %v13610_v2, 0  ;;  %v3366_v9 = vshll.u32 %v3365_v54, 23  ;;  %v3439_v37 = vsel %vm3425_vm13, %v3436_v49, %v3438_v6  ;;  %v13312_v18 = vand.u32 2147483647, %v10367_v57 }
 0x3cb   : > { %v3252_v28 = vclz %v6771_v62  ;;  %v10428_v22 = vmul.u32.u64.low %v3440_v60, %v3439_v37  ;;  %v10429_v38 = vmul.u32.u64.high %v3440_v60, %v3439_v37, %v10428_v22  ;;  %v3500_v4 = vshrl.u32 %v3499_v53, 23 }
 0x3cc   : > { %v2852_v0 = vxor.u32 2147483648, %v10332_v8  ;;  %v3166_v3 = vsub.s32 4, %v10180_v42  ;;  %v3361_v13 = vshll.u32 %v10336_v46, %v3359_v63  ;;  %v3431_v50 = vsel %vm3425_vm13, %v3428_v61, %v3430_v33 }
 0x3cd   : > { %v6772_v17 = vadd.s32 4294967294, %v3252_v28  ;;  %v3450_v54 = vadd.s32 1, %v10420_v32  ;;  %v6782_v49 = vadd.s32 4294967169, %v3500_v4  ;;  %v3603_v11 = vand.u32 2139095040, %v10383_v14 }
 0x3ce   : > { %v3060_v25 = vxor.u32 2147483648, %v10354_v51  ;;  %v13611_v53 = vxor.u32 2147483648, %v10334_v30  ;;  %v3367_v6 = vor.u32 4788187, %v3366_v9  ;;  %v3503_v46 = vand.u32 8388607, %v13312_v18 }
 0x3cf   : > { %v3363_v15 = vor.u32 %v3362_v58, %v3361_v13  ;;  %v3447_v63 = vmul.u32 %v3440_v60, %v3431_v50  ;;  %vm3449_vm12 = vc.u32 %v10429_v38, %v10419_v26  ;;  %v3506_v61 = vadd.s32 1, %v6782_v49  ;;  %v13612_v60 = vld [vmem:[#allocation25_spill] sm:$0xff] }
 0x3d0   : > { %v3165_v62 = vsel %vm3082_vm5, %v13611_v53, %v10334_v30  ;;  %v10451_v33 = vsel %vm2770_vm1, %v2852_v0, %v10332_v8  ;;  %v3451_v37 = vsel %vm3449_vm12, %v3450_v54, %v10420_v32  ;;  %v13311_v28 = vand.u32 2147483647, %v10383_v14 }
 0x3d1   : > { %v3604_v30 = vshrl.u32 %v3603_v11, 23  ;;  %v10458_v9 = vsel %vm10408_vm7, %v13604_v5, %v3165_v62  ;;  %vm6773_vm9 = vcmp.lt.s32.totalorder %v6772_v17, 0  ;;  %v3452_v58 = vadd.s32 %v3451_v37, %v3447_v63 }
 0x3d2   : > { %v10462_v22 = vadd.f32 %v13612_v60, %v10073_v20  ;;  %v3368_v4 = vand.u32 2147483647, %v3367_v6  ;;  %v3504_v13 = vor.u32 8388608, %v3503_v46  ;;  %vm3507_vm6 = vcmp.gt.s32.totalorder %v3506_v61, 0 }
 0x3d3   : > { %v6786_v8 = vadd.s32 4294967169, %v3604_v30  ;;  %v10467_v32 = vsel %vm13343_vm14, %v3060_v25, %v10354_v51  ;;  %v10472_v0 = vsel %vm3082_vm5, %v3166_v3, %v10180_v42  ;;  %v3370_v50 = vcvt.s32.f32 %v3363_v15 }
 0x3d4   : > { %13613 = vst [vmem:[#allocation24_spill] sm:$0xff] %v10472_v0  ;;  %v3453_v54 = vadd.s32 536870912, %v3452_v58  ;;  %v10474_v49 = vsel %vm6773_vm9, 0, %v6772_v17  ;;  %v3508_v20 = vsel %vm3507_vm6, %v3506_v61, 0  ;;  %v10478_v11 = vand.u32 8388607, %v13311_v28 }
 0x3d5   : > { %v3610_v53 = vadd.s32 1, %v6786_v8  ;;  %7293 = vcosq.f32 %v10458_v9  ;;  %v10486_v42 = vadd.f32 %v10352_v12, %v10138_v27  ;;  %v10488_v3 = vmul.f32 %v3370_v50, %v3368_v4 }
 0x3d6   : > { %v10482_v25 = vshrl.u32 %v3453_v54, 30  ;;  %v3240_v17 = vadd.s32 %v10323_v47, %v10317_v48  ;;  %v3510_v62 = vand.u32 31, %v3508_v20  ;;  %v10492_v6 = vshll.u32 %v3504_v13, 8 }
 0x3d7   : > { %13614 = vst [vmem:[#allocation47_spill] sm:$0xff] %v10486_v42  ;;  %v3256_v46 = vsub.s32 32, %v10474_v49  ;;  %v3257_v15 = vshll.u32 %v10391_v1, %v10474_v49  ;;  %v3260_v63 = vsub.s32 4294967266, %v10474_v49  ;;  %v3509_v37 = vshrl.u32 %v3508_v20, 5 }
 0x3d8   : > { %v3455_v61 = vshll.u32 %v10482_v25, 30  ;;  %v3511_v27 = vsub.s32 32, %v3510_v62  ;;  %v3608_v30 = vor.u32 8388608, %v10478_v11  ;;  %vm3611_vm2 = vcmp.gt.s32.totalorder %v3610_v53, 0 }
 0x3d9   : > { %v3513_v48 = vshll.u32 %v13423_v59, %v3510_v62  ;;  %v3516_v47 = vshll.u32 %v13424_v55, %v3510_v62  ;;  %v3519_v4 = vshll.u32 %v13425_v45, %v3510_v62  ;;  %v3522_v50 = vshll.u32 %v13426_v34, %v3510_v62 }
 0x3da   : > { %v10500_v60 = vsub.s32 %v3452_v58, %v3455_v61  ;;  %v3514_v13 = vshrl.u32 %v13424_v55, %v3511_v27  ;;  %v3517_v1 = vshrl.u32 %v13425_v45, %v3511_v27  ;;  %v3520_v8 = vshrl.u32 %v13426_v34, %v3511_v27 }
 0x3db   : > { %v3523_v49 = vshrl.u32 %v13427_v19, %v3511_v27  ;;  %v3525_v58 = vshll.u32 %v13427_v19, %v3510_v62  ;;  %v3526_v20 = vshrl.u32 %v13428_v41, %v3511_v27  ;;  %v3261_v11 = vadd.s32 127, %v3260_v63 }
 0x3dc   : > { %v3458_v54 = vsub.s32 0, %v10500_v60  ;;  %v3515_v61 = vor.u32 %v3514_v13, %v3513_v48  ;;  %v3518_v28 = vor.u32 %v3517_v1, %v3516_v47  ;;  %v3521_v18 = vor.u32 %v3520_v8, %v3519_v4 }
 0x3dd   : > { %v3524_v5 = vor.u32 %v3523_v49, %v3522_v50  ;;  %v3527_v40 = vor.u32 %v3526_v20, %v3525_v58  ;;  %v3612_v0 = vsel %vm3611_vm2, %v3610_v53, 0  ;;  %v3512_v24 = vshrl.u32 %v13423_v59, %v3511_v27 }
 0x3de   : > { %v6779_v51 = vmin.u32 %v3458_v54, %v10500_v60  ;;  %vm3528_vm0 = vcmp.lt.s32.totalorder %v3509_v37, 1  ;;  %vm3529_vm10 = vcmp.lt.s32.totalorder %v3509_v37, 2  ;;  %vm3531_vm5 = vcmp.lt.s32.totalorder %v3509_v37, 4 }
 0x3df   : > { %v10516_v23 = vpop.eup %7293  ;;  %vm3530_vm15 = vcmp.lt.s32.totalorder %v3509_v37, 3  ;;  %v3533_v16 = vsel %vm3531_vm5, %v3521_v18, 2102212464  ;;  %v3536_v63 = vsel %vm3528_vm0, %v3515_v61, %v3518_v28  ;;  %v3532_v48 = vsel %vm3528_vm0, %v3512_v24, %v3515_v61  ;;  %v10524_v24 = vpop.f32.mrb[7].mxu1 }
 0x3e0   : > { %13615 = vst [vmem:[#allocation45_spill] sm:$0xff] %v10516_v23  ;;  %v3460_v62 = vclz %v6779_v51  ;;  %v3537_v47 = vsel %vm3531_vm5, %v3524_v5, 920167782  ;;  %v3540_v4 = vsel %vm3528_vm0, %v3518_v28, %v3521_v18  ;;  %v3541_v13 = vsel %vm3531_vm5, %v3527_v40, 1326507024 }
 0x3e1   : > { %v3534_v8 = vsel %vm3530_vm15, %v3518_v28, %v3533_v16  ;;  %v3538_v50 = vsel %vm3530_vm15, %v3521_v18, %v3537_v47  ;;  %v3542_v54 = vsel %vm3530_vm15, %v3524_v5, %v3541_v13  ;;  %v3258_v53 = vshrl.u32 %v3240_v17, %v3256_v46 }
 0x3e2   : > { %v6780_v1 = vadd.s32 4294967294, %v3460_v62  ;;  %v3262_v49 = vshll.u32 %v3261_v11, 23  ;;  %v3539_v27 = vsel %vm3529_vm10, %v3536_v63, %v3538_v50  ;;  %v3543_v58 = vsel %vm3529_vm10, %v3540_v4, %v3542_v54 }
 0x3e3   : > { %v10521_v51 = vmul.u32.u64.low %v10492_v6, %v3543_v58  ;;  %v10522_v20 = vmul.u32.u64.high %v10492_v6, %v3543_v58, %v10521_v51  ;;  %v3614_v23 = vand.u32 31, %v3612_v0  ;;  %v3535_v16 = vsel %vm3529_vm10, %v3532_v48, %v3534_v8 }
 0x3e4   : > { %vm6781_vm13 = vcmp.lt.s32.totalorder %v6780_v1, 0  ;;  %v10530_v5 = vmul.u32.u64.low %v10492_v6, %v3539_v27  ;;  %v10531_v40 = vmul.u32.u64.high %v10492_v6, %v3539_v27, %v10530_v5  ;;  %v3448_v18 = vadd.s32 %v10419_v26, %v10429_v38 }
 0x3e5   : > { %v10526_v61 = vsel %vm6781_vm13, 0, %v6780_v1  ;;  %v10539_v17 = vadd.f32 %v10352_v12, %v10462_v22  ;;  %v3615_v46 = vsub.s32 32, %v3614_v23  ;;  %v3372_v11 = vxor.u32 2147483648, %v10488_v3 }
 0x3e6   : > { %v3468_v28 = vsub.s32 4294967266, %v10526_v61  ;;  %v10542_v62 = vor.u32 %v3258_v53, %v3257_v15  ;;  %v10544_v37 = vor.u32 4788187, %v3262_v49  ;;  %v10546_v63 = vshll.u32 %v3608_v30, 8 }
 0x3e7   : > { %13616 = vst [vmem:[#allocation39_spill] sm:$0xff] %v10539_v17  ;;  %v3551_v48 = vmul.u32 %v10492_v6, %v3535_v16  ;;  %vm3553_vm12 = vc.u32 %v10522_v20, %v10530_v5  ;;  %v3613_v26 = vshrl.u32 %v3612_v0, 5  ;;  %v3617_v38 = vshll.u32 %v13423_v59, %v3614_v23 }
 0x3e8   : > { %v3554_v12 = vadd.s32 1, %v10531_v40  ;;  %v3618_v22 = vshrl.u32 %v13424_v55, %v3615_v46  ;;  %v3620_v47 = vshll.u32 %v13424_v55, %v3614_v23  ;;  %v3621_v15 = vshrl.u32 %v13425_v45, %v3615_v46 }
 0x3e9   : > { %v3469_v4 = vadd.s32 127, %v3468_v28  ;;  %v3623_v30 = vshll.u32 %v13425_v45, %v3614_v23  ;;  %v3624_v13 = vshrl.u32 %v13426_v34, %v3615_v46  ;;  %v3627_v6 = vshrl.u32 %v13427_v19, %v3615_v46 }
 0x3ea   : > { %vm3290_vm9 = vcmp.lt.s32.totalorder %v10143_v43, 0  ;;  %v3555_v0 = vsel %vm3553_vm12, %v3554_v12, %v10531_v40  ;;  %v3619_v1 = vor.u32 %v3618_v22, %v3617_v38  ;;  %v3622_v8 = vor.u32 %v3621_v15, %v3620_v47 }
 0x3eb   : > { %v3626_v50 = vshll.u32 %v13426_v34, %v3614_v23  ;;  %v3264_v54 = vand.u32 2147483647, %v10544_v37  ;;  %v3556_v53 = vadd.s32 %v3555_v0, %v3551_v48  ;;  %v3625_v49 = vor.u32 %v3624_v13, %v3623_v30 }
 0x3ec   : > { %vm3632_vm6 = vcmp.lt.s32.totalorder %v3613_v26, 1  ;;  %v3464_v27 = vsub.s32 32, %v10526_v61  ;;  %v3629_v51 = vshll.u32 %v13427_v19, %v3614_v23  ;;  %v3630_v16 = vshrl.u32 %v13428_v41, %v3615_v46 }
 0x3ed   : > { %v3628_v58 = vor.u32 %v3627_v6, %v3626_v50  ;;  %v3470_v28 = vshll.u32 %v3469_v4, 23  ;;  %v3557_v29 = vadd.s32 536870912, %v3556_v53  ;;  %v3616_v40 = vshrl.u32 %v13423_v59, %v3615_v46 }
 0x3ee   : > { %vm3635_vm2 = vcmp.lt.s32.totalorder %v3613_v26, 4  ;;  %v13617_v38 = vand.u32 2147483647, %v10143_v43  ;;  %v13618_v12 = vmov 0  ;;  %v3631_v37 = vor.u32 %v3630_v16, %v3629_v51 }
 0x3ef   : > { %vm3634_vm10 = vcmp.lt.s32.totalorder %v3613_v26, 3  ;;  %v3640_v48 = vsel %vm3632_vm6, %v3619_v1, %v3622_v8  ;;  %v3641_v22 = vsel %vm3635_vm2, %v3628_v58, 920167782  ;;  %v10574_v47 = vshrl.u32 %v3557_v29, 30 }
 0x3f0   : > { %vm10569_vm0 = vcmp.le.f32.partialorder %v13617_v38, 0.7853982  ;;  %vm3633_vm5 = vcmp.lt.s32.totalorder %v3613_v26, 2  ;;  %v3637_v23 = vsel %vm3635_vm2, %v3625_v49, 2102212464  ;;  %v3642_v15 = vsel %vm3634_vm10, %v3625_v49, %v3641_v22 }
 0x3f1   : > { %v13619_v12 = vsel %vm10569_vm0, 4294967295, %v13618_v12  ;;  %v3466_v4 = vshrl.u32 %v3448_v18, %v3464_v27  ;;  %v3643_v46 = vsel %vm3633_vm5, %v3640_v48, %v3642_v15  ;;  %v3644_v30 = vsel %vm3632_vm6, %v3622_v8, %v3625_v49 }
 0x3f2   : > { %13620 = vst [vmem:[#allocation50_spill] sm:$0xff] %v13619_v12  ;;  %v3645_v13 = vsel %vm3635_vm2, %v3631_v37, 1326507024  ;;  %v3465_v6 = vshll.u32 %v10500_v60, %v10526_v61  ;;  %v3559_v0 = vshll.u32 %v10574_v47, 30  ;;  %v3636_v50 = vsel %vm3632_vm6, %v3616_v40, %v3619_v1 }
 0x3f3   : > { %v3646_v51 = vsel %vm3634_vm10, %v3628_v58, %v3645_v13  ;;  %v3638_v16 = vsel %vm3634_vm10, %v3622_v8, %v3637_v23  ;;  %v10584_v38 = vmul.u32.u64.low %v10546_v63, %v3643_v46  ;;  %v10585_v22 = vmul.u32.u64.high %v10546_v63, %v3643_v46, %v10584_v38 }
 0x3f4   : > { %v3647_v29 = vsel %vm3633_vm5, %v3644_v30, %v3646_v51  ;;  %v3373_v18 = vsel %vm3290_vm9, %v3372_v11, %v10488_v3  ;;  %v3266_v49 = vcvt.s32.f32 %v10542_v62  ;;  %v3471_v60 = vor.u32 4788187, %v3470_v28 }
 0x3f5   : > { %v10592_v61 = vsub.s32 %v3556_v53, %v3559_v0  ;;  %v3467_v27 = vor.u32 %v3466_v4, %v3465_v6  ;;  %v10595_v1 = vmul.u32.u64.low %v10546_v63, %v3647_v29  ;;  %v10596_v8 = vmul.u32.u64.high %v10546_v63, %v3647_v29, %v10595_v1 }
 0x3f6   : > { %v3707_v58 = vand.u32 2139095040, %v10486_v42  ;;  %7295 = vsinq.f32 %v10458_v9  ;;  %v3639_v37 = vsel %vm3633_vm5, %v3636_v50, %v3638_v16  ;;  %v13320_v3 = vand.u32 2147483647, %v10486_v42 }
 0x3f7   : > { %v3562_v40 = vsub.s32 0, %v10592_v61  ;;  %v13621_v11 = vsub.s32 4, %v10307_v35  ;;  %v10610_v53 = vmul.f32 %v3266_v49, %v3264_v54  ;;  %v3658_v28 = vadd.s32 1, %v10585_v22 }
 0x3f8   : > { %v3708_v48 = vshrl.u32 %v3707_v58, 23  ;;  %v10616_v9 = vsel %vm10569_vm0, %v10143_v43, %v3373_v18  ;;  %v3472_v26 = vand.u32 2147483647, %v3471_v60  ;;  %v3811_v15 = vand.u32 2139095040, %v10539_v17  ;;  %v13622_v60 = vld [vmem:[#allocation36_spill] sm:$0xff] }
 0x3f9   : > { %v10608_v62 = vsel %vm3290_vm9, %v13621_v11, %v10307_v35  ;;  %v6783_v23 = vmin.u32 %v3562_v40, %v10592_v61  ;;  %v3474_v4 = vcvt.s32.f32 %v3467_v27  ;;  %v3655_v46 = vmul.u32 %v10546_v63, %v3639_v37  ;;  %v13623_v27 = vld [vmem:[#allocation40_spill] sm:$0xff] }
 0x3fa   : > { %vm3657_vm15 = vc.u32 %v10596_v8, %v10584_v38  ;;  %v6790_v35 = vadd.s32 4294967169, %v3708_v48  ;;  %v3711_v13 = vand.u32 8388607, %v13320_v3  ;;  %v13319_v6 = vand.u32 2147483647, %v10539_v17 }
 0x3fb   : > { %v3564_v54 = vclz %v6783_v23  ;;  %v3659_v30 = vsel %vm3657_vm15, %v3658_v28, %v10585_v22  ;;  %7297 = vcosq.f32 %v10616_v9  ;;  %v10629_v16 = vmul.f32 %v3474_v4, %v3472_v26 }
 0x3fc   : > { %v3660_v50 = vadd.s32 %v3659_v30, %v3655_v46  ;;  %v3714_v51 = vadd.s32 1, %v6790_v35  ;;  %v3552_v63 = vadd.s32 %v10530_v5, %v10522_v20  ;;  %v3812_v18 = vshrl.u32 %v3811_v15, 23  ;;  %v13625_v5 = vld [vmem:[#allocation10_spill] sm:$0xff] }
 0x3fd   : > { %v6784_v29 = vadd.s32 4294967294, %v3564_v54  ;;  %v10636_v1 = vadd.f32 %v13623_v27, %v13622_v60  ;;  %v3712_v58 = vor.u32 8388608, %v3711_v13  ;;  %v10640_v37 = vand.u32 8388607, %v13319_v6 }
 0x3fe   : > { %v3661_v49 = vadd.s32 536870912, %v3660_v50  ;;  %vm3715_vm13 = vcmp.gt.s32.totalorder %v3714_v51, 0  ;;  %v10646_v48 = vmul.f32 %v10319_v10, %v13625_v5  ;;  %v6794_v46 = vadd.s32 4294967169, %v3812_v18 }
 0x3ff   : > { %vm6785_vm12 = vcmp.lt.s32.totalorder %v6784_v29, 0  ;;  %v3716_v40 = vsel %vm3715_vm13, %v3714_v51, 0  ;;  %vm13344_vm9 = vcmp.lt.s32.totalorder %v10019_v39, 0  ;;  %7299 = vsinq.f32 %v10616_v9  ;;  %v13628_v9 = vld [vmem:[#allocation33_spill] sm:$0xff] }
 0x400   : > { %v3567_v11 = vsel %vm6785_vm12, 0, %v6784_v29  ;;  %v10642_v28 = vshrl.u32 %v3661_v49, 30  ;;  %v3718_v20 = vand.u32 31, %v3716_v40  ;;  %v10648_v26 = vpop.eup %7295  ;;  %v3717_v4 = vshrl.u32 %v3716_v40, 5 }
 0x401   : > { %v3568_v23 = vsub.s32 32, %v3567_v11  ;;  %v3572_v15 = vsub.s32 4294967266, %v3567_v11  ;;  %v3569_v35 = vshll.u32 %v10592_v61, %v3567_v11  ;;  %v3818_v17 = vadd.s32 1, %v6794_v46 }
 0x402   : > { %13624 = vst [vmem:[#allocation6_spill] sm:$0xff] %v10642_v28  ;;  %v3663_v54 = vshll.u32 %v10642_v28, 30  ;;  %v3719_v30 = vsub.s32 32, %v3718_v20  ;;  %v3721_v13 = vshll.u32 %v13423_v59, %v3718_v20  ;;  %v3724_v49 = vshll.u32 %v13424_v55, %v3718_v20 }
 0x403   : > { %v3570_v51 = vshrl.u32 %v3552_v63, %v3568_v23  ;;  %v3573_v29 = vadd.s32 127, %v3572_v15  ;;  %v3727_v60 = vshll.u32 %v13425_v45, %v3718_v20  ;;  %v3730_v18 = vshll.u32 %v13426_v34, %v3718_v20 }
 0x404   : > { %v10655_v27 = vsub.s32 %v3660_v50, %v3663_v54  ;;  %v3722_v5 = vshrl.u32 %v13424_v55, %v3719_v30  ;;  %v3725_v40 = vshrl.u32 %v13425_v45, %v3719_v30  ;;  %v3728_v6 = vshrl.u32 %v13426_v34, %v3719_v30 }
 0x405   : > { %v3571_v61 = vor.u32 %v3570_v51, %v3569_v35  ;;  %v3574_v11 = vshll.u32 %v3573_v29, 23  ;;  %v3731_v3 = vshrl.u32 %v13427_v19, %v3719_v30  ;;  %v10662_v63 = vpop.eup %7297  ;;  %v3752_v50 = vshll.u32 %v3712_v58, 8 }
 0x406   : > { %13626 = vst [vmem:[#allocation14_spill] sm:$0xff] %v10662_v63  ;;  %v3666_v23 = vsub.s32 0, %v10655_v27  ;;  %v3723_v15 = vor.u32 %v3722_v5, %v3721_v13  ;;  %v3726_v22 = vor.u32 %v3725_v40, %v3724_v49  ;;  %v3729_v0 = vor.u32 %v3728_v6, %v3727_v60 }
 0x407   : > { %v3575_v54 = vor.u32 4788187, %v3574_v11  ;;  %v3732_v28 = vor.u32 %v3731_v3, %v3730_v18  ;;  %v3720_v51 = vshrl.u32 %v13423_v59, %v3719_v30  ;;  %v3733_v29 = vshll.u32 %v13427_v19, %v3718_v20 }
 0x408   : > { %v6787_v35 = vmin.u32 %v3666_v23, %v10655_v27  ;;  %v3734_v43 = vshrl.u32 %v13428_v41, %v3719_v30  ;;  %v3578_v12 = vcvt.s32.f32 %v3571_v61  ;;  %vm3736_vm6 = vcmp.lt.s32.totalorder %v3717_v4, 1 }
 0x409   : > { %v3576_v63 = vand.u32 2147483647, %v3575_v54  ;;  %vm3739_vm2 = vcmp.lt.s32.totalorder %v3717_v4, 4  ;;  %v3744_v5 = vsel %vm3736_vm6, %v3723_v15, %v3726_v22  ;;  %vm3737_vm10 = vcmp.lt.s32.totalorder %v3717_v4, 2 }
 0x40a   : > { %v3668_v13 = vclz %v6787_v35  ;;  %v3735_v58 = vor.u32 %v3734_v43, %v3733_v29  ;;  %v3741_v49 = vsel %vm3739_vm2, %v3729_v0, 2102212464  ;;  %vm3738_vm5 = vcmp.lt.s32.totalorder %v3717_v4, 3  ;;  %v13629_v29 = vld [vmem:[#allocation32_spill] sm:$0xff] }
 0x40b   : > { %v3745_v3 = vsel %vm3739_vm2, %v3732_v28, 920167782  ;;  %v3748_v6 = vsel %vm3736_vm6, %v3726_v22, %v3729_v0  ;;  %v3740_v60 = vsel %vm3736_vm6, %v3720_v51, %v3723_v15  ;;  %v3579_v11 = vmul.f32 %v3578_v12, %v3576_v63 }
 0x40c   : > { %v6788_v46 = vadd.s32 4294967294, %v3668_v13  ;;  %v3746_v40 = vsel %vm3738_vm5, %v3729_v0, %v3745_v3  ;;  %v3749_v18 = vsel %vm3739_vm2, %v3735_v58, 1326507024  ;;  %v3742_v20 = vsel %vm3738_vm5, %v3726_v22, %v3741_v49  ;;  %v13630_v58 = vld [vmem:[#allocation11_spill] sm:$0xff] }
 0x40d   : > { %v3747_v30 = vsel %vm3737_vm10, %v3744_v5, %v3746_v40  ;;  %v3750_v23 = vsel %vm3738_vm5, %v3732_v28, %v3749_v18  ;;  %vm3819_vm15 = vcmp.gt.s32.totalorder %v3818_v17, 0  ;;  %vm3498_vm13 = vcmp.lt.s32.totalorder %v10367_v57, 0 }
 0x40e   : > { %v3751_v61 = vsel %vm3737_vm10, %v3748_v6, %v3750_v23  ;;  %v10672_v54 = vmul.u32.u64.low %v3752_v50, %v3747_v30  ;;  %v10673_v35 = vmul.u32.u64.high %v3752_v50, %v3747_v30, %v10672_v54  ;;  %v13627_v12 = vxor.u32 2147483648, %v10610_v53 }
 0x40f   : > { %v10678_v43 = vmul.u32.u64.low %v3752_v50, %v3751_v61  ;;  %v10679_v15 = vmul.u32.u64.high %v3752_v50, %v3751_v61, %v10678_v43  ;;  %vm6789_vm12 = vcmp.lt.s32.totalorder %v6788_v46, 0  ;;  %v3743_v22 = vsel %vm3737_vm10, %v3740_v60, %v3742_v20 }
 0x410   : > { %v10686_v0 = vsel %vm13344_vm9, %v13627_v12, %v10610_v53  ;;  %v3816_v28 = vor.u32 8388608, %v10640_v37  ;;  %v3580_v63 = vxor.u32 2147483648, %v3579_v11  ;;  %v3820_v51 = vsel %vm3819_vm15, %v3818_v17, 0 }
 0x411   : > { %v2370_v13 = vadd.f32 %v13629_v29, %v13628_v9  ;;  %v2402_v49 = vmul.f32 %v10319_v10, %v13630_v58  ;;  %v13631_v3 = vand.u32 2147483647, %v10367_v57  ;;  %v13632_v53 = vmov 0  ;;  %v10733_v29 = vpop.eup %7299 }
 0x412   : > { %v13635_v4 = vsub.s32 4, %v10574_v47  ;;  %v3762_v37 = vadd.s32 1, %v10673_v35  ;;  %v2416_v6 = vadd.f32 %v10646_v48, %v10636_v1  ;;  %v10711_v60 = vsel %vm6789_vm12, 0, %v6788_v46 }
 0x413   : > { %vm10697_vm6 = vcmp.le.f32.partialorder %v13631_v3, 0.7853982  ;;  %v3759_v40 = vmul.u32 %v3752_v50, %v3743_v22  ;;  %vm3761_vm2 = vc.u32 %v10679_v15, %v10672_v54  ;;  %v3822_v18 = vand.u32 31, %v3820_v51  ;;  %v10738_v3 = vpop.permute.xlu1 %2645 }
 0x414   : > { %v13633_v53 = vsel %vm10697_vm6, 4294967295, %v13632_v53  ;;  %v10706_v17 = vsel %vm3498_vm13, %v13635_v4, %v10574_v47  ;;  %v3656_v20 = vadd.s32 %v10584_v38, %v10596_v8  ;;  %v3763_v30 = vsel %vm3761_vm2, %v3762_v37, %v10673_v35 }
 0x415   : > { %13634 = vst [vmem:[#allocation8_spill] sm:$0xff] %v13633_v53  ;;  %13636 = vst [vmem:[#allocation12_spill] sm:$0xff] %v10706_v17  ;;  %v10718_v23 = vshll.u32 %v3816_v28, 8  ;;  %v2531_v47 = vadd.f32 %v10145_v36, %v2416_v6  ;;  %v3581_v61 = vsel %vm3498_vm13, %v3580_v63, %v3579_v11  ;;  %v3764_v1 = vadd.s32 %v3763_v30, %v3759_v40 }
 0x416   : > { %v3823_v48 = vsub.s32 32, %v3822_v18  ;;  %v2418_v46 = vadd.f32 %v2402_v49, %v2370_v13  ;;  %v3672_v50 = vsub.s32 32, %v10711_v60  ;;  %v3676_v43 = vsub.s32 4294967266, %v10711_v60 }
 0x417   : > { %v3821_v12 = vshrl.u32 %v3820_v51, 5  ;;  %v3825_v22 = vshll.u32 %v13423_v59, %v3822_v18  ;;  %v3765_v38 = vadd.s32 536870912, %v3764_v1  ;;  %v3828_v35 = vshll.u32 %v13424_v55, %v3822_v18 }
 0x418   : > { %v3826_v8 = vshrl.u32 %v13424_v55, %v3823_v48  ;;  %v3829_v36 = vshrl.u32 %v13425_v45, %v3823_v48  ;;  %v3831_v28 = vshll.u32 %v13425_v45, %v3822_v18  ;;  %v3832_v11 = vshrl.u32 %v13426_v34, %v3823_v48 }
 0x419   : > { %v3834_v63 = vshll.u32 %v13426_v34, %v3822_v18  ;;  %v3835_v9 = vshrl.u32 %v13427_v19, %v3823_v48  ;;  %v10735_v51 = vshrl.u32 %v3765_v38, 30  ;;  %v3838_v49 = vshrl.u32 %v13428_v41, %v3823_v48 }
 0x41a   : > { %v3827_v13 = vor.u32 %v3826_v8, %v3825_v22  ;;  %v3830_v58 = vor.u32 %v3829_v36, %v3828_v35  ;;  %v3677_v4 = vadd.s32 127, %v3676_v43  ;;  %v3833_v37 = vor.u32 %v3832_v11, %v3831_v28 }
 0x41b   : > { %v3836_v6 = vor.u32 %v3835_v9, %v3834_v63  ;;  %v3837_v40 = vshll.u32 %v13427_v19, %v3822_v18  ;;  %vm13338_vm10 = vcmp.lt.s32.totalorder %v10196_v56, 0  ;;  %v3584_v30 = vsel %vm10697_vm6, %v10367_v57, %v3581_v61 }
 0x41c   : > { %v3673_v38 = vshll.u32 %v10655_v27, %v10711_v60  ;;  %v3767_v22 = vshll.u32 %v10735_v51, 30  ;;  %v10749_v8 = vadd.f32 %v10738_v3, %v2531_v47  ;;  %vm3840_vm5 = vcmp.lt.s32.totalorder %v3821_v12, 1 }
 0x41d   : > { %v3839_v35 = vor.u32 %v3838_v49, %v3837_v40  ;;  %vm3843_vm15 = vcmp.lt.s32.totalorder %v3821_v12, 4  ;;  %v2620_v43 = vadd.f32 %v10241_v7, %v2418_v46  ;;  %v3674_v18 = vshrl.u32 %v3656_v20, %v3672_v50 }
 0x41e   : > { %v10752_v36 = vsub.s32 %v3764_v1, %v3767_v22  ;;  %v3845_v28 = vsel %vm3843_vm15, %v3833_v37, 2102212464  ;;  %v3848_v11 = vsel %vm3840_vm5, %v3827_v13, %v3830_v58  ;;  %v3678_v61 = vshll.u32 %v3677_v4, 23 }
 0x41f   : > { %v3824_v63 = vshrl.u32 %v13423_v59, %v3823_v48  ;;  %vm3842_vm13 = vcmp.lt.s32.totalorder %v3821_v12, 3  ;;  %v3849_v27 = vsel %vm3843_vm15, %v3836_v6, 920167782  ;;  %vm3841_vm12 = vcmp.lt.s32.totalorder %v3821_v12, 2 }
 0x420   : > { %v3770_v60 = vsub.s32 0, %v10752_v36  ;;  %v3850_v47 = vsel %vm3842_vm13, %v3833_v37, %v3849_v27  ;;  %v3852_v9 = vsel %vm3840_vm5, %v3830_v58, %v3833_v37  ;;  %v3846_v40 = vsel %vm3842_vm13, %v3830_v58, %v3845_v28  ;;  %v13638_v27 = vld [vmem:[#allocation34_spill] sm:$0xff] }
 0x421   : > { %v3844_v49 = vsel %vm3840_vm5, %v3824_v63, %v3827_v13  ;;  %v3851_v7 = vsel %vm3841_vm12, %v3848_v11, %v3850_v47  ;;  %v3853_v20 = vsel %vm3843_vm15, %v3839_v35, 1326507024  ;;  %v3675_v4 = vor.u32 %v3674_v18, %v3673_v38 }
 0x422   : > { %v6791_v1 = vmin.u32 %v3770_v60, %v10752_v36  ;;  %v3854_v46 = vsel %vm3842_vm13, %v3836_v6, %v3853_v20  ;;  %v10762_v50 = vmul.u32.u64.low %v10718_v23, %v3851_v7  ;;  %v10763_v48 = vmul.u32.u64.high %v10718_v23, %v3851_v7, %v10762_v50  ;;  %v13639_v60 = vld [vmem:[#allocation16_spill] sm:$0xff] }
 0x423   : > { %v3679_v22 = vor.u32 4788187, %v3678_v61  ;;  %v3855_v5 = vsel %vm3841_vm12, %v3852_v9, %v3854_v46  ;;  %v3915_v37 = vand.u32 2139095040, %v10749_v8  ;;  %v10773_v35 = vadd.f32 %v10738_v3, %v2620_v43 }
 0x424   : > { %v3772_v13 = vclz %v6791_v1  ;;  %v10769_v58 = vmul.u32.u64.low %v10718_v23, %v3855_v5  ;;  %v10770_v28 = vmul.u32.u64.high %v10718_v23, %v3855_v5, %v10769_v58  ;;  %v13637_v6 = vxor.u32 2147483648, %v10629_v16 }
 0x425   : > { %v3847_v38 = vsel %vm3841_vm12, %v3844_v49, %v3846_v40  ;;  %v13329_v18 = vand.u32 2147483647, %v10749_v8  ;;  %v3916_v61 = vshrl.u32 %v3915_v37, 23  ;;  %v3866_v43 = vadd.s32 1, %v10763_v48 }
 0x426   : > { %v10780_v11 = vsel %vm13338_vm10, %v13637_v6, %v10629_v16  ;;  %v6792_v63 = vadd.s32 4294967294, %v3772_v13  ;;  %v2369_v47 = vadd.f32 %v13639_v60, %v13638_v27  ;;  %7301 = vcosq.f32 %v3584_v30 }
 0x427   : > { %v3680_v9 = vand.u32 2147483647, %v3679_v22  ;;  %v6798_v7 = vadd.s32 4294967169, %v3916_v61  ;;  %v4123_v16 = vand.u32 2139095040, %v10773_v35  ;;  %v3682_v12 = vcvt.s32.f32 %v3675_v4 }
 0x428   : > { %vm6793_vm2 = vcmp.lt.s32.totalorder %v6792_v63, 0  ;;  %v3863_v49 = vmul.u32 %v10718_v23, %v3847_v38  ;;  %vm3865_vm5 = vc.u32 %v10770_v28, %v10762_v50  ;;  %v3919_v1 = vand.u32 8388607, %v13329_v18 }
 0x429   : > { %v3775_v40 = vsel %vm6793_vm2, 0, %v6792_v63  ;;  %v3867_v20 = vsel %vm3865_vm5, %v3866_v43, %v10763_v48  ;;  %v3922_v46 = vadd.s32 1, %v6798_v7  ;;  %v3760_v22 = vadd.s32 %v10672_v54, %v10679_v15 }
 0x42a   : > { %v3776_v37 = vsub.s32 32, %v3775_v40  ;;  %v3780_v13 = vsub.s32 4294967266, %v3775_v40  ;;  %v3868_v58 = vadd.s32 %v3867_v20, %v3863_v49  ;;  %7303 = vsinq.f32 %v3584_v30  ;;  %v13641_v30 = vld [vmem:[#allocation18_spill] sm:$0xff] }
 0x42b   : > { %v10799_v4 = vmul.f32 %v3682_v12, %v3680_v9  ;;  %vm3923_vm15 = vcmp.gt.s32.totalorder %v3922_v46, 0  ;;  %v4124_v23 = vshrl.u32 %v4123_v16, 23  ;;  %v3777_v48 = vshll.u32 %v10752_v36, %v3775_v40 }
 0x42c   : > { %v3778_v6 = vshrl.u32 %v3760_v22, %v3776_v37  ;;  %v3781_v38 = vadd.s32 127, %v3780_v13  ;;  %v3869_v61 = vadd.s32 536870912, %v3868_v58  ;;  %v3924_v63 = vsel %vm3923_vm15, %v3922_v46, 0 }
 0x42d   : > { %v3920_v27 = vor.u32 8388608, %v3919_v1  ;;  %v3926_v60 = vand.u32 31, %v3924_v63  ;;  %v2401_v9 = vmul.f32 %v10319_v10, %v13641_v30  ;;  %v3925_v16 = vshrl.u32 %v3924_v63, 5 }
 0x42e   : > { %v3782_v7 = vshll.u32 %v3781_v38, 23  ;;  %v10803_v54 = vshrl.u32 %v3869_v61, 30  ;;  %v3779_v12 = vor.u32 %v3778_v6, %v3777_v48  ;;  %v6806_v20 = vadd.s32 4294967169, %v4124_v23 }
 0x42f   : > { %v3927_v49 = vsub.s32 32, %v3926_v60  ;;  %v3929_v36 = vshll.u32 %v13423_v59, %v3926_v60  ;;  %v3932_v40 = vshll.u32 %v13424_v55, %v3926_v60  ;;  %v3935_v1 = vshll.u32 %v13425_v45, %v3926_v60 }
 0x430   : > { %13640 = vst [vmem:[#allocation9_spill] sm:$0xff] %v10803_v54  ;;  %v3871_v46 = vshll.u32 %v10803_v54, 30  ;;  %v10812_v22 = vpop.eup %7301  ;;  %v3783_v37 = vor.u32 4788187, %v3782_v7  ;;  %v3938_v23 = vshll.u32 %v13426_v34, %v3926_v60  ;;  %v3941_v48 = vshll.u32 %v13427_v19, %v3926_v60 }
 0x431   : > { %13642 = vst [vmem:[#allocation13_spill] sm:$0xff] %v10812_v22  ;;  %v3930_v13 = vshrl.u32 %v13424_v55, %v3927_v49  ;;  %v3933_v38 = vshrl.u32 %v13425_v45, %v3927_v49  ;;  %v3936_v6 = vshrl.u32 %v13426_v34, %v3927_v49  ;;  %v3939_v63 = vshrl.u32 %v13427_v19, %v3927_v49 }
 0x432   : > { %v10817_v61 = vsub.s32 %v3868_v58, %v3871_v46  ;;  %v3942_v43 = vshrl.u32 %v13428_v41, %v3927_v49  ;;  %v3960_v57 = vshll.u32 %v3920_v27, 8  ;;  %v2417_v22 = vadd.f32 %v2401_v9, %v2369_v47 }
 0x433   : > { %v3931_v30 = vor.u32 %v3930_v13, %v3929_v36  ;;  %v3934_v5 = vor.u32 %v3933_v38, %v3932_v40  ;;  %v3937_v18 = vor.u32 %v3936_v6, %v3935_v1  ;;  %v3940_v15 = vor.u32 %v3939_v63, %v3938_v23 }
 0x434   : > { %v3874_v7 = vsub.s32 0, %v10817_v61  ;;  %v10824_v17 = vpop.eup %7303  ;;  %vm3706_vm13 = vcmp.lt.s32.totalorder %v10486_v42, 0  ;;  %v3784_v58 = vand.u32 2147483647, %v3783_v37  ;;  %v3786_v46 = vcvt.s32.f32 %v3779_v12 }
 0x435   : > { %13643 = vst [vmem:[#allocation7_spill] sm:$0xff] %v10824_v17  ;;  %v3943_v53 = vor.u32 %v3942_v43, %v3941_v48  ;;  %v4130_v54 = vadd.s32 1, %v6806_v20  ;;  %v3928_v36 = vshrl.u32 %v13423_v59, %v3927_v49  ;;  %vm3944_vm12 = vcmp.lt.s32.totalorder %v3925_v16, 1 }
 0x436   : > { %v6795_v60 = vmin.u32 %v3874_v7, %v10817_v61  ;;  %vm3947_vm2 = vcmp.lt.s32.totalorder %v3925_v16, 4  ;;  %vm3946_vm5 = vcmp.lt.s32.totalorder %v3925_v16, 3  ;;  %v3952_v1 = vsel %vm3944_vm12, %v3931_v30, %v3934_v5 }
 0x437   : > { %v3949_v40 = vsel %vm3947_vm2, %v3937_v18, 2102212464  ;;  %v3953_v13 = vsel %vm3947_vm2, %v3940_v15, 920167782  ;;  %vm3945_vm15 = vcmp.lt.s32.totalorder %v3925_v16, 2  ;;  %v3956_v9 = vsel %vm3944_vm12, %v3934_v5, %v3937_v18 }
 0x438   : > { %v3876_v27 = vclz %v6795_v60  ;;  %v3954_v47 = vsel %vm3946_vm5, %v3937_v18, %v3953_v13  ;;  %v3787_v38 = vmul.f32 %v3786_v46, %v3784_v58  ;;  %v3948_v6 = vsel %vm3944_vm12, %v3928_v36, %v3931_v30 }
 0x439   : > { %v3955_v12 = vsel %vm3945_vm15, %v3952_v1, %v3954_v47  ;;  %v3957_v43 = vsel %vm3947_vm2, %v3943_v53, 1326507024  ;;  %v3950_v37 = vsel %vm3946_vm5, %v3934_v5, %v3949_v40  ;;  %vm4131_vm4 = vcmp.gt.s32.totalorder %v4130_v54, 0 }
 0x43a   : > { %v6796_v20 = vadd.s32 4294967294, %v3876_v27  ;;  %v3958_v23 = vsel %vm3946_vm5, %v3940_v15, %v3957_v43  ;;  %v10831_v63 = vmul.u32.u64.low %v3960_v57, %v3955_v12  ;;  %v10832_v48 = vmul.u32.u64.high %v3960_v57, %v3955_v12, %v10831_v63 }
 0x43b   : > { %v3959_v49 = vsel %vm3945_vm15, %v3956_v9, %v3958_v23  ;;  %v13644_v7 = vand.u32 2147483647, %v10773_v35  ;;  %v4132_v30 = vsel %vm4131_vm4, %v4130_v54, 0  ;;  %v3788_v46 = vxor.u32 2147483648, %v3787_v38 }
 0x43c   : > { %vm6797_vm10 = vcmp.lt.s32.totalorder %v6796_v20, 0  ;;  %v10837_v18 = vmul.u32.u64.low %v3960_v57, %v3959_v49  ;;  %v10838_v58 = vmul.u32.u64.high %v3960_v57, %v3959_v49, %v10837_v18  ;;  %v3951_v5 = vsel %vm3945_vm15, %v3948_v6, %v3950_v37 }
 0x43d   : > { %v4127_v60 = vand.u32 8388607, %v13644_v7  ;;  %v3879_v53 = vsel %vm6797_vm10, 0, %v6796_v20  ;;  %v4134_v15 = vand.u32 31, %v4132_v30  ;;  %vm13342_vm12 = vcmp.lt.s32.totalorder %v10383_v14, 0 }
 0x43e   : > { %v3684_v36 = vxor.u32 2147483648, %v10799_v4  ;;  %v13645_v40 = vand.u32 2147483647, %v10486_v42  ;;  %v13648_v13 = vsub.s32 4, %v10735_v51  ;;  %v3864_v16 = vadd.s32 %v10762_v50, %v10770_v28 }
 0x43f   : > { %v3884_v27 = vsub.s32 4294967266, %v3879_v53  ;;  %v3880_v47 = vsub.s32 32, %v3879_v53  ;;  %v3970_v9 = vadd.s32 1, %v10832_v48  ;;  %v4135_v6 = vsub.s32 32, %v4134_v15 }
 0x440   : > { %vm10845_vm2 = vcmp.le.f32.partialorder %v13645_v40, 0.7853982  ;;  %v10854_v54 = vsel %vm3706_vm13, %v13648_v13, %v10735_v51  ;;  %v2533_v12 = vadd.f32 %v10342_v31, %v2417_v22  ;;  %v3967_v20 = vmul.u32 %v3960_v57, %v3951_v5 }
 0x441   : > { %v3885_v43 = vadd.s32 127, %v3884_v27  ;;  %vm3969_vm4 = vc.u32 %v10838_v58, %v10831_v63  ;;  %v4128_v37 = vor.u32 8388608, %v4127_v60  ;;  %v3789_v51 = vsel %vm3706_vm13, %v3788_v46, %v3787_v38 }
 0x442   : > { %v3971_v23 = vsel %vm3969_vm4, %v3970_v9, %v10832_v48  ;;  %v4138_v50 = vshrl.u32 %v13424_v55, %v4135_v6  ;;  %v4141_v28 = vshrl.u32 %v13425_v45, %v4135_v6  ;;  %v3881_v49 = vshll.u32 %v10817_v61, %v3879_v53 }
 0x443   : > { %v3886_v7 = vshll.u32 %v3885_v43, 23  ;;  %v3972_v18 = vadd.s32 %v3971_v23, %v3967_v20  ;;  %v4133_v31 = vshrl.u32 %v4132_v30, 5  ;;  %v3882_v22 = vshrl.u32 %v3864_v16, %v3880_v47 }
 0x444   : > { %v4137_v57 = vshll.u32 %v13423_v59, %v4134_v15  ;;  %v4140_v5 = vshll.u32 %v13424_v55, %v4134_v15  ;;  %v4144_v60 = vshrl.u32 %v13426_v34, %v4135_v6  ;;  %v4143_v38 = vshll.u32 %v13425_v45, %v4134_v15 }
 0x445   : > { %v3973_v40 = vadd.s32 536870912, %v3972_v18  ;;  %v4146_v48 = vshll.u32 %v13426_v34, %v4134_v15  ;;  %v4147_v46 = vshrl.u32 %v13427_v19, %v4135_v6  ;;  %v4149_v61 = vshll.u32 %v13427_v19, %v4134_v15 }
 0x446   : > { %v4139_v13 = vor.u32 %v4138_v50, %v4137_v57  ;;  %v4142_v27 = vor.u32 %v4141_v28, %v4140_v5  ;;  %v4150_v30 = vshrl.u32 %v13428_v41, %v4135_v6  ;;  %v3887_v53 = vor.u32 4788187, %v3886_v7 }
 0x447   : > { %v3974_v16 = vshrl.u32 %v3973_v40, 30  ;;  %v4145_v47 = vor.u32 %v4144_v60, %v4143_v38  ;;  %v4148_v9 = vor.u32 %v4147_v46, %v4146_v48  ;;  %v10879_v43 = vsel %vm13342_vm12, %v3684_v36, %v10799_v4 }
 0x448   : > { %v3792_v20 = vsel %vm10845_vm2, %v10486_v42, %v3789_v51  ;;  %v4151_v23 = vor.u32 %v4150_v30, %v4149_v61  ;;  %v10885_v50 = vadd.f32 %v10738_v3, %v2533_v12  ;;  %v3883_v15 = vor.u32 %v3882_v22, %v3881_v49 }
 0x449   : > { %v3975_v28 = vshll.u32 %v3974_v16, 30  ;;  %vm4152_vm10 = vcmp.lt.s32.totalorder %v4133_v31, 1  ;;  %vm4155_vm13 = vcmp.lt.s32.totalorder %v4133_v31, 4  ;;  %v4136_v7 = vshrl.u32 %v13423_v59, %v4135_v6 }
 0x44a   : > { %v4160_v57 = vsel %vm4152_vm10, %v4139_v13, %v4142_v27  ;;  %v4161_v5 = vsel %vm4155_vm13, %v4148_v9, 920167782  ;;  %v4168_v60 = vshll.u32 %v4128_v37, 8  ;;  %v3888_v4 = vand.u32 2147483647, %v3887_v53 }
 0x44b   : > { %v10889_v36 = vsub.s32 %v3972_v18, %v3975_v28  ;;  %vm4154_vm5 = vcmp.lt.s32.totalorder %v4133_v31, 3  ;;  %v4157_v40 = vsel %vm4155_vm13, %v4145_v47, 2102212464  ;;  %vm3914_vm15 = vcmp.lt.s32.totalorder %v10749_v8, 0 }
 0x44c   : > { %vm4153_vm4 = vcmp.lt.s32.totalorder %v4133_v31, 2  ;;  %v4162_v12 = vsel %vm4154_vm5, %v4145_v47, %v4161_v5  ;;  %v4164_v51 = vsel %vm4152_vm10, %v4142_v27, %v4145_v47  ;;  %v4165_v49 = vsel %vm4155_vm13, %v4151_v23, 1326507024 }
 0x44d   : > { %v3890_v22 = vcvt.s32.f32 %v3883_v15  ;;  %v3978_v38 = vsub.s32 0, %v10889_v36  ;;  %v4156_v6 = vsel %vm4152_vm10, %v4136_v7, %v4139_v13  ;;  %v4163_v48 = vsel %vm4153_vm4, %v4160_v57, %v4162_v12  ;;  %v13649_v7 = vld [vmem:[#allocation42_spill] sm:$0xff]  ;;  %v13650_v57 = vld [vmem:[#allocation21_spill] sm:$0xff] }
 0x44e   : > { %v4158_v37 = vsel %vm4154_vm5, %v4142_v27, %v4157_v40  ;;  %v4166_v46 = vsel %vm4154_vm5, %v4148_v9, %v4165_v49  ;;  %v10896_v18 = vmul.u32.u64.low %v4168_v60, %v4163_v48  ;;  %v10897_v61 = vmul.u32.u64.high %v4168_v60, %v4163_v48, %v10896_v18 }
 0x44f   : > { %v10899_v30 = vmul.f32 %v3890_v22, %v3888_v4  ;;  %v6799_v53 = vmin.u32 %v3978_v38, %v10889_v36  ;;  %v4167_v28 = vsel %vm4153_vm4, %v4164_v51, %v4166_v46  ;;  %v13339_v47 = vand.u32 2147483647, %v10885_v50  ;;  %v13654_v22 = vld [vmem:[#allocation19_spill] sm:$0xff] }
 0x450   : > { %v10904_v23 = vmul.u32.u64.low %v4168_v60, %v4167_v28  ;;  %v10905_v15 = vmul.u32.u64.high %v4168_v60, %v4167_v28, %v10904_v23  ;;  %v4019_v13 = vand.u32 2139095040, %v10885_v50  ;;  %v2371_v27 = vadd.f32 %v13650_v57, %v13649_v7 }
 0x451   : > { %7305 = vcosq.f32 %v3792_v20  ;;  %v13651_v9 = vand.u32 2147483647, %v10749_v8  ;;  %v3980_v4 = vclz %v6799_v53  ;;  %v3998_v40 = vsub.s32 4, %v3974_v16 }
 0x452   : > { %v4159_v12 = vsel %vm4153_vm4, %v4156_v6, %v4158_v37  ;;  %7307 = vsinq.f32 %v3792_v20  ;;  %v4178_v51 = vadd.s32 1, %v10897_v61  ;;  %v4020_v49 = vshrl.u32 %v4019_v13, 23  ;;  %v13655_v20 = vld [vmem:[#allocation38_spill] sm:$0xff] }
 0x453   : > { %vm10912_vm10 = vcmp.le.f32.partialorder %v13651_v9, 0.7853982  ;;  %v2403_v38 = vmul.f32 %v10319_v10, %v13654_v22  ;;  %v3968_v46 = vadd.s32 %v10831_v63, %v10838_v58  ;;  %v6800_v28 = vadd.s32 4294967294, %v3980_v4 }
 0x454   : > { %v4023_v23 = vand.u32 8388607, %v13339_v47  ;;  %v4175_v53 = vmul.u32 %v4168_v60, %v4159_v12  ;;  %vm4177_vm13 = vc.u32 %v10905_v15, %v10896_v18  ;;  %v6802_v31 = vadd.s32 4294967169, %v4020_v49 }
 0x455   : > { %v2854_v6 = vsub.s32 4, %v13655_v20  ;;  %vm6801_vm5 = vcmp.lt.s32.totalorder %v6800_v28, 0  ;;  %v10929_v37 = vsel %vm3914_vm15, %v3998_v40, %v3974_v16  ;;  %v4179_v10 = vsel %vm4177_vm13, %v4178_v51, %v10897_v61 }
 0x456   : > { %v13656_v13 = vand.u32 2147483647, %v13605_v52  ;;  %v3983_v58 = vsel %vm6801_vm5, 0, %v6800_v28  ;;  %v4180_v60 = vadd.s32 %v4179_v10, %v4175_v53  ;;  %v4026_v7 = vadd.s32 1, %v6802_v31 }
 0x457   : > { %v2419_v57 = vadd.f32 %v2403_v38, %v2371_v27  ;;  %v3984_v9 = vsub.s32 32, %v3983_v58  ;;  %v3988_v4 = vsub.s32 4294967266, %v3983_v58  ;;  %v4024_v12 = vor.u32 8388608, %v4023_v23 }
 0x458   : > { %vm10934_vm4 = vcmp.le.f32.partialorder %v13656_v13, 0.7853982  ;;  %v4181_v40 = vadd.s32 536870912, %v4180_v60  ;;  %vm4027_vm13 = vcmp.gt.s32.totalorder %v4026_v7, 0  ;;  %v2855_v51 = vsel %vm2770_vm1, %v2854_v6, %v13655_v20 }
 0x459   : > { %v2856_v16 = vsel %vm10934_vm4, %v13605_v52, %v10451_v33  ;;  %v2622_v61 = vadd.f32 %v10524_v24, %v2419_v57  ;;  %v3985_v49 = vshll.u32 %v10889_v36, %v3983_v58  ;;  %v3986_v22 = vshrl.u32 %v3968_v46, %v3984_v9  ;;  %v4333_v33 = vld [vmem:[%s13163_s7 + $0x8] sm:$0xff] }
 0x45a   : > { %v3989_v27 = vadd.s32 127, %v3988_v4  ;;  %v4028_v38 = vsel %vm4027_vm13, %v4026_v7, 0  ;;  %v4182_v23 = vshrl.u32 %v4181_v40, 30  ;;  %7309 = vcosq.f32 %v2856_v16  ;;  %4393 = vperm.xlu0 %7214, %v4333_v33   ;;  %4457 = vperm.xlu1 %7215, %v4333_v33   ;;  %v10968_v7 = vld [vmem:[%s13163_s7 + $0x18] sm:$0xff] }
 0x45b   : > { %v4030_v53 = vand.u32 31, %v4028_v38  ;;  %v10953_v24 = vpop.eup %7305  ;;  %v3987_v31 = vor.u32 %v3986_v22, %v3985_v49  ;;  %v10956_v36 = vadd.s32 %v10896_v18, %v10905_v15  ;;  %v10958_v46 = vshll.u32 %v4024_v12, 8 }
 0x45c   : > { %13659 = vst [vmem:[#allocation15_spill] sm:$0xff] %v10953_v24  ;;  %v3990_v20 = vshll.u32 %v3989_v27, 23  ;;  %v10960_v6 = vpop.eup %7307  ;;  %vm4122_vm1 = vcmp.lt.s32.totalorder %v10773_v35, 0  ;;  %v4183_v10 = vshll.u32 %v4182_v23, 30  ;;  %v2857_v58 = vsel %vm10934_vm4, 0, %v2855_v51 }
 0x45d   : > { %13660 = vst [vmem:[#allocation41_spill] sm:$0xff] %v10960_v6  ;;  %v4031_v13 = vsub.s32 32, %v4030_v53  ;;  %7311 = vsinq.f32 %v2856_v16  ;;  %v10970_v15 = vshrl.u32 %v4028_v38, 5  ;;  %v4033_v57 = vshll.u32 %v13423_v59, %v4030_v53 }
 0x45e   : > { %v3991_v18 = vor.u32 4788187, %v3990_v20  ;;  %v10974_v9 = vadd.f32 %v10738_v3, %v2622_v61  ;;  %v3994_v4 = vcvt.s32.f32 %v3987_v31  ;;  %v10976_v12 = vsub.s32 %v4180_v60, %v4183_v10  ;;  %4401 = vperm.xlu0 %7214, %v10968_v7  }
 0x45f   : > { %v4034_v63 = vshrl.u32 %v13424_v55, %v4031_v13  ;;  %v4036_v16 = vshll.u32 %v13424_v55, %v4030_v53  ;;  %v4037_v51 = vshrl.u32 %v13425_v45, %v4031_v13  ;;  %v4039_v49 = vshll.u32 %v13425_v45, %v4030_v53 }
 0x460   : > { %v3992_v40 = vand.u32 2147483647, %v3991_v18  ;;  %v4040_v22 = vshrl.u32 %v13426_v34, %v4031_v13  ;;  %v13661_v27 = vmov 0   ;;  %v4186_v3 = vsub.s32 0, %v10976_v12 }
 0x461   : > { %7216 = vset.pattern.permute.xlu1 %v13661_v27  ;;  %v4206_v61 = vsub.s32 4, %v4182_v23  ;;  %v4035_v60 = vor.u32 %v4034_v63, %v4033_v57  ;;  %v4042_v38 = vshll.u32 %v13426_v34, %v4030_v53  ;;  %v13662_v20 = vand.u32 2147483647, %v10773_v35 }
 0x462   : > { %4353 = vperm.xlu1 %7216, %v10968_v7   ;;  %v3995_v31 = vmul.f32 %v3994_v4, %v3992_v40  ;;  %v4038_v18 = vor.u32 %v4037_v51, %v4036_v16  ;;  %v4041_v48 = vor.u32 %v4040_v22, %v4039_v49  ;;  %v4043_v47 = vshrl.u32 %v13427_v19, %v4031_v13  ;;  %v4334_v4 = vld [vmem:[%s13163_s7 + $0x10] sm:$0xff] }
 0x463   : > { %vm10990_vm5 = vcmp.le.f32.partialorder %v13662_v20, 0.7853982  ;;  %v6807_v28 = vmin.u32 %v4186_v3, %v10976_v12  ;;  %v4045_v42 = vshll.u32 %v13427_v19, %v4030_v53  ;;  %v4046_v57 = vshrl.u32 %v13428_v41, %v4031_v13  ;;  %7218 = vset.pattern.permute.xlu0 %v13661_v27 }
 0x464   : > { %v2861_v63 = vadd.s32 3, %v2857_v58  ;;  %v3996_v40 = vxor.u32 2147483648, %v3995_v31  ;;  %v4044_v20 = vor.u32 %v4043_v47, %v4042_v38  ;;  %v4227_v16 = vand.u32 2139095040, %v10974_v9  ;;  %v11004_v51 = vpop.eup %7309  ;;  %4343 = vperm.xlu0 %7218, %v4333_v33  }
 0x465   : > { %v4188_v49 = vclz %v6807_v28  ;;  %v4047_v22 = vor.u32 %v4046_v57, %v4045_v42  ;;  %vm4048_vm4 = vcmp.lt.s32.totalorder %v10970_v15, 1  ;;  %vm4051_vm13 = vcmp.lt.s32.totalorder %v10970_v15, 4 }
 0x466   : > { %v13665_v53 = vmov 1   ;;  %v4207_v47 = vsel %vm4122_vm1, %v4206_v61, %v4182_v23  ;;  %v4032_v58 = vshrl.u32 %v13423_v59, %v4031_v13  ;;  %v4053_v3 = vsel %vm4051_vm13, %v4041_v48, 2102212464 }
 0x467   : > { %7217 = vset.pattern.permute.xlu1 %v13665_v53  ;;  %v4056_v38 = vsel %vm4048_vm4, %v4035_v60, %v4038_v18  ;;  %v11016_v42 = vpop.eup %7311  ;;  %v6808_v28 = vadd.s32 4294967294, %v4188_v49  ;;  %vm4049_vm12 = vcmp.lt.s32.totalorder %v10970_v15, 2  ;;  %vm4050_vm14 = vcmp.lt.s32.totalorder %v10970_v15, 3 }
 0x468   : > { %4397 = vperm.xlu1 %7217, %v4334_v4   ;;  %v4057_v33 = vsel %vm4051_vm13, %v4044_v20, 920167782  ;;  %v3997_v23 = vsel %vm3914_vm15, %v3996_v40, %v3995_v31  ;;  %v4052_v13 = vsel %vm4048_vm4, %v4032_v58, %v4035_v60  ;;  %v4060_v57 = vsel %vm4048_vm4, %v4038_v18, %v4041_v48  ;;  %4348 = vperm.xlu0 %7218, %v4334_v4  }
 0x469   : > { %v4058_v61 = vsel %vm4050_vm14, %v4041_v48, %v4057_v33  ;;  %vm6809_vm9 = vcmp.lt.s32.totalorder %v6808_v28, 0  ;;  %v4054_v53 = vsel %vm4050_vm14, %v4038_v18, %v4053_v3  ;;  %v4061_v24 = vsel %vm4051_vm13, %v4047_v22, 1326507024  ;;  %v4718_v48 = vld [vmem:[%s13164_s8] sm:$0xff] }
 0x46a   : > { %v4059_v49 = vsel %vm4049_vm12, %v4056_v38, %v4058_v61  ;;  %v4191_v6 = vsel %vm6809_vm9, 0, %v6808_v28  ;;  %v4062_v17 = vsel %vm4050_vm14, %v4044_v20, %v4061_v24  ;;  %v13666_v60 = vmov 2  }
 0x46b   : > { %v11033_v31 = vmul.u32.u64.low %v10958_v46, %v4059_v49  ;;  %v11034_v40 = vmul.u32.u64.high %v10958_v46, %v4059_v49, %v11033_v31  ;;  %v4192_v18 = vsub.s32 32, %v4191_v6  ;;  %v4196_v58 = vsub.s32 4294967266, %v4191_v6 }
 0x46c   : > { %7219 = vset.pattern.permute.xlu1 %v13666_v60  ;;  %v4209_v3 = vsel %vm10990_vm5, 0, %v4207_v47  ;;  %v4063_v22 = vsel %vm4049_vm12, %v4060_v57, %v4062_v17  ;;  %v4055_v24 = vsel %vm4049_vm12, %v4052_v13, %v4054_v53  ;;  %v4228_v28 = vshrl.u32 %v4227_v16, 23  ;;  %4724 = vperm.xlu0 %7218, %v4718_v48   ;;  %v4721_v16 = vld [vmem:[%s13164_s8 + $0x18] sm:$0xff] }
 0x46d   : > { %4461 = vperm.xlu1 %7219, %v4334_v4   ;;  %v11047_v20 = vmul.u32.u64.low %v10958_v46, %v4063_v22  ;;  %v11048_v38 = vmul.u32.u64.high %v10958_v46, %v4063_v22, %v11047_v20  ;;  %v4000_v33 = vsel %vm10912_vm10, %v10749_v8, %v3997_v23  ;;  %v4193_v61 = vshll.u32 %v10976_v12, %v4191_v6 }
 0x46e   : > { %v4194_v47 = vshrl.u32 %v10956_v36, %v4192_v18  ;;  %v4197_v49 = vadd.s32 127, %v4196_v58  ;;  %v4074_v17 = vadd.s32 1, %v11034_v40  ;;  %v6810_v4 = vadd.s32 4294967169, %v4228_v28 }
 0x46f   : > { %v13667_v15 = vand.u32 2147483647, %v10974_v9  ;;  %v2862_v57 = vand.u32 3, %v2861_v63  ;;  %v13668_v23 = vsel %vm10912_vm10, 0, %v10929_v37  ;;  %v4071_v53 = vmul.u32 %v10958_v46, %v4055_v24  ;;  %v4719_v46 = vld [vmem:[%s13164_s8 + $0x8] sm:$0xff] }
 0x470   : > { %v11065_v6 = vadd.s32 3, %v13668_v23  ;;  %v4195_v36 = vor.u32 %v4194_v47, %v4193_v61  ;;  %v4198_v12 = vshll.u32 %v4197_v49, 23  ;;  %vm4073_vm14 = vc.u32 %v11048_v38, %v11033_v31  ;;  %4739 = vperm.xlu0 %7218, %v4721_v16  }
 0x471   : > { %v4231_v13 = vand.u32 8388607, %v13667_v15  ;;  %4465 = vperm.xlu1 %7219, %v10968_v7   ;;  %v4234_v60 = vadd.s32 1, %v6810_v4  ;;  %v2865_v63 = vxor.u32 2147483648, %v11016_v42  ;;  %v2868_v48 = vxor.u32 2147483648, %v11004_v51 }
 0x472   : > { %7313 = vcosq.f32 %v4000_v33  ;;  %v4199_v18 = vor.u32 4788187, %v4198_v12  ;;  %v11072_v5 = vadd.s32 3, %v4209_v3  ;;  %v4075_v37 = vsel %vm4073_vm14, %v4074_v17, %v11034_v40  ;;  %v4720_v17 = vld [vmem:[%s13164_s8 + $0x10] sm:$0xff] }
 0x473   : > { %v4076_v58 = vadd.s32 %v4075_v37, %v4071_v53  ;;  %v4232_v7 = vor.u32 8388608, %v4231_v13  ;;  %vm4235_vm9 = vcmp.gt.s32.totalorder %v4234_v60, 0  ;;  %vm2864_vm12 = vcmp.eq.s32.totalorder %v2862_v57, 0 }
 0x474   : > { %v4200_v22 = vand.u32 2147483647, %v4199_v18  ;;  %v4202_v24 = vcvt.s32.f32 %v4195_v36  ;;  %v4236_v20 = vsel %vm4235_vm9, %v4234_v60, 0  ;;  %vm2867_vm15 = vcmp.eq.s32.totalorder %v2862_v57, 2 }
 0x475   : > { %7220 = vset.pattern.permute.xlu1 %v13661_v27  ;;  %v4077_v28 = vadd.s32 536870912, %v4076_v58  ;;  %v4238_v3 = vand.u32 31, %v4236_v20  ;;  %v2866_v61 = vsel %vm2864_vm12, %v11004_v51, %v2865_v63  ;;  %v2869_v40 = vsel %vm2867_vm15, %v2868_v48, %v11016_v42  ;;  %v6423_v48 = vld [vmem:[%s13166_s10] sm:$0x7] }
 0x476   : > { %4729 = vperm.xlu1 %7220, %v4719_v46   ;;  %7315 = vsinq.f32 %v4000_v33  ;;  %v4203_v47 = vmul.f32 %v4202_v24, %v4200_v22  ;;  %v11082_v49 = vadd.s32 %v11033_v31, %v11048_v38  ;;  %vm2863_vm10 = vcmp.lt.s32.totalorder %v2862_v57, 2 }
 0x477   : > { %v11087_v4 = vshrl.u32 %v4077_v28, 30  ;;  %v4239_v27 = vsub.s32 32, %v4238_v3  ;;  %v11089_v15 = vshll.u32 %v4232_v7, 8  ;;  %v13669_v51 = vand.u32 2147483647, %v10019_v39 }
 0x478   : > { %v4237_v33 = vshrl.u32 %v4236_v20, 5  ;;  %v4241_v31 = vshll.u32 %v13423_v59, %v4238_v3  ;;  %v4244_v38 = vshll.u32 %v13424_v55, %v4238_v3  ;;  %v2870_v13 = vsel %vm2863_vm10, %v2866_v61, %v2869_v40 }
 0x479   : > { %vm11093_vm4 = vcmp.le.f32.partialorder %v13669_v51, 0.7853982  ;;  %v4204_v57 = vxor.u32 2147483648, %v4203_v47  ;;  %v4079_v16 = vshll.u32 %v11087_v4, 30  ;;  %v4242_v23 = vshrl.u32 %v13424_v55, %v4239_v27 }
 0x47a   : > { %v4247_v36 = vshll.u32 %v13425_v45, %v4238_v3  ;;  %4734 = vperm.xlu1 %7220, %v4720_v17   ;;  %v4245_v12 = vshrl.u32 %v13425_v45, %v4239_v27  ;;  %v4248_v53 = vshrl.u32 %v13426_v34, %v4239_v27  ;;  %v4250_v60 = vshll.u32 %v13426_v34, %v4238_v3 }
 0x47b   : > { %v4251_v63 = vshrl.u32 %v13427_v19, %v4239_v27  ;;  %v11109_v18 = vsub.s32 %v4076_v58, %v4079_v16  ;;  %v4243_v37 = vor.u32 %v4242_v23, %v4241_v31  ;;  %vm2860_vm13 = vweird.f32 %v13605_v52 }
 0x47c   : > { %v3270_v46 = vsub.s32 4, %v10380_v21  ;;  %v3272_v7 = vsel %vm11093_vm4, %v10019_v39, %v10686_v0  ;;  %v11117_v22 = vpop.eup %7313  ;;  %v4240_v24 = vshrl.u32 %v13423_v59, %v4239_v27  ;;  %v4246_v20 = vor.u32 %v4245_v12, %v4244_v38 }
 0x47d   : > { %v4249_v28 = vor.u32 %v4248_v53, %v4247_v36  ;;  %v4252_v61 = vor.u32 %v4251_v63, %v4250_v60  ;;  %v4082_v58 = vsub.s32 0, %v11109_v18  ;;  %v4253_v40 = vshll.u32 %v13427_v19, %v4238_v3 }
 0x47e   : > { %v4254_v17 = vshrl.u32 %v13428_v41, %v4239_v27  ;;  %vm4256_vm14 = vcmp.lt.s32.totalorder %v4237_v33, 1  ;;  %6426 = vperm.xlu1 %7220, %v6423_v48   ;;  %v4205_v51 = vsel %vm4122_vm1, %v4204_v57, %v4203_v47  ;;  %vm4258_vm9 = vcmp.lt.s32.totalorder %v4237_v33, 3 }
 0x47f   : > { %vm4259_vm12 = vcmp.lt.s32.totalorder %v4237_v33, 4  ;;  %v4260_v0 = vsel %vm4256_vm14, %v4240_v24, %v4243_v37  ;;  %v6803_v31 = vmin.u32 %v4082_v58, %v11109_v18  ;;  %v4264_v23 = vsel %vm4256_vm14, %v4243_v37, %v4246_v20 }
 0x480   : > { %v4255_v16 = vor.u32 %v4254_v17, %v4253_v40  ;;  %v4261_v38 = vsel %vm4259_vm12, %v4249_v28, 2102212464  ;;  %v11126_v36 = vpop.eup %7315  ;;  %v4265_v3 = vsel %vm4259_vm12, %v4252_v61, 920167782  ;;  %v4268_v53 = vsel %vm4256_vm14, %v4246_v20, %v4249_v28 }
 0x481   : > { %v4262_v12 = vsel %vm4258_vm9, %v4246_v20, %v4261_v38  ;;  %vm13672_vm15 = vcmp.lt.s32.totalorder %v10019_v39, 0  ;;  %vm4018_vm1 = vcmp.lt.s32.totalorder %v10885_v50, 0  ;;  %v4084_v47 = vclz %v6803_v31 }
 0x482   : > { %v3271_v27 = vsel %vm13672_vm15, %v3270_v46, %v10380_v21  ;;  %vm4257_vm10 = vcmp.lt.s32.totalorder %v4237_v33, 2  ;;  %v4266_v57 = vsel %vm4258_vm9, %v4249_v28, %v4265_v3  ;;  %v4269_v60 = vsel %vm4259_vm12, %v4255_v16, 1326507024 }
 0x483   : > { %v4263_v63 = vsel %vm4257_vm10, %v4260_v0, %v4262_v12  ;;  %v4267_v48 = vsel %vm4257_vm10, %v4264_v23, %v4266_v57  ;;  %v4270_v37 = vsel %vm4258_vm9, %v4252_v61, %v4269_v60  ;;  %v3273_v24 = vsel %vm11093_vm4, 0, %v3271_v27 }
 0x484   : > { %v6804_v58 = vadd.s32 4294967294, %v4084_v47  ;;  %v4271_v20 = vsel %vm4257_vm10, %v4268_v53, %v4270_v37  ;;  %v11138_v40 = vmul.u32.u64.low %v11089_v15, %v4267_v48  ;;  %v11139_v17 = vmul.u32.u64.high %v11089_v15, %v4267_v48, %v11138_v40 }
 0x485   : > { %v11142_v21 = vmul.u32.u64.low %v11089_v15, %v4271_v20  ;;  %v11143_v46 = vmul.u32.u64.high %v11089_v15, %v4271_v20, %v11142_v21  ;;  %v11147_v28 = vsel %vm2860_vm13, nan, %v2870_v13  ;;  %7317 = vcosq.f32 %v3272_v7 }
 0x486   : > { %v11152_v42 = vsel %vm10990_vm5, %v10773_v35, %v4205_v51  ;;  %vm6805_vm4 = vcmp.lt.s32.totalorder %v6804_v58, 0  ;;  %v4102_v33 = vsub.s32 4, %v11087_v4  ;;  %7319 = vsinq.f32 %v3272_v7 }
 0x487   : > { %v4087_v61 = vsel %vm6805_vm4, 0, %v6804_v58  ;;  %v4279_v0 = vmul.u32 %v11089_v15, %v4263_v63  ;;  %v3277_v31 = vadd.s32 3, %v3273_v24  ;;  %v3062_v16 = vsub.s32 4, %v10102_v44 }
 0x488   : > { %v4088_v38 = vsub.s32 32, %v4087_v61  ;;  %v4092_v52 = vsub.s32 4294967266, %v4087_v61  ;;  %v4282_v13 = vadd.s32 1, %v11139_v17  ;;  %v13673_v23 = vand.u32 2147483647, %v13610_v2 }
 0x489   : > { %v4089_v51 = vshll.u32 %v11109_v18, %v4087_v61  ;;  %vm4281_vm5 = vc.u32 %v11143_v46, %v11138_v40  ;;  %vm13676_vm14 = vcmp.lt.s32.totalorder %v13610_v2, 0  ;;  %7321 = vcosq.f32 %v11152_v42 }
 0x48a   : > { %vm11160_vm13 = vcmp.le.f32.partialorder %v13673_v23, 0.7853982  ;;  %v3063_v15 = vsel %vm13676_vm14, %v3062_v16, %v10102_v44  ;;  %v4090_v12 = vshrl.u32 %v11082_v49, %v4088_v38  ;;  %v4093_v3 = vadd.s32 127, %v4092_v52 }
 0x48b   : > { %v3064_v7 = vsel %vm11160_vm13, %v13610_v2, %v10467_v32  ;;  %v4283_v53 = vsel %vm4281_vm5, %v4282_v13, %v11139_v17  ;;  %v3065_v27 = vsel %vm11160_vm13, 0, %v3063_v15  ;;  %v11181_v18 = vsel %vm4018_vm1, %v4102_v33, %v11087_v4 }
 0x48c   : > { %v4284_v44 = vadd.s32 %v4283_v53, %v4279_v0  ;;  %v3278_v47 = vand.u32 3, %v3277_v31  ;;  %v4091_v57 = vor.u32 %v4090_v12, %v4089_v51  ;;  %v4094_v60 = vshll.u32 %v4093_v3, 23  ;;  %v13684_v12 = vld [vmem:[#allocation31_spill] sm:$0xff] }
 0x48d   : > { %7323 = vcosq.f32 %v3064_v7  ;;  %v3069_v32 = vadd.s32 3, %v3065_v27  ;;  %v13677_v63 = vand.u32 2147483647, %v10196_v56  ;;  %v3478_v37 = vsub.s32 4, %v10482_v25 }
 0x48e   : > { %v4285_v49 = vadd.s32 536870912, %v4284_v44  ;;  %7325 = vsinq.f32 %v3064_v7  ;;  %v13680_v24 = vand.u32 2147483647, %v10885_v50  ;;  %v4095_v58 = vor.u32 4788187, %v4094_v60 }
 0x48f   : > { %vm11185_vm9 = vcmp.le.f32.partialorder %v13677_v63, 0.7853982  ;;  %v11197_v20 = vadd.s32 %v11138_v40, %v11143_v46  ;;  %vm3276_vm15 = vweird.f32 %v10019_v39  ;;  %v7318_v21 = vpop.eup %7317  ;;  %v3070_v61 = vand.u32 3, %v3069_v32 }
 0x490   : > { %vm11192_vm12 = vcmp.le.f32.partialorder %v13680_v24, 0.7853982  ;;  %v3480_v17 = vsel %vm11185_vm9, %v10196_v56, %v10780_v11  ;;  %v11204_v33 = vshrl.u32 %v4285_v49, 30  ;;  %vm13683_vm10 = vcmp.lt.s32.totalorder %v10196_v56, 0  ;;  %v7320_v31 = vpop.eup %7319 }
 0x491   : > { %v3479_v0 = vsel %vm13683_vm10, %v3478_v37, %v10482_v25  ;;  %7327 = vcosq.f32 %v3480_v17  ;;  %v4096_v16 = vand.u32 2147483647, %v4095_v58  ;;  %v4098_v40 = vcvt.s32.f32 %v4091_v57 }
 0x492   : > { %vm3279_vm4 = vcmp.lt.s32.totalorder %v3278_v47, 2  ;;  %v3284_v46 = vxor.u32 2147483648, %v7318_v21  ;;  %v4287_v38 = vshll.u32 %v11204_v33, 30  ;;  %vm3280_vm13 = vcmp.eq.s32.totalorder %v3278_v47, 0 }
 0x493   : > { %v3281_v52 = vxor.u32 2147483648, %v7320_v31  ;;  %vm3283_vm5 = vcmp.eq.s32.totalorder %v3278_v47, 2  ;;  %v4099_v11 = vmul.f32 %v4098_v40, %v4096_v16  ;;  %v3481_v23 = vsel %vm11185_vm9, 0, %v3479_v0  ;;  %v11217_v27 = vpop.eup %7321 }
 0x494   : > { %v3285_v13 = vsel %vm3283_vm5, %v3284_v46, %v7320_v31  ;;  %7329 = vsinq.f32 %v3480_v17  ;;  %v11212_v10 = vsub.s32 %v4284_v44, %v4287_v38  ;;  %vm3071_vm14 = vcmp.lt.s32.totalorder %v3070_v61, 2  ;;  %v13686_v17 = vld [vmem:[#allocation26_spill] sm:$0xff] }
 0x495   : > { %v3282_v25 = vsel %vm3280_vm13, %v7318_v21, %v3281_v52  ;;  %v3485_v51 = vadd.s32 3, %v3481_v23  ;;  %v4100_v15 = vxor.u32 2147483648, %v4099_v11  ;;  %vm3072_vm10 = vcmp.eq.s32.totalorder %v3070_v61, 0  ;;  %v13687_v21 = vld [vmem:[#allocation49_spill] sm:$0xff]  ;;  %v13689_v23 = vld [vmem:[#allocation24_spill] sm:$0xff] }
 0x496   : > { %v3286_v7 = vsel %vm3279_vm4, %v3282_v25, %v3285_v13  ;;  %v2753_v53 = vsel %vm10106_vm3, 0, %v13684_v12  ;;  %v4290_v47 = vsub.s32 0, %v11212_v10  ;;  %v4310_v63 = vsub.s32 4, %v11204_v33 }
 0x497   : > { %v3287_v57 = vsel %vm3276_vm15, nan, %v3286_v7  ;;  %v3486_v60 = vand.u32 3, %v3485_v51  ;;  %v2757_v44 = vadd.s32 3, %v2753_v53  ;;  %v7324_v32 = vpop.eup %7323  ;;  %v4101_v49 = vsel %vm4018_vm1, %v4100_v15, %v4099_v11 }
 0x498   : > { %v6918_v48 = vpack.c.bf16 %v3287_v57, %v11147_v28  ;;  %vm3068_vm9 = vweird.f32 %v13610_v2  ;;  %vm3075_vm3 = vcmp.eq.s32.totalorder %v3070_v61, 2  ;;  %v7326_v37 = vpop.eup %7325  ;;  %v4104_v24 = vsel %vm11192_vm12, %v10885_v50, %v4101_v49  ;;  %v13688_v28 = vld [vmem:[#allocation29_spill] sm:$0xff] }
 0x499   : > { %v6811_v39 = vmin.u32 %v4290_v47, %v11212_v10  ;;  %v3076_v58 = vxor.u32 2147483648, %v7324_v32  ;;  %v2761_v0 = vxor.u32 2147483648, %v13687_v21  ;;  %7331 = vcosq.f32 %v4104_v24 }
 0x49a   : > { %6919 = vmatprep.subr.bf16.mxu0 %v6918_v48  ;;  %v3073_v31 = vxor.u32 2147483648, %v7326_v37  ;;  %v2764_v16 = vxor.u32 2147483648, %v13688_v28  ;;  %vm3488_vm13 = vcmp.eq.s32.totalorder %v3486_v60, 0  ;;  %v2758_v52 = vand.u32 3, %v2757_v44 }
 0x49b   : > { %v7328_v40 = vpop.eup %7327  ;;  %v4292_v46 = vclz %v6811_v39  ;;  %v3077_v38 = vsel %vm3075_vm3, %v3076_v58, %v7326_v37  ;;  %vm3491_vm5 = vcmp.eq.s32.totalorder %v3486_v60, 2  ;;  %v3169_v51 = vsel %vm10408_vm7, 0, %v13689_v23 }
 0x49c   : > { %v3074_v11 = vsel %vm3072_vm10, %v7324_v32, %v3073_v31  ;;  %v3492_v13 = vxor.u32 2147483648, %v7328_v40  ;;  %7333 = vsinq.f32 %v4104_v24  ;;  %vm2760_vm1 = vcmp.eq.s32.totalorder %v2758_v52, 0  ;;  %v13691_v32 = vld [vmem:[#allocation27_spill] sm:$0xff] }
 0x49d   : > { %v6812_v15 = vadd.s32 4294967294, %v4292_v46  ;;  %v3078_v7 = vsel %vm3071_vm14, %v3074_v11, %v3077_v38  ;;  %vm2759_vm15 = vcmp.lt.s32.totalorder %v2758_v52, 2  ;;  %v2762_v3 = vsel %vm2760_vm1, %v13688_v28, %v2761_v0  ;;  %v13695_v11 = vld [vmem:[#allocation45_spill] sm:$0xff] }
 0x49e   : > { %v7330_v12 = vpop.eup %7329  ;;  %vm2763_vm3 = vcmp.eq.s32.totalorder %v2758_v52, 2  ;;  %v3173_v53 = vadd.s32 3, %v3169_v51  ;;  %vm3172_vm10 = vweird.f32 %v13691_v32  ;;  %v3177_v61 = vxor.u32 2147483648, %v10648_v26  ;;  %v13698_v51 = vld [vmem:[#allocation20_spill] sm:$0xff] }
 0x49f   : > { %vm6813_vm4 = vcmp.lt.s32.totalorder %v6812_v15, 0  ;;  %v3489_v47 = vxor.u32 2147483648, %v7330_v12  ;;  %v3493_v57 = vsel %vm3491_vm5, %v3492_v13, %v7330_v12  ;;  %v2765_v44 = vsel %vm2763_vm3, %v2764_v16, %v13687_v21 }
 0x4a0   : > { %v4295_v49 = vsel %vm6813_vm4, 0, %v6812_v15  ;;  %v2766_v48 = vsel %vm2759_vm15, %v2762_v3, %v2765_v44  ;;  %v3174_v37 = vand.u32 3, %v3173_v53  ;;  %v3079_v58 = vsel %vm3068_vm9, nan, %v3078_v7  ;;  %v13699_v15 = vld [vmem:[#allocation23_spill] sm:$0xff] }
 0x4a1   : > { %v4296_v24 = vsub.s32 32, %v4295_v49  ;;  %v4300_v39 = vsub.s32 4294967266, %v4295_v49  ;;  %v3490_v0 = vsel %vm3488_vm13, %v7328_v40, %v3489_v47  ;;  %v4297_v31 = vshll.u32 %v11212_v10, %v4295_v49 }
 0x4a2   : > { %vm13692_vm7 = vcmp.lt.s32.totalorder %v3486_v60, 2  ;;  %vm13693_vm14 = vweird.f32 %v13686_v17  ;;  %vm3175_vm1 = vcmp.lt.s32.totalorder %v3174_v37, 2  ;;  %vm13694_vm15 = vweird.f32 %v10196_v56  ;;  %v13696_v60 = vld [vmem:[#allocation30_spill] sm:$0xff] }
 0x4a3   : > { %v3494_v28 = vsel %vm13692_vm7, %v3490_v0, %v3493_v57  ;;  %v2767_v21 = vsel %vm13693_vm14, nan, %v2766_v48  ;;  %v4298_v16 = vshrl.u32 %v11197_v20, %v4296_v24  ;;  %v4301_v46 = vadd.s32 127, %v4300_v39  ;;  %v11254_v52 = vpop.eup %7331  ;;  %v13704_v48 = vld [vmem:[#allocation46_spill] sm:$0xff]  ;;  %v13706_v0 = vld [vmem:[#allocation39_spill] sm:$0xff] }
 0x4a4   : > { %v3495_v38 = vsel %vm13694_vm15, nan, %v3494_v28  ;;  %vm3176_vm4 = vcmp.eq.s32.totalorder %v3174_v37, 0  ;;  %v3180_v10 = vxor.u32 2147483648, %v13695_v11  ;;  %v2961_v17 = vsel %vm10127_vm8, 0, %v13696_v60 }
 0x4a5   : > { %v6928_v2 = vpack.c.bf16 %v3495_v38, %v3079_v58  ;;  %v3178_v40 = vsel %vm3176_vm4, %v13695_v11, %v3177_v61  ;;  %v4299_v23 = vor.u32 %v4298_v16, %v4297_v31  ;;  %v4302_v25 = vshll.u32 %v4301_v46, 23  ;;  %v13705_v58 = vld [vmem:[#allocation35_spill] sm:$0xff]  ;;  %v13707_v38 = vld [vmem:[#allocation14_spill] sm:$0xff] }
 0x4a6   : > { %vm3179_vm9 = vcmp.eq.s32.totalorder %v3174_v37, 2  ;;  %v2965_v20 = vadd.s32 3, %v2961_v17  ;;  %vm4226_vm13 = vcmp.lt.s32.totalorder %v10974_v9, 0  ;;  %vm2964_vm5 = vweird.f32 %v13698_v51  ;;  %v11268_v53 = vpop.eup %7333 }
 0x4a7   : > { %6929 = vmatprep.subr.bf16.mxu1 %v6928_v2  ;;  %v3181_v56 = vsel %vm3179_vm9, %v3180_v10, %v10648_v26  ;;  %v2969_v7 = vxor.u32 2147483648, %v13699_v15  ;;  %v3377_v3 = vsel %vm10569_vm0, 0, %v10608_v62  ;;  %v13701_v47 = vand.u32 2147483647, %v10974_v9 }
 0x4a8   : > { %v4303_v44 = vor.u32 4788187, %v4302_v25  ;;  %v3182_v49 = vsel %vm3175_vm1, %v3178_v40, %v3181_v56  ;;  %v2966_v26 = vand.u32 3, %v2965_v20  ;;  %v2972_v61 = vxor.u32 2147483648, %v13704_v48  ;;  %v13708_v40 = vld [vmem:[#allocation6_spill] sm:$0xff] }
 0x4a9   : > { %vm11272_vm8 = vcmp.le.f32.partialorder %v13701_v47, 0.7853982  ;;  %v4306_v24 = vcvt.s32.f32 %v4299_v23  ;;  %v3183_v39 = vsel %vm3172_vm10, nan, %v3182_v49  ;;  %vm3380_vm0 = vweird.f32 %v13705_v58  ;;  %v13714_v58 = vld [vmem:[#allocation9_spill] sm:$0xff] }
 0x4aa   : > { %v3381_v62 = vadd.s32 3, %v3377_v3  ;;  %vm3810_vm3 = vcmp.lt.s32.totalorder %v13706_v0, 0  ;;  %v4304_v31 = vand.u32 2147483647, %v4303_v44  ;;  %v6920_v28 = vpack.c.bf16 %v3183_v39, %v2767_v21 }
 0x4ab   : > { %vm2968_vm7 = vcmp.eq.s32.totalorder %v2966_v26, 0  ;;  %v3385_v16 = vxor.u32 2147483648, %v10733_v29  ;;  %vm2971_vm14 = vcmp.eq.s32.totalorder %v2966_v26, 2  ;;  %v3388_v2 = vxor.u32 2147483648, %v13707_v38 }
 0x4ac   : > { %v2970_v37 = vsel %vm2968_vm7, %v13704_v48, %v2969_v7  ;;  %v3382_v46 = vand.u32 3, %v3381_v62  ;;  %v4307_v11 = vmul.f32 %v4306_v24, %v4304_v31  ;;  %6921 = vmatpush1.bf16.msra.mxu0 %v6920_v28  ;;  %vm2967_vm1 = vcmp.lt.s32.totalorder %v2966_v26, 2 }
 0x4ad   : > { %v2973_v32 = vsel %vm2971_vm14, %v2972_v61, %v13699_v15  ;;  %v3686_v10 = vsub.s32 4, %v13708_v40  ;;  %v13709_v21 = vand.u32 2147483647, %v10383_v14  ;;  %vm13712_vm7 = vcmp.lt.s32.totalorder %v10383_v14, 0 }
 0x4ae   : > { %v2974_v60 = vsel %vm2967_vm1, %v2970_v37, %v2973_v32  ;;  %vm3384_vm10 = vcmp.eq.s32.totalorder %v3382_v46, 0  ;;  %vm3387_vm15 = vcmp.eq.s32.totalorder %v3382_v46, 2  ;;  %v4308_v17 = vxor.u32 2147483648, %v4307_v11 }
 0x4af   : > { %vm11289_vm4 = vcmp.le.f32.partialorder %v13709_v21, 0.7853982  ;;  %vm3383_vm9 = vcmp.lt.s32.totalorder %v3382_v46, 2  ;;  %v3386_v23 = vsel %vm3384_vm10, %v13707_v38, %v3385_v16  ;;  %v3389_v25 = vsel %vm3387_vm15, %v3388_v2, %v10733_v29 }
 0x4b0   : > { %v2975_v20 = vsel %vm2964_vm5, nan, %v2974_v60  ;;  %v3390_v56 = vsel %vm3383_vm9, %v3386_v23, %v3389_v25  ;;  %v3687_v15 = vsel %vm13712_vm7, %v3686_v10, %v13708_v40  ;;  %v3688_v7 = vsel %vm11289_vm4, %v10383_v14, %v10879_v43  ;;  %v13717_v10 = vld [vmem:[#allocation12_spill] sm:$0xff]  ;;  %v13719_v25 = vld [vmem:[#allocation7_spill] sm:$0xff] }
 0x4b1   : > { %v4309_v12 = vsel %vm4226_vm13, %v4308_v17, %v4307_v11  ;;  %v3391_v3 = vsel %vm3380_vm0, nan, %v3390_v56  ;;  %v3689_v29 = vsel %vm11289_vm4, 0, %v3687_v15  ;;  %7335 = vcosq.f32 %v3688_v7 }
 0x4b2   : > { %v4311_v51 = vsel %vm4226_vm13, %v4310_v63, %v11204_v33  ;;  %v4312_v43 = vsel %vm11272_vm8, %v10974_v9, %v4309_v12  ;;  %v6930_v47 = vpack.c.bf16 %v3391_v3, %v2975_v20  ;;  %7337 = vsinq.f32 %v3688_v7  ;;  %v13720_v12 = vld [vmem:[#allocation13_spill] sm:$0xff] }
 0x4b3   : > { %v3793_v44 = vsel %vm10845_vm2, 0, %v10854_v54  ;;  %7339 = vcosq.f32 %v4312_v43  ;;  %v3693_v49 = vadd.s32 3, %v3689_v29  ;;  %v4105_v26 = vsel %vm11192_vm12, 0, %v11181_v18 }
 0x4b4   : > { %v13713_v48 = vxor.u32 2147483648, %v10899_v30  ;;  %v11330_v63 = vand.u32 3, %v11065_v6  ;;  %7341 = vsinq.f32 %v4312_v43  ;;  %6931 = vmatpush1.bf16.msra.mxu1 %v6930_v47  ;;  %v4109_v61 = vadd.s32 3, %v4105_v26  ;;  %v13721_v43 = vld [vmem:[#allocation43_spill] sm:$0xff] }
 0x4b5   : > { %v4113_v24 = vxor.u32 2147483648, %v11268_v53  ;;  %v4116_v39 = vxor.u32 2147483648, %v11254_v52  ;;  %v3894_v62 = vsub.s32 4, %v13714_v58  ;;  %v4313_v18 = vsel %vm11272_vm8, 0, %v4311_v51 }
 0x4b6   : > { %v3893_v33 = vsel %vm3810_vm3, %v13713_v48, %v10899_v30  ;;  %7343 = vsinq.f32 %v11152_v42  ;;  %v11339_v4 = vand.u32 3, %v11072_v5  ;;  %v4110_v30 = vand.u32 3, %v4109_v61 }
 0x4b7   : > { %v13715_v6 = vand.u32 2147483647, %v13706_v0  ;;  %v3694_v31 = vand.u32 3, %v3693_v49  ;;  %v3895_v28 = vsel %vm3810_vm3, %v3894_v62, %v13714_v58  ;;  %v4317_v37 = vadd.s32 3, %v4313_v18 }
 0x4b8   : > { %vm4111_vm13 = vcmp.lt.s32.totalorder %v4110_v30, 2  ;;  %vm4112_vm5 = vcmp.eq.s32.totalorder %v4110_v30, 0  ;;  %vm4115_vm8 = vcmp.eq.s32.totalorder %v4110_v30, 2  ;;  %vm3692_vm0 = vweird.f32 %v10383_v14 }
 0x4b9   : > { %vm3809_vm12 = vcmp.le.f32.partialorder %v13715_v6, 0.7853982  ;;  %v4114_v42 = vsel %vm4112_vm5, %v11254_v52, %v4113_v24  ;;  %v4117_v5 = vsel %vm4115_vm8, %v4116_v39, %v11268_v53  ;;  %v4318_v2 = vand.u32 3, %v4317_v37 }
 0x4ba   : > { %v3896_v16 = vsel %vm3809_vm12, %v13706_v0, %v3893_v33  ;;  %v3897_v57 = vsel %vm3809_vm12, 0, %v3895_v28  ;;  %v4118_v38 = vsel %vm4111_vm13, %v4114_v42, %v4117_v5  ;;  %vm3695_vm3 = vcmp.lt.s32.totalorder %v3694_v31, 2 }
 0x4bb   : > { %7345 = vcosq.f32 %v3896_v16  ;;  %v3901_v46 = vadd.s32 3, %v3897_v57  ;;  %v7336_v11 = vpop.eup %7335  ;;  %vm4108_vm14 = vweird.f32 %v10885_v50  ;;  %v13718_v60 = vsel %vm10697_vm6, 0, %v13717_v10  ;;  %v13724_v10 = vld [vmem:[#allocation15_spill] sm:$0xff] }
 0x4bc   : > { %7347 = vsinq.f32 %v3896_v16  ;;  %v3589_v21 = vadd.s32 3, %v13718_v60  ;;  %v7338_v52 = vpop.eup %7337  ;;  %vm3696_vm1 = vcmp.eq.s32.totalorder %v3694_v31, 0  ;;  %vm3699_vm10 = vcmp.eq.s32.totalorder %v3694_v31, 2 }
 0x4bd   : > { %v3902_v32 = vand.u32 3, %v3901_v46  ;;  %v3700_v53 = vxor.u32 2147483648, %v7336_v11  ;;  %v4119_v13 = vsel %vm4108_vm14, nan, %v4118_v38  ;;  %v7340_v17 = vpop.eup %7339  ;;  %v3697_v23 = vxor.u32 2147483648, %v7338_v52  ;;  %v13723_v38 = vld [vmem:[#allocation41_spill] sm:$0xff] }
 0x4be   : > { %vm4316_vm15 = vweird.f32 %v10974_v9  ;;  %vm4319_vm4 = vcmp.lt.s32.totalorder %v4318_v2, 2  ;;  %vm4320_vm9 = vcmp.eq.s32.totalorder %v4318_v2, 0  ;;  %v3593_v20 = vxor.u32 2147483648, %v13719_v25  ;;  %v7342_v50 = vpop.eup %7341 }
 0x4bf   : > { %v3701_v56 = vsel %vm3699_vm10, %v3700_v53, %v7338_v52  ;;  %v4324_v15 = vxor.u32 2147483648, %v7340_v17  ;;  %v3590_v7 = vand.u32 3, %v3589_v21  ;;  %v3596_v3 = vxor.u32 2147483648, %v13720_v12 }
 0x4c0   : > { %v3698_v29 = vsel %vm3696_vm1, %v7336_v11, %v3697_v23  ;;  %vm3903_vm6 = vcmp.lt.s32.totalorder %v3902_v32, 2  ;;  %v4321_v51 = vxor.u32 2147483648, %v7342_v50  ;;  %vm4323_vm7 = vcmp.eq.s32.totalorder %v4318_v2, 2  ;;  %v7344_v47 = vpop.eup %7343  ;;  %v13725_v23 = vld [vmem:[#allocation47_spill] sm:$0xff] }
 0x4c1   : > { %vm3588_vm12 = vweird.f32 %v13721_v43  ;;  %v3702_v49 = vsel %vm3695_vm3, %v3698_v29, %v3701_v56  ;;  %vm3900_vm13 = vweird.f32 %v13706_v0  ;;  %vm3904_vm5 = vcmp.eq.s32.totalorder %v3902_v32, 0  ;;  %v4328_v0 = vld [vmem:[%s13162_s6] sm:$0xff]  ;;  %v4329_v56 = vld [vmem:[%s13162_s6 + $0x8] sm:$0xff] }
 0x4c2   : > { %v4325_v26 = vsel %vm4323_vm7, %v4324_v15, %v7342_v50  ;;  %vm3592_vm8 = vcmp.eq.s32.totalorder %v3590_v7, 0  ;;  %v3703_v48 = vsel %vm3692_vm0, nan, %v3702_v49  ;;  %v4322_v33 = vsel %vm4320_vm9, %v7340_v17, %v4321_v51  ;;  %v7422_v49 = vld [vmem:[%s7664_s16] sm:$0x3f] }
 0x4c3   : > { %v3594_v61 = vsel %vm3592_vm8, %v13720_v12, %v3593_v20  ;;  %vm3595_vm14 = vcmp.eq.s32.totalorder %v3590_v7, 2  ;;  %v6922_v24 = vpack.c.bf16 %v4119_v13, %v3703_v48  ;;  %vm3907_vm1 = vcmp.eq.s32.totalorder %v3902_v32, 2 }
 0x4c4   : > { %v3597_v39 = vsel %vm3595_vm14, %v3596_v3, %v13719_v25  ;;  %vm4004_vm10 = vweird.f32 %v10749_v8  ;;  %v4326_v62 = vsel %vm4319_vm4, %v4322_v33, %v4325_v26  ;;  %vm3591_vm3 = vcmp.lt.s32.totalorder %v3590_v7, 2  ;;  %v4339_v7 = vpop.permute.xlu1 %4338  ;;  %v13735_v3 = vld [vmem:[#allocation5_spill] sm:$0xff] }
 0x4c5   : > { %v7346_v58 = vpop.eup %7345  ;;  %vm4007_vm7 = vcmp.lt.s32.totalorder %v11330_v63, 2  ;;  %v4009_v14 = vxor.u32 2147483648, %v11126_v36  ;;  %6924 = vmatprep.subr.msk.bf16.mxu0 %vm9468_vm11, %v6922_v24  ;;  %v3598_v31 = vsel %vm3591_vm3, %v3594_v61, %v3597_v39  ;;  %vm4008_vm0 = vcmp.eq.s32.totalorder %v11330_v63, 0  ;;  %v7423_v61 = vld [vmem:[%s7664_s16 + $0x8] sm:$0x3f] }
 0x4c6   : > { %v7348_v18 = vpop.eup %7347  ;;  %v3908_v6 = vxor.u32 2147483648, %v7346_v58  ;;  %v4012_v28 = vxor.u32 2147483648, %v11117_v22  ;;  %vm4011_vm4 = vcmp.eq.s32.totalorder %v11330_v63, 2  ;;  %v3797_v57 = vadd.s32 3, %v3793_v44 }
 0x4c7   : > { %v3905_v16 = vxor.u32 2147483648, %v7348_v18  ;;  %v4010_v37 = vsel %vm4008_vm0, %v11117_v22, %v4009_v14  ;;  %v4327_v5 = vsel %vm4316_vm15, nan, %v4326_v62  ;;  %v3801_v2 = vxor.u32 2147483648, %v13723_v38  ;;  %v7425_v14 = vld [vmem:[%s7664_s16 + $0x18] sm:$0x3f] }
 0x4c8   : > { %v3909_v42 = vsel %vm3907_vm1, %v3908_v6, %v7348_v18  ;;  %v4013_v46 = vsel %vm4011_vm4, %v4012_v28, %v11126_v36  ;;  %v3798_v40 = vand.u32 3, %v3797_v57  ;;  %v3804_v1 = vxor.u32 2147483648, %v13724_v10  ;;  %v4390_v43 = vpop.permute.xlu1 %4389 }
 0x4c9   : > { %v3906_v11 = vsel %vm3904_vm5, %v7346_v58, %v3905_v16  ;;  %v4014_v22 = vsel %vm4007_vm7, %v4010_v37, %v4013_v46  ;;  %v3599_v44 = vsel %vm3588_vm12, nan, %v3598_v31  ;;  %v4217_v60 = vxor.u32 2147483648, %v7344_v47  ;;  %v7424_v58 = vld [vmem:[%s7664_s16 + $0x10] sm:$0x3f]  ;;  %s6594_s16 = scalar_lea.sflag [#allocation3], %s378_s25 }
 0x4ca   : > { %v3910_v54 = vsel %vm3903_vm6, %v3906_v11, %v3909_v42  ;;  %v4015_v9 = vsel %vm4004_vm10, nan, %v4014_v22  ;;  %vm3800_vm2 = vcmp.eq.s32.totalorder %v3798_v40, 0  ;;  %vm3803_vm15 = vcmp.eq.s32.totalorder %v3798_v40, 2 }
 0x4cb   : > { %v3911_v36 = vsel %vm3900_vm13, nan, %v3910_v54  ;;  %v6925_v21 = vpack.c.bf16 %v4015_v9, %v3599_v44  ;;  %v3802_v63 = vsel %vm3800_vm2, %v13724_v10, %v3801_v2  ;;  %vm4216_vm9 = vcmp.eq.s32.totalorder %v11339_v4, 0 }
 0x4cc   : > { %v6932_v52 = vpack.c.bf16 %v4327_v5, %v3911_v36  ;;  %vm3799_vm6 = vcmp.lt.s32.totalorder %v3798_v40, 2  ;;  %v3805_v32 = vsel %vm3803_vm15, %v3804_v1, %v13723_v38  ;;  %v4218_v8 = vsel %vm4216_vm9, %v11217_v27, %v4217_v60  ;;  %v4454_v42 = vpop.permute.xlu1 %4453 }
 0x4cd   : > { %6927 = vmatpush1.bf16.msk.msra.mxu0 %vm9468_vm11, %v6925_v21  ;;  %v4220_v53 = vxor.u32 2147483648, %v11217_v27  ;;  %v3806_v13 = vsel %vm3799_vm6, %v3802_v63, %v3805_v32  ;;  %vm4219_vm12 = vcmp.eq.s32.totalorder %v11339_v4, 2  ;;  %vm4215_vm13 = vcmp.lt.s32.totalorder %v11339_v4, 2  ;;  %v4331_v4 = vld [vmem:[%s13162_s6 + $0x18] sm:$0xff] }
 0x4ce   : > { %6934 = vmatprep.subr.msk.bf16.mxu1 %vm9468_vm11, %v6932_v52  ;;  %vm3796_vm5 = vweird.f32 %v13725_v23  ;;  %vm4212_vm8 = vweird.f32 %v10773_v35  ;;  %vm13726_vm14 = vcmask 236544   ;;  %v13727_v50 = vmov 0.0   ;;  %v4330_v35 = vld [vmem:[%s13162_s6 + $0x10] sm:$0xff] }
 0x4cf   : > { %v4221_v17 = vsel %vm4219_vm12, %v4220_v53, %v7344_v47  ;;  %v3807_v27 = vsel %vm3796_vm5, nan, %v3806_v13  ;;  %vm13728_vm1 = vmmov %vm13726_vm14  ;;  %v4358_v29 = vsub.s32 0, %v13735_v3  ;;  %v4406_v51 = vsub.s32 1, %v13735_v3 }
 0x4d0   : > { %v4222_v25 = vsel %vm4215_vm13, %v4218_v8, %v4221_v17  ;;  %6816 = vmatmul.mubr.msk.f32.vlgmr.msra.gmra.mrb[8].mxu0 %vm13726_vm14, %v4328_v0  ;;  %vm13729_vm10 = vmmov %vm13728_vm1  ;;  %v4470_v33 = vsub.s32 2, %v13735_v3 }
 0x4d1   : > { %v4223_v20 = vsel %vm4212_vm8, nan, %v4222_v25  ;;  %4610 = vmatprep.mubr.f32.mxu0 %v13727_v50  ;;  %vm13730_vm3 = vmmov %vm13728_vm1  ;;  %v11442_v26 = vrot.slane %v7422_v49, %v4358_v29  ;;  %v11444_v48 = vrot.slane %v7422_v49, %v4406_v51  ;;  %v11448_v24 = vrot.slane %v7423_v61, %v4358_v29 }
 0x4d2   : > { %v6935_v15 = vpack.c.bf16 %v4223_v20, %v3807_v27  ;;  %vm13732_vm7 = vmmov %vm13728_vm1  ;;  %v11450_v39 = vrot.slane %v7423_v61, %v4406_v51  ;;  %v11453_v62 = vrot.slane %v7424_v58, %v4358_v29  ;;  %v11456_v18 = vrot.slane %v7425_v14, %v4358_v29 }
 0x4d3   : > { %vm13733_vm0 = vmmov %vm13728_vm1  ;;  %v11458_v30 = vrot.slane %v7424_v58, %v4406_v51  ;;  %v4372_v6 = vmul.f32 %v11442_v26, %v4339_v7  ;;  %v11461_v31 = vrot.slane %v7425_v14, %v4406_v51  ;;  %v4420_v28 = vmul.f32 %v11444_v48, %v4390_v43 }
 0x4d4   : > { %6937 = vmatpush1.bf16.msk.msra.mxu1 %vm9468_vm11, %v6935_v15  ;;  %6817 = vmatmul.mubr.msk.f32.gmra.mrb[10].mxu0 %vm13728_vm1, %v4329_v56  ;;  %vm13731_vm11 = vmmov %vm13728_vm1  ;;  %v11464_v16 = vrot.slane %v7422_v49, %v4470_v33  ;;  %v4373_v37 = vmul.f32 %v11448_v24, %v4339_v7  ;;  %v4421_v57 = vmul.f32 %v11450_v39, %v4390_v43 }
 0x4d5   : > { %4616 = vmatprep.mubr.f32.mxu0 %v13727_v50  ;;  %vm13734_vm4 = vmmov %vm13733_vm0  ;;  %v11468_v46 = vrot.slane %v7423_v61, %v4470_v33  ;;  %v4374_v38 = vmul.f32 %v11453_v62, %v4339_v7  ;;  %v4375_v2 = vmul.f32 %v11456_v18, %v4339_v7  ;;  %v4422_v11 = vmul.f32 %v11458_v30, %v4390_v43 }
 0x4d6   : > { %v11473_v22 = vrot.slane %v7424_v58, %v4470_v33  ;;  %v4423_v40 = vmul.f32 %v11461_v31, %v4390_v43  ;;  %v4436_v10 = vadd.f32 %v4420_v28, %v4372_v6  ;;  %v4484_v1 = vmul.f32 %v11464_v16, %v4454_v42 }
 0x4d7   : > { %6822 = vmatmul.mubr.msk.f32.vlgmr.msra.gmra.mrb[8].mxu1 %vm13729_vm10, %v4328_v0  ;;  %13736 = vst [vmem:[#allocation22_spill] sm:$0xff] %v11468_v46  ;;  %v11477_v54 = vrot.slane %v7425_v14, %v4470_v33  ;;  %v4437_v9 = vadd.f32 %v4421_v57, %v4373_v37  ;;  %v4485_v60 = vmul.f32 %v11468_v46, %v4454_v42 }
 0x4d8   : > { %4699 = vmatprep.mubr.f32.mxu1 %v13727_v50  ;;  %6818 = vmatmul.mubr.msk.f32.gmra.mrb[12].mxu0 %vm13730_vm3, %v4330_v35  ;;  %v4438_v21 = vadd.f32 %v4422_v11, %v4374_v38  ;;  %v4486_v52 = vmul.f32 %v11473_v22, %v4454_v42  ;;  %v4500_v63 = vadd.f32 %v4484_v1, %v4436_v10 }
 0x4d9   : > { %4622 = vmatprep.mubr.f32.mxu0 %v13727_v50  ;;  %v4394_v12 = vpop.permute.xlu0 %4393  ;;  %v11482_v36 = vpop.permute.xlu1 %4457  ;;  %v4439_v32 = vadd.f32 %v4423_v40, %v4375_v2  ;;  %v4487_v8 = vmul.f32 %v11477_v54, %v4454_v42  ;;  %v4501_v0 = vadd.f32 %v4485_v60, %v4437_v9 }
 0x4da   : > { %v4502_v25 = vadd.f32 %v4486_v52, %v4438_v21  ;;  %v4424_v20 = vmul.f32 %v11444_v48, %v4394_v12  ;;  %v11497_v7 = vmul.f32 %v11461_v31, %v4394_v12 }
 0x4db   : > { %6823 = vmatmul.mubr.msk.f32.gmra.mrb[10].mxu1 %vm13731_vm11, %v4329_v56 }
 0x4dc   : > { %4705 = vmatprep.mubr.f32.mxu1 %v13727_v50  ;;  %6819 = vmatmul.mubr.msk.f32.gmra.mrb[14].mxu0 %vm13732_vm7, %v4331_v4 }
 0x4dd   : > { %6497 = vmatprep.mubr.f32.mxu0 %v13727_v50  ;;  %v4402_v47 = vpop.permute.xlu0 %4401 }
 0x4de   : > { %v11500_v3 = vmul.f32 %v11444_v48, %v4402_v47  ;;  %v11508_v43 = vmul.f32 %v11450_v39, %v4402_v47  ;;  %v11511_v49 = vmul.f32 %v11458_v30, %v4402_v47  ;;  %v11518_v58 = vmul.f32 %v11461_v31, %v4402_v47 }
 0x4df   : > { %6824 = vmatmul.mubr.msk.f32.gmra.mrb[12].mxu1 %vm13733_vm0, %v4330_v35  ;;  %v4503_v35 = vadd.f32 %v4487_v8, %v4439_v32 }
 0x4e0   : > { %4711 = vmatprep.mubr.f32.mxu1 %v13727_v50  ;;  %13738 = vst [vmem:[#allocation25_spill] sm:$0xff] %v11500_v3  ;;  %13739 = vst [vmem:[#allocation36_spill] sm:$0xff] %v11508_v43 }
 0x4e1   : > { %v4354_v56 = vpop.permute.xlu1 %4353  ;;  %13740 = vst [vmem:[#allocation40_spill] sm:$0xff] %v11511_v49  ;;  %13741 = vst [vmem:[#allocation10_spill] sm:$0xff] %v11518_v58 }
 0x4e2   : > { %v11521_v14 = vmul.f32 %v11442_v26, %v4354_v56  ;;  %v11524_v6 = vmul.f32 %v11448_v24, %v4354_v56  ;;  %v11528_v37 = vmul.f32 %v11453_v62, %v4354_v56  ;;  %v11531_v57 = vmul.f32 %v11456_v18, %v4354_v56 }
 0x4e3   : > { %6825 = vmatmul.mubr.msk.f32.gmra.mrb[14].mxu1 %vm13734_vm4, %v4331_v4  ;;  %v4344_v5 = vpop.permute.xlu0 %4343  ;;  %v4426_v4 = vmul.f32 %v11458_v30, %v4394_v12 }
 0x4e4   : > { %6568 = vmatprep.mubr.f32.mxu1 %v13727_v50  ;;  %v11490_v50 = vmul.f32 %v11450_v39, %v4394_v12  ;;  %13742 = vst [vmem:[#allocation33_spill] sm:$0xff] %v11521_v14  ;;  %13743 = vst [vmem:[#allocation32_spill] sm:$0xff] %v11524_v6  ;;  %v4376_v47 = vmul.f32 %v11442_v26, %v4344_v5  ;;  %v11538_v9 = vmul.f32 %v11448_v24, %v4344_v5 }
 0x4e5   : > { %13744 = vst [vmem:[#allocation11_spill] sm:$0xff] %v11528_v37  ;;  %13745 = vst [vmem:[#allocation34_spill] sm:$0xff] %v11531_v57  ;;  %v4378_v60 = vmul.f32 %v11453_v62, %v4344_v5  ;;  %v11542_v21 = vmul.f32 %v11456_v18, %v4344_v5 }
 0x4e7   : > { %v11479_v44 = vpop.permute.xlu0 %4348  ;;  %v4398_v52 = vpop.permute.xlu1 %4397 }
 0x4e8   : > { %v11545_v32 = vmul.f32 %v11444_v48, %v4398_v52  ;;  %v11548_v8 = vmul.f32 %v11450_v39, %v4398_v52 }
 0x4ea   : > { %13746 = vst [vmem:[#allocation16_spill] sm:$0xff] %v11548_v8 }
 0x4eb   : > { %v11486_v23 = vpop.permute.xlu0 %4724 }
 0x5a3   : > { %v4606_v53 = vpop.f32.mrb[8].mxu0 }
 0x5a4   : > { %v4607_v13 = vadd.f32 %v4606_v53, %v4500_v63  ;;  %v4608_v17 = vpop.f32.mrb[9].mxu0 }
 0x5a5   : > { %v4609_v27 = vadd.f32 %v4608_v17, %v4501_v0  ;;  %v11557_v17 = vmul.f32 %v11461_v31, %v4398_v52  ;;  %v11575_v31 = vmul.f32 %v11448_v24, %v11479_v44 }
 0x5a6   : > { %v11493_v15 = vadd.f32 %v11486_v23, %v4607_v13  ;;  %v11554_v13 = vmul.f32 %v11458_v30, %v4398_v52  ;;  %v11571_v30 = vmul.f32 %v11442_v26, %v11479_v44  ;;  %v4488_v26 = vmul.f32 %v11464_v16, %v11482_v36 }
 0x5a7   : > { %v11503_v29 = vadd.f32 %v11486_v23, %v4609_v27  ;;  %v11505_v51 = vpop.f32.mrb[10].mxu0  ;;  %13749 = vst [vmem:[#allocation21_spill] sm:$0xff] %v11557_v17  ;;  %13750 = vst [vmem:[#allocation19_spill] sm:$0xff] %v11575_v31 }
 0x5a8   : > { %13737 = vst [vmem:[#allocation48_spill] sm:$0xff] %v11493_v15  ;;  %v13348_v33 = vand.u32 2147483647, %v11493_v15  ;;  %v4761_v61 = vand.u32 2139095040, %v11493_v15  ;;  %v11515_v12 = vpop.f32.mrb[11].mxu0  ;;  %13748 = vst [vmem:[#allocation42_spill] sm:$0xff] %v11554_v13 }
 0x5a9   : > { %v4865_v28 = vand.u32 2139095040, %v11503_v29  ;;  %v13347_v2 = vand.u32 2147483647, %v11503_v29 }
 0x5aa   : > { %v4762_v42 = vshrl.u32 %v4761_v61, 23  ;;  %v4695_v38 = vpop.f32.mrb[8].mxu1  ;;  %v4765_v11 = vand.u32 8388607, %v13348_v33 }
 0x5ab   : > { %v4696_v40 = vadd.f32 %v4695_v38, %v4502_v25  ;;  %v4866_v10 = vshrl.u32 %v4865_v28, 23  ;;  %v4697_v1 = vpop.f32.mrb[9].mxu1  ;;  %v11561_v25 = vand.u32 8388607, %v13347_v2 }
 0x5ac   : > { %v6826_v63 = vadd.s32 4294967169, %v4762_v42  ;;  %v4766_v27 = vor.u32 8388608, %v4765_v11  ;;  %v11579_v42 = vmul.f32 %v11453_v62, %v11479_v44  ;;  %v4698_v2 = vadd.f32 %v4697_v1, %v4503_v35 }
 0x5ad   : > { %v11551_v53 = vadd.f32 %v11486_v23, %v4696_v40  ;;  %v6830_v0 = vadd.s32 4294967169, %v4866_v10  ;;  %v4440_v10 = vadd.f32 %v4424_v20, %v4376_v47  ;;  %v4870_v62 = vor.u32 8388608, %v11561_v25 }
 0x5ae   : > { %v4768_v5 = vadd.s32 1, %v6826_v63  ;;  %v11563_v48 = vpop.f32.mrb[10].mxu1  ;;  %13751 = vst [vmem:[#allocation38_spill] sm:$0xff] %v11579_v42  ;;  %v11585_v63 = vadd.f32 %v4426_v4, %v4378_v60  ;;  %v11596_v60 = vpop.f32.mrb[12].mxu0 }
 0x5af   : > { %13747 = vst [vmem:[#allocation18_spill] sm:$0xff] %v11551_v53  ;;  %v13349_v39 = vand.u32 2147483647, %v11551_v53  ;;  %v4969_v56 = vand.u32 2139095040, %v11551_v53  ;;  %v4872_v61 = vadd.s32 1, %v6830_v0  ;;  %v11567_v28 = vpop.f32.mrb[11].mxu1 }
 0x5b0   : > { %vm4769_vm2 = vcmp.gt.s32.totalorder %v4768_v5, 0  ;;  %v11587_v0 = vshll.u32 %v4766_v27, 8  ;;  %13752 = vst [vmem:[#allocation31_spill] sm:$0xff] %v11596_v60 }
 0x5b1   : > { %v4770_v38 = vsel %vm4769_vm2, %v4768_v5, 0  ;;  %v4970_v11 = vshrl.u32 %v4969_v56, 23  ;;  %v4973_v40 = vand.u32 8388607, %v13349_v39  ;;  %vm4873_vm15 = vcmp.gt.s32.totalorder %v4872_v61, 0 }
 0x5b2   : > { %v4772_v52 = vand.u32 31, %v4770_v38  ;;  %v4771_v24 = vshrl.u32 %v4770_v38, 5  ;;  %v11590_v58 = vsel %vm4873_vm15, %v4872_v61, 0 }
 0x5b3   : > { %v6834_v5 = vadd.s32 4294967169, %v4970_v11  ;;  %v4974_v56 = vor.u32 8388608, %v4973_v40 }
 0x5b4   : > { %v4773_v33 = vsub.s32 32, %v4772_v52  ;;  %v4775_v20 = vshll.u32 %v13423_v59, %v4772_v52  ;;  %v4778_v47 = vshll.u32 %v13424_v55, %v4772_v52  ;;  %v4781_v39 = vshll.u32 %v13425_v45, %v4772_v52 }
 0x5b5   : > { %v4784_v4 = vshll.u32 %v13426_v34, %v4772_v52  ;;  %v4787_v1 = vshll.u32 %v13427_v19, %v4772_v52  ;;  %vm4790_vm9 = vcmp.lt.s32.totalorder %v4771_v24, 1  ;;  %v4976_v6 = vadd.s32 1, %v6834_v5 }
 0x5b6   : > { %v4776_v27 = vshrl.u32 %v13424_v55, %v4773_v33  ;;  %v4779_v25 = vshrl.u32 %v13425_v45, %v4773_v33  ;;  %v4782_v35 = vshrl.u32 %v13426_v34, %v4773_v33  ;;  %v4774_v61 = vshrl.u32 %v13423_v59, %v4773_v33 }
 0x5b7   : > { %v4785_v38 = vshrl.u32 %v13427_v19, %v4773_v33  ;;  %v4788_v11 = vshrl.u32 %v13428_v41, %v4773_v33  ;;  %vm4792_vm6 = vcmp.lt.s32.totalorder %v4771_v24, 3  ;;  %vm4793_vm12 = vcmp.lt.s32.totalorder %v4771_v24, 4 }
 0x5b8   : > { %v4777_v40 = vor.u32 %v4776_v27, %v4775_v20  ;;  %v4780_v57 = vor.u32 %v4779_v25, %v4778_v47  ;;  %v4783_v43 = vor.u32 %v4782_v35, %v4781_v39  ;;  %vm4977_vm13 = vcmp.gt.s32.totalorder %v4976_v6, 0 }
 0x5b9   : > { %v4786_v49 = vor.u32 %v4785_v38, %v4784_v4  ;;  %v4789_v37 = vor.u32 %v4788_v11, %v4787_v1  ;;  %vm4791_vm5 = vcmp.lt.s32.totalorder %v4771_v24, 2  ;;  %v4978_v60 = vsel %vm4977_vm13, %v4976_v6, 0 }
 0x5ba   : > { %v4794_v3 = vsel %vm4790_vm9, %v4774_v61, %v4777_v40  ;;  %v4795_v14 = vsel %vm4793_vm12, %v4783_v43, 2102212464  ;;  %v4798_v17 = vsel %vm4790_vm9, %v4777_v40, %v4780_v57  ;;  %v4802_v8 = vsel %vm4790_vm9, %v4780_v57, %v4783_v43 }
 0x5bb   : > { %v4796_v52 = vsel %vm4792_vm6, %v4780_v57, %v4795_v14  ;;  %v4799_v31 = vsel %vm4793_vm12, %v4786_v49, 920167782  ;;  %v4803_v13 = vsel %vm4793_vm12, %v4789_v37, 1326507024  ;;  %v11605_v5 = vshrl.u32 %v4978_v60, 5 }
 0x5bc   : > { %v4800_v42 = vsel %vm4792_vm6, %v4783_v43, %v4799_v31  ;;  %v4804_v33 = vsel %vm4792_vm6, %v4786_v49, %v4803_v13  ;;  %v4797_v20 = vsel %vm4791_vm5, %v4794_v3, %v4796_v52  ;;  %v4980_v14 = vand.u32 31, %v4978_v60  ;;  %v11652_v60 = vpop.f32.mrb[12].mxu1 }
 0x5bd   : > { %v4801_v47 = vsel %vm4791_vm5, %v4798_v17, %v4800_v42  ;;  %v4805_v39 = vsel %vm4791_vm5, %v4802_v8, %v4804_v33  ;;  %v11616_v37 = vadd.f32 %v4488_v26, %v4440_v10  ;;  %v11620_v43 = vmul.f32 %v11473_v22, %v11482_v36 }
 0x5be   : > { %v11608_v4 = vmul.u32.u64.low %v11587_v0, %v4805_v39  ;;  %v11609_v27 = vmul.u32.u64.high %v11587_v0, %v4805_v39, %v11608_v4  ;;  %v11612_v25 = vmul.u32.u64.low %v11587_v0, %v4801_v47  ;;  %v11613_v35 = vmul.u32.u64.high %v11587_v0, %v4801_v47, %v11612_v25 }
 0x5bf   : > { %v11624_v3 = vadd.f32 %v11490_v50, %v11538_v9  ;;  %v4813_v49 = vmul.u32 %v11587_v0, %v4797_v20  ;;  %v11627_v6 = vshll.u32 %v4974_v56, 8  ;;  %v11629_v57 = vshll.u32 %v4870_v62, 8 }
 0x5c0   : > { %v11632_v8 = vadd.f32 %v11486_v23, %v4698_v2  ;;  %v4981_v13 = vsub.s32 32, %v4980_v14  ;;  %v4983_v17 = vshll.u32 %v13423_v59, %v4980_v14  ;;  %vm4998_vm8 = vcmp.lt.s32.totalorder %v11605_v5, 1 }
 0x5c1   : > { %v11637_v31 = vand.u32 31, %v11590_v58  ;;  %vm4815_vm14 = vc.u32 %v11609_v27, %v11612_v25  ;;  %v4816_v50 = vadd.s32 1, %v11613_v35  ;;  %v4986_v9 = vshll.u32 %v13424_v55, %v4980_v14 }
 0x5c2   : > { %v4989_v42 = vshll.u32 %v13425_v45, %v4980_v14  ;;  %v4984_v23 = vshrl.u32 %v13424_v55, %v4981_v13  ;;  %v4987_v2 = vshrl.u32 %v13425_v45, %v4981_v13  ;;  %v4990_v10 = vshrl.u32 %v13426_v34, %v4981_v13 }
 0x5c3   : > { %v4992_v26 = vshll.u32 %v13426_v34, %v4980_v14  ;;  %v4817_v24 = vsel %vm4815_vm14, %v4816_v50, %v11613_v35  ;;  %v4993_v0 = vshrl.u32 %v13427_v19, %v4981_v13  ;;  %v4995_v62 = vshll.u32 %v13427_v19, %v4980_v14 }
 0x5c4   : > { %v4996_v56 = vshrl.u32 %v13428_v41, %v4981_v13  ;;  %v4818_v1 = vadd.s32 %v4817_v24, %v4813_v49  ;;  %v4985_v61 = vor.u32 %v4984_v23, %v4983_v17  ;;  %v4988_v38 = vor.u32 %v4987_v2, %v4986_v9 }
 0x5c5   : > { %v4991_v11 = vor.u32 %v4990_v10, %v4989_v42  ;;  %v4994_v40 = vor.u32 %v4993_v0, %v4992_v26  ;;  %vm5000_vm1 = vcmp.lt.s32.totalorder %v11605_v5, 3  ;;  %vm5001_vm10 = vcmp.lt.s32.totalorder %v11605_v5, 4 }
 0x5c6   : > { %v4997_v52 = vor.u32 %v4996_v56, %v4995_v62  ;;  %v4819_v33 = vadd.s32 536870912, %v4818_v1  ;;  %v4982_v20 = vshrl.u32 %v13423_v59, %v4981_v13  ;;  %v5006_v39 = vsel %vm4998_vm8, %v4985_v61, %v4988_v38 }
 0x5c7   : > { %v5003_v47 = vsel %vm5001_vm10, %v4991_v11, 2102212464  ;;  %v5007_v4 = vsel %vm5001_vm10, %v4994_v40, 920167782  ;;  %v5010_v35 = vsel %vm4998_vm8, %v4988_v38, %v4991_v11  ;;  %v4877_v49 = vsub.s32 32, %v11637_v31 }
 0x5c8   : > { %v5011_v14 = vsel %vm5001_vm10, %v4997_v52, 1326507024  ;;  %v11662_v17 = vshrl.u32 %v4819_v33, 30  ;;  %vm4999_vm3 = vcmp.lt.s32.totalorder %v11605_v5, 2  ;;  %v5008_v50 = vsel %vm5000_vm1, %v4991_v11, %v5007_v4 }
 0x5c9   : > { %v5012_v9 = vsel %vm5000_vm1, %v4994_v40, %v5011_v14  ;;  %v5002_v13 = vsel %vm4998_vm8, %v4982_v20, %v4985_v61  ;;  %v5004_v42 = vsel %vm5000_vm1, %v4988_v38, %v5003_v47  ;;  %v5009_v23 = vsel %vm4999_vm3, %v5006_v39, %v5008_v50 }
 0x5ca   : > { %v5013_v2 = vsel %vm4999_vm3, %v5010_v35, %v5012_v9  ;;  %v4821_v10 = vshll.u32 %v11662_v17, 30  ;;  %v11673_v0 = vshrl.u32 %v11590_v58, 5  ;;  %v4879_v5 = vshll.u32 %v13423_v59, %v11637_v31 }
 0x5cb   : > { %v11669_v26 = vmul.u32.u64.low %v11627_v6, %v5013_v2  ;;  %v11670_v24 = vmul.u32.u64.high %v11627_v6, %v5013_v2, %v11669_v26  ;;  %v11676_v62 = vmul.u32.u64.low %v11627_v6, %v5009_v23  ;;  %v11677_v56 = vmul.u32.u64.high %v11627_v6, %v5009_v23, %v11676_v62 }
 0x5cc   : > { %v4880_v61 = vshrl.u32 %v13424_v55, %v4877_v49  ;;  %v11683_v38 = vsub.s32 %v4818_v1, %v4821_v10  ;;  %v5005_v11 = vsel %vm4999_vm3, %v5002_v13, %v5004_v42  ;;  %v4882_v40 = vshll.u32 %v13424_v55, %v11637_v31 }
 0x5cd   : > { %v4883_v52 = vshrl.u32 %v13425_v45, %v4877_v49  ;;  %v4885_v58 = vshll.u32 %v13425_v45, %v11637_v31  ;;  %v4886_v33 = vshrl.u32 %v13426_v34, %v4877_v49  ;;  %v4888_v20 = vshll.u32 %v13426_v34, %v11637_v31 }
 0x5ce   : > { %v4889_v47 = vshrl.u32 %v13427_v19, %v4877_v49  ;;  %v4824_v39 = vsub.s32 0, %v11683_v38  ;;  %vm5023_vm11 = vc.u32 %v11670_v24, %v11676_v62  ;;  %v4881_v1 = vor.u32 %v4880_v61, %v4879_v5 }
 0x5cf   : > { %v5073_v4 = vand.u32 2139095040, %v11632_v8  ;;  %v5024_v35 = vadd.s32 1, %v11677_v56  ;;  %v4884_v14 = vor.u32 %v4883_v52, %v4882_v40  ;;  %v4887_v50 = vor.u32 %v4886_v33, %v4885_v58  ;;  %v11709_v40 = vpop.permute.xlu1 %4461 }
 0x5d0   : > { %v4890_v9 = vor.u32 %v4889_v47, %v4888_v20  ;;  %v6827_v13 = vmin.u32 %v4824_v39, %v11683_v38  ;;  %v5021_v42 = vmul.u32 %v11627_v6, %v5005_v11  ;;  %v4891_v23 = vshll.u32 %v13427_v19, %v11637_v31 }
 0x5d1   : > { %v4892_v2 = vshrl.u32 %v13428_v41, %v4877_v49  ;;  %v5025_v10 = vsel %vm5023_vm11, %v5024_v35, %v11677_v56  ;;  %vm4894_vm7 = vcmp.lt.s32.totalorder %v11673_v0, 1  ;;  %vm4895_vm0 = vcmp.lt.s32.totalorder %v11673_v0, 2 }
 0x5d2   : > { %vm4896_vm4 = vcmp.lt.s32.totalorder %v11673_v0, 3  ;;  %v4826_v26 = vclz %v6827_v13  ;;  %v5026_v5 = vadd.s32 %v5025_v10, %v5021_v42  ;;  %vm4897_vm2 = vcmp.lt.s32.totalorder %v11673_v0, 4 }
 0x5d3   : > { %v4893_v61 = vor.u32 %v4892_v2, %v4891_v23  ;;  %v4902_v6 = vsel %vm4894_vm7, %v4881_v1, %v4884_v14  ;;  %v4903_v31 = vsel %vm4897_vm2, %v4890_v9, 920167782  ;;  %v4906_v56 = vsel %vm4894_vm7, %v4884_v14, %v4887_v50 }
 0x5d4   : > { %v5074_v11 = vshrl.u32 %v5073_v4, 23  ;;  %v6828_v52 = vadd.s32 4294967294, %v4826_v26  ;;  %v5027_v58 = vadd.s32 536870912, %v5026_v5  ;;  %v4904_v33 = vsel %vm4896_vm4, %v4887_v50, %v4903_v31 }
 0x5d5   : > { %v4907_v20 = vsel %vm4897_vm2, %v4893_v61, 1326507024  ;;  %v4878_v47 = vshrl.u32 %v13423_v59, %v4877_v49  ;;  %v4899_v39 = vsel %vm4897_vm2, %v4887_v50, 2102212464  ;;  %v4905_v23 = vsel %vm4895_vm0, %v4902_v6, %v4904_v33 }
 0x5d6   : > { %v4908_v35 = vsel %vm4896_vm4, %v4890_v9, %v4907_v20  ;;  %v6838_v13 = vadd.s32 4294967169, %v5074_v11  ;;  %vm6829_vm15 = vcmp.lt.s32.totalorder %v6828_v52, 0  ;;  %v11720_v42 = vshrl.u32 %v5027_v58, 30  ;;  %v11735_v11 = vpop.permute.xlu1 %4465 }
 0x5d7   : > { %v4909_v4 = vsel %vm4895_vm0, %v4906_v56, %v4908_v35  ;;  %v4829_v2 = vsel %vm6829_vm15, 0, %v6828_v52  ;;  %v4898_v9 = vsel %vm4894_vm7, %v4878_v47, %v4881_v1  ;;  %v4900_v31 = vsel %vm4896_vm4, %v4884_v14, %v4899_v39  ;;  %13753 = vst [vmem:[#allocation44_spill] sm:$0xff] %v11735_v11 }
 0x5d8   : > { %v11727_v10 = vmul.u32.u64.low %v11629_v57, %v4909_v4  ;;  %v11728_v26 = vmul.u32.u64.high %v11629_v57, %v4909_v4, %v11727_v10  ;;  %v5080_v49 = vadd.s32 1, %v6838_v13  ;;  %v4834_v50 = vsub.s32 4294967266, %v4829_v2 }
 0x5d9   : > { %v5029_v61 = vshll.u32 %v11720_v42, 30  ;;  %v11738_v6 = vmul.u32.u64.low %v11629_v57, %v4905_v23  ;;  %v11739_v56 = vmul.u32.u64.high %v11629_v57, %v4905_v23, %v11738_v6  ;;  %v4489_v52 = vmul.f32 %v11468_v46, %v11482_v36 }
 0x5da   : > { %vm5081_vm9 = vcmp.gt.s32.totalorder %v5080_v49, 0  ;;  %v4835_v58 = vadd.s32 127, %v4834_v50  ;;  %v4613_v1 = vadd.f32 %v11505_v51, %v11616_v37  ;;  %v11750_v14 = vmul.f32 %v11456_v18, %v11479_v44  ;;  %v11758_v4 = vpop.permute.xlu1 %4729 }
 0x5db   : > { %v11744_v33 = vsub.s32 %v5026_v5, %v5029_v61  ;;  %v5082_v20 = vsel %vm5081_vm9, %v5080_v49, 0  ;;  %v4830_v47 = vsub.s32 32, %v4829_v2  ;;  %v4901_v39 = vsel %vm4895_vm0, %v4898_v9, %v4900_v31 }
 0x5dc   : > { %13754 = vst [vmem:[#allocation26_spill] sm:$0xff] %v11750_v14  ;;  %v13350_v35 = vand.u32 2147483647, %v11632_v8  ;;  %v4836_v13 = vshll.u32 %v4835_v58, 23  ;;  %vm4919_vm6 = vc.u32 %v11728_v26, %v11738_v6  ;;  %v5084_v5 = vand.u32 31, %v5082_v20 }
 0x5dd   : > { %v5032_v23 = vsub.s32 0, %v11744_v33  ;;  %v4814_v51 = vadd.s32 %v11612_v25, %v11609_v27  ;;  %v4920_v18 = vadd.s32 1, %v11739_v56  ;;  %v11765_v44 = vadd.f32 %v11620_v43, %v11585_v63 }
 0x5de   : > { %v11768_v37 = vadd.f32 %v4489_v52, %v11624_v3  ;;  %v4917_v10 = vmul.u32 %v11629_v57, %v4901_v39  ;;  %v5085_v49 = vsub.s32 32, %v5084_v5  ;;  %v11773_v50 = vadd.f32 %v11758_v4, %v4613_v1 }
 0x5df   : > { %v6835_v0 = vmin.u32 %v5032_v23, %v11744_v33  ;;  %v4832_v61 = vshrl.u32 %v4814_v51, %v4830_v47  ;;  %v4837_v9 = vor.u32 4788187, %v4836_v13  ;;  %v4921_v27 = vsel %vm4919_vm6, %v4920_v18, %v11739_v56  ;;  %v11783_v47 = vpop.f32.mrb[13].mxu0 }
 0x5e0   : > { %13755 = vst [vmem:[#allocation49_spill] sm:$0xff] %v11773_v50  ;;  %v5077_v25 = vand.u32 8388607, %v13350_v35  ;;  %v4831_v63 = vshll.u32 %v11683_v38, %v4829_v2  ;;  %v4922_v3 = vadd.s32 %v4921_v27, %v4917_v10  ;;  %v5083_v31 = vshrl.u32 %v5082_v20, 5  ;;  %13756 = vst [vmem:[#allocation29_spill] sm:$0xff] %v11783_v47 }
 0x5e1   : > { %v5034_v43 = vclz %v6835_v0  ;;  %v5087_v52 = vshll.u32 %v13423_v59, %v5084_v5  ;;  %v5088_v57 = vshrl.u32 %v13424_v55, %v5085_v49  ;;  %v5091_v58 = vshrl.u32 %v13425_v45, %v5085_v49 }
 0x5e2   : > { %v5094_v1 = vshrl.u32 %v13426_v34, %v5085_v49  ;;  %v4923_v56 = vadd.s32 536870912, %v4922_v3  ;;  %v5090_v13 = vshll.u32 %v13424_v55, %v5084_v5  ;;  %v5097_v23 = vshrl.u32 %v13427_v19, %v5085_v49 }
 0x5e3   : > { %v6836_v39 = vadd.s32 4294967294, %v5034_v43  ;;  %v4833_v38 = vor.u32 %v4832_v61, %v4831_v63  ;;  %v4838_v2 = vand.u32 2147483647, %v4837_v9  ;;  %v5093_v20 = vshll.u32 %v13425_v45, %v5084_v5 }
 0x5e4   : > { %v5096_v51 = vshll.u32 %v13426_v34, %v5084_v5  ;;  %v11789_v18 = vshrl.u32 %v4923_v56, 30  ;;  %v5089_v0 = vor.u32 %v5088_v57, %v5087_v52  ;;  %v5092_v10 = vor.u32 %v5091_v58, %v5090_v13 }
 0x5e5   : > { %vm6837_vm12 = vcmp.lt.s32.totalorder %v6836_v39, 0  ;;  %v5095_v35 = vor.u32 %v5094_v1, %v5093_v20  ;;  %v5099_v43 = vshll.u32 %v13427_v19, %v5084_v5  ;;  %v5100_v11 = vshrl.u32 %v13428_v41, %v5085_v49 }
 0x5e6   : > { %13757 = vst [vmem:[#allocation24_spill] sm:$0xff] %v11789_v18  ;;  %v11791_v27 = vsel %vm6837_vm12, 0, %v6836_v39  ;;  %v5078_v61 = vor.u32 8388608, %v5077_v25  ;;  %v5098_v9 = vor.u32 %v5097_v23, %v5096_v51  ;;  %v13354_v63 = vand.u32 2147483647, %v11773_v50 }
 0x5e7   : > { %v5042_v14 = vsub.s32 4294967266, %v11791_v27  ;;  %v4840_v47 = vcvt.s32.f32 %v4833_v38  ;;  %v4925_v46 = vshll.u32 %v11789_v18, 30  ;;  %v5101_v56 = vor.u32 %v5100_v11, %v5099_v43 }
 0x5e8   : > { %vm5102_vm13 = vcmp.lt.s32.totalorder %v5083_v31, 1  ;;  %v5086_v52 = vshrl.u32 %v13423_v59, %v5085_v49  ;;  %vm5103_vm5 = vcmp.lt.s32.totalorder %v5083_v31, 2  ;;  %vm5104_vm8 = vcmp.lt.s32.totalorder %v5083_v31, 3 }
 0x5e9   : > { %vm5105_vm14 = vcmp.lt.s32.totalorder %v5083_v31, 4  ;;  %v4841_v57 = vmul.f32 %v4840_v47, %v4838_v2  ;;  %v11799_v5 = vsub.s32 %v4922_v3, %v4925_v46  ;;  %v5110_v1 = vsel %vm5102_vm13, %v5089_v0, %v5092_v10 }
 0x5ea   : > { %v5107_v58 = vsel %vm5105_vm14, %v5095_v35, 2102212464  ;;  %v5043_v39 = vadd.s32 127, %v5042_v14  ;;  %v5106_v25 = vsel %vm5102_vm13, %v5086_v52, %v5089_v0  ;;  %v5111_v13 = vsel %vm5105_vm14, %v5098_v9, 920167782 }
 0x5eb   : > { %v5114_v23 = vsel %vm5102_vm13, %v5092_v10, %v5095_v35  ;;  %v4928_v38 = vsub.s32 0, %v11799_v5  ;;  %v5112_v20 = vsel %vm5104_vm8, %v5095_v35, %v5111_v13  ;;  %v5115_v11 = vsel %vm5105_vm14, %v5101_v56, 1326507024  ;;  %v11822_v13 = vpop.f32.mrb[13].mxu1 }
 0x5ec   : > { %v5118_v51 = vshll.u32 %v5078_v61, 8  ;;  %v5038_v49 = vsub.s32 32, %v11791_v27  ;;  %v5108_v43 = vsel %vm5104_vm8, %v5092_v10, %v5107_v58  ;;  %v5113_v47 = vsel %vm5103_vm5, %v5110_v1, %v5112_v20 }
 0x5ed   : > { %v5116_v46 = vsel %vm5104_vm8, %v5098_v9, %v5115_v11  ;;  %v6831_v3 = vmin.u32 %v4928_v38, %v11799_v5  ;;  %v5022_v35 = vadd.s32 %v11676_v62, %v11670_v24  ;;  %v5044_v61 = vshll.u32 %v5043_v39, 23 }
 0x5ee   : > { %v5117_v14 = vsel %vm5103_vm5, %v5114_v23, %v5116_v46  ;;  %v11809_v2 = vmul.u32.u64.low %v5118_v51, %v5113_v47  ;;  %v11810_v0 = vmul.u32.u64.high %v5118_v51, %v5113_v47, %v11809_v2  ;;  %v5109_v58 = vsel %vm5103_vm5, %v5106_v25, %v5108_v43 }
 0x5ef   : > { %v11815_v56 = vmul.u32.u64.low %v5118_v51, %v5117_v14  ;;  %v11816_v52 = vmul.u32.u64.high %v5118_v51, %v5117_v14, %v11815_v56  ;;  %v4930_v10 = vclz %v6831_v3  ;;  %v5177_v9 = vand.u32 2139095040, %v11773_v50 }
 0x5f0   : > { %v4443_v1 = vadd.f32 %v11497_v7, %v11542_v21  ;;  %v4842_v23 = vxor.u32 2147483648, %v4841_v57  ;;  %v5040_v38 = vshrl.u32 %v5022_v35, %v5038_v49  ;;  %v4615_v20 = vadd.f32 %v11515_v12, %v11768_v37 }
 0x5f1   : > { %v4491_v24 = vmul.f32 %v11477_v54, %v11482_v36  ;;  %v5039_v62 = vshll.u32 %v11744_v33, %v11791_v27  ;;  %v6832_v31 = vadd.s32 4294967294, %v4930_v10  ;;  %v5128_v39 = vadd.s32 1, %v11810_v0 }
 0x5f2   : > { %v5178_v25 = vshrl.u32 %v5177_v9, 23  ;;  %v5045_v11 = vor.u32 4788187, %v5044_v61  ;;  %v5125_v43 = vmul.u32 %v5118_v51, %v5109_v58  ;;  %vm5127_vm1 = vc.u32 %v11816_v52, %v11809_v2 }
 0x5f3   : > { %v5181_v7 = vand.u32 8388607, %v13354_v63  ;;  %vm6833_vm10 = vcmp.lt.s32.totalorder %v6832_v31, 0  ;;  %v5129_v12 = vsel %vm5127_vm1, %v5128_v39, %v11810_v0  ;;  %v4702_v36 = vadd.f32 %v11563_v48, %v11765_v44 }
 0x5f4   : > { %v6842_v21 = vadd.s32 4294967169, %v5178_v25  ;;  %vm4760_vm3 = vcmp.lt.s32.totalorder %v11493_v15, 0  ;;  %v5041_v33 = vor.u32 %v5040_v38, %v5039_v62  ;;  %v5130_v37 = vadd.s32 %v5129_v12, %v5125_v43 }
 0x5f5   : > { %v11839_v27 = vadd.f32 %v4491_v24, %v4443_v1  ;;  %v13758_v51 = vand.u32 2147483647, %v11493_v15  ;;  %v13759_v49 = vmov 0  ;;  %v4844_v47 = vsub.s32 4, %v11662_v17 }
 0x5f6   : > { %v5052_v46 = vsub.s32 4, %v11720_v42  ;;  %v11849_v3 = vsel %vm6833_vm10, 0, %v6832_v31  ;;  %v5046_v14 = vand.u32 2147483647, %v5045_v11  ;;  %v5131_v48 = vadd.s32 536870912, %v5130_v37 }
 0x5f7   : > { %vm11843_vm11 = vcmp.le.f32.partialorder %v13758_v51, 0.7853982  ;;  %v5184_v44 = vadd.s32 1, %v6842_v21  ;;  %v11852_v0 = vadd.f32 %v11758_v4, %v4615_v20  ;;  %v4843_v35 = vsel %vm4760_vm3, %v4842_v23, %v4841_v57 }
 0x5f8   : > { %v13760_v49 = vsel %vm11843_vm11, 4294967295, %v13759_v49  ;;  %vm4968_vm7 = vcmp.lt.s32.totalorder %v11551_v53, 0  ;;  %v5182_v61 = vor.u32 8388608, %v5181_v7  ;;  %v11858_v56 = vadd.f32 %v11758_v4, %v4702_v36 }
 0x5f9   : > { %13761 = vst [vmem:[#allocation37_spill] sm:$0xff] %v13760_v49  ;;  %v5048_v10 = vcvt.s32.f32 %v5041_v33  ;;  %v4938_v58 = vsub.s32 4294967266, %v11849_v3  ;;  %v11861_v9 = vshrl.u32 %v5131_v48, 30  ;;  %vm5185_vm0 = vcmp.gt.s32.totalorder %v5184_v44, 0 }
 0x5fa   : > { %13762 = vst [vmem:[#allocation27_spill] sm:$0xff] %v11858_v56  ;;  %v11866_v1 = vsel %vm4760_vm3, %v4844_v47, %v11662_v17  ;;  %v11871_v57 = vsel %vm4968_vm7, %v5052_v46, %v11720_v42  ;;  %v4918_v23 = vadd.s32 %v11738_v6, %v11728_v26  ;;  %v5186_v38 = vsel %vm5185_vm0, %v5184_v44, 0 }
 0x5fb   : > { %13763 = vst [vmem:[#allocation45_spill] sm:$0xff] %v11861_v9  ;;  %13764 = vst [vmem:[#allocation30_spill] sm:$0xff] %v11866_v1  ;;  %v11878_v20 = vsel %vm11843_vm11, %v11493_v15, %v4843_v35  ;;  %v11880_v24 = vmul.f32 %v5048_v10, %v5046_v14  ;;  %v5133_v62 = vshll.u32 %v11861_v9, 30  ;;  %v5188_v17 = vand.u32 31, %v5186_v38 }
 0x5fc   : > { %13765 = vst [vmem:[#allocation17_spill] sm:$0xff] %v11871_v57  ;;  %v4934_v31 = vsub.s32 32, %v11849_v3  ;;  %v11884_v39 = vshll.u32 %v5182_v61, 8  ;;  %v5281_v25 = vand.u32 2139095040, %v11852_v0  ;;  %v4939_v26 = vadd.s32 127, %v4938_v58 }
 0x5fd   : > { %v11888_v6 = vsub.s32 %v5130_v37, %v5133_v62  ;;  %v5189_v11 = vsub.s32 32, %v5188_v17  ;;  %v5385_v43 = vand.u32 2139095040, %v11858_v56  ;;  %v5187_v7 = vshrl.u32 %v5186_v38, 5 }
 0x5fe   : > { %v5191_v12 = vshll.u32 %v13423_v59, %v5188_v17  ;;  %v5194_v21 = vshll.u32 %v13424_v55, %v5188_v17  ;;  %v5197_v36 = vshll.u32 %v13425_v45, %v5188_v17  ;;  %v5200_v46 = vshll.u32 %v13426_v34, %v5188_v17 }
 0x5ff   : > { %v5136_v33 = vsub.s32 0, %v11888_v6  ;;  %v5192_v51 = vshrl.u32 %v13424_v55, %v5189_v11  ;;  %v5195_v47 = vshrl.u32 %v13425_v45, %v5189_v11  ;;  %v5198_v37 = vshrl.u32 %v13426_v34, %v5189_v11 }
 0x600   : > { %v5201_v14 = vshrl.u32 %v13427_v19, %v5189_v11  ;;  %v5203_v48 = vshll.u32 %v13427_v19, %v5188_v17  ;;  %v5204_v44 = vshrl.u32 %v13428_v41, %v5189_v11  ;;  %v4935_v35 = vshll.u32 %v11799_v5, %v11849_v3 }
 0x601   : > { %v6839_v61 = vmin.u32 %v5136_v33, %v11888_v6  ;;  %v5193_v10 = vor.u32 %v5192_v51, %v5191_v12  ;;  %v5196_v58 = vor.u32 %v5195_v47, %v5194_v21  ;;  %v5199_v38 = vor.u32 %v5198_v37, %v5197_v36 }
 0x602   : > { %v5202_v62 = vor.u32 %v5201_v14, %v5200_v46  ;;  %v5205_v63 = vor.u32 %v5204_v44, %v5203_v48  ;;  %v5386_v42 = vshrl.u32 %v5385_v43, 23  ;;  %v4936_v57 = vshrl.u32 %v4918_v23, %v4934_v31 }
 0x603   : > { %v4940_v15 = vshll.u32 %v4939_v26, 23  ;;  %v5138_v49 = vclz %v6839_v61  ;;  %vm5206_vm4 = vcmp.lt.s32.totalorder %v5187_v7, 1  ;;  %v5190_v1 = vshrl.u32 %v13423_v59, %v5189_v11 }
 0x604   : > { %vm5208_vm2 = vcmp.lt.s32.totalorder %v5187_v7, 3  ;;  %vm5209_vm15 = vcmp.lt.s32.totalorder %v5187_v7, 4  ;;  %v5214_v17 = vsel %vm5206_vm4, %v5193_v10, %v5196_v58  ;;  %v5218_v3 = vsel %vm5206_vm4, %v5196_v58, %v5199_v38 }
 0x605   : > { %v6840_v9 = vadd.s32 4294967294, %v5138_v49  ;;  %v5211_v18 = vsel %vm5209_vm15, %v5199_v38, 2102212464  ;;  %v5215_v5 = vsel %vm5209_vm15, %v5202_v62, 920167782  ;;  %vm5207_vm9 = vcmp.lt.s32.totalorder %v5187_v7, 2 }
 0x606   : > { %v5216_v12 = vsel %vm5208_vm2, %v5199_v38, %v5215_v5  ;;  %v5219_v21 = vsel %vm5209_vm15, %v5205_v63, 1326507024  ;;  %v6850_v36 = vadd.s32 4294967169, %v5386_v42  ;;  %v5210_v33 = vsel %vm5206_vm4, %v5190_v1, %v5193_v10  ;;  %v11919_v1 = vpop.f32.mrb[14].mxu0 }
 0x607   : > { %vm6841_vm6 = vcmp.lt.s32.totalorder %v6840_v9, 0  ;;  %v5217_v23 = vsel %vm5207_vm9, %v5214_v17, %v5216_v12  ;;  %v5220_v31 = vsel %vm5208_vm2, %v5202_v62, %v5219_v21  ;;  %v5212_v26 = vsel %vm5208_vm2, %v5196_v58, %v5211_v18  ;;  %13767 = vst [vmem:[#allocation20_spill] sm:$0xff] %v11919_v1 }
 0x608   : > { %v5221_v43 = vsel %vm5207_vm9, %v5218_v3, %v5220_v31  ;;  %v11909_v11 = vmul.u32.u64.low %v11884_v39, %v5217_v23  ;;  %v11910_v51 = vmul.u32.u64.high %v11884_v39, %v5217_v23, %v11909_v11  ;;  %v11913_v49 = vor.u32 %v4936_v57, %v4935_v35 }
 0x609   : > { %v11915_v47 = vsel %vm6841_vm6, 0, %v6840_v9  ;;  %v13766_v63 = vand.u32 2147483647, %v11858_v56  ;;  %v5392_v46 = vadd.s32 1, %v6850_v36  ;;  %v11921_v37 = vor.u32 4788187, %v4940_v15 }
 0x60a   : > { %v11924_v18 = vmul.u32.u64.low %v11884_v39, %v5221_v43  ;;  %v11925_v14 = vmul.u32.u64.high %v11884_v39, %v5221_v43, %v11924_v18  ;;  %v5282_v48 = vshrl.u32 %v5281_v25, 23  ;;  %7349 = vcosq.f32 %v11878_v20 }
 0x60b   : > { %v5389_v42 = vand.u32 8388607, %v13766_v63  ;;  %v5213_v57 = vsel %vm5207_vm9, %v5210_v33, %v5212_v26  ;;  %vm5393_vm12 = vcmp.gt.s32.totalorder %v5392_v46, 0  ;;  %v13362_v9 = vand.u32 2147483647, %v11852_v0 }
 0x60c   : > { %v5146_v35 = vsub.s32 4294967266, %v11915_v47  ;;  %v5232_v61 = vadd.s32 1, %v11910_v51  ;;  %v5394_v15 = vsel %vm5393_vm12, %v5392_v46, 0  ;;  %v5126_v58 = vadd.s32 %v11809_v2, %v11816_v52 }
 0x60d   : > { %v5390_v25 = vor.u32 8388608, %v5389_v42  ;;  %v5396_v38 = vand.u32 31, %v5394_v15  ;;  %v4942_v7 = vand.u32 2147483647, %v11921_v37  ;;  %v5229_v62 = vmul.u32 %v11884_v39, %v5213_v57 }
 0x60e   : > { %vm5231_vm13 = vc.u32 %v11925_v14, %v11909_v11  ;;  %v6846_v17 = vadd.s32 4294967169, %v5282_v48  ;;  %v5142_v5 = vsub.s32 32, %v11915_v47  ;;  %v11944_v21 = vand.u32 8388607, %v13362_v9 }
 0x60f   : > { %v5233_v3 = vsel %vm5231_vm13, %v5232_v61, %v11910_v51  ;;  %v5397_v12 = vsub.s32 32, %v5396_v38  ;;  %v5147_v2 = vadd.s32 127, %v5146_v35  ;;  %v5395_v36 = vshrl.u32 %v5394_v15, 5 }
 0x610   : > { %v5234_v52 = vadd.s32 %v5233_v3, %v5229_v62  ;;  %v5399_v33 = vshll.u32 %v13423_v59, %v5396_v38  ;;  %v5402_v23 = vshll.u32 %v13424_v55, %v5396_v38  ;;  %v5405_v26 = vshll.u32 %v13425_v45, %v5396_v38 }
 0x611   : > { %v5400_v39 = vshrl.u32 %v13424_v55, %v5397_v12  ;;  %v5403_v31 = vshrl.u32 %v13425_v45, %v5397_v12  ;;  %v5406_v51 = vshrl.u32 %v13426_v34, %v5397_v12  ;;  %v5408_v63 = vshll.u32 %v13426_v34, %v5396_v38 }
 0x612   : > { %v5235_v43 = vadd.s32 536870912, %v5234_v52  ;;  %v5409_v42 = vshrl.u32 %v13427_v19, %v5397_v12  ;;  %v5411_v18 = vshll.u32 %v13427_v19, %v5396_v38  ;;  %v5288_v48 = vadd.s32 1, %v6846_v17 }
 0x613   : > { %v5401_v46 = vor.u32 %v5400_v39, %v5399_v33  ;;  %v5404_v37 = vor.u32 %v5403_v31, %v5402_v23  ;;  %v5407_v35 = vor.u32 %v5406_v51, %v5405_v26  ;;  %v5412_v15 = vshrl.u32 %v13428_v41, %v5397_v12 }
 0x614   : > { %v11955_v57 = vshrl.u32 %v5235_v43, 30  ;;  %v5410_v61 = vor.u32 %v5409_v42, %v5408_v63  ;;  %v11958_v62 = vpop.eup %7349  ;;  %v5144_v3 = vshrl.u32 %v5126_v58, %v5142_v5  ;;  %v5148_v9 = vshll.u32 %v5147_v2, 23 }
 0x615   : > { %13768 = vst [vmem:[#allocation23_spill] sm:$0xff] %v11958_v62  ;;  %v5430_v10 = vshll.u32 %v5390_v25, 8  ;;  %v5286_v44 = vor.u32 8388608, %v11944_v21  ;;  %v5413_v33 = vor.u32 %v5412_v15, %v5411_v18  ;;  %vm5414_vm5 = vcmp.lt.s32.totalorder %v5395_v36, 1 }
 0x616   : > { %v5237_v1 = vshll.u32 %v11955_v57, 30  ;;  %vm5417_vm8 = vcmp.lt.s32.totalorder %v5395_v36, 4  ;;  %v5398_v38 = vshrl.u32 %v13423_v59, %v5397_v12  ;;  %v5422_v39 = vsel %vm5414_vm5, %v5401_v46, %v5404_v37 }
 0x617   : > { %v5419_v17 = vsel %vm5417_vm8, %v5407_v35, 2102212464  ;;  %vm5289_vm14 = vcmp.gt.s32.totalorder %v5288_v48, 0  ;;  %vm5415_vm1 = vcmp.lt.s32.totalorder %v5395_v36, 2  ;;  %vm5416_vm10 = vcmp.lt.s32.totalorder %v5395_v36, 3 }
 0x618   : > { %v11963_v23 = vsub.s32 %v5234_v52, %v5237_v1  ;;  %v5423_v31 = vsel %vm5417_vm8, %v5410_v61, 920167782  ;;  %v5418_v58 = vsel %vm5414_vm5, %v5398_v38, %v5401_v46  ;;  %v5426_v25 = vsel %vm5414_vm5, %v5404_v37, %v5407_v35 }
 0x619   : > { %v5424_v5 = vsel %vm5416_vm10, %v5407_v35, %v5423_v31  ;;  %v5427_v2 = vsel %vm5417_vm8, %v5413_v33, 1326507024  ;;  %v5420_v26 = vsel %vm5416_vm10, %v5404_v37, %v5419_v17  ;;  %v5290_v1 = vsel %vm5289_vm14, %v5288_v48, 0 }
 0x61a   : > { %v5240_v21 = vsub.s32 0, %v11963_v23  ;;  %v5425_v43 = vsel %vm5415_vm1, %v5422_v39, %v5424_v5  ;;  %v5428_v51 = vsel %vm5416_vm10, %v5410_v61, %v5427_v2  ;;  %v5143_v52 = vshll.u32 %v11888_v6, %v11915_v47 }
 0x61b   : > { %v5429_v12 = vsel %vm5415_vm1, %v5426_v25, %v5428_v51  ;;  %v11968_v63 = vmul.u32.u64.low %v5430_v10, %v5425_v43  ;;  %v11969_v42 = vmul.u32.u64.high %v5430_v10, %v5425_v43, %v11968_v63  ;;  %v13769_v37 = vxor.u32 2147483648, %v11880_v24 }
 0x61c   : > { %v6843_v46 = vmin.u32 %v5240_v21, %v11963_v23  ;;  %v11975_v18 = vmul.u32.u64.low %v5430_v10, %v5429_v12  ;;  %v11976_v35 = vmul.u32.u64.high %v5430_v10, %v5429_v12, %v11975_v18  ;;  %v13770_v15 = vcvt.s32.f32 %v11913_v49 }
 0x61d   : > { %v11983_v61 = vsel %vm4968_vm7, %v13769_v37, %v11880_v24  ;;  %v5421_v48 = vsel %vm5415_vm1, %v5418_v58, %v5420_v26  ;;  %v5292_v38 = vand.u32 31, %v5290_v1  ;;  %v11990_v6 = vor.u32 %v5144_v3, %v5143_v52 }
 0x61e   : > { %v11987_v33 = vmul.f32 %v13770_v15, %v4942_v7  ;;  %v11994_v47 = vadd.s32 %v11909_v11, %v11925_v14  ;;  %v5242_v17 = vclz %v6843_v46  ;;  %v4704_v39 = vadd.f32 %v11567_v28, %v11839_v27 }
 0x61f   : > { %v11998_v31 = vor.u32 4788187, %v5148_v9  ;;  %v5440_v24 = vadd.s32 1, %v11969_v42  ;;  %v5293_v49 = vsub.s32 32, %v5292_v38  ;;  %v12001_v7 = vshll.u32 %v5286_v44, 8 }
 0x620   : > { %v6844_v36 = vadd.s32 4294967294, %v5242_v17  ;;  %v5437_v58 = vmul.u32 %v5430_v10, %v5421_v48  ;;  %vm5439_vm3 = vc.u32 %v11976_v35, %v11968_v63  ;;  %v12005_v3 = vshrl.u32 %v5290_v1, 5 }
 0x621   : > { %v5441_v11 = vsel %vm5439_vm3, %v5440_v24, %v11969_v42  ;;  %v5295_v14 = vshll.u32 %v13423_v59, %v5292_v38  ;;  %v5296_v28 = vshrl.u32 %v13424_v55, %v5293_v49  ;;  %v5299_v27 = vshrl.u32 %v13425_v45, %v5293_v49 }
 0x622   : > { %vm6845_vm7 = vcmp.lt.s32.totalorder %v6844_v36, 0  ;;  %v5442_v9 = vadd.s32 %v5441_v11, %v5437_v58  ;;  %v5298_v44 = vshll.u32 %v13424_v55, %v5292_v38  ;;  %v5302_v5 = vshrl.u32 %v13426_v34, %v5293_v49 }
 0x623   : > { %v12013_v10 = vsel %vm6845_vm7, 0, %v6844_v36  ;;  %v5301_v25 = vshll.u32 %v13425_v45, %v5292_v38  ;;  %v5304_v2 = vshll.u32 %v13426_v34, %v5292_v38  ;;  %v5305_v21 = vshrl.u32 %v13427_v19, %v5293_v49 }
 0x624   : > { %v5250_v26 = vsub.s32 4294967266, %v12013_v10  ;;  %v5443_v43 = vadd.s32 536870912, %v5442_v9  ;;  %v5297_v51 = vor.u32 %v5296_v28, %v5295_v14  ;;  %v5300_v12 = vor.u32 %v5299_v27, %v5298_v44 }
 0x625   : > { %v13771_v42 = vand.u32 2147483647, %v11551_v53  ;;  %v13772_v1 = vmov 0  ;;  %v5303_v52 = vor.u32 %v5302_v5, %v5301_v25  ;;  %v5306_v46 = vor.u32 %v5305_v21, %v5304_v2 }
 0x626   : > { %v5307_v18 = vshll.u32 %v13427_v19, %v5292_v38  ;;  %v5308_v37 = vshrl.u32 %v13428_v41, %v5293_v49  ;;  %v5150_v15 = vand.u32 2147483647, %v11998_v31  ;;  %v12028_v48 = vshrl.u32 %v5443_v43, 30 }
 0x627   : > { %vm12021_vm0 = vcmp.le.f32.partialorder %v13771_v42, 0.7853982  ;;  %v12031_v17 = vadd.f32 %v11758_v4, %v4704_v39  ;;  %v4444_v24 = vadd.f32 %v11545_v32, %v11571_v30  ;;  %v5251_v36 = vadd.s32 127, %v5250_v26 }
 0x628   : > { %v13773_v1 = vsel %vm12021_vm0, 4294967295, %v13772_v1  ;;  %v5309_v58 = vor.u32 %v5308_v37, %v5307_v18  ;;  %vm5313_vm4 = vcmp.lt.s32.totalorder %v12005_v3, 4  ;;  %v4492_v11 = vmul.f32 %v11464_v16, %v11709_v40 }
 0x629   : > { %13774 = vst [vmem:[#allocation50_spill] sm:$0xff] %v13773_v1  ;;  %v5445_v38 = vshll.u32 %v12028_v48, 30  ;;  %v5294_v14 = vshrl.u32 %v13423_v59, %v5293_v49  ;;  %vm5310_vm2 = vcmp.lt.s32.totalorder %v12005_v3, 1  ;;  %v5315_v31 = vsel %vm5313_vm4, %v5303_v52, 2102212464 }
 0x62a   : > { %v5318_v28 = vsel %vm5310_vm2, %v5297_v51, %v5300_v12  ;;  %v5319_v4 = vsel %vm5313_vm4, %v5306_v46, 920167782  ;;  %v5322_v39 = vsel %vm5310_vm2, %v5300_v12, %v5303_v52  ;;  %v5323_v27 = vsel %vm5313_vm4, %v5309_v58, 1326507024 }
 0x62b   : > { %v5246_v32 = vsub.s32 32, %v12013_v10  ;;  %v12042_v30 = vsub.s32 %v5442_v9, %v5445_v38  ;;  %vm5311_vm15 = vcmp.lt.s32.totalorder %v12005_v3, 2  ;;  %vm5312_vm9 = vcmp.lt.s32.totalorder %v12005_v3, 3 }
 0x62c   : > { %v5252_v44 = vshll.u32 %v5251_v36, 23  ;;  %v5314_v5 = vsel %vm5310_vm2, %v5294_v14, %v5297_v51  ;;  %v5320_v25 = vsel %vm5312_vm9, %v5303_v52, %v5319_v4  ;;  %v5324_v2 = vsel %vm5312_vm9, %v5306_v46, %v5323_v27  ;;  %v12061_v52 = vpop.f32.mrb[14].mxu1 }
 0x62d   : > { %vm4864_vm6 = vcmp.lt.s32.totalorder %v11503_v29, 0  ;;  %v5448_v49 = vsub.s32 0, %v12042_v30  ;;  %v5316_v21 = vsel %vm5312_vm9, %v5300_v12, %v5315_v31  ;;  %v5321_v26 = vsel %vm5311_vm15, %v5318_v28, %v5320_v25 }
 0x62e   : > { %v5325_v9 = vsel %vm5311_vm15, %v5322_v39, %v5324_v2  ;;  %v12057_v18 = vmul.u32.u64.low %v12001_v7, %v5321_v26  ;;  %v12058_v51 = vmul.u32.u64.high %v12001_v7, %v5321_v26, %v12057_v18  ;;  %7351 = vsinq.f32 %v11878_v20 }
 0x62f   : > { %v12053_v43 = vmul.u32.u64.low %v12001_v7, %v5325_v9  ;;  %v12054_v42 = vmul.u32.u64.high %v12001_v7, %v5325_v9, %v12053_v43  ;;  %v5054_v12 = vsel %vm12021_vm0, %v11551_v53, %v11983_v61  ;;  %v5152_v46 = vcvt.s32.f32 %v11990_v6 }
 0x630   : > { %v6851_v37 = vmin.u32 %v5448_v49, %v12042_v30  ;;  %v4946_v36 = vxor.u32 2147483648, %v11987_v33  ;;  %vm5072_vm12 = vcmp.lt.s32.totalorder %v11632_v8, 0  ;;  %v5248_v58 = vshrl.u32 %v11994_v47, %v5246_v32  ;;  %v12090_v49 = vpop.permute.xlu1 %4734 }
 0x631   : > { %v5317_v38 = vsel %vm5311_vm15, %v5314_v5, %v5316_v21  ;;  %v5489_v20 = vand.u32 2139095040, %v12031_v17  ;;  %v5153_v14 = vmul.f32 %v5152_v46, %v5150_v15  ;;  %v5247_v31 = vshll.u32 %v11963_v23, %v12013_v10  ;;  %v13775_v23 = vld [vmem:[#allocation31_spill] sm:$0xff] }
 0x632   : > { %v5253_v61 = vor.u32 4788187, %v5252_v44  ;;  %v5450_v28 = vclz %v6851_v37  ;;  %vm5335_vm13 = vc.u32 %v12054_v42, %v12057_v18  ;;  %v5336_v6 = vadd.s32 1, %v12058_v51 }
 0x633   : > { %v5490_v4 = vshrl.u32 %v5489_v20, 23  ;;  %v4508_v39 = vadd.f32 %v4492_v11, %v4444_v24  ;;  %7353 = vcosq.f32 %v5054_v12  ;;  %v5333_v3 = vmul.u32 %v12001_v7, %v5317_v38 }
 0x634   : > { %v6852_v47 = vadd.s32 4294967294, %v5450_v28  ;;  %v13363_v27 = vand.u32 2147483647, %v12031_v17  ;;  %v5249_v32 = vor.u32 %v5248_v58, %v5247_v31  ;;  %v5337_v15 = vsel %vm5335_vm13, %v5336_v6, %v12058_v51  ;;  %v13779_v28 = vld [vmem:[#allocation38_spill] sm:$0xff] }
 0x635   : > { %v6854_v5 = vadd.s32 4294967169, %v5490_v4  ;;  %v4619_v10 = vadd.f32 %v13775_v23, %v4508_v39  ;;  %7355 = vsinq.f32 %v5054_v12  ;;  %v5154_v44 = vxor.u32 2147483648, %v5153_v14  ;;  %v13780_v6 = vld [vmem:[#allocation42_spill] sm:$0xff] }
 0x636   : > { %vm6853_vm5 = vcmp.lt.s32.totalorder %v6852_v47, 0  ;;  %v5338_v25 = vadd.s32 %v5337_v15, %v5333_v3  ;;  %v12088_v24 = vsel %vm4864_vm6, %v4946_v36, %v11987_v33  ;;  %v5254_v11 = vand.u32 2147483647, %v5253_v61 }
 0x637   : > { %v5453_v2 = vsel %vm6853_vm5, 0, %v6852_v47  ;;  %v5496_v7 = vadd.s32 1, %v6854_v5  ;;  %v5493_v43 = vand.u32 8388607, %v13363_v27  ;;  %v5256_v51 = vcvt.s32.f32 %v5249_v32 }
 0x638   : > { %v5458_v26 = vsub.s32 4294967266, %v5453_v2  ;;  %v5339_v9 = vadd.s32 536870912, %v5338_v25  ;;  %v5454_v12 = vsub.s32 32, %v5453_v2  ;;  %v12096_v46 = vadd.f32 %v12090_v49, %v4619_v10  ;;  %v12098_v33 = vpop.eup %7351 }
 0x639   : > { %vm5497_vm8 = vcmp.gt.s32.totalorder %v5496_v7, 0  ;;  %13777 = vst [vmem:[#allocation35_spill] sm:$0xff] %v12098_v33  ;;  %v12102_v37 = vsel %vm5072_vm12, %v5154_v44, %v5153_v14  ;;  %v12106_v20 = vmul.f32 %v5256_v51, %v5254_v11  ;;  %v5438_v31 = vadd.s32 %v11968_v63, %v11976_v35 }
 0x63a   : > { %13776 = vst [vmem:[#allocation46_spill] sm:$0xff] %v12096_v46  ;;  %13778 = vst [vmem:[#allocation39_spill] sm:$0xff] %v12102_v37  ;;  %v5459_v36 = vadd.s32 127, %v5458_v26  ;;  %v12104_v58 = vshrl.u32 %v5339_v9, 30  ;;  %v5498_v38 = vsel %vm5497_vm8, %v5496_v7, 0  ;;  %v12112_v4 = vadd.f32 %v13780_v6, %v13779_v28 }
 0x63b   : > { %v5500_v61 = vand.u32 31, %v5498_v38  ;;  %v5455_v39 = vshll.u32 %v12042_v30, %v5453_v2  ;;  %v5494_v3 = vor.u32 8388608, %v5493_v43  ;;  %v5456_v32 = vshrl.u32 %v5438_v31, %v5454_v12 }
 0x63c   : > { %v5460_v47 = vshll.u32 %v5459_v36, 23  ;;  %v5341_v14 = vshll.u32 %v12104_v58, 30  ;;  %v5593_v23 = vand.u32 2139095040, %v12096_v46  ;;  %v5499_v35 = vshrl.u32 %v5498_v38, 5 }
 0x63d   : > { %v5501_v15 = vsub.s32 32, %v5500_v61  ;;  %v12118_v10 = vpop.eup %7353  ;;  %v5503_v44 = vshll.u32 %v13423_v59, %v5500_v61  ;;  %v5506_v11 = vshll.u32 %v13424_v55, %v5500_v61  ;;  %v5509_v7 = vshll.u32 %v13425_v45, %v5500_v61 }
 0x63e   : > { %13781 = vst [vmem:[#allocation14_spill] sm:$0xff] %v12118_v10  ;;  %v12120_v63 = vsub.s32 %v5338_v25, %v5341_v14  ;;  %v5461_v43 = vor.u32 4788187, %v5460_v47  ;;  %v5512_v25 = vshll.u32 %v13426_v34, %v5500_v61  ;;  %v5515_v31 = vshll.u32 %v13427_v19, %v5500_v61 }
 0x63f   : > { %v5504_v30 = vshrl.u32 %v13424_v55, %v5501_v15  ;;  %v5507_v2 = vshrl.u32 %v13425_v45, %v5501_v15  ;;  %v5510_v26 = vshrl.u32 %v13426_v34, %v5501_v15  ;;  %v12128_v9 = vpop.eup %7355  ;;  %v5513_v12 = vshrl.u32 %v13427_v19, %v5501_v15 }
 0x640   : > { %13782 = vst [vmem:[#allocation6_spill] sm:$0xff] %v12128_v9  ;;  %v5344_v51 = vsub.s32 0, %v12120_v63  ;;  %v5516_v28 = vshrl.u32 %v13428_v41, %v5501_v15  ;;  %v5258_v6 = vxor.u32 2147483648, %v12106_v20  ;;  %v5457_v5 = vor.u32 %v5456_v32, %v5455_v39  ;;  %v12143_v32 = vpop.f32.mrb[15].mxu0 }
 0x641   : > { %v5505_v36 = vor.u32 %v5504_v30, %v5503_v44  ;;  %v5508_v38 = vor.u32 %v5507_v2, %v5506_v11  ;;  %v5511_v27 = vor.u32 %v5510_v26, %v5509_v7  ;;  %v5514_v21 = vor.u32 %v5513_v12, %v5512_v25 }
 0x642   : > { %v6847_v14 = vmin.u32 %v5344_v51, %v12120_v63  ;;  %v5517_v47 = vor.u32 %v5516_v28, %v5515_v31  ;;  %v5534_v53 = vshll.u32 %v5494_v3, 8  ;;  %v5594_v10 = vshrl.u32 %v5593_v23, 23 }
 0x643   : > { %vm5176_vm14 = vcmp.lt.s32.totalorder %v11773_v50, 0  ;;  %vm5518_vm1 = vcmp.lt.s32.totalorder %v5499_v35, 1  ;;  %vm5521_vm10 = vcmp.lt.s32.totalorder %v5499_v35, 4  ;;  %v13783_v44 = vand.u32 2147483647, %v12096_v46 }
 0x644   : > { %v5346_v9 = vclz %v6847_v14  ;;  %v5462_v11 = vand.u32 2147483647, %v5461_v43  ;;  %vm5520_vm3 = vcmp.lt.s32.totalorder %v5499_v35, 3  ;;  %v5526_v30 = vsel %vm5518_vm1, %v5505_v36, %v5508_v38 }
 0x645   : > { %v5597_v61 = vand.u32 8388607, %v13783_v44  ;;  %v5527_v2 = vsel %vm5521_vm10, %v5514_v21, 920167782  ;;  %v5523_v7 = vsel %vm5521_vm10, %v5511_v27, 2102212464  ;;  %v5530_v3 = vsel %vm5518_vm1, %v5508_v38, %v5511_v27 }
 0x646   : > { %v6848_v51 = vadd.s32 4294967294, %v5346_v9  ;;  %v5528_v39 = vsel %vm5520_vm3, %v5511_v27, %v5527_v2  ;;  %v5464_v23 = vcvt.s32.f32 %v5457_v5  ;;  %v5502_v26 = vshrl.u32 %v13423_v59, %v5501_v15 }
 0x647   : > { %vm5519_vm7 = vcmp.lt.s32.totalorder %v5499_v35, 2  ;;  %v5531_v25 = vsel %vm5521_vm10, %v5517_v47, 1326507024  ;;  %v6858_v31 = vadd.s32 4294967169, %v5594_v10  ;;  %v5524_v14 = vsel %vm5520_vm3, %v5508_v38, %v5523_v7 }
 0x648   : > { %vm6849_vm4 = vcmp.lt.s32.totalorder %v6848_v51, 0  ;;  %v5529_v43 = vsel %vm5519_vm7, %v5526_v30, %v5528_v39  ;;  %v5532_v12 = vsel %vm5520_vm3, %v5514_v21, %v5531_v25  ;;  %v5522_v9 = vsel %vm5518_vm1, %v5502_v26, %v5505_v36  ;;  %v13787_v26 = vld [vmem:[#allocation16_spill] sm:$0xff] }
 0x649   : > { %v12148_v28 = vsel %vm6849_vm4, 0, %v6848_v51  ;;  %v5533_v27 = vsel %vm5519_vm7, %v5530_v3, %v5532_v12  ;;  %v12153_v44 = vmul.f32 %v5464_v23, %v5462_v11  ;;  %v5600_v5 = vadd.s32 1, %v6858_v31  ;;  %v13786_v23 = vld [vmem:[#allocation19_spill] sm:$0xff] }
 0x64a   : > { %v5350_v15 = vsub.s32 32, %v12148_v28  ;;  %v4494_v47 = vmul.f32 %v11473_v22, %v11709_v40  ;;  %v12158_v30 = vmul.u32.u64.low %v5534_v53, %v5533_v27  ;;  %v12159_v2 = vmul.u32.u64.high %v5534_v53, %v5533_v27, %v12158_v30 }
 0x64b   : > { %v12161_v21 = vmul.u32.u64.low %v5534_v53, %v5529_v43  ;;  %v12162_v10 = vmul.u32.u64.high %v5534_v53, %v5529_v43, %v12161_v21  ;;  %v5354_v36 = vsub.s32 4294967266, %v12148_v28  ;;  %v5525_v38 = vsel %vm5519_vm7, %v5522_v9, %v5524_v14 }
 0x64c   : > { %v5598_v51 = vor.u32 8388608, %v5597_v61  ;;  %vm5601_vm2 = vcmp.gt.s32.totalorder %v5600_v5, 0  ;;  %v13784_v11 = vsub.s32 4, %v11955_v57  ;;  %v5334_v39 = vadd.s32 %v12057_v18, %v12054_v42 }
 0x64d   : > { %v5602_v3 = vsel %vm5601_vm2, %v5600_v5, 0  ;;  %v12178_v25 = vadd.f32 %v13787_v26, %v13786_v23  ;;  %v12183_v35 = vsel %vm5176_vm14, %v5258_v6, %v12106_v20  ;;  %v4510_v12 = vadd.f32 %v4494_v47, %v12112_v4  ;;  %v13788_v4 = vld [vmem:[#allocation22_spill] sm:$0xff] }
 0x64e   : > { %v12172_v7 = vsel %vm5176_vm14, %v13784_v11, %v11955_v57  ;;  %v5604_v43 = vand.u32 31, %v5602_v3  ;;  %v12187_v57 = vshrl.u32 %v5334_v39, %v5350_v15  ;;  %v5541_v31 = vmul.u32 %v5534_v53, %v5525_v38 }
 0x64f   : > { %13785 = vst [vmem:[#allocation9_spill] sm:$0xff] %v12172_v7  ;;  %vm5543_vm15 = vc.u32 %v12159_v2, %v12161_v21  ;;  %v5544_v42 = vadd.s32 1, %v12162_v10  ;;  %v5355_v18 = vadd.s32 127, %v5354_v36  ;;  %v12192_v14 = vshll.u32 %v5598_v51, 8 }
 0x650   : > { %v5605_v9 = vsub.s32 32, %v5604_v43  ;;  %v4708_v20 = vadd.f32 %v11652_v60, %v4510_v12  ;;  %v5603_v27 = vshrl.u32 %v5602_v3, 5  ;;  %v5607_v5 = vshll.u32 %v13423_v59, %v5604_v43 }
 0x651   : > { %v5545_v6 = vsel %vm5543_vm15, %v5544_v42, %v12162_v10  ;;  %v4493_v15 = vmul.f32 %v13788_v4, %v11709_v40  ;;  %v5610_v30 = vshll.u32 %v13424_v55, %v5604_v43  ;;  %v5613_v36 = vshll.u32 %v13425_v45, %v5604_v43 }
 0x652   : > { %v5546_v53 = vadd.s32 %v5545_v6, %v5541_v31  ;;  %v5608_v47 = vshrl.u32 %v13424_v55, %v5605_v9  ;;  %v5611_v38 = vshrl.u32 %v13425_v45, %v5605_v9  ;;  %v5614_v51 = vshrl.u32 %v13426_v34, %v5605_v9 }
 0x653   : > { %v5616_v60 = vshll.u32 %v13426_v34, %v5604_v43  ;;  %v5617_v10 = vshrl.u32 %v13427_v19, %v5605_v9  ;;  %v5619_v3 = vshll.u32 %v13427_v19, %v5604_v43  ;;  %v5620_v23 = vshrl.u32 %v13428_v41, %v5605_v9 }
 0x654   : > { %v5547_v11 = vadd.s32 536870912, %v5546_v53  ;;  %v5609_v39 = vor.u32 %v5608_v47, %v5607_v5  ;;  %v13789_v26 = vand.u32 2147483647, %v11773_v50  ;;  %v5356_v31 = vshll.u32 %v5355_v18, 23 }
 0x655   : > { %v5612_v42 = vor.u32 %v5611_v38, %v5610_v30  ;;  %v5615_v6 = vor.u32 %v5614_v51, %v5613_v36  ;;  %v5618_v61 = vor.u32 %v5617_v10, %v5616_v60  ;;  %vm5384_vm13 = vcmp.lt.s32.totalorder %v11858_v56, 0 }
 0x656   : > { %vm12210_vm9 = vcmp.le.f32.partialorder %v13789_v26, 0.7853982  ;;  %v12215_v1 = vshrl.u32 %v5547_v11, 30  ;;  %v5621_v7 = vor.u32 %v5620_v23, %v5619_v3  ;;  %vm5622_vm5 = vcmp.lt.s32.totalorder %v5603_v27, 1 }
 0x657   : > { %v12218_v43 = vadd.f32 %v12090_v49, %v4708_v20  ;;  %v5606_v5 = vshrl.u32 %v13423_v59, %v5605_v9  ;;  %vm5623_vm8 = vcmp.lt.s32.totalorder %v5603_v27, 2  ;;  %vm5625_vm14 = vcmp.lt.s32.totalorder %v5603_v27, 4 }
 0x658   : > { %13792 = vst [vmem:[#allocation8_spill] sm:$0xff] %v12215_v1  ;;  %v5630_v47 = vsel %vm5622_vm5, %v5609_v39, %v5612_v42  ;;  %v5549_v26 = vshll.u32 %v12215_v1, 30  ;;  %vm5624_vm1 = vcmp.lt.s32.totalorder %v5603_v27, 3  ;;  %v5627_v18 = vsel %vm5625_vm14, %v5615_v6, 2102212464 }
 0x659   : > { %13793 = vst [vmem:[#allocation12_spill] sm:$0xff] %v12218_v43  ;;  %v5631_v30 = vsel %vm5625_vm14, %v5618_v61, 920167782  ;;  %v13794_v36 = vand.u32 2147483647, %v11858_v56  ;;  %v13795_v38 = vmov 0  ;;  %v5626_v51 = vsel %vm5622_vm5, %v5606_v5, %v5609_v39 }
 0x65a   : > { %v5632_v60 = vsel %vm5624_vm1, %v5615_v6, %v5631_v30  ;;  %v5634_v20 = vsel %vm5622_vm5, %v5612_v42, %v5615_v6  ;;  %v5635_v10 = vsel %vm5625_vm14, %v5621_v7, 1326507024  ;;  %v12228_v11 = vsub.s32 %v5546_v53, %v5549_v26 }
 0x65b   : > { %vm12224_vm10 = vcmp.le.f32.partialorder %v13794_v36, 0.7853982  ;;  %v5628_v9 = vsel %vm5624_vm1, %v5612_v42, %v5627_v18  ;;  %v5633_v3 = vsel %vm5623_vm8, %v5630_v47, %v5632_v60  ;;  %v5636_v23 = vsel %vm5624_vm1, %v5618_v61, %v5635_v10  ;;  %v12243_v42 = vpop.f32.mrb[15].mxu1 }
 0x65c   : > { %v13796_v38 = vsel %vm12224_vm10, 4294967295, %v13795_v38  ;;  %v5351_v62 = vshll.u32 %v12120_v63, %v12148_v28  ;;  %v5637_v33 = vsel %vm5623_vm8, %v5634_v20, %v5636_v23  ;;  %v5357_v37 = vor.u32 4788187, %v5356_v31 }
 0x65d   : > { %13797 = vst [vmem:[#allocation7_spill] sm:$0xff] %v13796_v38  ;;  %v12235_v36 = vmul.u32.u64.low %v12192_v14, %v5633_v3  ;;  %v12236_v1 = vmul.u32.u64.high %v12192_v14, %v5633_v3, %v12235_v36  ;;  %v5552_v39 = vsub.s32 0, %v12228_v11  ;;  %v5629_v61 = vsel %vm5623_vm8, %v5626_v51, %v5628_v9 }
 0x65e   : > { %v12240_v7 = vmul.u32.u64.low %v12192_v14, %v5637_v33  ;;  %v12241_v53 = vmul.u32.u64.high %v12192_v14, %v5637_v33, %v12240_v7  ;;  %v13373_v6 = vand.u32 2147483647, %v12218_v43  ;;  %v5801_v63 = vand.u32 2139095040, %v12218_v43 }
 0x65f   : > { %v4509_v28 = vadd.f32 %v4493_v15, %v12178_v25  ;;  %v5262_v31 = vsel %vm12210_vm9, %v11773_v50, %v12183_v35  ;;  %v5468_v5 = vsub.s32 4, %v12028_v48  ;;  %v5353_v33 = vor.u32 %v12187_v57, %v5351_v62  ;;  %v13799_v15 = vld [vmem:[#allocation29_spill] sm:$0xff] }
 0x660   : > { %v6855_v47 = vmin.u32 %v5552_v39, %v12228_v11  ;;  %v13798_v27 = vxor.u32 2147483648, %v12153_v44  ;;  %v5648_v18 = vadd.s32 1, %v12236_v1  ;;  %v5802_v25 = vshrl.u32 %v5801_v63, 23  ;;  %v13800_v39 = vld [vmem:[#allocation26_spill] sm:$0xff] }
 0x661   : > { %v4621_v30 = vadd.f32 %v13799_v15, %v4509_v28  ;;  %v5358_v51 = vand.u32 2147483647, %v5357_v37  ;;  %v5645_v35 = vmul.u32 %v12192_v14, %v5629_v61  ;;  %vm5647_vm3 = vc.u32 %v12241_v53, %v12235_v36 }
 0x662   : > { %v5467_v26 = vsel %vm5384_vm13, %v13798_v27, %v12153_v44  ;;  %v5554_v60 = vclz %v6855_v47  ;;  %v5649_v62 = vsel %vm5647_vm3, %v5648_v18, %v12236_v1  ;;  %v6866_v57 = vadd.s32 4294967169, %v5802_v25  ;;  %v13801_v1 = vld [vmem:[#allocation21_spill] sm:$0xff] }
 0x663   : > { %v5805_v20 = vand.u32 8388607, %v13373_v6  ;;  %v12269_v10 = vadd.f32 %v12090_v49, %v4621_v30  ;;  %v12274_v44 = vsel %vm12224_vm10, %v11858_v56, %v5467_v26  ;;  %v5360_v37 = vcvt.s32.f32 %v5353_v33 }
 0x664   : > { %v6856_v9 = vadd.s32 4294967294, %v5554_v60  ;;  %v5650_v3 = vadd.s32 %v5649_v62, %v5645_v35  ;;  %v5808_v14 = vadd.s32 1, %v6866_v57  ;;  %v4447_v7 = vadd.f32 %v13801_v1, %v13800_v39  ;;  %v13803_v35 = vld [vmem:[#allocation33_spill] sm:$0xff] }
 0x665   : > { %v5697_v23 = vand.u32 2139095040, %v12269_v10  ;;  %v4495_v61 = vmul.f32 %v11477_v54, %v11709_v40  ;;  %7357 = vcosq.f32 %v5262_v31  ;;  %v12281_v63 = vmul.f32 %v5360_v37, %v5358_v51 }
 0x666   : > { %vm6857_vm7 = vcmp.lt.s32.totalorder %v6856_v9, 0  ;;  %v5651_v28 = vadd.s32 536870912, %v5650_v3  ;;  %7359 = vsinq.f32 %v5262_v31  ;;  %v5806_v27 = vor.u32 8388608, %v5805_v20 }
 0x667   : > { %v5557_v47 = vsel %vm6857_vm7, 0, %v6856_v9  ;;  %vm5809_vm4 = vcmp.gt.s32.totalorder %v5808_v14, 0  ;;  %v12286_v33 = vsel %vm5384_vm13, %v5468_v5, %v12028_v48  ;;  %7361 = vcosq.f32 %v12274_v44  ;;  %v13804_v48 = vld [vmem:[#allocation25_spill] sm:$0xff] }
 0x668   : > { %13802 = vst [vmem:[#allocation13_spill] sm:$0xff] %v12286_v33  ;;  %v12289_v26 = vshrl.u32 %v5651_v28, 30  ;;  %v13372_v40 = vand.u32 2147483647, %v12269_v10  ;;  %v5558_v18 = vsub.s32 32, %v5557_v47  ;;  %v5810_v25 = vsel %vm5809_vm4, %v5808_v14, 0 }
 0x669   : > { %v5698_v15 = vshrl.u32 %v5697_v23, 23  ;;  %v4511_v30 = vadd.f32 %v4495_v61, %v4447_v7  ;;  %v5542_v51 = vadd.s32 %v12161_v21, %v12159_v2  ;;  %v12298_v5 = vadd.f32 %v13804_v48, %v13803_v35  ;;  %v13805_v21 = vld [vmem:[#allocation44_spill] sm:$0xff] }
 0x66a   : > { %v5653_v60 = vshll.u32 %v12289_v26, 30  ;;  %v12301_v62 = vadd.s32 %v12235_v36, %v12241_v53  ;;  %v5812_v57 = vand.u32 31, %v5810_v25  ;;  %v12303_v20 = vshll.u32 %v5806_v27, 8 }
 0x66b   : > { %v4710_v37 = vadd.f32 %v11822_v13, %v4511_v30  ;;  %v5559_v9 = vshll.u32 %v12228_v11, %v5557_v47  ;;  %v12311_v2 = vand.u32 8388607, %v13372_v40  ;;  %v12315_v23 = vmul.f32 %v11464_v16, %v13805_v21 }
 0x66c   : > { %v12307_v14 = vsub.s32 %v5650_v3, %v5653_v60  ;;  %v5560_v39 = vshrl.u32 %v5542_v51, %v5558_v18  ;;  %v5562_v36 = vsub.s32 4294967266, %v5557_v47  ;;  %v5813_v53 = vsub.s32 32, %v5812_v57 }
 0x66d   : > { %v6862_v1 = vadd.s32 4294967169, %v5698_v15  ;;  %v5811_v61 = vshrl.u32 %v5810_v25, 5  ;;  %v5815_v13 = vshll.u32 %v13423_v59, %v5812_v57  ;;  %v5818_v11 = vshll.u32 %v13424_v55, %v5812_v57 }
 0x66e   : > { %v5656_v7 = vsub.s32 0, %v12307_v14  ;;  %v5816_v3 = vshrl.u32 %v13424_v55, %v5813_v53  ;;  %v5819_v28 = vshrl.u32 %v13425_v45, %v5813_v53  ;;  %v5821_v27 = vshll.u32 %v13425_v45, %v5812_v57 }
 0x66f   : > { %v5822_v16 = vshrl.u32 %v13426_v34, %v5813_v53  ;;  %v12324_v30 = vpop.eup %7357  ;;  %v5824_v18 = vshll.u32 %v13426_v34, %v5812_v57  ;;  %v5825_v25 = vshrl.u32 %v13427_v19, %v5813_v53  ;;  %v5827_v15 = vshll.u32 %v13427_v19, %v5812_v57 }
 0x670   : > { %13806 = vst [vmem:[#allocation43_spill] sm:$0xff] %v12324_v30  ;;  %v6859_v47 = vmin.u32 %v5656_v7, %v12307_v14  ;;  %v12330_v51 = vpop.eup %7359  ;;  %v5817_v60 = vor.u32 %v5816_v3, %v5815_v13  ;;  %v5820_v35 = vor.u32 %v5819_v28, %v5818_v11  ;;  %v5828_v40 = vshrl.u32 %v13428_v41, %v5813_v53 }
 0x671   : > { %13807 = vst [vmem:[#allocation28_spill] sm:$0xff] %v12330_v51  ;;  %v5823_v48 = vor.u32 %v5822_v16, %v5821_v27  ;;  %v12333_v6 = vpop.eup %7361  ;;  %v5826_v56 = vor.u32 %v5825_v25, %v5824_v18  ;;  %v5702_v38 = vor.u32 8388608, %v12311_v2  ;;  %v12337_v7 = vadd.f32 %v12090_v49, %v4710_v37 }
 0x672   : > { %13808 = vst [vmem:[#allocation41_spill] sm:$0xff] %v12333_v6  ;;  %v5658_v31 = vclz %v6859_v47  ;;  %vm5280_vm2 = vcmp.lt.s32.totalorder %v11852_v0, 0  ;;  %v12340_v33 = vor.u32 %v5560_v39, %v5559_v9  ;;  %v5563_v57 = vadd.s32 127, %v5562_v36 }
 0x673   : > { %v5829_v30 = vor.u32 %v5828_v40, %v5827_v15  ;;  %v5704_v13 = vadd.s32 1, %v6862_v1  ;;  %v5814_v3 = vshrl.u32 %v13423_v59, %v5813_v53  ;;  %vm5830_vm15 = vcmp.lt.s32.totalorder %v5811_v61, 1 }
 0x674   : > { %v6860_v11 = vadd.s32 4294967294, %v5658_v31  ;;  %vm5833_vm13 = vcmp.lt.s32.totalorder %v5811_v61, 4  ;;  %vm5832_vm5 = vcmp.lt.s32.totalorder %v5811_v61, 3  ;;  %v5838_v27 = vsel %vm5830_vm15, %v5817_v60, %v5820_v35 }
 0x675   : > { %v5835_v28 = vsel %vm5833_vm13, %v5823_v48, 2102212464  ;;  %v5839_v16 = vsel %vm5833_vm13, %v5826_v56, 920167782  ;;  %vm5831_vm14 = vcmp.lt.s32.totalorder %v5811_v61, 2  ;;  %v5842_v37 = vsel %vm5830_vm15, %v5820_v35, %v5823_v48 }
 0x676   : > { %vm6861_vm8 = vcmp.lt.s32.totalorder %v6860_v11, 0  ;;  %v5840_v49 = vsel %vm5832_vm5, %v5823_v48, %v5839_v16  ;;  %v5834_v47 = vsel %vm5830_vm15, %v5814_v3, %v5817_v60  ;;  %v5843_v39 = vsel %vm5833_vm13, %v5829_v30, 1326507024 }
 0x677   : > { %v5661_v2 = vsel %vm6861_vm8, 0, %v6860_v11  ;;  %v5841_v9 = vsel %vm5831_vm14, %v5838_v27, %v5840_v49  ;;  %v5836_v31 = vsel %vm5832_vm5, %v5820_v35, %v5835_v28  ;;  %v5844_v1 = vsel %vm5832_vm5, %v5826_v56, %v5843_v39 }
 0x678   : > { %v5662_v40 = vsub.s32 32, %v5661_v2  ;;  %v5666_v36 = vsub.s32 4294967266, %v5661_v2  ;;  %v5845_v53 = vsel %vm5831_vm14, %v5842_v37, %v5844_v1  ;;  %vm5705_vm1 = vcmp.gt.s32.totalorder %v5704_v13, 0 }
 0x679   : > { %v12346_v18 = vmul.u32.u64.low %v12303_v20, %v5841_v9  ;;  %v12347_v25 = vmul.u32.u64.high %v12303_v20, %v5841_v9, %v12346_v18  ;;  %v5564_v15 = vshll.u32 %v5563_v57, 23  ;;  %7363 = vsinq.f32 %v12274_v44 }
 0x67a   : > { %v5667_v16 = vadd.s32 127, %v5666_v36  ;;  %v12351_v48 = vmul.u32.u64.low %v12303_v20, %v5845_v53  ;;  %v12352_v60 = vmul.u32.u64.high %v12303_v20, %v5845_v53, %v12351_v48  ;;  %v5664_v30 = vshrl.u32 %v12301_v62, %v5662_v40 }
 0x67b   : > { %v5837_v56 = vsel %vm5831_vm14, %v5834_v47, %v5836_v31  ;;  %v5706_v35 = vsel %vm5705_vm1, %v5704_v13, 0  ;;  %v13809_v11 = vxor.u32 2147483648, %v12281_v63  ;;  %v4512_v27 = vadd.f32 %v12315_v23, %v12298_v5 }
 0x67c   : > { %v5668_v57 = vshll.u32 %v5667_v16, 23  ;;  %v5708_v28 = vand.u32 31, %v5706_v35  ;;  %v5663_v49 = vshll.u32 %v12307_v14, %v5661_v2  ;;  %v5856_v44 = vadd.s32 1, %v12347_v25 }
 0x67d   : > { %v12362_v3 = vsel %vm5280_vm2, %v13809_v11, %v12281_v63  ;;  %v12368_v62 = vshll.u32 %v5702_v38, 8  ;;  %v13378_v61 = vand.u32 2147483647, %v12337_v7  ;;  %v12371_v13 = vor.u32 4788187, %v5564_v15 }
 0x67e   : > { %v5853_v63 = vmul.u32 %v12303_v20, %v5837_v56  ;;  %vm5855_vm3 = vc.u32 %v12352_v60, %v12346_v18  ;;  %v5665_v47 = vor.u32 %v5664_v30, %v5663_v49  ;;  %v5709_v23 = vsub.s32 32, %v5708_v28 }
 0x67f   : > { %v5857_v5 = vsel %vm5855_vm3, %v5856_v44, %v12347_v25  ;;  %v5905_v14 = vand.u32 2139095040, %v12337_v7  ;;  %v5669_v2 = vor.u32 4788187, %v5668_v57  ;;  %v5711_v9 = vshll.u32 %v13423_v59, %v5708_v28 }
 0x680   : > { %v5858_v38 = vadd.s32 %v5857_v5, %v5853_v63  ;;  %v5714_v39 = vshll.u32 %v13424_v55, %v5708_v28  ;;  %v5712_v40 = vshrl.u32 %v13424_v55, %v5709_v23  ;;  %v5715_v36 = vshrl.u32 %v13425_v45, %v5709_v23 }
 0x681   : > { %v5717_v20 = vshll.u32 %v13425_v45, %v5708_v28  ;;  %v5718_v31 = vshrl.u32 %v13426_v34, %v5709_v23  ;;  %v5707_v53 = vshrl.u32 %v5706_v35, 5  ;;  %v5720_v25 = vshll.u32 %v13426_v34, %v5708_v28 }
 0x682   : > { %v5859_v1 = vadd.s32 536870912, %v5858_v38  ;;  %v5721_v15 = vshrl.u32 %v13427_v19, %v5709_v23  ;;  %v5713_v16 = vor.u32 %v5712_v40, %v5711_v9  ;;  %v5716_v48 = vor.u32 %v5715_v36, %v5714_v39 }
 0x683   : > { %v5719_v30 = vor.u32 %v5718_v31, %v5717_v20  ;;  %v5724_v56 = vshrl.u32 %v13428_v41, %v5709_v23  ;;  %v5670_v11 = vand.u32 2147483647, %v5669_v2  ;;  %v5723_v44 = vshll.u32 %v13427_v19, %v5708_v28  ;;  %v12391_v63 = vpop.eup %7363 }
 0x684   : > { %v12388_v57 = vshrl.u32 %v5859_v1, 30  ;;  %v5722_v49 = vor.u32 %v5721_v15, %v5720_v25  ;;  %13811 = vst [vmem:[#allocation47_spill] sm:$0xff] %v12391_v63  ;;  %v5566_v5 = vand.u32 2147483647, %v12371_v13  ;;  %v5672_v35 = vcvt.s32.f32 %v5665_v47  ;;  %v13812_v47 = vld [vmem:[#allocation20_spill] sm:$0xff] }
 0x685   : > { %v5906_v37 = vshrl.u32 %v5905_v14, 23  ;;  %v5909_v6 = vand.u32 8388607, %v13378_v61  ;;  %v5725_v39 = vor.u32 %v5724_v56, %v5723_v44  ;;  %vm5726_vm7 = vcmp.lt.s32.totalorder %v5707_v53, 1  ;;  %v12408_v61 = vpop.permute.xlu0 %4739 }
 0x686   : > { %13810 = vst [vmem:[#allocation15_spill] sm:$0xff] %v12388_v57  ;;  %v5861_v9 = vshll.u32 %v12388_v57, 30  ;;  %vm5729_vm4 = vcmp.lt.s32.totalorder %v5707_v53, 4  ;;  %v5710_v2 = vshrl.u32 %v13423_v59, %v5709_v23  ;;  %v5734_v36 = vsel %vm5726_vm7, %v5713_v16, %v5716_v48 }
 0x687   : > { %v5731_v40 = vsel %vm5729_vm4, %v5719_v30, 2102212464  ;;  %v5735_v28 = vsel %vm5729_vm4, %v5722_v49, 920167782  ;;  %v12400_v20 = vmul.f32 %v5672_v35, %v5670_v11  ;;  %vm5728_vm15 = vcmp.lt.s32.totalorder %v5707_v53, 3 }
 0x688   : > { %v12402_v13 = vsub.s32 %v5858_v38, %v5861_v9  ;;  %v4625_v14 = vadd.f32 %v13812_v47, %v4512_v27  ;;  %vm5727_vm13 = vcmp.lt.s32.totalorder %v5707_v53, 2  ;;  %v5730_v31 = vsel %vm5726_vm7, %v5710_v2, %v5713_v16 }
 0x689   : > { %v5736_v1 = vsel %vm5728_vm15, %v5719_v30, %v5735_v28  ;;  %v5738_v25 = vsel %vm5726_vm7, %v5716_v48, %v5719_v30  ;;  %v5732_v56 = vsel %vm5728_vm15, %v5716_v48, %v5731_v40  ;;  %v5739_v44 = vsel %vm5729_vm4, %v5725_v39, 1326507024 }
 0x68a   : > { %v5864_v15 = vsub.s32 0, %v12402_v13  ;;  %v5737_v23 = vsel %vm5727_vm13, %v5734_v36, %v5736_v1  ;;  %v5740_v11 = vsel %vm5728_vm15, %v5722_v49, %v5739_v44  ;;  %v6870_v27 = vadd.s32 4294967169, %v5906_v37  ;;  %v13815_v44 = vld [vmem:[#allocation40_spill] sm:$0xff] }
 0x68b   : > { %v12411_v38 = vmul.u32.u64.low %v12368_v62, %v5737_v23  ;;  %v12412_v35 = vmul.u32.u64.high %v12368_v62, %v5737_v23, %v12411_v38  ;;  %v5741_v30 = vsel %vm5727_vm13, %v5738_v25, %v5740_v11  ;;  %v5910_v9 = vor.u32 8388608, %v5909_v6  ;;  %v13814_v23 = vld [vmem:[#allocation11_spill] sm:$0xff] }
 0x68c   : > { %v6867_v16 = vmin.u32 %v5864_v15, %v12402_v13  ;;  %v12418_v48 = vadd.f32 %v12408_v61, %v4625_v14  ;;  %v5733_v2 = vsel %vm5727_vm13, %v5730_v31, %v5732_v56  ;;  %v5912_v49 = vadd.s32 1, %v6870_v27 }
 0x68d   : > { %v12422_v39 = vmul.u32.u64.low %v12368_v62, %v5741_v30  ;;  %v12423_v40 = vmul.u32.u64.high %v12368_v62, %v5741_v30, %v12422_v39  ;;  %v13813_v36 = vcvt.s32.f32 %v12340_v33  ;;  %v5854_v53 = vadd.s32 %v12346_v18, %v12352_v60 }
 0x68e   : > { %v5866_v47 = vclz %v6867_v16  ;;  %v6009_v1 = vand.u32 2139095040, %v12418_v48  ;;  %v5752_v14 = vadd.s32 1, %v12412_v35  ;;  %vm5913_vm5 = vcmp.gt.s32.totalorder %v5912_v49, 0 }
 0x68f   : > { %v12427_v28 = vmul.f32 %v13813_v36, %v5566_v5  ;;  %v5749_v25 = vmul.u32 %v12368_v62, %v5733_v2  ;;  %v5914_v15 = vsel %vm5913_vm5, %v5912_v49, 0  ;;  %v12436_v33 = vshll.u32 %v5910_v9, 8 }
 0x690   : > { %v6868_v31 = vadd.s32 4294967294, %v5866_v47  ;;  %vm5751_vm8 = vc.u32 %v12423_v40, %v12411_v38  ;;  %v5916_v5 = vand.u32 31, %v5914_v15  ;;  %v12443_v11 = vadd.f32 %v13815_v44, %v13814_v23 }
 0x691   : > { %v5753_v18 = vsel %vm5751_vm8, %v5752_v14, %v12412_v35  ;;  %v6010_v60 = vshrl.u32 %v6009_v1, 23  ;;  %v12448_v62 = vmul.f32 %v11473_v22, %v13805_v21  ;;  %v12450_v30 = vshrl.u32 %v5914_v15, 5 }
 0x692   : > { %vm6869_vm14 = vcmp.lt.s32.totalorder %v6868_v31, 0  ;;  %v5754_v16 = vadd.s32 %v5753_v18, %v5749_v25  ;;  %v5917_v9 = vsub.s32 32, %v5916_v5  ;;  %v5919_v36 = vshll.u32 %v13423_v59, %v5916_v5 }
 0x693   : > { %v5869_v27 = vsel %vm6869_vm14, 0, %v6868_v31  ;;  %v5922_v35 = vshll.u32 %v13424_v55, %v5916_v5  ;;  %v5925_v31 = vshll.u32 %v13425_v45, %v5916_v5  ;;  %vm5592_vm1 = vcmp.lt.s32.totalorder %v12096_v46, 0 }
 0x694   : > { %v5870_v2 = vsub.s32 32, %v5869_v27  ;;  %v5871_v39 = vshll.u32 %v12402_v13, %v5869_v27  ;;  %v5874_v49 = vsub.s32 4294967266, %v5869_v27  ;;  %v5755_v47 = vadd.s32 536870912, %v5754_v16 }
 0x695   : > { %v5920_v23 = vshrl.u32 %v13424_v55, %v5917_v9  ;;  %v5923_v1 = vshrl.u32 %v13425_v45, %v5917_v9  ;;  %v5926_v25 = vshrl.u32 %v13426_v34, %v5917_v9  ;;  %v5928_v18 = vshll.u32 %v13426_v34, %v5916_v5 }
 0x696   : > { %v5872_v22 = vshrl.u32 %v5854_v53, %v5870_v2  ;;  %v5875_v14 = vadd.s32 127, %v5874_v49  ;;  %v12460_v15 = vshrl.u32 %v5755_v47, 30  ;;  %v5929_v6 = vshrl.u32 %v13427_v19, %v5917_v9 }
 0x697   : > { %v5921_v13 = vor.u32 %v5920_v23, %v5919_v36  ;;  %v5924_v44 = vor.u32 %v5923_v1, %v5922_v35  ;;  %v5927_v56 = vor.u32 %v5926_v25, %v5925_v31  ;;  %v5931_v2 = vshll.u32 %v13427_v19, %v5916_v5 }
 0x698   : > { %v5873_v27 = vor.u32 %v5872_v22, %v5871_v39  ;;  %v5876_v37 = vshll.u32 %v5875_v14, 23  ;;  %v5757_v53 = vshll.u32 %v12460_v15, 30  ;;  %v5932_v49 = vshrl.u32 %v13428_v41, %v5917_v9 }
 0x699   : > { %v6874_v63 = vadd.s32 4294967169, %v6010_v60  ;;  %v5918_v47 = vshrl.u32 %v13423_v59, %v5917_v9  ;;  %v5930_v50 = vor.u32 %v5929_v6, %v5928_v18  ;;  %vm5934_vm3 = vcmp.lt.s32.totalorder %v12450_v30, 1 }
 0x69a   : > { %v5877_v51 = vor.u32 4788187, %v5876_v37  ;;  %v13816_v36 = vand.u32 2147483647, %v12096_v46  ;;  %v13817_v39 = vmov 0  ;;  %v5880_v23 = vcvt.s32.f32 %v5873_v27 }
 0x69b   : > { %v12475_v35 = vsub.s32 %v5754_v16, %v5757_v53  ;;  %v5933_v1 = vor.u32 %v5932_v49, %v5931_v2  ;;  %vm5937_vm4 = vcmp.lt.s32.totalorder %v12450_v30, 4  ;;  %vm5935_vm15 = vcmp.lt.s32.totalorder %v12450_v30, 2 }
 0x69c   : > { %vm12471_vm7 = vcmp.le.f32.partialorder %v13816_v36, 0.7853982  ;;  %v5878_v5 = vand.u32 2147483647, %v5877_v51  ;;  %v5939_v37 = vsel %vm5937_vm4, %v5927_v56, 2102212464  ;;  %v5942_v6 = vsel %vm5934_vm3, %v5921_v13, %v5924_v44 }
 0x69d   : > { %v13818_v39 = vsel %vm12471_vm7, 4294967295, %v13817_v39  ;;  %vm13393_vm13 = vcmp.lt.s32.totalorder %v12218_v43, 0  ;;  %v5760_v60 = vsub.s32 0, %v12475_v35  ;;  %vm5936_vm5 = vcmp.lt.s32.totalorder %v12450_v30, 3 }
 0x69e   : > { %13819 = vst [vmem:[#allocation5_spill] sm:$0xff] %v13818_v39  ;;  %v5943_v9 = vsel %vm5937_vm4, %v5930_v50, 920167782  ;;  %v5946_v16 = vsel %vm5934_vm3, %v5924_v44, %v5927_v56  ;;  %vm13398_vm8 = vcmp.lt.s32.totalorder %v12031_v17, 0  ;;  %v5881_v22 = vmul.f32 %v5880_v23, %v5878_v5 }
 0x69f   : > { %v5938_v51 = vsel %vm5934_vm3, %v5918_v47, %v5921_v13  ;;  %v5944_v14 = vsel %vm5936_vm5, %v5927_v56, %v5943_v9  ;;  %v5947_v31 = vsel %vm5937_vm4, %v5933_v1, 1326507024  ;;  %v6863_v25 = vmin.u32 %v5760_v60, %v12475_v35 }
 0x6a0   : > { %v5940_v18 = vsel %vm5936_vm5, %v5924_v44, %v5939_v37  ;;  %v5945_v27 = vsel %vm5935_vm15, %v5942_v6, %v5944_v14  ;;  %v5948_v53 = vsel %vm5936_vm5, %v5930_v50, %v5947_v31  ;;  %v13820_v2 = vxor.u32 2147483648, %v12400_v20 }
 0x6a1   : > { %v5949_v36 = vsel %vm5935_vm15, %v5946_v16, %v5948_v53  ;;  %v12500_v13 = vmul.u32.u64.low %v12436_v33, %v5945_v27  ;;  %v12501_v56 = vmul.u32.u64.high %v12436_v33, %v5945_v27, %v12500_v13  ;;  %v5762_v47 = vclz %v6863_v25 }
 0x6a2   : > { %v5675_v49 = vsel %vm5592_vm1, %v13820_v2, %v12400_v20  ;;  %v12505_v44 = vmul.u32.u64.low %v12436_v33, %v5949_v36  ;;  %v12506_v23 = vmul.u32.u64.high %v12436_v33, %v5949_v36, %v12505_v44  ;;  %v13821_v50 = vand.u32 2147483647, %v12418_v48 }
 0x6a3   : > { %v5882_v5 = vxor.u32 2147483648, %v5881_v22  ;;  %v5941_v20 = vsel %vm5935_vm15, %v5938_v51, %v5940_v18  ;;  %v6016_v37 = vadd.s32 1, %v6874_v63  ;;  %v4514_v6 = vadd.f32 %v12448_v62, %v12443_v11  ;;  %v13829_v44 = vld [vmem:[#allocation36_spill] sm:$0xff] }
 0x6a4   : > { %v6013_v1 = vand.u32 8388607, %v13821_v50  ;;  %v5570_v60 = vxor.u32 2147483648, %v12427_v28  ;;  %v13822_v9 = vsub.s32 4, %v12289_v26  ;;  %v13824_v14 = vand.u32 2147483647, %v12218_v43 }
 0x6a5   : > { %v13825_v31 = vmov 0  ;;  %v6864_v30 = vadd.s32 4294967294, %v5762_v47  ;;  %v12531_v63 = vsel %vm12471_vm7, %v12096_v46, %v5675_v49  ;;  %v5960_v11 = vadd.s32 1, %v12501_v56 }
 0x6a6   : > { %v12520_v16 = vsel %vm5592_vm1, %v13822_v9, %v12289_v26  ;;  %vm12524_vm14 = vcmp.le.f32.partialorder %v13824_v14, 0.7853982  ;;  %vm6017_vm3 = vcmp.gt.s32.totalorder %v6016_v37, 0  ;;  %v4714_v62 = vadd.f32 %v12061_v52, %v4514_v6 }
 0x6a7   : > { %13823 = vst [vmem:[#allocation31_spill] sm:$0xff] %v12520_v16  ;;  %v13826_v31 = vsel %vm12524_vm14, 4294967295, %v13825_v31  ;;  %vm6865_vm4 = vcmp.lt.s32.totalorder %v6864_v30, 0  ;;  %v5957_v26 = vmul.u32 %v12436_v33, %v5941_v20  ;;  %vm5959_vm1 = vc.u32 %v12506_v23, %v12500_v13 }
 0x6a8   : > { %13827 = vst [vmem:[#allocation38_spill] sm:$0xff] %v13826_v31  ;;  %v6014_v51 = vor.u32 8388608, %v6013_v1  ;;  %v5883_v25 = vsel %vm13393_vm13, %v5882_v5, %v5881_v22  ;;  %v5765_v18 = vsel %vm6865_vm4, 0, %v6864_v30  ;;  %v5961_v27 = vsel %vm5959_vm1, %v5960_v11, %v12501_v56  ;;  %v13828_v22 = vld [vmem:[#allocation32_spill] sm:$0xff] }
 0x6a9   : > { %v6018_v53 = vsel %vm6017_vm3, %v6016_v37, 0  ;;  %v12544_v2 = vsel %vm13398_vm8, %v5570_v60, %v12427_v28  ;;  %v5770_v49 = vsub.s32 4294967266, %v5765_v18  ;;  %v5962_v33 = vadd.s32 %v5961_v27, %v5957_v26 }
 0x6aa   : > { %7365 = vcosq.f32 %v12531_v63  ;;  %v5750_v36 = vadd.s32 %v12411_v38, %v12423_v40  ;;  %v6020_v47 = vand.u32 31, %v6018_v53  ;;  %v12552_v50 = vadd.f32 %v13829_v44, %v13828_v22 }
 0x6ab   : > { %v12557_v56 = vsel %vm12524_vm14, %v12218_v43, %v5883_v25  ;;  %v5771_v28 = vadd.s32 127, %v5770_v49  ;;  %v5963_v1 = vadd.s32 536870912, %v5962_v33  ;;  %v12561_v5 = vmul.f32 %v13788_v4, %v13805_v21 }
 0x6ac   : > { %v5766_v20 = vsub.s32 32, %v5765_v18  ;;  %v6021_v37 = vsub.s32 32, %v6020_v47  ;;  %v12563_v6 = vshll.u32 %v6014_v51, 8  ;;  %v12566_v38 = vadd.f32 %v12408_v61, %v4714_v62 }
 0x6ad   : > { %v12568_v40 = vshrl.u32 %v5963_v1, 30  ;;  %v6023_v60 = vshll.u32 %v13423_v59, %v6020_v47  ;;  %v6026_v9 = vshll.u32 %v13424_v55, %v6020_v47  ;;  %v6029_v14 = vshll.u32 %v13425_v45, %v6020_v47 }
 0x6ae   : > { %v5772_v30 = vshll.u32 %v5771_v28, 23  ;;  %v6024_v11 = vshrl.u32 %v13424_v55, %v6021_v37  ;;  %v6027_v4 = vshrl.u32 %v13425_v45, %v6021_v37  ;;  %v6030_v26 = vshrl.u32 %v13426_v34, %v6021_v37 }
 0x6af   : > { %13830 = vst [vmem:[#allocation42_spill] sm:$0xff] %v12568_v40  ;;  %v5965_v51 = vshll.u32 %v12568_v40, 30  ;;  %v6019_v25 = vshrl.u32 %v6018_v53, 5  ;;  %v6032_v62 = vshll.u32 %v13426_v34, %v6020_v47  ;;  %v6033_v27 = vshrl.u32 %v13427_v19, %v6021_v37 }
 0x6b0   : > { %v5767_v49 = vshll.u32 %v12475_v35, %v5765_v18  ;;  %v6025_v22 = vor.u32 %v6024_v11, %v6023_v60  ;;  %v6028_v44 = vor.u32 %v6027_v4, %v6026_v9  ;;  %v6031_v1 = vor.u32 %v6030_v26, %v6029_v14 }
 0x6b1   : > { %v12580_v52 = vsub.s32 %v5962_v33, %v5965_v51  ;;  %v6034_v28 = vor.u32 %v6033_v27, %v6032_v62  ;;  %v6035_v31 = vshll.u32 %v13427_v19, %v6020_v47  ;;  %v6036_v46 = vshrl.u32 %v13428_v41, %v6021_v37 }
 0x6b2   : > { %v5768_v39 = vshrl.u32 %v5750_v36, %v5766_v20  ;;  %v5773_v16 = vor.u32 4788187, %v5772_v30  ;;  %v6022_v53 = vshrl.u32 %v13423_v59, %v6021_v37  ;;  %v6217_v40 = vand.u32 2139095040, %v12566_v38 }
 0x6b3   : > { %v5968_v43 = vsub.s32 0, %v12580_v52  ;;  %v6037_v57 = vor.u32 %v6036_v46, %v6035_v31  ;;  %vm6038_vm15 = vcmp.lt.s32.totalorder %v6019_v25, 1  ;;  %vm6041_vm5 = vcmp.lt.s32.totalorder %v6019_v25, 4 }
 0x6b4   : > { %v12587_v35 = vpop.eup %7365  ;;  %vm6040_vm3 = vcmp.lt.s32.totalorder %v6019_v25, 3  ;;  %v6043_v18 = vsel %vm6041_vm5, %v6031_v1, 2102212464  ;;  %v6046_v33 = vsel %vm6038_vm15, %v6025_v22, %v6028_v44  ;;  %v6047_v47 = vsel %vm6041_vm5, %v6034_v28, 920167782 }
 0x6b5   : > { %v6871_v60 = vmin.u32 %v5968_v43, %v12580_v52  ;;  %vm6039_vm4 = vcmp.lt.s32.totalorder %v6019_v25, 2  ;;  %v6048_v36 = vsel %vm6040_vm3, %v6031_v1, %v6047_v47  ;;  %v6050_v20 = vsel %vm6038_vm15, %v6028_v44, %v6031_v1 }
 0x6b6   : > { %v5769_v37 = vor.u32 %v5768_v39, %v5767_v49  ;;  %v6049_v9 = vsel %vm6039_vm4, %v6046_v33, %v6048_v36  ;;  %v6051_v14 = vsel %vm6041_vm5, %v6037_v57, 1326507024  ;;  %v13394_v46 = vand.u32 2147483647, %v12566_v38 }
 0x6b7   : > { %v5970_v31 = vclz %v6871_v60  ;;  %v6042_v30 = vsel %vm6038_vm15, %v6022_v53, %v6025_v22  ;;  %v6044_v11 = vsel %vm6040_vm3, %v6028_v44, %v6043_v18  ;;  %v6052_v4 = vsel %vm6040_vm3, %v6034_v28, %v6051_v14  ;;  %v13831_v14 = vld [vmem:[#allocation34_spill] sm:$0xff] }
 0x6b8   : > { %v6053_v26 = vsel %vm6039_vm4, %v6050_v20, %v6052_v4  ;;  %v12597_v51 = vmul.u32.u64.low %v12563_v6, %v6049_v9  ;;  %v12598_v43 = vmul.u32.u64.high %v12563_v6, %v6049_v9, %v12597_v51  ;;  %v6218_v62 = vshrl.u32 %v6217_v40, 23 }
 0x6b9   : > { %v5774_v27 = vand.u32 2147483647, %v5773_v16  ;;  %v6872_v39 = vadd.s32 4294967294, %v5970_v31  ;;  %v12602_v49 = vmul.u32.u64.low %v12563_v6, %v6053_v26  ;;  %v12603_v57 = vmul.u32.u64.high %v12563_v6, %v6053_v26, %v12602_v49  ;;  %v13832_v31 = vld [vmem:[#allocation10_spill] sm:$0xff] }
 0x6ba   : > { %7367 = vsinq.f32 %v12531_v63  ;;  %v6045_v22 = vsel %vm6039_vm4, %v6042_v30, %v6044_v11  ;;  %v6882_v44 = vadd.s32 4294967169, %v6218_v62  ;;  %v6221_v1 = vand.u32 8388607, %v13394_v46 }
 0x6bb   : > { %7369 = vcosq.f32 %v12557_v56  ;;  %v5776_v28 = vcvt.s32.f32 %v5769_v37  ;;  %v5958_v40 = vadd.s32 %v12500_v13, %v12506_v23  ;;  %vm6873_vm1 = vcmp.lt.s32.totalorder %v6872_v39, 0 }
 0x6bc   : > { %v5973_v16 = vsel %vm6873_vm1, 0, %v6872_v39  ;;  %v6064_v53 = vadd.s32 1, %v12598_v43  ;;  %v6224_v18 = vadd.s32 1, %v6882_v44  ;;  %v4513_v63 = vadd.f32 %v12561_v5, %v12552_v50 }
 0x6bd   : > { %v12615_v25 = vmul.f32 %v5776_v28, %v5774_v27  ;;  %v5974_v33 = vsub.s32 32, %v5973_v16  ;;  %v5978_v47 = vsub.s32 4294967266, %v5973_v16  ;;  %v6061_v60 = vmul.u32 %v12563_v6, %v6045_v22 }
 0x6be   : > { %vm6063_vm15 = vc.u32 %v12603_v57, %v12597_v51  ;;  %v6222_v36 = vor.u32 8388608, %v6221_v1  ;;  %vm6225_vm5 = vcmp.gt.s32.totalorder %v6224_v18, 0  ;;  %v4627_v13 = vadd.f32 %v12143_v32, %v4513_v63 }
 0x6bf   : > { %v5976_v23 = vshrl.u32 %v5958_v40, %v5974_v33  ;;  %v5979_v20 = vadd.s32 127, %v5978_v47  ;;  %v6065_v37 = vsel %vm6063_vm15, %v6064_v53, %v12598_v43  ;;  %v6226_v9 = vsel %vm6225_vm5, %v6224_v18, 0 }
 0x6c0   : > { %7371 = vsinq.f32 %v12557_v56  ;;  %v6066_v50 = vadd.s32 %v6065_v37, %v6061_v60  ;;  %v6228_v5 = vand.u32 31, %v6226_v9  ;;  %v12625_v30 = vadd.f32 %v13832_v31, %v13831_v14 }
 0x6c1   : > { %v5778_v6 = vxor.u32 2147483648, %v12615_v25  ;;  %v5975_v11 = vshll.u32 %v12580_v52, %v5973_v16  ;;  %v5980_v4 = vshll.u32 %v5979_v20, 23  ;;  %v12631_v32 = vmul.f32 %v11477_v54, %v13805_v21 }
 0x6c2   : > { %v6067_v26 = vadd.s32 536870912, %v6066_v50  ;;  %v6229_v43 = vsub.s32 32, %v6228_v5  ;;  %v12633_v62 = vshll.u32 %v6222_v36, 8  ;;  %v12636_v56 = vadd.f32 %v12408_v61, %v4627_v13 }
 0x6c3   : > { %v5977_v27 = vor.u32 %v5976_v23, %v5975_v11  ;;  %v6227_v39 = vshrl.u32 %v6226_v9, 5  ;;  %v6231_v49 = vshll.u32 %v13423_v59, %v6228_v5  ;;  %v6234_v22 = vshll.u32 %v13424_v55, %v6228_v5 }
 0x6c4   : > { %v12640_v44 = vpop.eup %7367  ;;  %v5981_v52 = vor.u32 4788187, %v5980_v4  ;;  %v12642_v1 = vshrl.u32 %v6067_v26, 30  ;;  %v6232_v54 = vshrl.u32 %v13424_v55, %v6229_v43  ;;  %v6235_v21 = vshrl.u32 %v13425_v45, %v6229_v43 }
 0x6c5   : > { %v12646_v28 = vpop.eup %7369  ;;  %v6237_v40 = vshll.u32 %v13425_v45, %v6228_v5  ;;  %v6238_v16 = vshrl.u32 %v13426_v34, %v6229_v43  ;;  %v6240_v53 = vshll.u32 %v13426_v34, %v6228_v5  ;;  %v6241_v18 = vshrl.u32 %v13427_v19, %v6229_v43 }
 0x6c6   : > { %v6069_v63 = vshll.u32 %v12642_v1, 30  ;;  %v6233_v33 = vor.u32 %v6232_v54, %v6231_v49  ;;  %v6236_v47 = vor.u32 %v6235_v21, %v6234_v22  ;;  %v6110_v60 = vand.u32 2147483647, %v12636_v56 }
 0x6c7   : > { %vm13396_vm3 = vcmp.lt.s32.totalorder %v12269_v10, 0  ;;  %v6239_v36 = vor.u32 %v6238_v16, %v6237_v40  ;;  %v6242_v13 = vor.u32 %v6241_v18, %v6240_v53  ;;  %v6243_v23 = vshll.u32 %v13427_v19, %v6228_v5 }
 0x6c8   : > { %v6244_v20 = vshrl.u32 %v13428_v41, %v6229_v43  ;;  %v5984_v37 = vcvt.s32.f32 %v5977_v27  ;;  %v12657_v9 = vsub.s32 %v6066_v50, %v6069_v63  ;;  %v6230_v14 = vshrl.u32 %v13423_v59, %v6229_v43 }
 0x6c9   : > { %v6113_v31 = vand.u32 2139095040, %v12636_v56  ;;  %v5982_v11 = vand.u32 2147483647, %v5981_v52  ;;  %vm6246_vm4 = vcmp.lt.s32.totalorder %v6227_v39, 1  ;;  %vm6249_vm1 = vcmp.lt.s32.totalorder %v6227_v39, 4 }
 0x6ca   : > { %v6245_v4 = vor.u32 %v6244_v20, %v6243_v23  ;;  %v12661_v26 = vpop.eup %7371  ;;  %v6072_v49 = vsub.s32 0, %v12657_v9  ;;  %vm6247_vm15 = vcmp.lt.s32.totalorder %v6227_v39, 2  ;;  %v6251_v22 = vsel %vm6249_vm1, %v6239_v36, 2102212464 }
 0x6cb   : > { %v6254_v5 = vsel %vm6246_vm4, %v6233_v33, %v6236_v47  ;;  %vm6248_vm5 = vcmp.lt.s32.totalorder %v6227_v39, 3  ;;  %v6250_v54 = vsel %vm6246_vm4, %v6230_v14, %v6233_v33  ;;  %v6255_v27 = vsel %vm6249_vm1, %v6242_v13, 920167782  ;;  %v13836_v39 = vld [vmem:[#allocation24_spill] sm:$0xff] }
 0x6cc   : > { %v6258_v50 = vsel %vm6246_vm4, %v6236_v47, %v6239_v36  ;;  %v6875_v21 = vmin.u32 %v6072_v49, %v12657_v9  ;;  %v6252_v43 = vsel %vm6248_vm5, %v6236_v47, %v6251_v22  ;;  %v6256_v40 = vsel %vm6248_vm5, %v6239_v36, %v6255_v27 }
 0x6cd   : > { %v6259_v16 = vsel %vm6249_vm1, %v6245_v4, 1326507024  ;;  %v5985_v52 = vmul.f32 %v5984_v37, %v5982_v11  ;;  %v6257_v53 = vsel %vm6247_vm15, %v6254_v5, %v6256_v40  ;;  %v6114_v63 = vshrl.u32 %v6113_v31, 23 }
 0x6ce   : > { %v6260_v18 = vsel %vm6248_vm5, %v6242_v13, %v6259_v16  ;;  %vm13395_vm13 = vcmp.lt.s32.totalorder %v12337_v7, 0  ;;  %v6074_v23 = vclz %v6875_v21  ;;  %v6253_v14 = vsel %vm6247_vm15, %v6250_v54, %v6252_v43 }
 0x6cf   : > { %v6261_v20 = vsel %vm6247_vm15, %v6258_v50, %v6260_v18  ;;  %v12669_v46 = vmul.u32.u64.low %v12633_v62, %v6257_v53  ;;  %v12670_v33 = vmul.u32.u64.high %v12633_v62, %v6257_v53, %v12669_v46  ;;  %v6878_v37 = vadd.s32 4294967169, %v6114_v63 }
 0x6d0   : > { %v12675_v47 = vmul.u32.u64.low %v12633_v62, %v6261_v20  ;;  %v12676_v36 = vmul.u32.u64.high %v12633_v62, %v6261_v20, %v12675_v47  ;;  %v12683_v13 = vsel %vm13396_vm3, %v5778_v6, %v12615_v25  ;;  %v6876_v31 = vadd.s32 4294967294, %v6074_v23 }
 0x6d1   : > { %v13833_v11 = vand.u32 2147483647, %v11503_v29  ;;  %v4948_v49 = vsub.s32 4, %v13836_v39  ;;  %v6062_v22 = vadd.s32 %v12597_v51, %v12603_v57  ;;  %v6117_v5 = vand.u32 8388607, %v6110_v60 }
 0x6d2   : > { %v6120_v54 = vadd.s32 1, %v6878_v37  ;;  %v5986_v6 = vxor.u32 2147483648, %v5985_v52  ;;  %vm6877_vm1 = vcmp.lt.s32.totalorder %v6876_v31, 0  ;;  %v6269_v27 = vmul.u32 %v12633_v62, %v6253_v14 }
 0x6d3   : > { %vm12687_vm4 = vcmp.le.f32.partialorder %v13833_v11, 0.7853982  ;;  %v6272_v50 = vadd.s32 1, %v12670_v33  ;;  %v6077_v21 = vsel %vm6877_vm1, 0, %v6876_v31  ;;  %vm6271_vm15 = vc.u32 %v12676_v36, %v12669_v46 }
 0x6d4   : > { %v4950_v25 = vsel %vm12687_vm4, %v11503_v29, %v12088_v24  ;;  %vm6121_vm5 = vcmp.gt.s32.totalorder %v6120_v54, 0  ;;  %v4515_v51 = vadd.f32 %v12631_v32, %v12625_v30  ;;  %v6078_v57 = vsub.s32 32, %v6077_v21 }
 0x6d5   : > { %v6082_v43 = vsub.s32 4294967266, %v6077_v21  ;;  %v6273_v24 = vsel %vm6271_vm15, %v6272_v50, %v12670_v33  ;;  %v6118_v53 = vor.u32 8388608, %v6117_v5  ;;  %v6122_v18 = vsel %vm6121_vm5, %v6120_v54, 0 }
 0x6d6   : > { %v6274_v16 = vadd.s32 %v6273_v24, %v6269_v27  ;;  %v4716_v62 = vadd.f32 %v12243_v42, %v4515_v51  ;;  %v6079_v63 = vshll.u32 %v12657_v9, %v6077_v21  ;;  %v6080_v23 = vshrl.u32 %v6062_v22, %v6078_v57 }
 0x6d7   : > { %v6083_v20 = vadd.s32 127, %v6082_v43  ;;  %v6124_v14 = vand.u32 31, %v6122_v18  ;;  %v12712_v47 = vsel %vm13395_vm13, %v5986_v6, %v5985_v52  ;;  %v12717_v32 = vsel %vm4864_vm6, %v4948_v49, %v13836_v39 }
 0x6d8   : > { %v6275_v30 = vadd.s32 536870912, %v6274_v16  ;;  %7373 = vcosq.f32 %v4950_v25  ;;  %v6081_v33 = vor.u32 %v6080_v23, %v6079_v63  ;;  %v6123_v9 = vshrl.u32 %v6122_v18, 5 }
 0x6d9   : > { %v6084_v37 = vshll.u32 %v6083_v20, 23  ;;  %v6125_v31 = vsub.s32 32, %v6124_v14  ;;  %7375 = vsinq.f32 %v4950_v25  ;;  %v12721_v11 = vshll.u32 %v6118_v53, 8 }
 0x6da   : > { %v12719_v42 = vshrl.u32 %v6275_v30, 30  ;;  %v12724_v22 = vadd.f32 %v12408_v61, %v4716_v62  ;;  %v6127_v5 = vshll.u32 %v13423_v59, %v6124_v14  ;;  %v6130_v39 = vshll.u32 %v13424_v55, %v6124_v14 }
 0x6db   : > { %v6085_v52 = vor.u32 4788187, %v6084_v37  ;;  %v6128_v54 = vshrl.u32 %v13424_v55, %v6125_v31  ;;  %v6131_v6 = vshrl.u32 %v13425_v45, %v6125_v31  ;;  %v6133_v25 = vshll.u32 %v13425_v45, %v6124_v14 }
 0x6dc   : > { %v6277_v49 = vshll.u32 %v12719_v42, 30  ;;  %v6134_v27 = vshrl.u32 %v13426_v34, %v6125_v31  ;;  %vm13397_vm6 = vcmp.lt.s32.totalorder %v12418_v48, 0  ;;  %v6088_v61 = vcvt.s32.f32 %v6081_v33 }
 0x6dd   : > { %v6086_v50 = vand.u32 2147483647, %v6085_v52  ;;  %v6136_v21 = vshll.u32 %v13426_v34, %v6124_v14  ;;  %v6137_v51 = vshrl.u32 %v13427_v19, %v6125_v31  ;;  %v6129_v43 = vor.u32 %v6128_v54, %v6127_v5 }
 0x6de   : > { %v12736_v57 = vsub.s32 %v6274_v16, %v6277_v49  ;;  %v6132_v24 = vor.u32 %v6131_v6, %v6130_v39  ;;  %v6135_v53 = vor.u32 %v6134_v27, %v6133_v25  ;;  %v6139_v63 = vshll.u32 %v13427_v19, %v6124_v14 }
 0x6df   : > { %v6089_v18 = vmul.f32 %v6088_v61, %v6086_v50  ;;  %v6138_v62 = vor.u32 %v6137_v51, %v6136_v21  ;;  %v6140_v23 = vshrl.u32 %v13428_v41, %v6125_v31  ;;  %v13837_v20 = vand.u32 2147483647, %v12418_v48 }
 0x6e0   : > { %v6280_v33 = vsub.s32 0, %v12736_v57  ;;  %v6126_v16 = vshrl.u32 %v13423_v59, %v6125_v31  ;;  %vm6145_vm15 = vcmp.lt.s32.totalorder %v6123_v9, 4  ;;  %v6321_v37 = vand.u32 2139095040, %v12724_v22 }
 0x6e1   : > { %vm12742_vm1 = vcmp.le.f32.partialorder %v13837_v20, 0.7853982  ;;  %v6141_v52 = vor.u32 %v6140_v23, %v6139_v63  ;;  %vm6142_vm5 = vcmp.lt.s32.totalorder %v6123_v9, 1  ;;  %vm6144_vm13 = vcmp.lt.s32.totalorder %v6123_v9, 3 }
 0x6e2   : > { %v6147_v14 = vsel %vm6145_vm15, %v6135_v53, 2102212464  ;;  %v12750_v5 = vpop.eup %7373  ;;  %v6090_v54 = vxor.u32 2147483648, %v6089_v18  ;;  %v6883_v39 = vmin.u32 %v6280_v33, %v12736_v57  ;;  %v6150_v49 = vsel %vm6142_vm5, %v6129_v43, %v6132_v24 }
 0x6e3   : > { %v6151_v6 = vsel %vm6145_vm15, %v6138_v62, 920167782  ;;  %v7376_v25 = vpop.eup %7375  ;;  %vm6143_vm3 = vcmp.lt.s32.totalorder %v6123_v9, 2  ;;  %v6146_v27 = vsel %vm6142_vm5, %v6126_v16, %v6129_v43  ;;  %v6154_v50 = vsel %vm6142_vm5, %v6132_v24, %v6135_v53 }
 0x6e4   : > { %v6152_v31 = vsel %vm6144_vm13, %v6135_v53, %v6151_v6  ;;  %v6282_v61 = vclz %v6883_v39  ;;  %v6148_v21 = vsel %vm6144_vm13, %v6132_v24, %v6147_v14  ;;  %v6155_v63 = vsel %vm6145_vm15, %v6141_v52, 1326507024 }
 0x6e5   : > { %v6153_v51 = vsel %vm6143_vm3, %v6150_v49, %v6152_v31  ;;  %v6156_v23 = vsel %vm6144_vm13, %v6138_v62, %v6155_v63  ;;  %v4951_v40 = vsel %vm12687_vm4, 0, %v12717_v32  ;;  %v6091_v43 = vsel %vm13397_vm6, %v6090_v54, %v6089_v18 }
 0x6e6   : > { %v12759_v20 = vmul.u32.u64.low %v12721_v11, %v6153_v51  ;;  %v12760_v33 = vmul.u32.u64.high %v12721_v11, %v6153_v51, %v12759_v20  ;;  %v6884_v53 = vadd.s32 4294967294, %v6282_v61  ;;  %v6157_v16 = vsel %vm6143_vm3, %v6154_v50, %v6156_v23 }
 0x6e7   : > { %v6318_v24 = vand.u32 2147483647, %v12724_v22  ;;  %v6149_v14 = vsel %vm6143_vm3, %v6146_v27, %v6148_v21  ;;  %v12769_v52 = vmul.u32.u64.low %v12721_v11, %v6157_v16  ;;  %v12770_v9 = vmul.u32.u64.high %v12721_v11, %v6157_v16, %v12769_v52 }
 0x6e8   : > { %v6322_v62 = vshrl.u32 %v6321_v37, 23  ;;  %v6270_v39 = vadd.s32 %v12669_v46, %v12676_v36  ;;  %vm6885_vm13 = vcmp.lt.s32.totalorder %v6884_v53, 0  ;;  %v6300_v4 = vsub.s32 4, %v12719_v42 }
 0x6e9   : > { %v4955_v32 = vadd.s32 3, %v4951_v40  ;;  %v6094_v18 = vsel %vm12742_vm1, %v12418_v48, %v6091_v43  ;;  %v6285_v54 = vsel %vm6885_vm13, 0, %v6884_v53  ;;  %v6168_v49 = vadd.s32 1, %v12760_v33 }
 0x6ea   : > { %v6886_v6 = vadd.s32 4294967169, %v6322_v62  ;;  %v6286_v27 = vsub.s32 32, %v6285_v54  ;;  %v6290_v31 = vsub.s32 4294967266, %v6285_v54  ;;  %v6165_v50 = vmul.u32 %v12721_v11, %v6149_v14 }
 0x6eb   : > { %v6325_v37 = vand.u32 8388607, %v6318_v24  ;;  %vm6167_vm3 = vc.u32 %v12770_v9, %v12759_v20  ;;  %v4956_v36 = vand.u32 3, %v4955_v32  ;;  %v4959_v40 = vxor.u32 2147483648, %v7376_v25 }
 0x6ec   : > { %v6328_v46 = vadd.s32 1, %v6886_v6  ;;  %v6287_v61 = vshll.u32 %v12736_v57, %v6285_v54  ;;  %v6288_v21 = vshrl.u32 %v6270_v39, %v6286_v27  ;;  %v6291_v51 = vadd.s32 127, %v6290_v31 }
 0x6ed   : > { %v6169_v63 = vsel %vm6167_vm3, %v6168_v49, %v12760_v33  ;;  %7377 = vcosq.f32 %v6094_v18  ;;  %v4962_v43 = vxor.u32 2147483648, %v12750_v5  ;;  %v6326_v52 = vor.u32 8388608, %v6325_v37 }
 0x6ee   : > { %v6170_v23 = vadd.s32 %v6169_v63, %v6165_v50  ;;  %vm6329_vm4 = vcmp.gt.s32.totalorder %v6328_v46, 0  ;;  %7379 = vsinq.f32 %v6094_v18  ;;  %v6289_v11 = vor.u32 %v6288_v21, %v6287_v61 }
 0x6ef   : > { %v6292_v53 = vshll.u32 %v6291_v51, 23  ;;  %v6330_v16 = vsel %vm6329_vm4, %v6328_v46, 0  ;;  %vm4958_vm15 = vcmp.eq.s32.totalorder %v4956_v36, 0  ;;  %v12787_v57 = vadd.s32 %v12759_v20, %v12770_v9 }
 0x6f0   : > { %v6171_v14 = vadd.s32 536870912, %v6170_v23  ;;  %v6332_v62 = vand.u32 31, %v6330_v16  ;;  %v4960_v39 = vsel %vm4958_vm15, %v12750_v5, %v4959_v40  ;;  %vm4961_vm5 = vcmp.eq.s32.totalorder %v4956_v36, 2 }
 0x6f1   : > { %v6293_v32 = vor.u32 4788187, %v6292_v53  ;;  %v6331_v54 = vshrl.u32 %v6330_v16, 5  ;;  %v4963_v6 = vsel %vm4961_vm5, %v4962_v43, %v7376_v25  ;;  %v6296_v27 = vcvt.s32.f32 %v6289_v11 }
 0x6f2   : > { %v12790_v33 = vshrl.u32 %v6171_v14, 30  ;;  %v6333_v49 = vsub.s32 32, %v6332_v62  ;;  %v6335_v31 = vshll.u32 %v13423_v59, %v6332_v62  ;;  %v6338_v50 = vshll.u32 %v13424_v55, %v6332_v62 }
 0x6f3   : > { %v6294_v18 = vand.u32 2147483647, %v6293_v32  ;;  %v6341_v5 = vshll.u32 %v13425_v45, %v6332_v62  ;;  %v6344_v40 = vshll.u32 %v13426_v34, %v6332_v62  ;;  %vm13399_vm13 = vcmp.lt.s32.totalorder %v12566_v38, 0 }
 0x6f4   : > { %v6173_v37 = vshll.u32 %v12790_v33, 30  ;;  %v6336_v46 = vshrl.u32 %v13424_v55, %v6333_v49  ;;  %v6339_v20 = vshrl.u32 %v13425_v45, %v6333_v49  ;;  %v6342_v9 = vshrl.u32 %v13426_v34, %v6333_v49 }
 0x6f5   : > { %v6345_v25 = vshrl.u32 %v13427_v19, %v6333_v49  ;;  %v6348_v61 = vshrl.u32 %v13428_v41, %v6333_v49  ;;  %v6347_v55 = vshll.u32 %v13427_v19, %v6332_v62  ;;  %v6297_v43 = vmul.f32 %v6296_v27, %v6294_v18 }
 0x6f6   : > { %v12803_v21 = vsub.s32 %v6170_v23, %v6173_v37  ;;  %v6337_v51 = vor.u32 %v6336_v46, %v6335_v31  ;;  %v6340_v63 = vor.u32 %v6339_v20, %v6338_v50  ;;  %v6343_v11 = vor.u32 %v6342_v9, %v6341_v5 }
 0x6f7   : > { %v6346_v53 = vor.u32 %v6345_v25, %v6344_v40  ;;  %v6366_v45 = vshll.u32 %v6326_v52, 8  ;;  %v12806_v16 = vpop.eup %7377  ;;  %v6349_v14 = vor.u32 %v6348_v61, %v6347_v55  ;;  %vm6350_vm3 = vcmp.lt.s32.totalorder %v6331_v54, 1 }
 0x6f8   : > { %v6176_v34 = vsub.s32 0, %v12803_v21  ;;  %vm4957_vm4 = vcmp.lt.s32.totalorder %v4956_v36, 2  ;;  %v12809_v41 = vpop.eup %7379  ;;  %v6334_v23 = vshrl.u32 %v13423_v59, %v6333_v49  ;;  %vm6353_vm15 = vcmp.lt.s32.totalorder %v6331_v54, 4 }
 0x6f9   : > { %v6358_v32 = vsel %vm6350_vm3, %v6337_v51, %v6340_v63  ;;  %v4964_v31 = vsel %vm4957_vm4, %v4960_v39, %v4963_v6  ;;  %vm6352_vm5 = vcmp.lt.s32.totalorder %v6331_v54, 3  ;;  %v6355_v62 = vsel %vm6353_vm15, %v6343_v11, 2102212464 }
 0x6fa   : > { %v6879_v19 = vmin.u32 %v6176_v34, %v12803_v21  ;;  %v6359_v52 = vsel %vm6353_vm15, %v6346_v53, 920167782  ;;  %v6298_v18 = vxor.u32 2147483648, %v6297_v43  ;;  %vm6351_vm6 = vcmp.lt.s32.totalorder %v6331_v54, 2 }
 0x6fb   : > { %v6360_v27 = vsel %vm6352_vm5, %v6343_v11, %v6359_v52  ;;  %v6362_v50 = vsel %vm6350_vm3, %v6340_v63, %v6343_v11  ;;  %v6354_v36 = vsel %vm6350_vm3, %v6334_v23, %v6337_v51  ;;  %v6363_v59 = vsel %vm6353_vm15, %v6349_v14, 1326507024 }
 0x6fc   : > { %v6178_v37 = vclz %v6879_v19  ;;  %v6361_v46 = vsel %vm6351_vm6, %v6358_v32, %v6360_v27  ;;  %v13840_v49 = vand.u32 2147483647, %v12566_v38  ;;  %v6356_v6 = vsel %vm6352_vm5, %v6340_v63, %v6355_v62 }
 0x6fd   : > { %v6364_v20 = vsel %vm6352_vm5, %v6346_v53, %v6363_v59  ;;  %v12823_v5 = vmul.u32.u64.low %v6366_v45, %v6361_v46  ;;  %v12824_v9 = vmul.u32.u64.high %v6366_v45, %v6361_v46, %v12823_v5  ;;  %vm4954_vm4 = vweird.f32 %v11503_v29 }
 0x6fe   : > { %vm12819_vm8 = vcmp.le.f32.partialorder %v13840_v49, 0.7853982  ;;  %v6880_v40 = vadd.s32 4294967294, %v6178_v37  ;;  %v6365_v25 = vsel %vm6351_vm6, %v6362_v50, %v6364_v20  ;;  %v13843_v61 = vand.u32 2147483647, %v11852_v0  ;;  %v13850_v37 = vld [vmem:[#allocation39_spill] sm:$0xff] }
 0x6ff   : > { %v5364_v55 = vsub.s32 4, %v12104_v58  ;;  %v6299_v63 = vsel %vm13399_vm13, %v6298_v18, %v6297_v43  ;;  %v12837_v11 = vmul.u32.u64.low %v6366_v45, %v6365_v25  ;;  %v12838_v53 = vmul.u32.u64.high %v6366_v45, %v6365_v25, %v12837_v11 }
 0x700   : > { %vm12830_vm3 = vcmp.le.f32.partialorder %v13843_v61, 0.7853982  ;;  %vm6881_vm15 = vcmp.lt.s32.totalorder %v6880_v40, 0  ;;  %v6357_v14 = vsel %vm6351_vm6, %v6354_v36, %v6356_v6  ;;  %v6376_v19 = vadd.s32 1, %v12824_v9 }
 0x701   : > { %v5366_v34 = vsel %vm12830_vm3, %v11852_v0, %v12362_v3  ;;  %v5365_v23 = vsel %vm5280_vm2, %v5364_v55, %v12104_v58  ;;  %v6181_v32 = vsel %vm6881_vm15, 0, %v6880_v40  ;;  %v13846_v3 = vand.u32 2147483647, %v11632_v8  ;;  %v13849_v58 = vld [vmem:[#allocation45_spill] sm:$0xff] }
 0x702   : > { %7381 = vcosq.f32 %v5366_v34  ;;  %v5367_v43 = vsel %vm12830_vm3, 0, %v5365_v23  ;;  %v6182_v62 = vsub.s32 32, %v6181_v32  ;;  %v6186_v52 = vsub.s32 4294967266, %v6181_v32 }
 0x703   : > { %7383 = vsinq.f32 %v5366_v34  ;;  %v5371_v18 = vadd.s32 3, %v5367_v43  ;;  %vm12853_vm5 = vcmp.le.f32.partialorder %v13846_v3, 0.7853982  ;;  %v6373_v27 = vmul.u32 %v6366_v45, %v6357_v14 }
 0x704   : > { %vm6375_vm2 = vc.u32 %v12838_v53, %v12823_v5  ;;  %v5156_v50 = vsub.s32 4, %v13849_v58  ;;  %v5158_v36 = vsel %vm12853_vm5, %v11632_v8, %v13850_v37  ;;  %v6183_v46 = vshll.u32 %v12803_v21, %v6181_v32 }
 0x705   : > { %v6184_v59 = vshrl.u32 %v12787_v57, %v6182_v62  ;;  %v6187_v49 = vadd.s32 127, %v6186_v52  ;;  %v6377_v6 = vsel %vm6375_vm2, %v6376_v19, %v12824_v9  ;;  %v5372_v40 = vand.u32 3, %v5371_v18 }
 0x706   : > { %v6378_v20 = vadd.s32 %v6377_v6, %v6373_v27  ;;  %v5157_v45 = vsel %vm5072_vm12, %v5156_v50, %v13849_v58  ;;  %7385 = vcosq.f32 %v5158_v36  ;;  %v12872_v25 = vsel %vm12819_vm8, %v12566_v38, %v6299_v63  ;;  %v13856_v58 = vld [vmem:[#allocation30_spill] sm:$0xff] }
 0x707   : > { %v6185_v61 = vor.u32 %v6184_v59, %v6183_v46  ;;  %v6188_v51 = vshll.u32 %v6187_v49, 23  ;;  %v4965_v57 = vsel %vm4954_vm4, nan, %v4964_v31  ;;  %vm5370_vm6 = vweird.f32 %v11852_v0  ;;  %v13854_v31 = vld [vmem:[#allocation8_spill] sm:$0xff] }
 0x708   : > { %v6379_v21 = vadd.s32 536870912, %v6378_v20  ;;  %v5159_v9 = vsel %vm12853_vm5, 0, %v5157_v45  ;;  %7387 = vsinq.f32 %v5158_v36  ;;  %v12880_v11 = vadd.s32 %v12823_v5, %v12838_v53 }
 0x709   : > { %v6189_v55 = vor.u32 4788187, %v6188_v51  ;;  %v5163_v34 = vadd.s32 3, %v5159_v9  ;;  %v13851_v63 = vand.u32 2147483647, %v12031_v17  ;;  %vm5373_vm3 = vcmp.lt.s32.totalorder %v5372_v40, 2 }
 0x70a   : > { %v12889_v29 = vshrl.u32 %v6379_v21, 30  ;;  %v5572_v23 = vsub.s32 4, %v13854_v31  ;;  %v6192_v19 = vcvt.s32.f32 %v6185_v61  ;;  %vm13855_vm15 = vcmp.lt.s32.totalorder %v12031_v17, 0 }
 0x70b   : > { %vm12884_vm12 = vcmp.le.f32.partialorder %v13851_v63, 0.7853982  ;;  %v6190_v32 = vand.u32 2147483647, %v6189_v55  ;;  %v5164_v43 = vand.u32 3, %v5163_v34  ;;  %vm5377_vm5 = vcmp.eq.s32.totalorder %v5372_v40, 2 }
 0x70c   : > { %v5574_v5 = vsel %vm12884_vm12, %v12031_v17, %v12544_v2  ;;  %v7382_v53 = vpop.eup %7381  ;;  %v6381_v52 = vshll.u32 %v12889_v29, 30  ;;  %v5573_v3 = vsel %vm13855_vm15, %v5572_v23, %v13854_v31  ;;  %v4847_v2 = vsel %vm11843_vm11, 0, %v13856_v58  ;;  %v13858_v34 = vld [vmem:[#allocation35_spill] sm:$0xff] }
 0x70d   : > { %7389 = vcosq.f32 %v5574_v5  ;;  %v7384_v62 = vpop.eup %7383  ;;  %v5378_v18 = vxor.u32 2147483648, %v7382_v53  ;;  %v6193_v54 = vmul.f32 %v6192_v19, %v6190_v32  ;;  %vm5374_vm2 = vcmp.eq.s32.totalorder %v5372_v40, 0 }
 0x70e   : > { %7391 = vsinq.f32 %v5574_v5  ;;  %v5375_v27 = vxor.u32 2147483648, %v7384_v62  ;;  %v12903_v37 = vsub.s32 %v6378_v20, %v6381_v52  ;;  %vm5162_vm13 = vweird.f32 %v11632_v8 }
 0x70f   : > { %v5379_v36 = vsel %vm5377_vm5, %v5378_v18, %v7384_v62  ;;  %v5575_v46 = vsel %vm12884_vm12, 0, %v5573_v3  ;;  %v6194_v59 = vxor.u32 2147483648, %v6193_v54  ;;  %vm5165_vm15 = vcmp.lt.s32.totalorder %v5164_v43, 2  ;;  %v13861_v3 = vld [vmem:[#allocation9_spill] sm:$0xff] }
 0x710   : > { %v5376_v49 = vsel %vm5374_vm2, %v7382_v53, %v5375_v27  ;;  %v5579_v6 = vadd.s32 3, %v5575_v46  ;;  %v7386_v45 = vpop.eup %7385  ;;  %v6384_v61 = vsub.s32 0, %v12903_v37  ;;  %vm5169_vm4 = vcmp.eq.s32.totalorder %v5164_v43, 2  ;;  %v13859_v53 = vld [vmem:[#allocation23_spill] sm:$0xff] }
 0x711   : > { %v5380_v51 = vsel %vm5373_vm3, %v5376_v49, %v5379_v36  ;;  %v4851_v21 = vadd.s32 3, %v4847_v2  ;;  %v5170_v9 = vxor.u32 2147483648, %v7386_v45  ;;  %v4855_v63 = vxor.u32 2147483648, %v13858_v34  ;;  %v13862_v49 = vld [vmem:[#allocation48_spill] sm:$0xff] }
 0x712   : > { %v5381_v20 = vsel %vm5370_vm6, nan, %v5380_v51  ;;  %v5580_v55 = vand.u32 3, %v5579_v6  ;;  %v7388_v14 = vpop.eup %7387  ;;  %v6887_v31 = vmin.u32 %v6384_v61, %v12903_v37  ;;  %v4858_v32 = vxor.u32 2147483648, %v13859_v53 }
 0x713   : > { %v6938_v23 = vpack.c.bf16 %v5381_v20, %v4965_v57  ;;  %v4852_v5 = vand.u32 3, %v4851_v21  ;;  %vm13860_vm12 = vcmp.lt.s32.totalorder %v12636_v56, 0  ;;  %vm5166_vm3 = vcmp.eq.s32.totalorder %v5164_v43, 0  ;;  %v13863_v43 = vld [vmem:[#allocation49_spill] sm:$0xff]  ;;  %v13864_v21 = vld [vmem:[#allocation28_spill] sm:$0xff] }
 0x714   : > { %v12918_v40 = vsel %vm13860_vm12, %v6194_v59, %v6193_v54  ;;  %v5167_v0 = vxor.u32 2147483648, %v7388_v14  ;;  %v5171_v19 = vsel %vm5169_vm4, %v5170_v9, %v7388_v14  ;;  %v6386_v62 = vclz %v6887_v31 }
 0x715   : > { %6939 = vmatprep.subr.bf16.mxu0 %v6938_v23  ;;  %vm5581_vm6 = vcmp.lt.s32.totalorder %v5580_v55, 2  ;;  %vm5582_vm5 = vcmp.eq.s32.totalorder %v5580_v55, 0  ;;  %vm4854_vm2 = vcmp.eq.s32.totalorder %v4852_v5, 0  ;;  %vm4857_vm11 = vcmp.eq.s32.totalorder %v4852_v5, 2 }
 0x716   : > { %v5168_v18 = vsel %vm5166_vm3, %v7386_v45, %v5167_v0  ;;  %v4856_v57 = vsel %vm4854_vm2, %v13859_v53, %v4855_v63  ;;  %v5263_v27 = vsel %vm12210_vm9, 0, %v13861_v3  ;;  %v6888_v54 = vadd.s32 4294967294, %v6386_v62  ;;  %v13865_v63 = vld [vmem:[#allocation43_spill] sm:$0xff]  ;;  %v13867_v53 = vld [vmem:[#allocation17_spill] sm:$0xff] }
 0x717   : > { %v7390_v52 = vpop.eup %7389  ;;  %v5172_v50 = vsel %vm5165_vm15, %v5168_v18, %v5171_v19  ;;  %v4859_v36 = vsel %vm4857_vm11, %v4858_v32, %v13858_v34  ;;  %vm5585_vm4 = vcmp.eq.s32.totalorder %v5580_v55, 2  ;;  %vm4850_vm12 = vweird.f32 %v13862_v49  ;;  %v13869_v55 = vld [vmem:[#allocation6_spill] sm:$0xff] }
 0x718   : > { %v7392_v58 = vpop.eup %7391  ;;  %v5586_v2 = vxor.u32 2147483648, %v7390_v52  ;;  %v5173_v46 = vsel %vm5162_vm13, nan, %v5172_v50  ;;  %vm4853_vm3 = vcmp.lt.s32.totalorder %v4852_v5, 2  ;;  %vm6889_vm2 = vcmp.lt.s32.totalorder %v6888_v54, 0  ;;  %v13870_v50 = vld [vmem:[#allocation14_spill] sm:$0xff] }
 0x719   : > { %v5583_v59 = vxor.u32 2147483648, %v7392_v58  ;;  %v4860_v45 = vsel %vm4853_vm3, %v4856_v57, %v4859_v36  ;;  %v5267_v12 = vadd.s32 3, %v5263_v27  ;;  %v6389_v61 = vsel %vm6889_vm2, 0, %v6888_v54 }
 0x71a   : > { %v5587_v6 = vsel %vm5585_vm4, %v5586_v2, %v7392_v58  ;;  %vm5266_vm9 = vweird.f32 %v13863_v43  ;;  %v5271_v20 = vxor.u32 2147483648, %v13864_v21  ;;  %v6390_v9 = vsub.s32 32, %v6389_v61  ;;  %v13875_v43 = vld [vmem:[#allocation41_spill] sm:$0xff] }
 0x71b   : > { %v5584_v51 = vsel %vm5582_vm5, %v7390_v52, %v5583_v59  ;;  %v6394_v34 = vsub.s32 4294967266, %v6389_v61  ;;  %v5274_v14 = vxor.u32 2147483648, %v13865_v63  ;;  %v6391_v31 = vshll.u32 %v12903_v37, %v6389_v61 }
 0x71c   : > { %v5588_v8 = vsel %vm5581_vm6, %v5584_v51, %v5587_v6  ;;  %vm13866_vm13 = vweird.f32 %v12031_v17  ;;  %v5268_v5 = vand.u32 3, %v5267_v12  ;;  %v5055_v0 = vsel %vm12021_vm0, 0, %v13867_v53 }
 0x71d   : > { %v5589_v23 = vsel %vm13866_vm13, nan, %v5588_v8  ;;  %v6392_v19 = vshrl.u32 %v12880_v11, %v6390_v9  ;;  %v6395_v62 = vadd.s32 127, %v6394_v34  ;;  %v5059_v18 = vadd.s32 3, %v5055_v0  ;;  %v13871_v11 = vld [vmem:[#allocation13_spill] sm:$0xff]  ;;  %v13873_v8 = vld [vmem:[#allocation18_spill] sm:$0xff] }
 0x71e   : > { %v6946_v52 = vpack.c.bf16 %v5589_v23, %v5173_v46  ;;  %vm5269_vm15 = vcmp.lt.s32.totalorder %v5268_v5, 2  ;;  %vm5270_vm11 = vcmp.eq.s32.totalorder %v5268_v5, 0  ;;  %vm5273_vm6 = vcmp.eq.s32.totalorder %v5268_v5, 2 }
 0x71f   : > { %v5063_v57 = vxor.u32 2147483648, %v13869_v55  ;;  %v6393_v3 = vor.u32 %v6392_v19, %v6391_v31  ;;  %v6396_v37 = vshll.u32 %v6395_v62, 23  ;;  %v5272_v17 = vsel %vm5270_vm11, %v13865_v63, %v5271_v20  ;;  %v13879_v19 = vld [vmem:[#allocation27_spill] sm:$0xff] }
 0x720   : > { %6947 = vmatprep.subr.bf16.mxu1 %v6946_v52  ;;  %v5275_v27 = vsel %vm5273_vm6, %v5274_v14, %v13864_v21  ;;  %v5060_v54 = vand.u32 3, %v5059_v18  ;;  %v5066_v2 = vxor.u32 2147483648, %v13870_v50  ;;  %v5471_v46 = vsel %vm12224_vm10, 0, %v13871_v11 }
 0x721   : > { %v5276_v58 = vsel %vm5269_vm15, %v5272_v17, %v5275_v27  ;;  %v6397_v59 = vor.u32 4788187, %v6396_v37  ;;  %v6400_v6 = vcvt.s32.f32 %v6393_v3  ;;  %v4861_v12 = vsel %vm4850_vm12, nan, %v4860_v45  ;;  %v13874_v45 = vld [vmem:[#allocation47_spill] sm:$0xff] }
 0x722   : > { %v5277_v61 = vsel %vm5266_vm9, nan, %v5276_v58  ;;  %vm6320_vm0 = vcmp.lt.s32.totalorder %v12724_v22, 0  ;;  %vm5061_vm5 = vcmp.lt.s32.totalorder %v5060_v54, 2  ;;  %vm5062_vm4 = vcmp.eq.s32.totalorder %v5060_v54, 0 }
 0x723   : > { %v6940_v51 = vpack.c.bf16 %v5277_v61, %v4861_v12  ;;  %vm5065_vm3 = vcmp.eq.s32.totalorder %v5060_v54, 2  ;;  %v6398_v21 = vand.u32 2147483647, %v6397_v59  ;;  %v5064_v20 = vsel %vm5062_vm4, %v13870_v50, %v5063_v57  ;;  %v13885_v59 = vld [vmem:[#allocation15_spill] sm:$0xff]  ;;  %v13889_v12 = vld [vmem:[#allocation42_spill] sm:$0xff] }
 0x724   : > { %v5067_v9 = vsel %vm5065_vm3, %v5066_v2, %v13869_v55  ;;  %v5475_v34 = vadd.s32 3, %v5471_v46  ;;  %vm5058_vm10 = vweird.f32 %v13873_v8  ;;  %v5479_v63 = vxor.u32 2147483648, %v13874_v45 }
 0x725   : > { %6941 = vmatpush1.bf16.msra.mxu0 %v6940_v51  ;;  %v5068_v49 = vsel %vm5061_vm5, %v5064_v20, %v5067_v9  ;;  %v5482_v14 = vxor.u32 2147483648, %v13875_v43  ;;  %v6401_v31 = vmul.f32 %v6400_v6, %v6398_v21  ;;  %v13876_v5 = vand.u32 2147483647, %v12269_v10  ;;  %v13887_v6 = vld [vmem:[#allocation12_spill] sm:$0xff] }
 0x726   : > { %v5476_v23 = vand.u32 3, %v5475_v34  ;;  %v5780_v32 = vsub.s32 4, %v12460_v15  ;;  %v5069_v0 = vsel %vm5058_vm10, nan, %v5068_v49  ;;  %vm5474_vm2 = vweird.f32 %v13879_v19 }
 0x727   : > { %vm12960_vm12 = vcmp.le.f32.partialorder %v13876_v5, 0.7853982  ;;  %v6196_v52 = vsub.s32 4, %v12790_v33  ;;  %v6402_v18 = vxor.u32 2147483648, %v6401_v31  ;;  %vm13880_vm11 = vcmp.lt.s32.totalorder %v12269_v10, 0 }
 0x728   : > { %v5782_v62 = vsel %vm12960_vm12, %v12269_v10, %v12683_v13  ;;  %vm5477_vm9 = vcmp.lt.s32.totalorder %v5476_v23, 2  ;;  %vm5478_vm13 = vcmp.eq.s32.totalorder %v5476_v23, 0  ;;  %vm5481_vm15 = vcmp.eq.s32.totalorder %v5476_v23, 2 }
 0x729   : > { %v5480_v55 = vsel %vm5478_vm13, %v13875_v43, %v5479_v63  ;;  %v5483_v57 = vsel %vm5481_vm15, %v5482_v14, %v13874_v45  ;;  %v5781_v3 = vsel %vm13880_vm11, %v5780_v32, %v12460_v15  ;;  %7393 = vcosq.f32 %v5782_v62  ;;  %v13896_v63 = vld [vmem:[#allocation31_spill] sm:$0xff] }
 0x72a   : > { %v5484_v37 = vsel %vm5477_vm9, %v5480_v55, %v5483_v57  ;;  %v5783_v17 = vsel %vm12960_vm12, 0, %v5781_v3  ;;  %7395 = vsinq.f32 %v5782_v62  ;;  %vm6111_vm6 = vcmp.le.f32.partialorder %v6110_v60, 0.7853982 }
 0x72b   : > { %v5485_v13 = vsel %vm5474_vm2, nan, %v5484_v37  ;;  %v5787_v27 = vadd.s32 3, %v5783_v17  ;;  %vm13881_vm5 = vcmp.lt.s32.totalorder %v12636_v56, 0  ;;  %v6198_v54 = vsel %vm6111_vm6, %v12636_v56, %v12918_v40 }
 0x72c   : > { %v6197_v58 = vsel %vm13881_vm5, %v6196_v52, %v12790_v33  ;;  %v6403_v15 = vsel %vm6320_vm0, %v6402_v18, %v6401_v31  ;;  %v6948_v50 = vpack.c.bf16 %v5485_v13, %v5069_v0  ;;  %7397 = vcosq.f32 %v6198_v54 }
 0x72d   : > { %v6199_v2 = vsel %vm6111_vm6, 0, %v6197_v58  ;;  %v5788_v11 = vand.u32 3, %v5787_v27  ;;  %7399 = vsinq.f32 %v6198_v54  ;;  %v13882_v60 = vand.u32 2147483647, %v12337_v7 }
 0x72e   : > { %v6203_v36 = vadd.s32 3, %v6199_v2  ;;  %v13886_v33 = vsub.s32 4, %v13885_v59  ;;  %vm13888_vm3 = vcmp.lt.s32.totalorder %v13887_v6, 0  ;;  %7401 = vcosq.f32 %v12872_v25  ;;  %6949 = vmatpush1.bf16.msra.mxu1 %v6948_v50 }
 0x72f   : > { %vm12989_vm4 = vcmp.le.f32.partialorder %v13882_v60, 0.7853982  ;;  %v5988_v61 = vsub.s32 4, %v13889_v12  ;;  %v13890_v21 = vsub.s32 4, %v12642_v1  ;;  %vm13891_vm10 = vcmp.lt.s32.totalorder %v12418_v48, 0 }
 0x730   : > { %v12998_v40 = vsel %vm13888_vm3, %v13886_v33, %v13885_v59  ;;  %v5990_v51 = vsel %vm12989_vm4, %v12337_v7, %v12712_v47  ;;  %vm13892_vm12 = vcmp.lt.s32.totalorder %v12566_v38, 0  ;;  %7403 = vsinq.f32 %v12872_v25 }
 0x731   : > { %v13011_v20 = vsel %vm13891_vm10, %v13890_v21, %v12642_v1  ;;  %v13018_v9 = vsel %vm13892_vm12, %v6300_v4, %v12719_v42  ;;  %vm13023_vm2 = vcmp.le.f32.partialorder %v6318_v24, 0.7853982  ;;  %vm13895_vm9 = vcmp.lt.s32.totalorder %v12337_v7, 0 }
 0x732   : > { %v5989_v1 = vsel %vm13895_vm9, %v5988_v61, %v13889_v12  ;;  %7405 = vcosq.f32 %v5990_v51  ;;  %v6404_v34 = vsub.s32 4, %v12889_v29  ;;  %v6406_v42 = vsel %vm13023_vm2, %v12724_v22, %v6403_v15 }
 0x733   : > { %vm5786_vm13 = vweird.f32 %v12269_v10  ;;  %vm5789_vm15 = vcmp.lt.s32.totalorder %v5788_v11, 2  ;;  %v6204_v4 = vand.u32 3, %v6203_v36  ;;  %v5991_v24 = vsel %vm12989_vm4, 0, %v5989_v1  ;;  %v7394_v49 = vpop.eup %7393  ;;  %v13898_v10 = vld [vmem:[#allocation46_spill] sm:$0xff] }
 0x734   : > { %vm5790_vm11 = vcmp.eq.s32.totalorder %v5788_v11, 0  ;;  %7407 = vsinq.f32 %v5990_v51  ;;  %v5995_v25 = vadd.s32 3, %v5991_v24  ;;  %v6405_v8 = vsel %vm6320_vm0, %v6404_v34, %v12889_v29  ;;  %v7396_v31 = vpop.eup %7395 }
 0x735   : > { %vm5793_vm6 = vcmp.eq.s32.totalorder %v5788_v11, 2  ;;  %vm6202_vm5 = vweird.f32 %v12636_v56  ;;  %v6407_v45 = vsel %vm13023_vm2, 0, %v6405_v8  ;;  %7409 = vcosq.f32 %v6406_v42 }
 0x736   : > { %v5679_v14 = vsel %vm12471_vm7, 0, %v13896_v63  ;;  %v5794_v23 = vxor.u32 2147483648, %v7394_v49  ;;  %v5996_v5 = vand.u32 3, %v5995_v25  ;;  %7411 = vsinq.f32 %v6406_v42  ;;  %v7398_v0 = vpop.eup %7397 }
 0x737   : > { %v6411_v53 = vadd.s32 3, %v6407_v45  ;;  %v5791_v32 = vxor.u32 2147483648, %v7396_v31  ;;  %vm6205_vm4 = vcmp.lt.s32.totalorder %v6204_v4, 2  ;;  %vm6206_vm0 = vcmp.eq.s32.totalorder %v6204_v4, 0  ;;  %v7400_v18 = vpop.eup %7399 }
 0x738   : > { %v5683_v29 = vadd.s32 3, %v5679_v14  ;;  %v5795_v19 = vsel %vm5793_vm6, %v5794_v23, %v7396_v31  ;;  %vm6209_vm3 = vcmp.eq.s32.totalorder %v6204_v4, 2  ;;  %v5687_v62 = vxor.u32 2147483648, %v12640_v44  ;;  %v13049_v17 = vpop.eup %7401 }
 0x739   : > { %v5690_v52 = vxor.u32 2147483648, %v12587_v35  ;;  %v5792_v55 = vsel %vm5790_vm11, %v7394_v49, %v5791_v32  ;;  %v6210_v57 = vxor.u32 2147483648, %v7398_v0  ;;  %v6412_v3 = vand.u32 3, %v6411_v53 }
 0x73a   : > { %v5684_v37 = vand.u32 3, %v5683_v29  ;;  %v5796_v13 = vsel %vm5789_vm15, %v5792_v55, %v5795_v19  ;;  %v6207_v27 = vxor.u32 2147483648, %v7400_v18  ;;  %vm5998_vm12 = vcmp.eq.s32.totalorder %v5996_v5, 0  ;;  %v13053_v58 = vpop.eup %7403 }
 0x73b   : > { %v5797_v54 = vsel %vm5786_vm13, nan, %v5796_v13  ;;  %v6211_v15 = vsel %vm6209_vm3, %v6210_v57, %v7400_v18  ;;  %vm6001_vm2 = vcmp.eq.s32.totalorder %v5996_v5, 2  ;;  %v6095_v50 = vsel %vm12742_vm1, 0, %v13011_v20 }
 0x73c   : > { %v7406_v2 = vpop.eup %7405  ;;  %v6208_v11 = vsel %vm6206_vm0, %v7398_v0, %v6207_v27  ;;  %vm6410_vm9 = vweird.f32 %v12724_v22  ;;  %vm6413_vm15 = vcmp.lt.s32.totalorder %v6412_v3, 2  ;;  %vm6414_vm11 = vcmp.eq.s32.totalorder %v6412_v3, 0  ;;  %v6427_v27 = vpop.permute.xlu1 %6426 }
 0x73d   : > { %vm6417_vm6 = vcmp.eq.s32.totalorder %v6412_v3, 2  ;;  %v6212_v36 = vsel %vm6205_vm4, %v6208_v11, %v6211_v15  ;;  %v6002_v60 = vxor.u32 2147483648, %v7406_v2  ;;  %vm5682_vm13 = vweird.f32 %v13898_v10 }
 0x73e   : > { %vm5686_vm7 = vcmp.eq.s32.totalorder %v5684_v37, 0  ;;  %vm5689_vm3 = vcmp.eq.s32.totalorder %v5684_v37, 2  ;;  %vm6098_vm10 = vweird.f32 %v12418_v48  ;;  %v7408_v46 = vpop.eup %7407  ;;  %v6213_v30 = vsel %vm6202_vm5, nan, %v6212_v36  ;;  %v6422_v48 = vld [vmem:[%s13165_s9] sm:$0x7] }
 0x73f   : > { %v5688_v59 = vsel %vm5686_vm7, %v12587_v35, %v5687_v62  ;;  %v5691_v33 = vsel %vm5689_vm3, %v5690_v52, %v12640_v44  ;;  %v6099_v12 = vadd.s32 3, %v6095_v50  ;;  %v7410_v61 = vpop.eup %7409  ;;  %v6942_v51 = vpack.c.bf16 %v6213_v30, %v5797_v54 }
 0x740   : > { %v5999_v21 = vxor.u32 2147483648, %v7408_v46  ;;  %v6003_v20 = vsel %vm6001_vm2, %v6002_v60, %v7408_v46  ;;  %v6103_v47 = vxor.u32 2147483648, %v12809_v41  ;;  %v7412_v1 = vpop.eup %7411  ;;  %v6418_v34 = vxor.u32 2147483648, %v7410_v61 }
 0x741   : > { %vm5685_vm1 = vcmp.lt.s32.totalorder %v5684_v37, 2  ;;  %v6100_v42 = vand.u32 3, %v6099_v12  ;;  %v6106_v4 = vxor.u32 2147483648, %v12806_v16  ;;  %6943 = vmatprep.subr.bf16.mxu0 %v6942_v51  ;;  %v6415_v35 = vxor.u32 2147483648, %v7412_v1 }
 0x742   : > { %v6000_v56 = vsel %vm5998_vm12, %v7406_v2, %v5999_v21  ;;  %v5692_v24 = vsel %vm5685_vm1, %v5688_v59, %v5691_v33  ;;  %v5887_v25 = vsel %vm12524_vm14, 0, %v12998_v40  ;;  %vm13900_vm5 = vcmp.lt.s32.totalorder %v5996_v5, 2 }
 0x743   : > { %v6004_v8 = vsel %vm13900_vm5, %v6000_v56, %v6003_v20  ;;  %v6419_v49 = vsel %vm6417_vm6, %v6418_v34, %v7412_v1  ;;  %vm6101_vm4 = vcmp.lt.s32.totalorder %v6100_v42, 2  ;;  %vm6102_vm0 = vcmp.eq.s32.totalorder %v6100_v42, 0 }
 0x744   : > { %vm13901_vm7 = vweird.f32 %v12337_v7  ;;  %v6416_v63 = vsel %vm6414_vm11, %v7410_v61, %v6415_v35  ;;  %v6104_v43 = vsel %vm6102_vm0, %v12806_v16, %v6103_v47  ;;  %vm6105_vm12 = vcmp.eq.s32.totalorder %v6100_v42, 2 }
 0x745   : > { %v6005_v45 = vsel %vm13901_vm7, nan, %v6004_v8  ;;  %v6420_v14 = vsel %vm6413_vm15, %v6416_v63, %v6419_v49  ;;  %v6107_v31 = vsel %vm6105_vm12, %v6106_v4, %v12809_v41  ;;  %v5891_v23 = vadd.s32 3, %v5887_v25 }
 0x746   : > { %v5895_v40 = vxor.u32 2147483648, %v12661_v26  ;;  %v6421_v5 = vsel %vm6410_vm9, nan, %v6420_v14  ;;  %v6108_v53 = vsel %vm6101_vm4, %v6104_v43, %v6107_v31  ;;  %v5898_v32 = vxor.u32 2147483648, %v12646_v28 }
 0x747   : > { %v6303_v7 = vsel %vm12819_vm8, 0, %v13018_v9  ;;  %v6950_v29 = vpack.c.bf16 %v6421_v5, %v6005_v45  ;;  %v5693_v16 = vsel %vm5682_vm13, nan, %v5692_v24  ;;  %v6109_v41 = vsel %vm6098_vm10, nan, %v6108_v53 }
 0x748   : > { %v5892_v0 = vand.u32 3, %v5891_v23  ;;  %v6944_v19 = vpack.c.bf16 %v6109_v41, %v5693_v16  ;;  %v6307_v62 = vadd.s32 3, %v6303_v7  ;;  %v6311_v22 = vxor.u32 2147483648, %v13053_v58 }
 0x749   : > { %6951 = vmatprep.subr.bf16.mxu1 %v6950_v29  ;;  %v6314_v52 = vxor.u32 2147483648, %v13049_v17  ;;  %vm6429_vm8 = vcmask 261120   ;;  %vm5890_vm6 = vweird.f32 %v13887_v6  ;;  %vm6306_vm13 = vweird.f32 %v12566_v38 }
 0x74a   : > { %vm5894_vm14 = vcmp.eq.s32.totalorder %v5892_v0, 0  ;;  %vm5897_vm2 = vcmp.eq.s32.totalorder %v5892_v0, 2  ;;  %6945 = vmatpush1.bf16.msra.mxu0 %v6944_v19  ;;  %v6308_v18 = vand.u32 3, %v6307_v62  ;;  %vm5893_vm10 = vcmp.lt.s32.totalorder %v5892_v0, 2 }
 0x74b   : > { %v5896_v39 = vsel %vm5894_vm14, %v12646_v28, %v5895_v40  ;;  %v5899_v9 = vsel %vm5897_vm2, %v5898_v32, %v12661_v26 }
 0x74c   : > { %v5900_v55 = vsel %vm5893_vm10, %v5896_v39, %v5899_v9  ;;  %vm6310_vm9 = vcmp.eq.s32.totalorder %v6308_v18, 0  ;;  %vm6313_vm15 = vcmp.eq.s32.totalorder %v6308_v18, 2  ;;  %vm6309_vm11 = vcmp.lt.s32.totalorder %v6308_v18, 2 }
 0x74d   : > { %v6312_v57 = vsel %vm6310_vm9, %v13049_v17, %v6311_v22  ;;  %v6315_v3 = vsel %vm6313_vm15, %v6314_v52, %v13053_v58  ;;  %6890 = vmatmul.mubr.msk.f32.vlgmr.msra.gmra.mrb[16].mxu0 %vm6429_vm8, %v6422_v48  ;;  %v5901_v26 = vsel %vm5890_vm6, nan, %v5900_v55 }
 0x74e   : > { %v6316_v28 = vsel %vm6309_vm11, %v6312_v57, %v6315_v3 }
 0x74f   : > { %v6317_v37 = vsel %vm6306_vm13, nan, %v6316_v28 }
 0x750   : > { %v6952_v13 = vpack.c.bf16 %v6317_v37, %v5901_v26 }
 0x752   : > { %6953 = vmatpush1.bf16.msra.mxu1 %v6952_v13 }
 0x755   : > { %6891 = vmatmul.mubr.msk.f32.vlgmr.msra.gmra.mrb[16].mxu1 %vm6429_vm8, %v6422_v48 }
 0x820   : > { %v6499_v54 = vpop.f32.mrb[16].mxu0 }
 0x821   : > { %v6500_v15 = vadd.f32 %v6499_v54, %v6427_v27  ;;  %v6501_v17 = vpop.f32.mrb[17].mxu0 }
 0x822   : > { %v6502_v50 = vadd.f32 %v6501_v17, %v6427_v27 }
 0x823   : > { %v6575_v58 = vmul.f32 1.442695, %v6500_v15 }
 0x824   : > { %v6577_v2 = vmul.f32 1.442695, %v6502_v50 }
 0x825   : > { %7413 = vpow2.f32 %v6575_v58 }
 0x826   : > { %7415 = vpow2.f32 %v6577_v2 }
 0x828   : > { %v6570_v6 = vpop.f32.mrb[16].mxu1 }
 0x829   : > { %v6571_v38 = vadd.f32 %v6570_v6, %v6427_v27  ;;  %v6572_v11 = vpop.f32.mrb[17].mxu1 }
 0x82a   : > { %v6573_v36 = vadd.f32 %v6572_v11, %v6427_v27 }
 0x82b   : > { %v6579_v60 = vmul.f32 1.442695, %v6571_v38 }
 0x82c   : > { %v6581_v10 = vmul.f32 1.442695, %v6573_v36 }
 0x82d   : > { %7417 = vpow2.f32 %v6579_v60 }
 0x82e   : > { %7419 = vpow2.f32 %v6581_v10 }
 0x82f   : > { %v7414_v46 = vpop.eup %7413 }
 0x830   : > { %v7416_v30 = vpop.eup %7415 }
 0x831   : > { %v6587_v59 = vcombine.low %v7414_v46, %v7416_v30 }
 0x833   : > { %6591 = vst [vmem:[%s380_s30] sm:$0x77] %v6587_v59 }
 0x837   : > { %v7418_v33 = vpop.eup %7417 }
 0x838   : > { %v7420_v12 = vpop.eup %7419 }
 0x839   : > { %v6588_v61 = vcombine.low %v7418_v33, %v7420_v12 }
 0x83b   : > { %6592 = vst [vmem:[%s380_s30 + $0x8] sm:$0x77] %v6588_v61 }
 0x83c   : > { %7439 = shalt.err (!%p7436_p3)
}
 0x83d   : > { %s7440_s25 = scalar_lea.hbm %s13114_s22, 256  ;;  %s7444_s14 = scalar_lea.hbm %s13167_s11, 512 }
 0x83e   : > { %p7441_p4 = scmp.ne.s32.totalorder %s13114_s22, %s7440_s25  ;;  %p7445_p9 = scmp.lt.u32.totalorder %s13114_s22, %s13167_s11 }
 0x83f   : > { %p7446_p10 = scmp.lt.u32.totalorder %s7444_s14, %s7440_s25  ;;  %p7448_p12 = scmp.lt.u32.totalorder %s7440_s25, %s13114_s22 }
 0x840   : > { %p7442_p7 = pnand %p7441_p4, %p7600_p5 }
 0x841   : > { %p7447_p11 = por %p7446_p10, %p7445_p9 }
 0x842   : > { %p7443_p8 = pneg %p7442_p7 }
 0x843   : > { %p7449_p13 = por %p7448_p12, %p7447_p11 }
 0x845   : > { %p7450_p0 = pnand %p7449_p13, %p7443_p8 }
 0x847   : > { %7453 = shalt.err (!%p7450_p0)
}
 0x848   : > { %7146 = dma.vmem_to_hbm [thread:$0]  (%p7600_p5), %s13116_s13, 256, %s13114_s22, %s6594_s16  }
 0x849 PF: > { %p7152_p1 = scmp.ge.s32.totalorder %s7488_s20, 2  ;;  %s6620_s0 = sand.u32 1, %s7476_s17  }
 0x84a   : > { %s6621_s24 = scalar_lea.sflag [#allocation3], %s6620_s0 }
 0x84b   : > { %p7149_p2 = pnand %p7152_p1, %p7604_p6 }
 0x84d   : > { %7471 = dma.done.wait (!%p7149_p2), %s6621_s24, 256  }
 0x84e   : > { %7473 = vsyncadd (!%p7149_p2), %s6621_s24, 4294967040  ;;  %p21_p3 = scmp.ge.s32.totalorder %s7587_s23, 4   ;;  %s13902_s17 = smov %s7480_s18 }
 0x84f   : > { %s13903_s18 = smov %s7484_s19  ;;  %s13904_s19 = smov %s7598_s26 }
 0x850   : > { %s13905_s20 = smov %s7587_s23  ;;  %23 = sbr.rel (!%p21_p3) target bundleno = 5 (0x5), region = 99 }
 0x857   :  { %6626 = vsyncpa [#allocation3], 1 }
 0x858   :  { %6628 = vsyncpa [#allocation3 + $0x1], 1 }

</bundles_post_ra>
